<compile_context>
chip_gen: v6e
topology: v6e:2x2x1
jax: 0.10.0
libtpu: 0.0.40
codegen_flags: <defaults>
</compile_context>

<pallas_src>
import functools

import jax
import jax.numpy as jnp
from jax import lax
from jax.experimental import pallas as pl
from jax.experimental.pallas import tpu as pltpu


# ----------------------------------------------------------------------------
# Fused encoder + projector kernel (one grid step per view)
# ----------------------------------------------------------------------------
def _encoder_proj_kernel(patches_ref, pool_ref, wc_ref, bc_ref,
                         w1_ref, b1_ref, w2_ref, b2_ref, z_ref):
    # conv-as-matmul (+bias, ReLU) over all im2col rows of this view
    conv = jnp.dot(patches_ref[...], wc_ref[...],
                   preferred_element_type=jnp.float32)            # (N*pos, Cenc)
    conv = jnp.maximum(conv + bc_ref[...], 0.0)

    # Global average pool over the `pos` spatial rows of each sample as one
    # MXU matmul against the precomputed block-averaging matrix (bf16,
    # constant index_map -> fetched once, reused by both grid steps).
    y = jnp.dot(pool_ref[...], conv.astype(jnp.bfloat16),
                preferred_element_type=jnp.float32)               # (N, Cenc)

    # projector: Linear -> ReLU -> Linear  (bf16 MXU operands, f32 acc)
    h = jnp.maximum(
        jnp.dot(y.astype(jnp.bfloat16), w1_ref[...],
                preferred_element_type=jnp.float32) + b1_ref[...], 0.0)
    z_ref[...] = (jnp.dot(h.astype(jnp.bfloat16), w2_ref[...],
                          preferred_element_type=jnp.float32) + b2_ref[...])


def encoder_projector(patches, pool, wc, bc, w1, b1, w2, b2, *, n_views, rows):
    """patches: [n_views*rows, Kpad] bf16; pool: [N, rows] bf16.
    Returns z [n_views*N, Pout] f32 (projected representation per sample)."""
    kdim = patches.shape[1]
    n = pool.shape[0]
    cenc = wc.shape[1]
    hid = w1.shape[1]
    pout = w2.shape[1]
    return pl.pallas_call(
        _encoder_proj_kernel,
        grid=(n_views,),
        in_specs=[
            pl.BlockSpec((rows, kdim), lambda v: (v, 0)),
            pl.BlockSpec((n, rows), lambda v: (0, 0)),
            pl.BlockSpec((kdim, cenc), lambda v: (0, 0)),
            pl.BlockSpec((1, cenc), lambda v: (0, 0)),
            pl.BlockSpec((cenc, hid), lambda v: (0, 0)),
            pl.BlockSpec((1, hid), lambda v: (0, 0)),
            pl.BlockSpec((hid, pout), lambda v: (0, 0)),
            pl.BlockSpec((1, pout), lambda v: (0, 0)),
        ],
        out_specs=pl.BlockSpec((n, pout), lambda v: (v, 0)),
        out_shape=jax.ShapeDtypeStruct((n_views * n, pout), jnp.float32),
        compiler_params=pltpu.CompilerParams(
            dimension_semantics=("parallel",),
            vmem_limit_bytes=32 * 1024 * 1024),
    )(patches, pool, wc, bc, w1, b1, w2, b2)


# ----------------------------------------------------------------------------
# Fused whitening + per-split loss kernel (grid over all (iter, split) pairs)
# ----------------------------------------------------------------------------
def _whiten_loss_kernel(x_ref, loss_ref, *, eps, nrows, fdim, mode):
    # x holds BOTH views of this split side by side: cols [0:f]=z1, [f:2f]=z2.
    x = x_ref[...]                                     # (nrows, 2f) f32
    f2 = 2 * fdim
    a = x[:, :fdim]
    b = x[:, fdim:]

    xc = x - jnp.mean(x, axis=0, keepdims=True)

    if mode == "bn":
        var = jnp.mean(xc * xc, axis=0, keepdims=True)
        w = xc / jnp.sqrt(var + eps)
    else:  # cholesky
        col = lax.broadcasted_iota(jnp.int32, (1, f2), 1)
        row = lax.broadcasted_iota(jnp.int32, (f2, 1), 0)

        # Both covariances with one MXU matmul (contract rows; no transpose),
        # then zero the cross-view blocks -> block-diagonal system.
        cov = lax.dot_general(xc, xc, (((0,), (0,)), ((), ())),
                              preferred_element_type=jnp.float32) / (nrows - 1)
        same_blk = ((row < fdim) == (col < fdim)).astype(jnp.float32)
        cov = cov * same_blk
        if eps != 0.0:
            eye = (row == col).astype(jnp.float32)
            cov = (1.0 - eps) * cov + eps * eye

        # Unrolled right-looking Cholesky (tiny static size).  The Schur
        # complement stays symmetric, so `rowj` is column j of L transposed:
        # we accumulate LT = L.T directly and never need a transpose.
        A = cov
        LT = jnp.zeros((f2, f2), jnp.float32)
        for j in range(f2):
            d = jnp.maximum(A[j:j + 1, j:j + 1], 1e-20)  # clamp: keep rsqrt finite
            inv_sd = lax.rsqrt(d)
            colj = jnp.where(row >= j, A[:, j:j + 1], 0.0) * inv_sd   # (2f,1)
            rowj = jnp.where(col >= j, A[j:j + 1, :], 0.0) * inv_sd   # (1,2f)
            LT = LT + rowj * (row == j).astype(jnp.float32)
            A = A - colj * rowj

        # Unrolled inverse of lower-triangular L: row j of inv(L) uses only
        # (1,2f)/(2f,2f) data (VPU multiply + sublane reduce), no big solves.
        invL = jnp.zeros((f2, f2), jnp.float32)
        for j in range(f2):
            ltcol = LT[:, j:j + 1]                                    # = L[j,:]^T
            acc = jnp.sum(ltcol * invL, axis=0, keepdims=True)        # (1,2f)
            rowinv = ((col == j).astype(jnp.float32) - acc) / LT[j:j + 1, j:j + 1]
            invL = invL + rowinv * (row == j).astype(jnp.float32)

        # Whitening solve for BOTH views at once: xc @ inv(L).T, one matmul.
        w = lax.dot_general(xc, invL, (((1,), (1,)), ((), ())),
                            preferred_element_type=jnp.float32)

    def l2n(v):
        nrm = jnp.sqrt(jnp.sum(v * v, axis=-1, keepdims=True))
        return v / jnp.maximum(nrm, 1e-12)

    # NOTE: the reference detaches the whitened terms; forward value identical.
    d1 = l2n(a) - l2n(w[:, fdim:])     # normalize(z1 split) - normalize(whiten(z2))
    d2 = l2n(b) - l2n(w[:, :fdim])     # normalize(z2 split) - normalize(whiten(z1))
    split_loss = 0.5 * (jnp.mean(d1 * d1) + jnp.mean(d2 * d2))
    loss_ref[...] = jnp.reshape(split_loss, (1, 1, 1))


def whiten_loss_splits(x_stack, fdim, eps, mode):
    """x_stack: [S, nrows, 2*fdim] (both views concatenated on the last axis).
    Returns [S] per-split losses (f32)."""
    s, nrows, f2 = x_stack.shape
    out = pl.pallas_call(
        functools.partial(_whiten_loss_kernel, eps=float(eps), nrows=nrows,
                          fdim=fdim, mode=mode),
        grid=(s,),
        in_specs=[pl.BlockSpec((None, nrows, f2), lambda i: (i, 0, 0))],
        out_specs=pl.BlockSpec((1, 1, 1), lambda i: (i, 0, 0)),
        out_shape=jax.ShapeDtypeStruct((s, 1, 1), jnp.float32),
        compiler_params=pltpu.CompilerParams(
            dimension_semantics=("parallel",)),
    )(x_stack.astype(jnp.float32))
    return out[:, 0, 0]


# ----------------------------------------------------------------------------
# Plain-JAX glue
# ----------------------------------------------------------------------------
def im2col_nchw(x, k=3, stride=2, pad=1):
    """NCHW -> [N*Ho*Wo, k*k*C] patches, feature order (ki, kj, c).
    TODO(synk): patch extraction stays as one fused XLA copy; could be folded
    into the encoder kernel as 9 shifted VMEM reads."""
    xp = jnp.pad(x, ((0, 0), (0, 0), (pad, pad), (pad, pad)))
    xp = jnp.transpose(xp, (0, 2, 3, 1))                       # NHWC
    N, Hp, Wp, C = xp.shape
    Ho = (Hp - k) // stride + 1
    Wo = (Wp - k) // stride + 1
    cols = [xp[:, i:i + stride * Ho:stride, j:j + stride * Wo:stride, :]
            for i in range(k) for j in range(k)]
    patches = jnp.concatenate(cols, axis=-1)                   # [N,Ho,Wo,k*k*C]
    return patches.reshape(N * Ho * Wo, k * k * C), Ho, Wo


def _l2_normalize(x):
    return x / jnp.maximum(jnp.linalg.norm(x, axis=1, keepdims=True), 1e-12)


# ----------------------------------------------------------------------------
# Model
# ----------------------------------------------------------------------------
class WhiteningModel:
    def __init__(self, input_shape=(3, 16, 16), enc_channels=16,
                 proj_shape=(32, 8), whiten="cholesky", w_iter=1, w_split=2,
                 eps=0.0, seed=42):
        cin, _, _ = input_shape
        hidden, out = proj_shape
        self.whiten = whiten
        self.w_iter = w_iter
        self.w_split = w_split
        self.eps = eps
        self.rep_dim = enc_channels
        self.kdim = cin * 9
        self.kdim_pad = 32 if self.kdim <= 32 else ((self.kdim + 127) // 128) * 128

        key = jax.random.PRNGKey(seed)
        k = jax.random.split(key, 6)
        # Encoder stand-in: 3x3 stride-2 conv + ReLU + global avg pool.
        conv_w = jax.random.normal(k[0], (enc_channels, cin, 3, 3),
                                   jnp.float32) / jnp.sqrt(cin * 9)
        # Weight flattened to the patch feature order (ki, kj, c), K padded,
        # stored bf16 for the MXU (f32 accumulation in-kernel).
        w2d = jnp.transpose(conv_w, (2, 3, 1, 0)).reshape(self.kdim, enc_channels)
        w2d = jnp.pad(w2d, ((0, self.kdim_pad - self.kdim), (0, 0)))
        self.conv_w2d = w2d.astype(jnp.bfloat16)
        self.conv_b = (jax.random.normal(k[1], (1, enc_channels), jnp.float32)
                       * 0.01)
        # Projector: Linear(rep->hidden) + ReLU + Linear(hidden->out), bf16 MXU.
        self.W1 = (jax.random.normal(k[2], (enc_channels, hidden), jnp.float32)
                   / jnp.sqrt(enc_channels)).astype(jnp.bfloat16)
        self.b1 = jax.random.normal(k[3], (1, hidden), jnp.float32) * 0.01
        self.W2 = (jax.random.normal(k[4], (hidden, out), jnp.float32)
                   / jnp.sqrt(hidden)).astype(jnp.bfloat16)
        self.b2 = jax.random.normal(k[5], (1, out), jnp.float32) * 0.01

    # -- encoder + projector for BOTH views: one fused Pallas call ------------
    def gen_reps(self, x1, x2):
        n = x1.shape[0]
        assert n % 8 == 0, "batch must be a multiple of 8 (TPU sublane tiling)"
        x = jnp.concatenate([x1, x2], axis=0)                # (2N, C, H, W)
        patches, ho, wo = im2col_nchw(x, k=3, stride=2, pad=1)
        pad_k = self.kdim_pad - patches.shape[1]
        if pad_k:
            patches = jnp.pad(patches, ((0, 0), (0, pad_k)))
        patches = patches.astype(jnp.bfloat16)
        pos = ho * wo
        # Precomputed block-averaging (global-avg-pool) matrix: row s has
        # 1/pos on columns [s*pos, (s+1)*pos).  Constant-folded at compile.
        pool = (jnp.repeat(jnp.eye(n, dtype=jnp.float32), pos, axis=1)
                / pos).astype(jnp.bfloat16)
        z = encoder_projector(patches, pool, self.conv_w2d, self.conv_b,
                              self.W1, self.b1, self.W2, self.b2,
                              n_views=2, rows=n * pos)
        # gen_loss only consumes z; the pooled encoder rep y is intentionally
        # not materialized in HBM (perf review: unused output, masked stores).
        return z[:n], z[n:]

    # -- loss (batched whitening, in-kernel Cholesky + inverse, one call) -----
    def gen_loss(self, z_online1, z_online2, perm_key):
        bs, fs = z_online1.shape
        if self.whiten not in ("cholesky", "bn"):
            raise NotImplementedError(f"{self.whiten} is not implemented yet.")

        bss = bs // self.w_split
        remain = bs % bss
        if min(bss, remain if remain != 0 else float("inf")) < 1.9 * fs:
            return 0.0 * jnp.linalg.norm(_l2_normalize(z_online1))

        n_full = bs // bss
        n_splits = n_full + (1 if remain else 0)

        keys = jax.random.split(perm_key, self.w_iter)
        perms = jnp.stack([jax.random.permutation(k, bs) for k in keys])
        z1_all = z_online1[perms]                        # (w_iter, bs, fs)
        z2_all = z_online2[perms]
        z12_all = jnp.concatenate([z1_all, z2_all], axis=-1)   # (w_iter, bs, 2fs)

        # Full-size splits are contiguous slices of the permuted batch: expose
        # them to the kernel with a single reshape (no per-split gather/stack).
        z12_full = z12_all[:, :n_full * bss].reshape(
            self.w_iter * n_full, bss, 2 * fs)
        loss_sum = jnp.sum(whiten_loss_splits(z12_full, fs, self.eps,
                                              self.whiten))
        if remain:
            loss_sum = loss_sum + jnp.sum(whiten_loss_splits(
                z12_all[:, n_full * bss:], fs, self.eps, self.whiten))

        # Matches the reference exactly: it divides by w_iter * total_splits,
        # where total_splits itself accumulated over all w_iter iterations.
        total_splits = self.w_iter * n_splits
        return loss_sum / (self.w_iter * total_splits)

    # -- forward --------------------------------------------------------------
    def forward(self, x1, x2, perm_key):
        z1, z2 = self.gen_reps(x1, x2)
        return self.gen_loss(z1, z2, perm_key)


# ----------------------------------------------------------------------------
if __name__ == "__main__":
    key = jax.random.PRNGKey(0)
    k1, k2, kperm = jax.random.split(key, 3)

    batch = 64   # needs batch//w_split >= 1.9*proj_out for the whitening path
    x1 = jax.random.normal(k1, (batch, 3, 16, 16), jnp.float32)
    x2 = jax.random.normal(k2, (batch, 3, 16, 16), jnp.float32)

    model = WhiteningModel(input_shape=(3, 16, 16), enc_channels=16,
                           proj_shape=(32, 8), whiten="cholesky",
                           w_iter=1, w_split=2, eps=0.0)

    fwd = jax.jit(model.forward)
    loss = jax.block_until_ready(fwd(x1, x2, kperm))
    assert bool(jnp.isfinite(loss)), f"non-finite loss: {loss}"
    print("KERNEL_OK")
</pallas_src>

<mosaic_0001>
module attributes {stable_mosaic.version = 11 : i64} {
  func.func @_encoder_proj_kernel(%arg0: i32, %arg1: memref<4096x32xbf16, #tpu.memory_space<vmem>>, %arg2: memref<64x4096xbf16, #tpu.memory_space<vmem>>, %arg3: memref<32x16xbf16, #tpu.memory_space<vmem>>, %arg4: memref<1x16xf32, #tpu.memory_space<vmem>>, %arg5: memref<16x32xbf16, #tpu.memory_space<vmem>>, %arg6: memref<1x32xf32, #tpu.memory_space<vmem>>, %arg7: memref<32x8xbf16, #tpu.memory_space<vmem>>, %arg8: memref<1x8xf32, #tpu.memory_space<vmem>>, %arg9: memref<64x8xf32, #tpu.memory_space<vmem>>) attributes {dimension_semantics = [#tpu.dimension_semantics<parallel>], iteration_bounds = array<i64: 2>, scalar_prefetch = 0 : i64, scratch_operands = 0 : i64, tpu.core_type = #tpu.core_type<tc>, window_params = [{transform_indices = @transform_0, window_bounds = array<i64: 4096, 32>}, {pipeline_mode = #tpu.pipeline_mode<synchronous>, transform_indices = @transform_1, window_bounds = array<i64: 64, 4096>}, {pipeline_mode = #tpu.pipeline_mode<synchronous>, transform_indices = @transform_2, window_bounds = array<i64: 32, 16>}, {pipeline_mode = #tpu.pipeline_mode<synchronous>, transform_indices = @transform_3, window_bounds = array<i64: 1, 16>}, {pipeline_mode = #tpu.pipeline_mode<synchronous>, transform_indices = @transform_4, window_bounds = array<i64: 16, 32>}, {pipeline_mode = #tpu.pipeline_mode<synchronous>, transform_indices = @transform_5, window_bounds = array<i64: 1, 32>}, {pipeline_mode = #tpu.pipeline_mode<synchronous>, transform_indices = @transform_6, window_bounds = array<i64: 32, 8>}, {pipeline_mode = #tpu.pipeline_mode<synchronous>, transform_indices = @transform_7, window_bounds = array<i64: 1, 8>}, {transform_indices = @transform_8, window_bounds = array<i64: 64, 8>}]} {
    %c0 = arith.constant 0 : index
    %c0_0 = arith.constant 0 : index
    %0 = vector.load %arg1[%c0, %c0_0] : memref<4096x32xbf16, #tpu.memory_space<vmem>>, vector<4096x32xbf16>
    %c0_1 = arith.constant 0 : index
    %c0_2 = arith.constant 0 : index
    %1 = vector.load %arg3[%c0_1, %c0_2] : memref<32x16xbf16, #tpu.memory_space<vmem>>, vector<32x16xbf16>
    %cst = arith.constant dense<0.000000e+00> : vector<4096x16xf32>
    %2 = tpu.matmul %0, %1, %cst {dimension_numbers = #tpu.dot_dimension_numbers<[1], [0], [0], [1], [0, 0, 1, 1], [], []>} : vector<4096x32xbf16>, vector<32x16xbf16>, vector<4096x16xf32> -> vector<4096x16xf32>
    %c0_3 = arith.constant 0 : index
    %c0_4 = arith.constant 0 : index
    %3 = vector.load %arg4[%c0_3, %c0_4] : memref<1x16xf32, #tpu.memory_space<vmem>>, vector<1x16xf32>
    %4 = vector.broadcast %3 : vector<1x16xf32> to vector<4096x16xf32>
    %5 = arith.addf %2, %4 : vector<4096x16xf32>
    %cst_5 = arith.constant 0.000000e+00 : f32
    %6 = vector.broadcast %cst_5 : f32 to vector<4096x16xf32>
    %7 = arith.maximumf %5, %6 : vector<4096x16xf32>
    %c0_6 = arith.constant 0 : index
    %c0_7 = arith.constant 0 : index
    %8 = vector.load %arg2[%c0_6, %c0_7] : memref<64x4096xbf16, #tpu.memory_space<vmem>>, vector<64x4096xbf16>
    %9 = arith.truncf %7 : vector<4096x16xf32> to vector<4096x16xbf16>
    %cst_8 = arith.constant dense<0.000000e+00> : vector<64x16xf32>
    %10 = tpu.matmul %8, %9, %cst_8 {dimension_numbers = #tpu.dot_dimension_numbers<[1], [0], [0], [1], [0, 0, 1, 1], [], []>} : vector<64x4096xbf16>, vector<4096x16xbf16>, vector<64x16xf32> -> vector<64x16xf32>
    %11 = arith.truncf %10 : vector<64x16xf32> to vector<64x16xbf16>
    %c0_9 = arith.constant 0 : index
    %c0_10 = arith.constant 0 : index
    %12 = vector.load %arg5[%c0_9, %c0_10] : memref<16x32xbf16, #tpu.memory_space<vmem>>, vector<16x32xbf16>
    %cst_11 = arith.constant dense<0.000000e+00> : vector<64x32xf32>
    %13 = tpu.matmul %11, %12, %cst_11 {dimension_numbers = #tpu.dot_dimension_numbers<[1], [0], [0], [1], [0, 0, 1, 1], [], []>} : vector<64x16xbf16>, vector<16x32xbf16>, vector<64x32xf32> -> vector<64x32xf32>
    %c0_12 = arith.constant 0 : index
    %c0_13 = arith.constant 0 : index
    %14 = vector.load %arg6[%c0_12, %c0_13] : memref<1x32xf32, #tpu.memory_space<vmem>>, vector<1x32xf32>
    %15 = vector.broadcast %14 : vector<1x32xf32> to vector<64x32xf32>
    %16 = arith.addf %13, %15 : vector<64x32xf32>
    %cst_14 = arith.constant 0.000000e+00 : f32
    %17 = vector.broadcast %cst_14 : f32 to vector<64x32xf32>
    %18 = arith.maximumf %16, %17 : vector<64x32xf32>
    %19 = arith.truncf %18 : vector<64x32xf32> to vector<64x32xbf16>
    %c0_15 = arith.constant 0 : index
    %c0_16 = arith.constant 0 : index
    %20 = vector.load %arg7[%c0_15, %c0_16] : memref<32x8xbf16, #tpu.memory_space<vmem>>, vector<32x8xbf16>
    %cst_17 = arith.constant dense<0.000000e+00> : vector<64x8xf32>
    %21 = tpu.matmul %19, %20, %cst_17 {dimension_numbers = #tpu.dot_dimension_numbers<[1], [0], [0], [1], [0, 0, 1, 1], [], []>} : vector<64x32xbf16>, vector<32x8xbf16>, vector<64x8xf32> -> vector<64x8xf32>
    %c0_18 = arith.constant 0 : index
    %c0_19 = arith.constant 0 : index
    %22 = vector.load %arg8[%c0_18, %c0_19] : memref<1x8xf32, #tpu.memory_space<vmem>>, vector<1x8xf32>
    %23 = vector.broadcast %22 : vector<1x8xf32> to vector<64x8xf32>
    %24 = arith.addf %21, %23 : vector<64x8xf32>
    %c0_20 = arith.constant 0 : index
    %c0_21 = arith.constant 0 : index
    %25 = vector.load %arg9[%c0_20, %c0_21] : memref<64x8xf32, #tpu.memory_space<vmem>>, vector<64x8xf32>
    tpu.vector_store %arg9[%c0_20, %c0_21], %24 {strides = array<i32>} : memref<64x8xf32, #tpu.memory_space<vmem>>, vector<64x8xf32>,
    return
  }
  func.func @transform_0(%arg0: i32) -> (i32, i32) {
    %c0_i32 = arith.constant 0 : i32
    %c0_i32_0 = arith.constant 0 : i32
    return %arg0, %c0_i32 : i32, i32
  }
  func.func @transform_1(%arg0: i32) -> (i32, i32) {
    %c0_i32 = arith.constant 0 : i32
    %c0_i32_0 = arith.constant 0 : i32
    %c0_i32_1 = arith.constant 0 : i32
    return %c0_i32, %c0_i32_0 : i32, i32
  }
  func.func @transform_2(%arg0: i32) -> (i32, i32) {
    %c0_i32 = arith.constant 0 : i32
    %c0_i32_0 = arith.constant 0 : i32
    %c0_i32_1 = arith.constant 0 : i32
    return %c0_i32, %c0_i32_0 : i32, i32
  }
  func.func @transform_3(%arg0: i32) -> (i32, i32) {
    %c0_i32 = arith.constant 0 : i32
    %c0_i32_0 = arith.constant 0 : i32
    %c0_i32_1 = arith.constant 0 : i32
    return %c0_i32, %c0_i32_0 : i32, i32
  }
  func.func @transform_4(%arg0: i32) -> (i32, i32) {
    %c0_i32 = arith.constant 0 : i32
    %c0_i32_0 = arith.constant 0 : i32
    %c0_i32_1 = arith.constant 0 : i32
    return %c0_i32, %c0_i32_0 : i32, i32
  }
  func.func @transform_5(%arg0: i32) -> (i32, i32) {
    %c0_i32 = arith.constant 0 : i32
    %c0_i32_0 = arith.constant 0 : i32
    %c0_i32_1 = arith.constant 0 : i32
    return %c0_i32, %c0_i32_0 : i32, i32
  }
  func.func @transform_6(%arg0: i32) -> (i32, i32) {
    %c0_i32 = arith.constant 0 : i32
    %c0_i32_0 = arith.constant 0 : i32
    %c0_i32_1 = arith.constant 0 : i32
    return %c0_i32, %c0_i32_0 : i32, i32
  }
  func.func @transform_7(%arg0: i32) -> (i32, i32) {
    %c0_i32 = arith.constant 0 : i32
    %c0_i32_0 = arith.constant 0 : i32
    %c0_i32_1 = arith.constant 0 : i32
    return %c0_i32, %c0_i32_0 : i32, i32
  }
  func.func @transform_8(%arg0: i32) -> (i32, i32) {
    %c0_i32 = arith.constant 0 : i32
    %c0_i32_0 = arith.constant 0 : i32
    return %arg0, %c0_i32 : i32, i32
  }
}

module attributes {stable_mosaic.version = 11 : i64} {
  func.func @_whiten_loss_kernel(%arg0: i32, %arg1: memref<1x32x16xf32, #tpu.memory_space<vmem>>, %arg2: memref<1x1x1xf32, #tpu.memory_space<vmem>>) attributes {dimension_semantics = [#tpu.dimension_semantics<parallel>], iteration_bounds = array<i64: 2>, scalar_prefetch = 0 : i64, scratch_operands = 0 : i64, tpu.core_type = #tpu.core_type<tc>, window_params = [{transform_indices = @transform_0, window_bounds = array<i64: 1, 32, 16>}, {transform_indices = @transform_1, window_bounds = array<i64: 1, 1, 1>}]} {
    %c0 = arith.constant 0 : index
    %c0_0 = arith.constant 0 : index
    %c0_1 = arith.constant 0 : index
    %0 = vector.load %arg1[%c0, %c0_0, %c0_1] : memref<1x32x16xf32, #tpu.memory_space<vmem>>, vector<1x32x16xf32>
    %1 = vector.shape_cast %0 : vector<1x32x16xf32> to vector<32x16xf32>
    %2 = vector.extract_strided_slice %1 {offsets = [0, 0], sizes = [32, 8], strides = [1, 1]} : vector<32x16xf32> to vector<32x8xf32>
    %3 = vector.extract_strided_slice %1 {offsets = [0, 8], sizes = [32, 8], strides = [1, 1]} : vector<32x16xf32> to vector<32x8xf32>
    %cst = arith.constant dense<0.000000e+00> : vector<16xf32>
    %4 = vector.multi_reduction <add>, %1, %cst [0] : vector<32x16xf32> to vector<16xf32>
    %5 = vector.shape_cast %4 : vector<16xf32> to vector<1x16xf32>
    %cst_2 = arith.constant 3.200000e+01 : f32
    %6 = vector.broadcast %cst_2 : f32 to vector<1x16xf32>
    %7 = arith.divf %5, %6 : vector<1x16xf32>
    %8 = vector.broadcast %7 : vector<1x16xf32> to vector<32x16xf32>
    %9 = arith.subf %1, %8 : vector<32x16xf32>
    %10 = tpu.iota {dimensions = array<i32: 1>} : vector<1x16xi32>
    %11 = tpu.iota {dimensions = array<i32: 0>} : vector<16x1xi32>
    %cst_3 = arith.constant dense<0.000000e+00> : vector<16x16xf32>
    %12 = tpu.matmul %9, %9, %cst_3 {dimension_numbers = #tpu.dot_dimension_numbers<[0], [0], [1], [1], [0, 1, 1, 1], [], []>} : vector<32x16xf32>, vector<32x16xf32>, vector<16x16xf32> -> vector<16x16xf32>
    %cst_4 = arith.constant 3.100000e+01 : f32
    %13 = vector.broadcast %cst_4 : f32 to vector<16x16xf32>
    %14 = arith.divf %12, %13 : vector<16x16xf32>
    %c8_i32 = arith.constant 8 : i32
    %15 = vector.broadcast %c8_i32 : i32 to vector<16x1xi32>
    %16 = arith.cmpi slt, %11, %15 : vector<16x1xi32>
    %c8_i32_5 = arith.constant 8 : i32
    %17 = vector.broadcast %c8_i32_5 : i32 to vector<1x16xi32>
    %18 = arith.cmpi slt, %10, %17 : vector<1x16xi32>
    %19 = vector.broadcast %16 : vector<16x1xi1> to vector<16x16xi1>
    %20 = vector.broadcast %18 : vector<1x16xi1> to vector<16x16xi1>
    %21 = vector.broadcast %19 : vector<16x16xi1> to vector<16x16xi1>
    %22 = vector.broadcast %20 : vector<16x16xi1> to vector<16x16xi1>
    %23 = arith.xori %21, %22 : vector<16x16xi1>
    %cst_6 = arith.constant dense<true> : vector<16x16xi1>
    %24 = arith.xori %23, %cst_6 : vector<16x16xi1>
    %25 = arith.extui %24 : vector<16x16xi1> to vector<16x16xi32>
    %26 = arith.sitofp %25 : vector<16x16xi32> to vector<16x16xf32>
    %27 = arith.mulf %14, %26 : vector<16x16xf32>
    %cst_7 = arith.constant 0.000000e+00 : f32
    %28 = vector.broadcast %cst_7 : f32 to vector<16x16xf32>
    %29 = vector.extract_strided_slice %27 {offsets = [0, 0], sizes = [1, 1], strides = [1, 1]} : vector<16x16xf32> to vector<1x1xf32>
    %cst_8 = arith.constant 9.99999968E-21 : f32
    %30 = vector.broadcast %cst_8 : f32 to vector<1x1xf32>
    %31 = arith.maximumf %29, %30 : vector<1x1xf32>
    %32 = math.rsqrt %31 : vector<1x1xf32>
    %c0_i32 = arith.constant 0 : i32
    %33 = vector.broadcast %c0_i32 : i32 to vector<16x1xi32>
    %34 = arith.cmpi sge, %11, %33 : vector<16x1xi32>
    %35 = vector.extract_strided_slice %27 {offsets = [0, 0], sizes = [16, 1], strides = [1, 1]} : vector<16x16xf32> to vector<16x1xf32>
    %cst_9 = arith.constant 0.000000e+00 : f32
    %36 = vector.broadcast %cst_9 : f32 to vector<16x1xf32>
    %37 = arith.select %34, %35, %36 : vector<16x1xi1>, vector<16x1xf32>
    %38 = vector.broadcast %32 : vector<1x1xf32> to vector<16x1xf32>
    %39 = arith.mulf %37, %38 : vector<16x1xf32>
    %c0_i32_10 = arith.constant 0 : i32
    %40 = vector.broadcast %c0_i32_10 : i32 to vector<1x16xi32>
    %41 = arith.cmpi sge, %10, %40 : vector<1x16xi32>
    %42 = vector.extract_strided_slice %27 {offsets = [0, 0], sizes = [1, 16], strides = [1, 1]} : vector<16x16xf32> to vector<1x16xf32>
    %cst_11 = arith.constant 0.000000e+00 : f32
    %43 = vector.broadcast %cst_11 : f32 to vector<1x16xf32>
    %44 = arith.select %41, %42, %43 : vector<1x16xi1>, vector<1x16xf32>
    %45 = vector.broadcast %32 : vector<1x1xf32> to vector<1x16xf32>
    %46 = arith.mulf %44, %45 : vector<1x16xf32>
    %c0_i32_12 = arith.constant 0 : i32
    %47 = vector.broadcast %c0_i32_12 : i32 to vector<16x1xi32>
    %48 = arith.cmpi eq, %11, %47 : vector<16x1xi32>
    %49 = arith.extui %48 : vector<16x1xi1> to vector<16x1xi32>
    %50 = arith.sitofp %49 : vector<16x1xi32> to vector<16x1xf32>
    %51 = vector.broadcast %46 : vector<1x16xf32> to vector<16x16xf32>
    %52 = vector.broadcast %50 : vector<16x1xf32> to vector<16x16xf32>
    %53 = arith.mulf %51, %52 : vector<16x16xf32>
    %54 = arith.addf %28, %53 : vector<16x16xf32>
    %55 = vector.broadcast %39 : vector<16x1xf32> to vector<16x16xf32>
    %56 = vector.broadcast %46 : vector<1x16xf32> to vector<16x16xf32>
    %57 = arith.mulf %55, %56 : vector<16x16xf32>
    %58 = arith.subf %27, %57 : vector<16x16xf32>
    %59 = vector.extract_strided_slice %58 {offsets = [1, 1], sizes = [1, 1], strides = [1, 1]} : vector<16x16xf32> to vector<1x1xf32>
    %cst_13 = arith.constant 9.99999968E-21 : f32
    %60 = vector.broadcast %cst_13 : f32 to vector<1x1xf32>
    %61 = arith.maximumf %59, %60 : vector<1x1xf32>
    %62 = math.rsqrt %61 : vector<1x1xf32>
    %c1_i32 = arith.constant 1 : i32
    %63 = vector.broadcast %c1_i32 : i32 to vector<16x1xi32>
    %64 = arith.cmpi sge, %11, %63 : vector<16x1xi32>
    %65 = vector.extract_strided_slice %58 {offsets = [0, 1], sizes = [16, 1], strides = [1, 1]} : vector<16x16xf32> to vector<16x1xf32>
    %cst_14 = arith.constant 0.000000e+00 : f32
    %66 = vector.broadcast %cst_14 : f32 to vector<16x1xf32>
    %67 = arith.select %64, %65, %66 : vector<16x1xi1>, vector<16x1xf32>
    %68 = vector.broadcast %62 : vector<1x1xf32> to vector<16x1xf32>
    %69 = arith.mulf %67, %68 : vector<16x1xf32>
    %c1_i32_15 = arith.constant 1 : i32
    %70 = vector.broadcast %c1_i32_15 : i32 to vector<1x16xi32>
    %71 = arith.cmpi sge, %10, %70 : vector<1x16xi32>
    %72 = vector.extract_strided_slice %58 {offsets = [1, 0], sizes = [1, 16], strides = [1, 1]} : vector<16x16xf32> to vector<1x16xf32>
    %cst_16 = arith.constant 0.000000e+00 : f32
    %73 = vector.broadcast %cst_16 : f32 to vector<1x16xf32>
    %74 = arith.select %71, %72, %73 : vector<1x16xi1>, vector<1x16xf32>
    %75 = vector.broadcast %62 : vector<1x1xf32> to vector<1x16xf32>
    %76 = arith.mulf %74, %75 : vector<1x16xf32>
    %c1_i32_17 = arith.constant 1 : i32
    %77 = vector.broadcast %c1_i32_17 : i32 to vector<16x1xi32>
    %78 = arith.cmpi eq, %11, %77 : vector<16x1xi32>
    %79 = arith.extui %78 : vector<16x1xi1> to vector<16x1xi32>
    %80 = arith.sitofp %79 : vector<16x1xi32> to vector<16x1xf32>
    %81 = vector.broadcast %76 : vector<1x16xf32> to vector<16x16xf32>
    %82 = vector.broadcast %80 : vector<16x1xf32> to vector<16x16xf32>
    %83 = arith.mulf %81, %82 : vector<16x16xf32>
    %84 = arith.addf %54, %83 : vector<16x16xf32>
    %85 = vector.broadcast %69 : vector<16x1xf32> to vector<16x16xf32>
    %86 = vector.broadcast %76 : vector<1x16xf32> to vector<16x16xf32>
    %87 = arith.mulf %85, %86 : vector<16x16xf32>
    %88 = arith.subf %58, %87 : vector<16x16xf32>
    %89 = vector.extract_strided_slice %88 {offsets = [2, 2], sizes = [1, 1], strides = [1, 1]} : vector<16x16xf32> to vector<1x1xf32>
    %cst_18 = arith.constant 9.99999968E-21 : f32
    %90 = vector.broadcast %cst_18 : f32 to vector<1x1xf32>
    %91 = arith.maximumf %89, %90 : vector<1x1xf32>
    %92 = math.rsqrt %91 : vector<1x1xf32>
    %c2_i32 = arith.constant 2 : i32
    %93 = vector.broadcast %c2_i32 : i32 to vector<16x1xi32>
    %94 = arith.cmpi sge, %11, %93 : vector<16x1xi32>
    %95 = vector.extract_strided_slice %88 {offsets = [0, 2], sizes = [16, 1], strides = [1, 1]} : vector<16x16xf32> to vector<16x1xf32>
    %cst_19 = arith.constant 0.000000e+00 : f32
    %96 = vector.broadcast %cst_19 : f32 to vector<16x1xf32>
    %97 = arith.select %94, %95, %96 : vector<16x1xi1>, vector<16x1xf32>
    %98 = vector.broadcast %92 : vector<1x1xf32> to vector<16x1xf32>
    %99 = arith.mulf %97, %98 : vector<16x1xf32>
    %c2_i32_20 = arith.constant 2 : i32
    %100 = vector.broadcast %c2_i32_20 : i32 to vector<1x16xi32>
    %101 = arith.cmpi sge, %10, %100 : vector<1x16xi32>
    %102 = vector.extract_strided_slice %88 {offsets = [2, 0], sizes = [1, 16], strides = [1, 1]} : vector<16x16xf32> to vector<1x16xf32>
    %cst_21 = arith.constant 0.000000e+00 : f32
    %103 = vector.broadcast %cst_21 : f32 to vector<1x16xf32>
    %104 = arith.select %101, %102, %103 : vector<1x16xi1>, vector<1x16xf32>
    %105 = vector.broadcast %92 : vector<1x1xf32> to vector<1x16xf32>
    %106 = arith.mulf %104, %105 : vector<1x16xf32>
    %c2_i32_22 = arith.constant 2 : i32
    %107 = vector.broadcast %c2_i32_22 : i32 to vector<16x1xi32>
    %108 = arith.cmpi eq, %11, %107 : vector<16x1xi32>
    %109 = arith.extui %108 : vector<16x1xi1> to vector<16x1xi32>
    %110 = arith.sitofp %109 : vector<16x1xi32> to vector<16x1xf32>
    %111 = vector.broadcast %106 : vector<1x16xf32> to vector<16x16xf32>
    %112 = vector.broadcast %110 : vector<16x1xf32> to vector<16x16xf32>
    %113 = arith.mulf %111, %112 : vector<16x16xf32>
    %114 = arith.addf %84, %113 : vector<16x16xf32>
    %115 = vector.broadcast %99 : vector<16x1xf32> to vector<16x16xf32>
    %116 = vector.broadcast %106 : vector<1x16xf32> to vector<16x16xf32>
    %117 = arith.mulf %115, %116 : vector<16x16xf32>
    %118 = arith.subf %88, %117 : vector<16x16xf32>
    %119 = vector.extract_strided_slice %118 {offsets = [3, 3], sizes = [1, 1], strides = [1, 1]} : vector<16x16xf32> to vector<1x1xf32>
    %cst_23 = arith.constant 9.99999968E-21 : f32
    %120 = vector.broadcast %cst_23 : f32 to vector<1x1xf32>
    %121 = arith.maximumf %119, %120 : vector<1x1xf32>
    %122 = math.rsqrt %121 : vector<1x1xf32>
    %c3_i32 = arith.constant 3 : i32
    %123 = vector.broadcast %c3_i32 : i32 to vector<16x1xi32>
    %124 = arith.cmpi sge, %11, %123 : vector<16x1xi32>
    %125 = vector.extract_strided_slice %118 {offsets = [0, 3], sizes = [16, 1], strides = [1, 1]} : vector<16x16xf32> to vector<16x1xf32>
    %cst_24 = arith.constant 0.000000e+00 : f32
    %126 = vector.broadcast %cst_24 : f32 to vector<16x1xf32>
    %127 = arith.select %124, %125, %126 : vector<16x1xi1>, vector<16x1xf32>
    %128 = vector.broadcast %122 : vector<1x1xf32> to vector<16x1xf32>
    %129 = arith.mulf %127, %128 : vector<16x1xf32>
    %c3_i32_25 = arith.constant 3 : i32
    %130 = vector.broadcast %c3_i32_25 : i32 to vector<1x16xi32>
    %131 = arith.cmpi sge, %10, %130 : vector<1x16xi32>
    %132 = vector.extract_strided_slice %118 {offsets = [3, 0], sizes = [1, 16], strides = [1, 1]} : vector<16x16xf32> to vector<1x16xf32>
    %cst_26 = arith.constant 0.000000e+00 : f32
    %133 = vector.broadcast %cst_26 : f32 to vector<1x16xf32>
    %134 = arith.select %131, %132, %133 : vector<1x16xi1>, vector<1x16xf32>
    %135 = vector.broadcast %122 : vector<1x1xf32> to vector<1x16xf32>
    %136 = arith.mulf %134, %135 : vector<1x16xf32>
    %c3_i32_27 = arith.constant 3 : i32
    %137 = vector.broadcast %c3_i32_27 : i32 to vector<16x1xi32>
    %138 = arith.cmpi eq, %11, %137 : vector<16x1xi32>
    %139 = arith.extui %138 : vector<16x1xi1> to vector<16x1xi32>
    %140 = arith.sitofp %139 : vector<16x1xi32> to vector<16x1xf32>
    %141 = vector.broadcast %136 : vector<1x16xf32> to vector<16x16xf32>
    %142 = vector.broadcast %140 : vector<16x1xf32> to vector<16x16xf32>
    %143 = arith.mulf %141, %142 : vector<16x16xf32>
    %144 = arith.addf %114, %143 : vector<16x16xf32>
    %145 = vector.broadcast %129 : vector<16x1xf32> to vector<16x16xf32>
    %146 = vector.broadcast %136 : vector<1x16xf32> to vector<16x16xf32>
    %147 = arith.mulf %145, %146 : vector<16x16xf32>
    %148 = arith.subf %118, %147 : vector<16x16xf32>
    %149 = vector.extract_strided_slice %148 {offsets = [4, 4], sizes = [1, 1], strides = [1, 1]} : vector<16x16xf32> to vector<1x1xf32>
    %cst_28 = arith.constant 9.99999968E-21 : f32
    %150 = vector.broadcast %cst_28 : f32 to vector<1x1xf32>
    %151 = arith.maximumf %149, %150 : vector<1x1xf32>
    %152 = math.rsqrt %151 : vector<1x1xf32>
    %c4_i32 = arith.constant 4 : i32
    %153 = vector.broadcast %c4_i32 : i32 to vector<16x1xi32>
    %154 = arith.cmpi sge, %11, %153 : vector<16x1xi32>
    %155 = vector.extract_strided_slice %148 {offsets = [0, 4], sizes = [16, 1], strides = [1, 1]} : vector<16x16xf32> to vector<16x1xf32>
    %cst_29 = arith.constant 0.000000e+00 : f32
    %156 = vector.broadcast %cst_29 : f32 to vector<16x1xf32>
    %157 = arith.select %154, %155, %156 : vector<16x1xi1>, vector<16x1xf32>
    %158 = vector.broadcast %152 : vector<1x1xf32> to vector<16x1xf32>
    %159 = arith.mulf %157, %158 : vector<16x1xf32>
    %c4_i32_30 = arith.constant 4 : i32
    %160 = vector.broadcast %c4_i32_30 : i32 to vector<1x16xi32>
    %161 = arith.cmpi sge, %10, %160 : vector<1x16xi32>
    %162 = vector.extract_strided_slice %148 {offsets = [4, 0], sizes = [1, 16], strides = [1, 1]} : vector<16x16xf32> to vector<1x16xf32>
    %cst_31 = arith.constant 0.000000e+00 : f32
    %163 = vector.broadcast %cst_31 : f32 to vector<1x16xf32>
    %164 = arith.select %161, %162, %163 : vector<1x16xi1>, vector<1x16xf32>
    %165 = vector.broadcast %152 : vector<1x1xf32> to vector<1x16xf32>
    %166 = arith.mulf %164, %165 : vector<1x16xf32>
    %c4_i32_32 = arith.constant 4 : i32
    %167 = vector.broadcast %c4_i32_32 : i32 to vector<16x1xi32>
    %168 = arith.cmpi eq, %11, %167 : vector<16x1xi32>
    %169 = arith.extui %168 : vector<16x1xi1> to vector<16x1xi32>
    %170 = arith.sitofp %169 : vector<16x1xi32> to vector<16x1xf32>
    %171 = vector.broadcast %166 : vector<1x16xf32> to vector<16x16xf32>
    %172 = vector.broadcast %170 : vector<16x1xf32> to vector<16x16xf32>
    %173 = arith.mulf %171, %172 : vector<16x16xf32>
    %174 = arith.addf %144, %173 : vector<16x16xf32>
    %175 = vector.broadcast %159 : vector<16x1xf32> to vector<16x16xf32>
    %176 = vector.broadcast %166 : vector<1x16xf32> to vector<16x16xf32>
    %177 = arith.mulf %175, %176 : vector<16x16xf32>
    %178 = arith.subf %148, %177 : vector<16x16xf32>
    %179 = vector.extract_strided_slice %178 {offsets = [5, 5], sizes = [1, 1], strides = [1, 1]} : vector<16x16xf32> to vector<1x1xf32>
    %cst_33 = arith.constant 9.99999968E-21 : f32
    %180 = vector.broadcast %cst_33 : f32 to vector<1x1xf32>
    %181 = arith.maximumf %179, %180 : vector<1x1xf32>
    %182 = math.rsqrt %181 : vector<1x1xf32>
    %c5_i32 = arith.constant 5 : i32
    %183 = vector.broadcast %c5_i32 : i32 to vector<16x1xi32>
    %184 = arith.cmpi sge, %11, %183 : vector<16x1xi32>
    %185 = vector.extract_strided_slice %178 {offsets = [0, 5], sizes = [16, 1], strides = [1, 1]} : vector<16x16xf32> to vector<16x1xf32>
    %cst_34 = arith.constant 0.000000e+00 : f32
    %186 = vector.broadcast %cst_34 : f32 to vector<16x1xf32>
    %187 = arith.select %184, %185, %186 : vector<16x1xi1>, vector<16x1xf32>
    %188 = vector.broadcast %182 : vector<1x1xf32> to vector<16x1xf32>
    %189 = arith.mulf %187, %188 : vector<16x1xf32>
    %c5_i32_35 = arith.constant 5 : i32
    %190 = vector.broadcast %c5_i32_35 : i32 to vector<1x16xi32>
    %191 = arith.cmpi sge, %10, %190 : vector<1x16xi32>
    %192 = vector.extract_strided_slice %178 {offsets = [5, 0], sizes = [1, 16], strides = [1, 1]} : vector<16x16xf32> to vector<1x16xf32>
    %cst_36 = arith.constant 0.000000e+00 : f32
    %193 = vector.broadcast %cst_36 : f32 to vector<1x16xf32>
    %194 = arith.select %191, %192, %193 : vector<1x16xi1>, vector<1x16xf32>
    %195 = vector.broadcast %182 : vector<1x1xf32> to vector<1x16xf32>
    %196 = arith.mulf %194, %195 : vector<1x16xf32>
    %c5_i32_37 = arith.constant 5 : i32
    %197 = vector.broadcast %c5_i32_37 : i32 to vector<16x1xi32>
    %198 = arith.cmpi eq, %11, %197 : vector<16x1xi32>
    %199 = arith.extui %198 : vector<16x1xi1> to vector<16x1xi32>
    %200 = arith.sitofp %199 : vector<16x1xi32> to vector<16x1xf32>
    %201 = vector.broadcast %196 : vector<1x16xf32> to vector<16x16xf32>
    %202 = vector.broadcast %200 : vector<16x1xf32> to vector<16x16xf32>
    %203 = arith.mulf %201, %202 : vector<16x16xf32>
    %204 = arith.addf %174, %203 : vector<16x16xf32>
    %205 = vector.broadcast %189 : vector<16x1xf32> to vector<16x16xf32>
    %206 = vector.broadcast %196 : vector<1x16xf32> to vector<16x16xf32>
    %207 = arith.mulf %205, %206 : vector<16x16xf32>
    %208 = arith.subf %178, %207 : vector<16x16xf32>
    %209 = vector.extract_strided_slice %208 {offsets = [6, 6], sizes = [1, 1], strides = [1, 1]} : vector<16x16xf32> to vector<1x1xf32>
    %cst_38 = arith.constant 9.99999968E-21 : f32
    %210 = vector.broadcast %cst_38 : f32 to vector<1x1xf32>
    %211 = arith.maximumf %209, %210 : vector<1x1xf32>
    %212 = math.rsqrt %211 : vector<1x1xf32>
    %c6_i32 = arith.constant 6 : i32
    %213 = vector.broadcast %c6_i32 : i32 to vector<16x1xi32>
    %214 = arith.cmpi sge, %11, %213 : vector<16x1xi32>
    %215 = vector.extract_strided_slice %208 {offsets = [0, 6], sizes = [16, 1], strides = [1, 1]} : vector<16x16xf32> to vector<16x1xf32>
    %cst_39 = arith.constant 0.000000e+00 : f32
    %216 = vector.broadcast %cst_39 : f32 to vector<16x1xf32>
    %217 = arith.select %214, %215, %216 : vector<16x1xi1>, vector<16x1xf32>
    %218 = vector.broadcast %212 : vector<1x1xf32> to vector<16x1xf32>
    %219 = arith.mulf %217, %218 : vector<16x1xf32>
    %c6_i32_40 = arith.constant 6 : i32
    %220 = vector.broadcast %c6_i32_40 : i32 to vector<1x16xi32>
    %221 = arith.cmpi sge, %10, %220 : vector<1x16xi32>
    %222 = vector.extract_strided_slice %208 {offsets = [6, 0], sizes = [1, 16], strides = [1, 1]} : vector<16x16xf32> to vector<1x16xf32>
    %cst_41 = arith.constant 0.000000e+00 : f32
    %223 = vector.broadcast %cst_41 : f32 to vector<1x16xf32>
    %224 = arith.select %221, %222, %223 : vector<1x16xi1>, vector<1x16xf32>
    %225 = vector.broadcast %212 : vector<1x1xf32> to vector<1x16xf32>
    %226 = arith.mulf %224, %225 : vector<1x16xf32>
    %c6_i32_42 = arith.constant 6 : i32
    %227 = vector.broadcast %c6_i32_42 : i32 to vector<16x1xi32>
    %228 = arith.cmpi eq, %11, %227 : vector<16x1xi32>
    %229 = arith.extui %228 : vector<16x1xi1> to vector<16x1xi32>
    %230 = arith.sitofp %229 : vector<16x1xi32> to vector<16x1xf32>
    %231 = vector.broadcast %226 : vector<1x16xf32> to vector<16x16xf32>
    %232 = vector.broadcast %230 : vector<16x1xf32> to vector<16x16xf32>
    %233 = arith.mulf %231, %232 : vector<16x16xf32>
    %234 = arith.addf %204, %233 : vector<16x16xf32>
    %235 = vector.broadcast %219 : vector<16x1xf32> to vector<16x16xf32>
    %236 = vector.broadcast %226 : vector<1x16xf32> to vector<16x16xf32>
    %237 = arith.mulf %235, %236 : vector<16x16xf32>
    %238 = arith.subf %208, %237 : vector<16x16xf32>
    %239 = vector.extract_strided_slice %238 {offsets = [7, 7], sizes = [1, 1], strides = [1, 1]} : vector<16x16xf32> to vector<1x1xf32>
    %cst_43 = arith.constant 9.99999968E-21 : f32
    %240 = vector.broadcast %cst_43 : f32 to vector<1x1xf32>
    %241 = arith.maximumf %239, %240 : vector<1x1xf32>
    %242 = math.rsqrt %241 : vector<1x1xf32>
    %c7_i32 = arith.constant 7 : i32
    %243 = vector.broadcast %c7_i32 : i32 to vector<16x1xi32>
    %244 = arith.cmpi sge, %11, %243 : vector<16x1xi32>
    %245 = vector.extract_strided_slice %238 {offsets = [0, 7], sizes = [16, 1], strides = [1, 1]} : vector<16x16xf32> to vector<16x1xf32>
    %cst_44 = arith.constant 0.000000e+00 : f32
    %246 = vector.broadcast %cst_44 : f32 to vector<16x1xf32>
    %247 = arith.select %244, %245, %246 : vector<16x1xi1>, vector<16x1xf32>
    %248 = vector.broadcast %242 : vector<1x1xf32> to vector<16x1xf32>
    %249 = arith.mulf %247, %248 : vector<16x1xf32>
    %c7_i32_45 = arith.constant 7 : i32
    %250 = vector.broadcast %c7_i32_45 : i32 to vector<1x16xi32>
    %251 = arith.cmpi sge, %10, %250 : vector<1x16xi32>
    %252 = vector.extract_strided_slice %238 {offsets = [7, 0], sizes = [1, 16], strides = [1, 1]} : vector<16x16xf32> to vector<1x16xf32>
    %cst_46 = arith.constant 0.000000e+00 : f32
    %253 = vector.broadcast %cst_46 : f32 to vector<1x16xf32>
    %254 = arith.select %251, %252, %253 : vector<1x16xi1>, vector<1x16xf32>
    %255 = vector.broadcast %242 : vector<1x1xf32> to vector<1x16xf32>
    %256 = arith.mulf %254, %255 : vector<1x16xf32>
    %c7_i32_47 = arith.constant 7 : i32
    %257 = vector.broadcast %c7_i32_47 : i32 to vector<16x1xi32>
    %258 = arith.cmpi eq, %11, %257 : vector<16x1xi32>
    %259 = arith.extui %258 : vector<16x1xi1> to vector<16x1xi32>
    %260 = arith.sitofp %259 : vector<16x1xi32> to vector<16x1xf32>
    %261 = vector.broadcast %256 : vector<1x16xf32> to vector<16x16xf32>
    %262 = vector.broadcast %260 : vector<16x1xf32> to vector<16x16xf32>
    %263 = arith.mulf %261, %262 : vector<16x16xf32>
    %264 = arith.addf %234, %263 : vector<16x16xf32>
    %265 = vector.broadcast %249 : vector<16x1xf32> to vector<16x16xf32>
    %266 = vector.broadcast %256 : vector<1x16xf32> to vector<16x16xf32>
    %267 = arith.mulf %265, %266 : vector<16x16xf32>
    %268 = arith.subf %238, %267 : vector<16x16xf32>
    %269 = vector.extract_strided_slice %268 {offsets = [8, 8], sizes = [1, 1], strides = [1, 1]} : vector<16x16xf32> to vector<1x1xf32>
    %cst_48 = arith.constant 9.99999968E-21 : f32
    %270 = vector.broadcast %cst_48 : f32 to vector<1x1xf32>
    %271 = arith.maximumf %269, %270 : vector<1x1xf32>
    %272 = math.rsqrt %271 : vector<1x1xf32>
    %c8_i32_49 = arith.constant 8 : i32
    %273 = vector.broadcast %c8_i32_49 : i32 to vector<16x1xi32>
    %274 = arith.cmpi sge, %11, %273 : vector<16x1xi32>
    %275 = vector.extract_strided_slice %268 {offsets = [0, 8], sizes = [16, 1], strides = [1, 1]} : vector<16x16xf32> to vector<16x1xf32>
    %cst_50 = arith.constant 0.000000e+00 : f32
    %276 = vector.broadcast %cst_50 : f32 to vector<16x1xf32>
    %277 = arith.select %274, %275, %276 : vector<16x1xi1>, vector<16x1xf32>
    %278 = vector.broadcast %272 : vector<1x1xf32> to vector<16x1xf32>
    %279 = arith.mulf %277, %278 : vector<16x1xf32>
    %c8_i32_51 = arith.constant 8 : i32
    %280 = vector.broadcast %c8_i32_51 : i32 to vector<1x16xi32>
    %281 = arith.cmpi sge, %10, %280 : vector<1x16xi32>
    %282 = vector.extract_strided_slice %268 {offsets = [8, 0], sizes = [1, 16], strides = [1, 1]} : vector<16x16xf32> to vector<1x16xf32>
    %cst_52 = arith.constant 0.000000e+00 : f32
    %283 = vector.broadcast %cst_52 : f32 to vector<1x16xf32>
    %284 = arith.select %281, %282, %283 : vector<1x16xi1>, vector<1x16xf32>
    %285 = vector.broadcast %272 : vector<1x1xf32> to vector<1x16xf32>
    %286 = arith.mulf %284, %285 : vector<1x16xf32>
    %c8_i32_53 = arith.constant 8 : i32
    %287 = vector.broadcast %c8_i32_53 : i32 to vector<16x1xi32>
    %288 = arith.cmpi eq, %11, %287 : vector<16x1xi32>
    %289 = arith.extui %288 : vector<16x1xi1> to vector<16x1xi32>
    %290 = arith.sitofp %289 : vector<16x1xi32> to vector<16x1xf32>
    %291 = vector.broadcast %286 : vector<1x16xf32> to vector<16x16xf32>
    %292 = vector.broadcast %290 : vector<16x1xf32> to vector<16x16xf32>
    %293 = arith.mulf %291, %292 : vector<16x16xf32>
    %294 = arith.addf %264, %293 : vector<16x16xf32>
    %295 = vector.broadcast %279 : vector<16x1xf32> to vector<16x16xf32>
    %296 = vector.broadcast %286 : vector<1x16xf32> to vector<16x16xf32>
    %297 = arith.mulf %295, %296 : vector<16x16xf32>
    %298 = arith.subf %268, %297 : vector<16x16xf32>
    %299 = vector.extract_strided_slice %298 {offsets = [9, 9], sizes = [1, 1], strides = [1, 1]} : vector<16x16xf32> to vector<1x1xf32>
    %cst_54 = arith.constant 9.99999968E-21 : f32
    %300 = vector.broadcast %cst_54 : f32 to vector<1x1xf32>
    %301 = arith.maximumf %299, %300 : vector<1x1xf32>
    %302 = math.rsqrt %301 : vector<1x1xf32>
    %c9_i32 = arith.constant 9 : i32
    %303 = vector.broadcast %c9_i32 : i32 to vector<16x1xi32>
    %304 = arith.cmpi sge, %11, %303 : vector<16x1xi32>
    %305 = vector.extract_strided_slice %298 {offsets = [0, 9], sizes = [16, 1], strides = [1, 1]} : vector<16x16xf32> to vector<16x1xf32>
    %cst_55 = arith.constant 0.000000e+00 : f32
    %306 = vector.broadcast %cst_55 : f32 to vector<16x1xf32>
    %307 = arith.select %304, %305, %306 : vector<16x1xi1>, vector<16x1xf32>
    %308 = vector.broadcast %302 : vector<1x1xf32> to vector<16x1xf32>
    %309 = arith.mulf %307, %308 : vector<16x1xf32>
    %c9_i32_56 = arith.constant 9 : i32
    %310 = vector.broadcast %c9_i32_56 : i32 to vector<1x16xi32>
    %311 = arith.cmpi sge, %10, %310 : vector<1x16xi32>
    %312 = vector.extract_strided_slice %298 {offsets = [9, 0], sizes = [1, 16], strides = [1, 1]} : vector<16x16xf32> to vector<1x16xf32>
    %cst_57 = arith.constant 0.000000e+00 : f32
    %313 = vector.broadcast %cst_57 : f32 to vector<1x16xf32>
    %314 = arith.select %311, %312, %313 : vector<1x16xi1>, vector<1x16xf32>
    %315 = vector.broadcast %302 : vector<1x1xf32> to vector<1x16xf32>
    %316 = arith.mulf %314, %315 : vector<1x16xf32>
    %c9_i32_58 = arith.constant 9 : i32
    %317 = vector.broadcast %c9_i32_58 : i32 to vector<16x1xi32>
    %318 = arith.cmpi eq, %11, %317 : vector<16x1xi32>
    %319 = arith.extui %318 : vector<16x1xi1> to vector<16x1xi32>
    %320 = arith.sitofp %319 : vector<16x1xi32> to vector<16x1xf32>
    %321 = vector.broadcast %316 : vector<1x16xf32> to vector<16x16xf32>
    %322 = vector.broadcast %320 : vector<16x1xf32> to vector<16x16xf32>
    %323 = arith.mulf %321, %322 : vector<16x16xf32>
    %324 = arith.addf %294, %323 : vector<16x16xf32>
    %325 = vector.broadcast %309 : vector<16x1xf32> to vector<16x16xf32>
    %326 = vector.broadcast %316 : vector<1x16xf32> to vector<16x16xf32>
    %327 = arith.mulf %325, %326 : vector<16x16xf32>
    %328 = arith.subf %298, %327 : vector<16x16xf32>
    %329 = vector.extract_strided_slice %328 {offsets = [10, 10], sizes = [1, 1], strides = [1, 1]} : vector<16x16xf32> to vector<1x1xf32>
    %cst_59 = arith.constant 9.99999968E-21 : f32
    %330 = vector.broadcast %cst_59 : f32 to vector<1x1xf32>
    %331 = arith.maximumf %329, %330 : vector<1x1xf32>
    %332 = math.rsqrt %331 : vector<1x1xf32>
    %c10_i32 = arith.constant 10 : i32
    %333 = vector.broadcast %c10_i32 : i32 to vector<16x1xi32>
    %334 = arith.cmpi sge, %11, %333 : vector<16x1xi32>
    %335 = vector.extract_strided_slice %328 {offsets = [0, 10], sizes = [16, 1], strides = [1, 1]} : vector<16x16xf32> to vector<16x1xf32>
    %cst_60 = arith.constant 0.000000e+00 : f32
    %336 = vector.broadcast %cst_60 : f32 to vector<16x1xf32>
    %337 = arith.select %334, %335, %336 : vector<16x1xi1>, vector<16x1xf32>
    %338 = vector.broadcast %332 : vector<1x1xf32> to vector<16x1xf32>
    %339 = arith.mulf %337, %338 : vector<16x1xf32>
    %c10_i32_61 = arith.constant 10 : i32
    %340 = vector.broadcast %c10_i32_61 : i32 to vector<1x16xi32>
    %341 = arith.cmpi sge, %10, %340 : vector<1x16xi32>
    %342 = vector.extract_strided_slice %328 {offsets = [10, 0], sizes = [1, 16], strides = [1, 1]} : vector<16x16xf32> to vector<1x16xf32>
    %cst_62 = arith.constant 0.000000e+00 : f32
    %343 = vector.broadcast %cst_62 : f32 to vector<1x16xf32>
    %344 = arith.select %341, %342, %343 : vector<1x16xi1>, vector<1x16xf32>
    %345 = vector.broadcast %332 : vector<1x1xf32> to vector<1x16xf32>
    %346 = arith.mulf %344, %345 : vector<1x16xf32>
    %c10_i32_63 = arith.constant 10 : i32
    %347 = vector.broadcast %c10_i32_63 : i32 to vector<16x1xi32>
    %348 = arith.cmpi eq, %11, %347 : vector<16x1xi32>
    %349 = arith.extui %348 : vector<16x1xi1> to vector<16x1xi32>
    %350 = arith.sitofp %349 : vector<16x1xi32> to vector<16x1xf32>
    %351 = vector.broadcast %346 : vector<1x16xf32> to vector<16x16xf32>
    %352 = vector.broadcast %350 : vector<16x1xf32> to vector<16x16xf32>
    %353 = arith.mulf %351, %352 : vector<16x16xf32>
    %354 = arith.addf %324, %353 : vector<16x16xf32>
    %355 = vector.broadcast %339 : vector<16x1xf32> to vector<16x16xf32>
    %356 = vector.broadcast %346 : vector<1x16xf32> to vector<16x16xf32>
    %357 = arith.mulf %355, %356 : vector<16x16xf32>
    %358 = arith.subf %328, %357 : vector<16x16xf32>
    %359 = vector.extract_strided_slice %358 {offsets = [11, 11], sizes = [1, 1], strides = [1, 1]} : vector<16x16xf32> to vector<1x1xf32>
    %cst_64 = arith.constant 9.99999968E-21 : f32
    %360 = vector.broadcast %cst_64 : f32 to vector<1x1xf32>
    %361 = arith.maximumf %359, %360 : vector<1x1xf32>
    %362 = math.rsqrt %361 : vector<1x1xf32>
    %c11_i32 = arith.constant 11 : i32
    %363 = vector.broadcast %c11_i32 : i32 to vector<16x1xi32>
    %364 = arith.cmpi sge, %11, %363 : vector<16x1xi32>
    %365 = vector.extract_strided_slice %358 {offsets = [0, 11], sizes = [16, 1], strides = [1, 1]} : vector<16x16xf32> to vector<16x1xf32>
    %cst_65 = arith.constant 0.000000e+00 : f32
    %366 = vector.broadcast %cst_65 : f32 to vector<16x1xf32>
    %367 = arith.select %364, %365, %366 : vector<16x1xi1>, vector<16x1xf32>
    %368 = vector.broadcast %362 : vector<1x1xf32> to vector<16x1xf32>
    %369 = arith.mulf %367, %368 : vector<16x1xf32>
    %c11_i32_66 = arith.constant 11 : i32
    %370 = vector.broadcast %c11_i32_66 : i32 to vector<1x16xi32>
    %371 = arith.cmpi sge, %10, %370 : vector<1x16xi32>
    %372 = vector.extract_strided_slice %358 {offsets = [11, 0], sizes = [1, 16], strides = [1, 1]} : vector<16x16xf32> to vector<1x16xf32>
    %cst_67 = arith.constant 0.000000e+00 : f32
    %373 = vector.broadcast %cst_67 : f32 to vector<1x16xf32>
    %374 = arith.select %371, %372, %373 : vector<1x16xi1>, vector<1x16xf32>
    %375 = vector.broadcast %362 : vector<1x1xf32> to vector<1x16xf32>
    %376 = arith.mulf %374, %375 : vector<1x16xf32>
    %c11_i32_68 = arith.constant 11 : i32
    %377 = vector.broadcast %c11_i32_68 : i32 to vector<16x1xi32>
    %378 = arith.cmpi eq, %11, %377 : vector<16x1xi32>
    %379 = arith.extui %378 : vector<16x1xi1> to vector<16x1xi32>
    %380 = arith.sitofp %379 : vector<16x1xi32> to vector<16x1xf32>
    %381 = vector.broadcast %376 : vector<1x16xf32> to vector<16x16xf32>
    %382 = vector.broadcast %380 : vector<16x1xf32> to vector<16x16xf32>
    %383 = arith.mulf %381, %382 : vector<16x16xf32>
    %384 = arith.addf %354, %383 : vector<16x16xf32>
    %385 = vector.broadcast %369 : vector<16x1xf32> to vector<16x16xf32>
    %386 = vector.broadcast %376 : vector<1x16xf32> to vector<16x16xf32>
    %387 = arith.mulf %385, %386 : vector<16x16xf32>
    %388 = arith.subf %358, %387 : vector<16x16xf32>
    %389 = vector.extract_strided_slice %388 {offsets = [12, 12], sizes = [1, 1], strides = [1, 1]} : vector<16x16xf32> to vector<1x1xf32>
    %cst_69 = arith.constant 9.99999968E-21 : f32
    %390 = vector.broadcast %cst_69 : f32 to vector<1x1xf32>
    %391 = arith.maximumf %389, %390 : vector<1x1xf32>
    %392 = math.rsqrt %391 : vector<1x1xf32>
    %c12_i32 = arith.constant 12 : i32
    %393 = vector.broadcast %c12_i32 : i32 to vector<16x1xi32>
    %394 = arith.cmpi sge, %11, %393 : vector<16x1xi32>
    %395 = vector.extract_strided_slice %388 {offsets = [0, 12], sizes = [16, 1], strides = [1, 1]} : vector<16x16xf32> to vector<16x1xf32>
    %cst_70 = arith.constant 0.000000e+00 : f32
    %396 = vector.broadcast %cst_70 : f32 to vector<16x1xf32>
    %397 = arith.select %394, %395, %396 : vector<16x1xi1>, vector<16x1xf32>
    %398 = vector.broadcast %392 : vector<1x1xf32> to vector<16x1xf32>
    %399 = arith.mulf %397, %398 : vector<16x1xf32>
    %c12_i32_71 = arith.constant 12 : i32
    %400 = vector.broadcast %c12_i32_71 : i32 to vector<1x16xi32>
    %401 = arith.cmpi sge, %10, %400 : vector<1x16xi32>
    %402 = vector.extract_strided_slice %388 {offsets = [12, 0], sizes = [1, 16], strides = [1, 1]} : vector<16x16xf32> to vector<1x16xf32>
    %cst_72 = arith.constant 0.000000e+00 : f32
    %403 = vector.broadcast %cst_72 : f32 to vector<1x16xf32>
    %404 = arith.select %401, %402, %403 : vector<1x16xi1>, vector<1x16xf32>
    %405 = vector.broadcast %392 : vector<1x1xf32> to vector<1x16xf32>
    %406 = arith.mulf %404, %405 : vector<1x16xf32>
    %c12_i32_73 = arith.constant 12 : i32
    %407 = vector.broadcast %c12_i32_73 : i32 to vector<16x1xi32>
    %408 = arith.cmpi eq, %11, %407 : vector<16x1xi32>
    %409 = arith.extui %408 : vector<16x1xi1> to vector<16x1xi32>
    %410 = arith.sitofp %409 : vector<16x1xi32> to vector<16x1xf32>
    %411 = vector.broadcast %406 : vector<1x16xf32> to vector<16x16xf32>
    %412 = vector.broadcast %410 : vector<16x1xf32> to vector<16x16xf32>
    %413 = arith.mulf %411, %412 : vector<16x16xf32>
    %414 = arith.addf %384, %413 : vector<16x16xf32>
    %415 = vector.broadcast %399 : vector<16x1xf32> to vector<16x16xf32>
    %416 = vector.broadcast %406 : vector<1x16xf32> to vector<16x16xf32>
    %417 = arith.mulf %415, %416 : vector<16x16xf32>
    %418 = arith.subf %388, %417 : vector<16x16xf32>
    %419 = vector.extract_strided_slice %418 {offsets = [13, 13], sizes = [1, 1], strides = [1, 1]} : vector<16x16xf32> to vector<1x1xf32>
    %cst_74 = arith.constant 9.99999968E-21 : f32
    %420 = vector.broadcast %cst_74 : f32 to vector<1x1xf32>
    %421 = arith.maximumf %419, %420 : vector<1x1xf32>
    %422 = math.rsqrt %421 : vector<1x1xf32>
    %c13_i32 = arith.constant 13 : i32
    %423 = vector.broadcast %c13_i32 : i32 to vector<16x1xi32>
    %424 = arith.cmpi sge, %11, %423 : vector<16x1xi32>
    %425 = vector.extract_strided_slice %418 {offsets = [0, 13], sizes = [16, 1], strides = [1, 1]} : vector<16x16xf32> to vector<16x1xf32>
    %cst_75 = arith.constant 0.000000e+00 : f32
    %426 = vector.broadcast %cst_75 : f32 to vector<16x1xf32>
    %427 = arith.select %424, %425, %426 : vector<16x1xi1>, vector<16x1xf32>
    %428 = vector.broadcast %422 : vector<1x1xf32> to vector<16x1xf32>
    %429 = arith.mulf %427, %428 : vector<16x1xf32>
    %c13_i32_76 = arith.constant 13 : i32
    %430 = vector.broadcast %c13_i32_76 : i32 to vector<1x16xi32>
    %431 = arith.cmpi sge, %10, %430 : vector<1x16xi32>
    %432 = vector.extract_strided_slice %418 {offsets = [13, 0], sizes = [1, 16], strides = [1, 1]} : vector<16x16xf32> to vector<1x16xf32>
    %cst_77 = arith.constant 0.000000e+00 : f32
    %433 = vector.broadcast %cst_77 : f32 to vector<1x16xf32>
    %434 = arith.select %431, %432, %433 : vector<1x16xi1>, vector<1x16xf32>
    %435 = vector.broadcast %422 : vector<1x1xf32> to vector<1x16xf32>
    %436 = arith.mulf %434, %435 : vector<1x16xf32>
    %c13_i32_78 = arith.constant 13 : i32
    %437 = vector.broadcast %c13_i32_78 : i32 to vector<16x1xi32>
    %438 = arith.cmpi eq, %11, %437 : vector<16x1xi32>
    %439 = arith.extui %438 : vector<16x1xi1> to vector<16x1xi32>
    %440 = arith.sitofp %439 : vector<16x1xi32> to vector<16x1xf32>
    %441 = vector.broadcast %436 : vector<1x16xf32> to vector<16x16xf32>
    %442 = vector.broadcast %440 : vector<16x1xf32> to vector<16x16xf32>
    %443 = arith.mulf %441, %442 : vector<16x16xf32>
    %444 = arith.addf %414, %443 : vector<16x16xf32>
    %445 = vector.broadcast %429 : vector<16x1xf32> to vector<16x16xf32>
    %446 = vector.broadcast %436 : vector<1x16xf32> to vector<16x16xf32>
    %447 = arith.mulf %445, %446 : vector<16x16xf32>
    %448 = arith.subf %418, %447 : vector<16x16xf32>
    %449 = vector.extract_strided_slice %448 {offsets = [14, 14], sizes = [1, 1], strides = [1, 1]} : vector<16x16xf32> to vector<1x1xf32>
    %cst_79 = arith.constant 9.99999968E-21 : f32
    %450 = vector.broadcast %cst_79 : f32 to vector<1x1xf32>
    %451 = arith.maximumf %449, %450 : vector<1x1xf32>
    %452 = math.rsqrt %451 : vector<1x1xf32>
    %c14_i32 = arith.constant 14 : i32
    %453 = vector.broadcast %c14_i32 : i32 to vector<16x1xi32>
    %454 = arith.cmpi sge, %11, %453 : vector<16x1xi32>
    %455 = vector.extract_strided_slice %448 {offsets = [0, 14], sizes = [16, 1], strides = [1, 1]} : vector<16x16xf32> to vector<16x1xf32>
    %cst_80 = arith.constant 0.000000e+00 : f32
    %456 = vector.broadcast %cst_80 : f32 to vector<16x1xf32>
    %457 = arith.select %454, %455, %456 : vector<16x1xi1>, vector<16x1xf32>
    %458 = vector.broadcast %452 : vector<1x1xf32> to vector<16x1xf32>
    %459 = arith.mulf %457, %458 : vector<16x1xf32>
    %c14_i32_81 = arith.constant 14 : i32
    %460 = vector.broadcast %c14_i32_81 : i32 to vector<1x16xi32>
    %461 = arith.cmpi sge, %10, %460 : vector<1x16xi32>
    %462 = vector.extract_strided_slice %448 {offsets = [14, 0], sizes = [1, 16], strides = [1, 1]} : vector<16x16xf32> to vector<1x16xf32>
    %cst_82 = arith.constant 0.000000e+00 : f32
    %463 = vector.broadcast %cst_82 : f32 to vector<1x16xf32>
    %464 = arith.select %461, %462, %463 : vector<1x16xi1>, vector<1x16xf32>
    %465 = vector.broadcast %452 : vector<1x1xf32> to vector<1x16xf32>
    %466 = arith.mulf %464, %465 : vector<1x16xf32>
    %c14_i32_83 = arith.constant 14 : i32
    %467 = vector.broadcast %c14_i32_83 : i32 to vector<16x1xi32>
    %468 = arith.cmpi eq, %11, %467 : vector<16x1xi32>
    %469 = arith.extui %468 : vector<16x1xi1> to vector<16x1xi32>
    %470 = arith.sitofp %469 : vector<16x1xi32> to vector<16x1xf32>
    %471 = vector.broadcast %466 : vector<1x16xf32> to vector<16x16xf32>
    %472 = vector.broadcast %470 : vector<16x1xf32> to vector<16x16xf32>
    %473 = arith.mulf %471, %472 : vector<16x16xf32>
    %474 = arith.addf %444, %473 : vector<16x16xf32>
    %475 = vector.broadcast %459 : vector<16x1xf32> to vector<16x16xf32>
    %476 = vector.broadcast %466 : vector<1x16xf32> to vector<16x16xf32>
    %477 = arith.mulf %475, %476 : vector<16x16xf32>
    %478 = arith.subf %448, %477 : vector<16x16xf32>
    %479 = vector.extract_strided_slice %478 {offsets = [15, 15], sizes = [1, 1], strides = [1, 1]} : vector<16x16xf32> to vector<1x1xf32>
    %cst_84 = arith.constant 9.99999968E-21 : f32
    %480 = vector.broadcast %cst_84 : f32 to vector<1x1xf32>
    %481 = arith.maximumf %479, %480 : vector<1x1xf32>
    %482 = math.rsqrt %481 : vector<1x1xf32>
    %c15_i32 = arith.constant 15 : i32
    %483 = vector.broadcast %c15_i32 : i32 to vector<1x16xi32>
    %484 = arith.cmpi sge, %10, %483 : vector<1x16xi32>
    %485 = vector.extract_strided_slice %478 {offsets = [15, 0], sizes = [1, 16], strides = [1, 1]} : vector<16x16xf32> to vector<1x16xf32>
    %cst_85 = arith.constant 0.000000e+00 : f32
    %486 = vector.broadcast %cst_85 : f32 to vector<1x16xf32>
    %487 = arith.select %484, %485, %486 : vector<1x16xi1>, vector<1x16xf32>
    %488 = vector.broadcast %482 : vector<1x1xf32> to vector<1x16xf32>
    %489 = arith.mulf %487, %488 : vector<1x16xf32>
    %c15_i32_86 = arith.constant 15 : i32
    %490 = vector.broadcast %c15_i32_86 : i32 to vector<16x1xi32>
    %491 = arith.cmpi eq, %11, %490 : vector<16x1xi32>
    %492 = arith.extui %491 : vector<16x1xi1> to vector<16x1xi32>
    %493 = arith.sitofp %492 : vector<16x1xi32> to vector<16x1xf32>
    %494 = vector.broadcast %489 : vector<1x16xf32> to vector<16x16xf32>
    %495 = vector.broadcast %493 : vector<16x1xf32> to vector<16x16xf32>
    %496 = arith.mulf %494, %495 : vector<16x16xf32>
    %497 = arith.addf %474, %496 : vector<16x16xf32>
    %cst_87 = arith.constant 0.000000e+00 : f32
    %498 = vector.broadcast %cst_87 : f32 to vector<16x16xf32>
    %499 = vector.extract_strided_slice %497 {offsets = [0, 0], sizes = [16, 1], strides = [1, 1]} : vector<16x16xf32> to vector<16x1xf32>
    %500 = vector.broadcast %499 : vector<16x1xf32> to vector<16x16xf32>
    %501 = arith.mulf %500, %498 : vector<16x16xf32>
    %cst_88 = arith.constant dense<0.000000e+00> : vector<16xf32>
    %502 = vector.multi_reduction <add>, %501, %cst_88 [0] : vector<16x16xf32> to vector<16xf32>
    %503 = vector.shape_cast %502 : vector<16xf32> to vector<1x16xf32>
    %c0_i32_89 = arith.constant 0 : i32
    %504 = vector.broadcast %c0_i32_89 : i32 to vector<1x16xi32>
    %505 = arith.cmpi eq, %10, %504 : vector<1x16xi32>
    %506 = arith.extui %505 : vector<1x16xi1> to vector<1x16xi32>
    %507 = arith.sitofp %506 : vector<1x16xi32> to vector<1x16xf32>
    %508 = arith.subf %507, %503 : vector<1x16xf32>
    %509 = vector.extract_strided_slice %497 {offsets = [0, 0], sizes = [1, 1], strides = [1, 1]} : vector<16x16xf32> to vector<1x1xf32>
    %510 = vector.broadcast %509 : vector<1x1xf32> to vector<1x16xf32>
    %511 = arith.divf %508, %510 : vector<1x16xf32>
    %c0_i32_90 = arith.constant 0 : i32
    %512 = vector.broadcast %c0_i32_90 : i32 to vector<16x1xi32>
    %513 = arith.cmpi eq, %11, %512 : vector<16x1xi32>
    %514 = arith.extui %513 : vector<16x1xi1> to vector<16x1xi32>
    %515 = arith.sitofp %514 : vector<16x1xi32> to vector<16x1xf32>
    %516 = vector.broadcast %511 : vector<1x16xf32> to vector<16x16xf32>
    %517 = vector.broadcast %515 : vector<16x1xf32> to vector<16x16xf32>
    %518 = arith.mulf %516, %517 : vector<16x16xf32>
    %519 = arith.addf %498, %518 : vector<16x16xf32>
    %520 = vector.extract_strided_slice %497 {offsets = [0, 1], sizes = [16, 1], strides = [1, 1]} : vector<16x16xf32> to vector<16x1xf32>
    %521 = vector.broadcast %520 : vector<16x1xf32> to vector<16x16xf32>
    %522 = arith.mulf %521, %519 : vector<16x16xf32>
    %cst_91 = arith.constant dense<0.000000e+00> : vector<16xf32>
    %523 = vector.multi_reduction <add>, %522, %cst_91 [0] : vector<16x16xf32> to vector<16xf32>
    %524 = vector.shape_cast %523 : vector<16xf32> to vector<1x16xf32>
    %c1_i32_92 = arith.constant 1 : i32
    %525 = vector.broadcast %c1_i32_92 : i32 to vector<1x16xi32>
    %526 = arith.cmpi eq, %10, %525 : vector<1x16xi32>
    %527 = arith.extui %526 : vector<1x16xi1> to vector<1x16xi32>
    %528 = arith.sitofp %527 : vector<1x16xi32> to vector<1x16xf32>
    %529 = arith.subf %528, %524 : vector<1x16xf32>
    %530 = vector.extract_strided_slice %497 {offsets = [1, 1], sizes = [1, 1], strides = [1, 1]} : vector<16x16xf32> to vector<1x1xf32>
    %531 = vector.broadcast %530 : vector<1x1xf32> to vector<1x16xf32>
    %532 = arith.divf %529, %531 : vector<1x16xf32>
    %c1_i32_93 = arith.constant 1 : i32
    %533 = vector.broadcast %c1_i32_93 : i32 to vector<16x1xi32>
    %534 = arith.cmpi eq, %11, %533 : vector<16x1xi32>
    %535 = arith.extui %534 : vector<16x1xi1> to vector<16x1xi32>
    %536 = arith.sitofp %535 : vector<16x1xi32> to vector<16x1xf32>
    %537 = vector.broadcast %532 : vector<1x16xf32> to vector<16x16xf32>
    %538 = vector.broadcast %536 : vector<16x1xf32> to vector<16x16xf32>
    %539 = arith.mulf %537, %538 : vector<16x16xf32>
    %540 = arith.addf %519, %539 : vector<16x16xf32>
    %541 = vector.extract_strided_slice %497 {offsets = [0, 2], sizes = [16, 1], strides = [1, 1]} : vector<16x16xf32> to vector<16x1xf32>
    %542 = vector.broadcast %541 : vector<16x1xf32> to vector<16x16xf32>
    %543 = arith.mulf %542, %540 : vector<16x16xf32>
    %cst_94 = arith.constant dense<0.000000e+00> : vector<16xf32>
    %544 = vector.multi_reduction <add>, %543, %cst_94 [0] : vector<16x16xf32> to vector<16xf32>
    %545 = vector.shape_cast %544 : vector<16xf32> to vector<1x16xf32>
    %c2_i32_95 = arith.constant 2 : i32
    %546 = vector.broadcast %c2_i32_95 : i32 to vector<1x16xi32>
    %547 = arith.cmpi eq, %10, %546 : vector<1x16xi32>
    %548 = arith.extui %547 : vector<1x16xi1> to vector<1x16xi32>
    %549 = arith.sitofp %548 : vector<1x16xi32> to vector<1x16xf32>
    %550 = arith.subf %549, %545 : vector<1x16xf32>
    %551 = vector.extract_strided_slice %497 {offsets = [2, 2], sizes = [1, 1], strides = [1, 1]} : vector<16x16xf32> to vector<1x1xf32>
    %552 = vector.broadcast %551 : vector<1x1xf32> to vector<1x16xf32>
    %553 = arith.divf %550, %552 : vector<1x16xf32>
    %c2_i32_96 = arith.constant 2 : i32
    %554 = vector.broadcast %c2_i32_96 : i32 to vector<16x1xi32>
    %555 = arith.cmpi eq, %11, %554 : vector<16x1xi32>
    %556 = arith.extui %555 : vector<16x1xi1> to vector<16x1xi32>
    %557 = arith.sitofp %556 : vector<16x1xi32> to vector<16x1xf32>
    %558 = vector.broadcast %553 : vector<1x16xf32> to vector<16x16xf32>
    %559 = vector.broadcast %557 : vector<16x1xf32> to vector<16x16xf32>
    %560 = arith.mulf %558, %559 : vector<16x16xf32>
    %561 = arith.addf %540, %560 : vector<16x16xf32>
    %562 = vector.extract_strided_slice %497 {offsets = [0, 3], sizes = [16, 1], strides = [1, 1]} : vector<16x16xf32> to vector<16x1xf32>
    %563 = vector.broadcast %562 : vector<16x1xf32> to vector<16x16xf32>
    %564 = arith.mulf %563, %561 : vector<16x16xf32>
    %cst_97 = arith.constant dense<0.000000e+00> : vector<16xf32>
    %565 = vector.multi_reduction <add>, %564, %cst_97 [0] : vector<16x16xf32> to vector<16xf32>
    %566 = vector.shape_cast %565 : vector<16xf32> to vector<1x16xf32>
    %c3_i32_98 = arith.constant 3 : i32
    %567 = vector.broadcast %c3_i32_98 : i32 to vector<1x16xi32>
    %568 = arith.cmpi eq, %10, %567 : vector<1x16xi32>
    %569 = arith.extui %568 : vector<1x16xi1> to vector<1x16xi32>
    %570 = arith.sitofp %569 : vector<1x16xi32> to vector<1x16xf32>
    %571 = arith.subf %570, %566 : vector<1x16xf32>
    %572 = vector.extract_strided_slice %497 {offsets = [3, 3], sizes = [1, 1], strides = [1, 1]} : vector<16x16xf32> to vector<1x1xf32>
    %573 = vector.broadcast %572 : vector<1x1xf32> to vector<1x16xf32>
    %574 = arith.divf %571, %573 : vector<1x16xf32>
    %c3_i32_99 = arith.constant 3 : i32
    %575 = vector.broadcast %c3_i32_99 : i32 to vector<16x1xi32>
    %576 = arith.cmpi eq, %11, %575 : vector<16x1xi32>
    %577 = arith.extui %576 : vector<16x1xi1> to vector<16x1xi32>
    %578 = arith.sitofp %577 : vector<16x1xi32> to vector<16x1xf32>
    %579 = vector.broadcast %574 : vector<1x16xf32> to vector<16x16xf32>
    %580 = vector.broadcast %578 : vector<16x1xf32> to vector<16x16xf32>
    %581 = arith.mulf %579, %580 : vector<16x16xf32>
    %582 = arith.addf %561, %581 : vector<16x16xf32>
    %583 = vector.extract_strided_slice %497 {offsets = [0, 4], sizes = [16, 1], strides = [1, 1]} : vector<16x16xf32> to vector<16x1xf32>
    %584 = vector.broadcast %583 : vector<16x1xf32> to vector<16x16xf32>
    %585 = arith.mulf %584, %582 : vector<16x16xf32>
    %cst_100 = arith.constant dense<0.000000e+00> : vector<16xf32>
    %586 = vector.multi_reduction <add>, %585, %cst_100 [0] : vector<16x16xf32> to vector<16xf32>
    %587 = vector.shape_cast %586 : vector<16xf32> to vector<1x16xf32>
    %c4_i32_101 = arith.constant 4 : i32
    %588 = vector.broadcast %c4_i32_101 : i32 to vector<1x16xi32>
    %589 = arith.cmpi eq, %10, %588 : vector<1x16xi32>
    %590 = arith.extui %589 : vector<1x16xi1> to vector<1x16xi32>
    %591 = arith.sitofp %590 : vector<1x16xi32> to vector<1x16xf32>
    %592 = arith.subf %591, %587 : vector<1x16xf32>
    %593 = vector.extract_strided_slice %497 {offsets = [4, 4], sizes = [1, 1], strides = [1, 1]} : vector<16x16xf32> to vector<1x1xf32>
    %594 = vector.broadcast %593 : vector<1x1xf32> to vector<1x16xf32>
    %595 = arith.divf %592, %594 : vector<1x16xf32>
    %c4_i32_102 = arith.constant 4 : i32
    %596 = vector.broadcast %c4_i32_102 : i32 to vector<16x1xi32>
    %597 = arith.cmpi eq, %11, %596 : vector<16x1xi32>
    %598 = arith.extui %597 : vector<16x1xi1> to vector<16x1xi32>
    %599 = arith.sitofp %598 : vector<16x1xi32> to vector<16x1xf32>
    %600 = vector.broadcast %595 : vector<1x16xf32> to vector<16x16xf32>
    %601 = vector.broadcast %599 : vector<16x1xf32> to vector<16x16xf32>
    %602 = arith.mulf %600, %601 : vector<16x16xf32>
    %603 = arith.addf %582, %602 : vector<16x16xf32>
    %604 = vector.extract_strided_slice %497 {offsets = [0, 5], sizes = [16, 1], strides = [1, 1]} : vector<16x16xf32> to vector<16x1xf32>
    %605 = vector.broadcast %604 : vector<16x1xf32> to vector<16x16xf32>
    %606 = arith.mulf %605, %603 : vector<16x16xf32>
    %cst_103 = arith.constant dense<0.000000e+00> : vector<16xf32>
    %607 = vector.multi_reduction <add>, %606, %cst_103 [0] : vector<16x16xf32> to vector<16xf32>
    %608 = vector.shape_cast %607 : vector<16xf32> to vector<1x16xf32>
    %c5_i32_104 = arith.constant 5 : i32
    %609 = vector.broadcast %c5_i32_104 : i32 to vector<1x16xi32>
    %610 = arith.cmpi eq, %10, %609 : vector<1x16xi32>
    %611 = arith.extui %610 : vector<1x16xi1> to vector<1x16xi32>
    %612 = arith.sitofp %611 : vector<1x16xi32> to vector<1x16xf32>
    %613 = arith.subf %612, %608 : vector<1x16xf32>
    %614 = vector.extract_strided_slice %497 {offsets = [5, 5], sizes = [1, 1], strides = [1, 1]} : vector<16x16xf32> to vector<1x1xf32>
    %615 = vector.broadcast %614 : vector<1x1xf32> to vector<1x16xf32>
    %616 = arith.divf %613, %615 : vector<1x16xf32>
    %c5_i32_105 = arith.constant 5 : i32
    %617 = vector.broadcast %c5_i32_105 : i32 to vector<16x1xi32>
    %618 = arith.cmpi eq, %11, %617 : vector<16x1xi32>
    %619 = arith.extui %618 : vector<16x1xi1> to vector<16x1xi32>
    %620 = arith.sitofp %619 : vector<16x1xi32> to vector<16x1xf32>
    %621 = vector.broadcast %616 : vector<1x16xf32> to vector<16x16xf32>
    %622 = vector.broadcast %620 : vector<16x1xf32> to vector<16x16xf32>
    %623 = arith.mulf %621, %622 : vector<16x16xf32>
    %624 = arith.addf %603, %623 : vector<16x16xf32>
    %625 = vector.extract_strided_slice %497 {offsets = [0, 6], sizes = [16, 1], strides = [1, 1]} : vector<16x16xf32> to vector<16x1xf32>
    %626 = vector.broadcast %625 : vector<16x1xf32> to vector<16x16xf32>
    %627 = arith.mulf %626, %624 : vector<16x16xf32>
    %cst_106 = arith.constant dense<0.000000e+00> : vector<16xf32>
    %628 = vector.multi_reduction <add>, %627, %cst_106 [0] : vector<16x16xf32> to vector<16xf32>
    %629 = vector.shape_cast %628 : vector<16xf32> to vector<1x16xf32>
    %c6_i32_107 = arith.constant 6 : i32
    %630 = vector.broadcast %c6_i32_107 : i32 to vector<1x16xi32>
    %631 = arith.cmpi eq, %10, %630 : vector<1x16xi32>
    %632 = arith.extui %631 : vector<1x16xi1> to vector<1x16xi32>
    %633 = arith.sitofp %632 : vector<1x16xi32> to vector<1x16xf32>
    %634 = arith.subf %633, %629 : vector<1x16xf32>
    %635 = vector.extract_strided_slice %497 {offsets = [6, 6], sizes = [1, 1], strides = [1, 1]} : vector<16x16xf32> to vector<1x1xf32>
    %636 = vector.broadcast %635 : vector<1x1xf32> to vector<1x16xf32>
    %637 = arith.divf %634, %636 : vector<1x16xf32>
    %c6_i32_108 = arith.constant 6 : i32
    %638 = vector.broadcast %c6_i32_108 : i32 to vector<16x1xi32>
    %639 = arith.cmpi eq, %11, %638 : vector<16x1xi32>
    %640 = arith.extui %639 : vector<16x1xi1> to vector<16x1xi32>
    %641 = arith.sitofp %640 : vector<16x1xi32> to vector<16x1xf32>
    %642 = vector.broadcast %637 : vector<1x16xf32> to vector<16x16xf32>
    %643 = vector.broadcast %641 : vector<16x1xf32> to vector<16x16xf32>
    %644 = arith.mulf %642, %643 : vector<16x16xf32>
    %645 = arith.addf %624, %644 : vector<16x16xf32>
    %646 = vector.extract_strided_slice %497 {offsets = [0, 7], sizes = [16, 1], strides = [1, 1]} : vector<16x16xf32> to vector<16x1xf32>
    %647 = vector.broadcast %646 : vector<16x1xf32> to vector<16x16xf32>
    %648 = arith.mulf %647, %645 : vector<16x16xf32>
    %cst_109 = arith.constant dense<0.000000e+00> : vector<16xf32>
    %649 = vector.multi_reduction <add>, %648, %cst_109 [0] : vector<16x16xf32> to vector<16xf32>
    %650 = vector.shape_cast %649 : vector<16xf32> to vector<1x16xf32>
    %c7_i32_110 = arith.constant 7 : i32
    %651 = vector.broadcast %c7_i32_110 : i32 to vector<1x16xi32>
    %652 = arith.cmpi eq, %10, %651 : vector<1x16xi32>
    %653 = arith.extui %652 : vector<1x16xi1> to vector<1x16xi32>
    %654 = arith.sitofp %653 : vector<1x16xi32> to vector<1x16xf32>
    %655 = arith.subf %654, %650 : vector<1x16xf32>
    %656 = vector.extract_strided_slice %497 {offsets = [7, 7], sizes = [1, 1], strides = [1, 1]} : vector<16x16xf32> to vector<1x1xf32>
    %657 = vector.broadcast %656 : vector<1x1xf32> to vector<1x16xf32>
    %658 = arith.divf %655, %657 : vector<1x16xf32>
    %c7_i32_111 = arith.constant 7 : i32
    %659 = vector.broadcast %c7_i32_111 : i32 to vector<16x1xi32>
    %660 = arith.cmpi eq, %11, %659 : vector<16x1xi32>
    %661 = arith.extui %660 : vector<16x1xi1> to vector<16x1xi32>
    %662 = arith.sitofp %661 : vector<16x1xi32> to vector<16x1xf32>
    %663 = vector.broadcast %658 : vector<1x16xf32> to vector<16x16xf32>
    %664 = vector.broadcast %662 : vector<16x1xf32> to vector<16x16xf32>
    %665 = arith.mulf %663, %664 : vector<16x16xf32>
    %666 = arith.addf %645, %665 : vector<16x16xf32>
    %667 = vector.extract_strided_slice %497 {offsets = [0, 8], sizes = [16, 1], strides = [1, 1]} : vector<16x16xf32> to vector<16x1xf32>
    %668 = vector.broadcast %667 : vector<16x1xf32> to vector<16x16xf32>
    %669 = arith.mulf %668, %666 : vector<16x16xf32>
    %cst_112 = arith.constant dense<0.000000e+00> : vector<16xf32>
    %670 = vector.multi_reduction <add>, %669, %cst_112 [0] : vector<16x16xf32> to vector<16xf32>
    %671 = vector.shape_cast %670 : vector<16xf32> to vector<1x16xf32>
    %c8_i32_113 = arith.constant 8 : i32
    %672 = vector.broadcast %c8_i32_113 : i32 to vector<1x16xi32>
    %673 = arith.cmpi eq, %10, %672 : vector<1x16xi32>
    %674 = arith.extui %673 : vector<1x16xi1> to vector<1x16xi32>
    %675 = arith.sitofp %674 : vector<1x16xi32> to vector<1x16xf32>
    %676 = arith.subf %675, %671 : vector<1x16xf32>
    %677 = vector.extract_strided_slice %497 {offsets = [8, 8], sizes = [1, 1], strides = [1, 1]} : vector<16x16xf32> to vector<1x1xf32>
    %678 = vector.broadcast %677 : vector<1x1xf32> to vector<1x16xf32>
    %679 = arith.divf %676, %678 : vector<1x16xf32>
    %c8_i32_114 = arith.constant 8 : i32
    %680 = vector.broadcast %c8_i32_114 : i32 to vector<16x1xi32>
    %681 = arith.cmpi eq, %11, %680 : vector<16x1xi32>
    %682 = arith.extui %681 : vector<16x1xi1> to vector<16x1xi32>
    %683 = arith.sitofp %682 : vector<16x1xi32> to vector<16x1xf32>
    %684 = vector.broadcast %679 : vector<1x16xf32> to vector<16x16xf32>
    %685 = vector.broadcast %683 : vector<16x1xf32> to vector<16x16xf32>
    %686 = arith.mulf %684, %685 : vector<16x16xf32>
    %687 = arith.addf %666, %686 : vector<16x16xf32>
    %688 = vector.extract_strided_slice %497 {offsets = [0, 9], sizes = [16, 1], strides = [1, 1]} : vector<16x16xf32> to vector<16x1xf32>
    %689 = vector.broadcast %688 : vector<16x1xf32> to vector<16x16xf32>
    %690 = arith.mulf %689, %687 : vector<16x16xf32>
    %cst_115 = arith.constant dense<0.000000e+00> : vector<16xf32>
    %691 = vector.multi_reduction <add>, %690, %cst_115 [0] : vector<16x16xf32> to vector<16xf32>
    %692 = vector.shape_cast %691 : vector<16xf32> to vector<1x16xf32>
    %c9_i32_116 = arith.constant 9 : i32
    %693 = vector.broadcast %c9_i32_116 : i32 to vector<1x16xi32>
    %694 = arith.cmpi eq, %10, %693 : vector<1x16xi32>
    %695 = arith.extui %694 : vector<1x16xi1> to vector<1x16xi32>
    %696 = arith.sitofp %695 : vector<1x16xi32> to vector<1x16xf32>
    %697 = arith.subf %696, %692 : vector<1x16xf32>
    %698 = vector.extract_strided_slice %497 {offsets = [9, 9], sizes = [1, 1], strides = [1, 1]} : vector<16x16xf32> to vector<1x1xf32>
    %699 = vector.broadcast %698 : vector<1x1xf32> to vector<1x16xf32>
    %700 = arith.divf %697, %699 : vector<1x16xf32>
    %c9_i32_117 = arith.constant 9 : i32
    %701 = vector.broadcast %c9_i32_117 : i32 to vector<16x1xi32>
    %702 = arith.cmpi eq, %11, %701 : vector<16x1xi32>
    %703 = arith.extui %702 : vector<16x1xi1> to vector<16x1xi32>
    %704 = arith.sitofp %703 : vector<16x1xi32> to vector<16x1xf32>
    %705 = vector.broadcast %700 : vector<1x16xf32> to vector<16x16xf32>
    %706 = vector.broadcast %704 : vector<16x1xf32> to vector<16x16xf32>
    %707 = arith.mulf %705, %706 : vector<16x16xf32>
    %708 = arith.addf %687, %707 : vector<16x16xf32>
    %709 = vector.extract_strided_slice %497 {offsets = [0, 10], sizes = [16, 1], strides = [1, 1]} : vector<16x16xf32> to vector<16x1xf32>
    %710 = vector.broadcast %709 : vector<16x1xf32> to vector<16x16xf32>
    %711 = arith.mulf %710, %708 : vector<16x16xf32>
    %cst_118 = arith.constant dense<0.000000e+00> : vector<16xf32>
    %712 = vector.multi_reduction <add>, %711, %cst_118 [0] : vector<16x16xf32> to vector<16xf32>
    %713 = vector.shape_cast %712 : vector<16xf32> to vector<1x16xf32>
    %c10_i32_119 = arith.constant 10 : i32
    %714 = vector.broadcast %c10_i32_119 : i32 to vector<1x16xi32>
    %715 = arith.cmpi eq, %10, %714 : vector<1x16xi32>
    %716 = arith.extui %715 : vector<1x16xi1> to vector<1x16xi32>
    %717 = arith.sitofp %716 : vector<1x16xi32> to vector<1x16xf32>
    %718 = arith.subf %717, %713 : vector<1x16xf32>
    %719 = vector.extract_strided_slice %497 {offsets = [10, 10], sizes = [1, 1], strides = [1, 1]} : vector<16x16xf32> to vector<1x1xf32>
    %720 = vector.broadcast %719 : vector<1x1xf32> to vector<1x16xf32>
    %721 = arith.divf %718, %720 : vector<1x16xf32>
    %c10_i32_120 = arith.constant 10 : i32
    %722 = vector.broadcast %c10_i32_120 : i32 to vector<16x1xi32>
    %723 = arith.cmpi eq, %11, %722 : vector<16x1xi32>
    %724 = arith.extui %723 : vector<16x1xi1> to vector<16x1xi32>
    %725 = arith.sitofp %724 : vector<16x1xi32> to vector<16x1xf32>
    %726 = vector.broadcast %721 : vector<1x16xf32> to vector<16x16xf32>
    %727 = vector.broadcast %725 : vector<16x1xf32> to vector<16x16xf32>
    %728 = arith.mulf %726, %727 : vector<16x16xf32>
    %729 = arith.addf %708, %728 : vector<16x16xf32>
    %730 = vector.extract_strided_slice %497 {offsets = [0, 11], sizes = [16, 1], strides = [1, 1]} : vector<16x16xf32> to vector<16x1xf32>
    %731 = vector.broadcast %730 : vector<16x1xf32> to vector<16x16xf32>
    %732 = arith.mulf %731, %729 : vector<16x16xf32>
    %cst_121 = arith.constant dense<0.000000e+00> : vector<16xf32>
    %733 = vector.multi_reduction <add>, %732, %cst_121 [0] : vector<16x16xf32> to vector<16xf32>
    %734 = vector.shape_cast %733 : vector<16xf32> to vector<1x16xf32>
    %c11_i32_122 = arith.constant 11 : i32
    %735 = vector.broadcast %c11_i32_122 : i32 to vector<1x16xi32>
    %736 = arith.cmpi eq, %10, %735 : vector<1x16xi32>
    %737 = arith.extui %736 : vector<1x16xi1> to vector<1x16xi32>
    %738 = arith.sitofp %737 : vector<1x16xi32> to vector<1x16xf32>
    %739 = arith.subf %738, %734 : vector<1x16xf32>
    %740 = vector.extract_strided_slice %497 {offsets = [11, 11], sizes = [1, 1], strides = [1, 1]} : vector<16x16xf32> to vector<1x1xf32>
    %741 = vector.broadcast %740 : vector<1x1xf32> to vector<1x16xf32>
    %742 = arith.divf %739, %741 : vector<1x16xf32>
    %c11_i32_123 = arith.constant 11 : i32
    %743 = vector.broadcast %c11_i32_123 : i32 to vector<16x1xi32>
    %744 = arith.cmpi eq, %11, %743 : vector<16x1xi32>
    %745 = arith.extui %744 : vector<16x1xi1> to vector<16x1xi32>
    %746 = arith.sitofp %745 : vector<16x1xi32> to vector<16x1xf32>
    %747 = vector.broadcast %742 : vector<1x16xf32> to vector<16x16xf32>
    %748 = vector.broadcast %746 : vector<16x1xf32> to vector<16x16xf32>
    %749 = arith.mulf %747, %748 : vector<16x16xf32>
    %750 = arith.addf %729, %749 : vector<16x16xf32>
    %751 = vector.extract_strided_slice %497 {offsets = [0, 12], sizes = [16, 1], strides = [1, 1]} : vector<16x16xf32> to vector<16x1xf32>
    %752 = vector.broadcast %751 : vector<16x1xf32> to vector<16x16xf32>
    %753 = arith.mulf %752, %750 : vector<16x16xf32>
    %cst_124 = arith.constant dense<0.000000e+00> : vector<16xf32>
    %754 = vector.multi_reduction <add>, %753, %cst_124 [0] : vector<16x16xf32> to vector<16xf32>
    %755 = vector.shape_cast %754 : vector<16xf32> to vector<1x16xf32>
    %c12_i32_125 = arith.constant 12 : i32
    %756 = vector.broadcast %c12_i32_125 : i32 to vector<1x16xi32>
    %757 = arith.cmpi eq, %10, %756 : vector<1x16xi32>
    %758 = arith.extui %757 : vector<1x16xi1> to vector<1x16xi32>
    %759 = arith.sitofp %758 : vector<1x16xi32> to vector<1x16xf32>
    %760 = arith.subf %759, %755 : vector<1x16xf32>
    %761 = vector.extract_strided_slice %497 {offsets = [12, 12], sizes = [1, 1], strides = [1, 1]} : vector<16x16xf32> to vector<1x1xf32>
    %762 = vector.broadcast %761 : vector<1x1xf32> to vector<1x16xf32>
    %763 = arith.divf %760, %762 : vector<1x16xf32>
    %c12_i32_126 = arith.constant 12 : i32
    %764 = vector.broadcast %c12_i32_126 : i32 to vector<16x1xi32>
    %765 = arith.cmpi eq, %11, %764 : vector<16x1xi32>
    %766 = arith.extui %765 : vector<16x1xi1> to vector<16x1xi32>
    %767 = arith.sitofp %766 : vector<16x1xi32> to vector<16x1xf32>
    %768 = vector.broadcast %763 : vector<1x16xf32> to vector<16x16xf32>
    %769 = vector.broadcast %767 : vector<16x1xf32> to vector<16x16xf32>
    %770 = arith.mulf %768, %769 : vector<16x16xf32>
    %771 = arith.addf %750, %770 : vector<16x16xf32>
    %772 = vector.extract_strided_slice %497 {offsets = [0, 13], sizes = [16, 1], strides = [1, 1]} : vector<16x16xf32> to vector<16x1xf32>
    %773 = vector.broadcast %772 : vector<16x1xf32> to vector<16x16xf32>
    %774 = arith.mulf %773, %771 : vector<16x16xf32>
    %cst_127 = arith.constant dense<0.000000e+00> : vector<16xf32>
    %775 = vector.multi_reduction <add>, %774, %cst_127 [0] : vector<16x16xf32> to vector<16xf32>
    %776 = vector.shape_cast %775 : vector<16xf32> to vector<1x16xf32>
    %c13_i32_128 = arith.constant 13 : i32
    %777 = vector.broadcast %c13_i32_128 : i32 to vector<1x16xi32>
    %778 = arith.cmpi eq, %10, %777 : vector<1x16xi32>
    %779 = arith.extui %778 : vector<1x16xi1> to vector<1x16xi32>
    %780 = arith.sitofp %779 : vector<1x16xi32> to vector<1x16xf32>
    %781 = arith.subf %780, %776 : vector<1x16xf32>
    %782 = vector.extract_strided_slice %497 {offsets = [13, 13], sizes = [1, 1], strides = [1, 1]} : vector<16x16xf32> to vector<1x1xf32>
    %783 = vector.broadcast %782 : vector<1x1xf32> to vector<1x16xf32>
    %784 = arith.divf %781, %783 : vector<1x16xf32>
    %c13_i32_129 = arith.constant 13 : i32
    %785 = vector.broadcast %c13_i32_129 : i32 to vector<16x1xi32>
    %786 = arith.cmpi eq, %11, %785 : vector<16x1xi32>
    %787 = arith.extui %786 : vector<16x1xi1> to vector<16x1xi32>
    %788 = arith.sitofp %787 : vector<16x1xi32> to vector<16x1xf32>
    %789 = vector.broadcast %784 : vector<1x16xf32> to vector<16x16xf32>
    %790 = vector.broadcast %788 : vector<16x1xf32> to vector<16x16xf32>
    %791 = arith.mulf %789, %790 : vector<16x16xf32>
    %792 = arith.addf %771, %791 : vector<16x16xf32>
    %793 = vector.extract_strided_slice %497 {offsets = [0, 14], sizes = [16, 1], strides = [1, 1]} : vector<16x16xf32> to vector<16x1xf32>
    %794 = vector.broadcast %793 : vector<16x1xf32> to vector<16x16xf32>
    %795 = arith.mulf %794, %792 : vector<16x16xf32>
    %cst_130 = arith.constant dense<0.000000e+00> : vector<16xf32>
    %796 = vector.multi_reduction <add>, %795, %cst_130 [0] : vector<16x16xf32> to vector<16xf32>
    %797 = vector.shape_cast %796 : vector<16xf32> to vector<1x16xf32>
    %c14_i32_131 = arith.constant 14 : i32
    %798 = vector.broadcast %c14_i32_131 : i32 to vector<1x16xi32>
    %799 = arith.cmpi eq, %10, %798 : vector<1x16xi32>
    %800 = arith.extui %799 : vector<1x16xi1> to vector<1x16xi32>
    %801 = arith.sitofp %800 : vector<1x16xi32> to vector<1x16xf32>
    %802 = arith.subf %801, %797 : vector<1x16xf32>
    %803 = vector.extract_strided_slice %497 {offsets = [14, 14], sizes = [1, 1], strides = [1, 1]} : vector<16x16xf32> to vector<1x1xf32>
    %804 = vector.broadcast %803 : vector<1x1xf32> to vector<1x16xf32>
    %805 = arith.divf %802, %804 : vector<1x16xf32>
    %c14_i32_132 = arith.constant 14 : i32
    %806 = vector.broadcast %c14_i32_132 : i32 to vector<16x1xi32>
    %807 = arith.cmpi eq, %11, %806 : vector<16x1xi32>
    %808 = arith.extui %807 : vector<16x1xi1> to vector<16x1xi32>
    %809 = arith.sitofp %808 : vector<16x1xi32> to vector<16x1xf32>
    %810 = vector.broadcast %805 : vector<1x16xf32> to vector<16x16xf32>
    %811 = vector.broadcast %809 : vector<16x1xf32> to vector<16x16xf32>
    %812 = arith.mulf %810, %811 : vector<16x16xf32>
    %813 = arith.addf %792, %812 : vector<16x16xf32>
    %814 = vector.extract_strided_slice %497 {offsets = [0, 15], sizes = [16, 1], strides = [1, 1]} : vector<16x16xf32> to vector<16x1xf32>
    %815 = vector.broadcast %814 : vector<16x1xf32> to vector<16x16xf32>
    %816 = arith.mulf %815, %813 : vector<16x16xf32>
    %cst_133 = arith.constant dense<0.000000e+00> : vector<16xf32>
    %817 = vector.multi_reduction <add>, %816, %cst_133 [0] : vector<16x16xf32> to vector<16xf32>
    %818 = vector.shape_cast %817 : vector<16xf32> to vector<1x16xf32>
    %c15_i32_134 = arith.constant 15 : i32
    %819 = vector.broadcast %c15_i32_134 : i32 to vector<1x16xi32>
    %820 = arith.cmpi eq, %10, %819 : vector<1x16xi32>
    %821 = arith.extui %820 : vector<1x16xi1> to vector<1x16xi32>
    %822 = arith.sitofp %821 : vector<1x16xi32> to vector<1x16xf32>
    %823 = arith.subf %822, %818 : vector<1x16xf32>
    %824 = vector.extract_strided_slice %497 {offsets = [15, 15], sizes = [1, 1], strides = [1, 1]} : vector<16x16xf32> to vector<1x1xf32>
    %825 = vector.broadcast %824 : vector<1x1xf32> to vector<1x16xf32>
    %826 = arith.divf %823, %825 : vector<1x16xf32>
    %c15_i32_135 = arith.constant 15 : i32
    %827 = vector.broadcast %c15_i32_135 : i32 to vector<16x1xi32>
    %828 = arith.cmpi eq, %11, %827 : vector<16x1xi32>
    %829 = arith.extui %828 : vector<16x1xi1> to vector<16x1xi32>
    %830 = arith.sitofp %829 : vector<16x1xi32> to vector<16x1xf32>
    %831 = vector.broadcast %826 : vector<1x16xf32> to vector<16x16xf32>
    %832 = vector.broadcast %830 : vector<16x1xf32> to vector<16x16xf32>
    %833 = arith.mulf %831, %832 : vector<16x16xf32>
    %834 = arith.addf %813, %833 : vector<16x16xf32>
    %cst_136 = arith.constant dense<0.000000e+00> : vector<32x16xf32>
    %835 = tpu.matmul %9, %834, %cst_136 {dimension_numbers = #tpu.dot_dimension_numbers<[1], [1], [0], [0], [0, 0, 1, 0], [], []>} : vector<32x16xf32>, vector<16x16xf32>, vector<32x16xf32> -> vector<32x16xf32>
    %836 = arith.mulf %2, %2 : vector<32x8xf32>
    %cst_137 = arith.constant dense<0.000000e+00> : vector<32xf32>
    %837 = vector.multi_reduction <add>, %836, %cst_137 [1] : vector<32x8xf32> to vector<32xf32>
    %838 = vector.shape_cast %837 : vector<32xf32> to vector<32x1xf32>
    %839 = math.sqrt %838 : vector<32x1xf32>
    %cst_138 = arith.constant 9.99999996E-13 : f32
    %840 = vector.broadcast %cst_138 : f32 to vector<32x1xf32>
    %841 = arith.maximumf %839, %840 : vector<32x1xf32>
    %842 = vector.broadcast %841 : vector<32x1xf32> to vector<32x8xf32>
    %843 = arith.divf %2, %842 : vector<32x8xf32>
    %844 = vector.extract_strided_slice %835 {offsets = [0, 8], sizes = [32, 8], strides = [1, 1]} : vector<32x16xf32> to vector<32x8xf32>
    %845 = arith.mulf %844, %844 : vector<32x8xf32>
    %cst_139 = arith.constant dense<0.000000e+00> : vector<32xf32>
    %846 = vector.multi_reduction <add>, %845, %cst_139 [1] : vector<32x8xf32> to vector<32xf32>
    %847 = vector.shape_cast %846 : vector<32xf32> to vector<32x1xf32>
    %848 = math.sqrt %847 : vector<32x1xf32>
    %cst_140 = arith.constant 9.99999996E-13 : f32
    %849 = vector.broadcast %cst_140 : f32 to vector<32x1xf32>
    %850 = arith.maximumf %848, %849 : vector<32x1xf32>
    %851 = vector.broadcast %850 : vector<32x1xf32> to vector<32x8xf32>
    %852 = arith.divf %844, %851 : vector<32x8xf32>
    %853 = arith.subf %843, %852 : vector<32x8xf32>
    %854 = arith.mulf %3, %3 : vector<32x8xf32>
    %cst_141 = arith.constant dense<0.000000e+00> : vector<32xf32>
    %855 = vector.multi_reduction <add>, %854, %cst_141 [1] : vector<32x8xf32> to vector<32xf32>
    %856 = vector.shape_cast %855 : vector<32xf32> to vector<32x1xf32>
    %857 = math.sqrt %856 : vector<32x1xf32>
    %cst_142 = arith.constant 9.99999996E-13 : f32
    %858 = vector.broadcast %cst_142 : f32 to vector<32x1xf32>
    %859 = arith.maximumf %857, %858 : vector<32x1xf32>
    %860 = vector.broadcast %859 : vector<32x1xf32> to vector<32x8xf32>
    %861 = arith.divf %3, %860 : vector<32x8xf32>
    %862 = vector.extract_strided_slice %835 {offsets = [0, 0], sizes = [32, 8], strides = [1, 1]} : vector<32x16xf32> to vector<32x8xf32>
    %863 = arith.mulf %862, %862 : vector<32x8xf32>
    %cst_143 = arith.constant dense<0.000000e+00> : vector<32xf32>
    %864 = vector.multi_reduction <add>, %863, %cst_143 [1] : vector<32x8xf32> to vector<32xf32>
    %865 = vector.shape_cast %864 : vector<32xf32> to vector<32x1xf32>
    %866 = math.sqrt %865 : vector<32x1xf32>
    %cst_144 = arith.constant 9.99999996E-13 : f32
    %867 = vector.broadcast %cst_144 : f32 to vector<32x1xf32>
    %868 = arith.maximumf %866, %867 : vector<32x1xf32>
    %869 = vector.broadcast %868 : vector<32x1xf32> to vector<32x8xf32>
    %870 = arith.divf %862, %869 : vector<32x8xf32>
    %871 = arith.subf %861, %870 : vector<32x8xf32>
    %872 = arith.mulf %853, %853 : vector<32x8xf32>
    %873 = vector.shape_cast %872 : vector<32x8xf32> to vector<1x32x8xf32>
    %cst_145 = arith.constant dense<0.000000e+00> : vector<1xf32>
    %874 = vector.multi_reduction <add>, %873, %cst_145 [1, 2] : vector<1x32x8xf32> to vector<1xf32>
    %875 = vector.shape_cast %874 : vector<1xf32> to vector<1x1x1xf32>
    %876 = vector.extract %875[0, 0, 0] : f32 from vector<1x1x1xf32>
    %cst_146 = arith.constant 2.560000e+02 : f32
    %877 = arith.divf %876, %cst_146 : f32
    %878 = arith.mulf %871, %871 : vector<32x8xf32>
    %879 = vector.shape_cast %878 : vector<32x8xf32> to vector<1x32x8xf32>
    %cst_147 = arith.constant dense<0.000000e+00> : vector<1xf32>
    %880 = vector.multi_reduction <add>, %879, %cst_147 [1, 2] : vector<1x32x8xf32> to vector<1xf32>
    %881 = vector.shape_cast %880 : vector<1xf32> to vector<1x1x1xf32>
    %882 = vector.extract %881[0, 0, 0] : f32 from vector<1x1x1xf32>
    %cst_148 = arith.constant 2.560000e+02 : f32
    %883 = arith.divf %882, %cst_148 : f32
    %884 = arith.addf %877, %883 : f32
    %cst_149 = arith.constant 5.000000e-01 : f32
    %885 = arith.mulf %cst_149, %884 : f32
    %886 = vector.broadcast %885 : f32 to vector<1x1x1xf32>
    %c0_150 = arith.constant 0 : index
    %c0_151 = arith.constant 0 : index
    %c0_152 = arith.constant 0 : index
    %887 = vector.load %arg2[%c0_150, %c0_151, %c0_152] : memref<1x1x1xf32, #tpu.memory_space<vmem>>, vector<1x1x1xf32>
    tpu.vector_store %arg2[%c0_150, %c0_151, %c0_152], %886 {strides = array<i32>} : memref<1x1x1xf32, #tpu.memory_space<vmem>>, vector<1x1x1xf32>,
    return
  }
  func.func @transform_0(%arg0: i32) -> (i32, i32, i32) {
    %c0_i32 = arith.constant 0 : i32
    %c0_i32_0 = arith.constant 0 : i32
    %c0_i32_1 = arith.constant 0 : i32
    return %arg0, %c0_i32, %c0_i32_0 : i32, i32, i32
  }
  func.func @transform_1(%arg0: i32) -> (i32, i32, i32) {
    %c0_i32 = arith.constant 0 : i32
    %c0_i32_0 = arith.constant 0 : i32
    %c0_i32_1 = arith.constant 0 : i32
    return %arg0, %c0_i32, %c0_i32_0 : i32, i32, i32
  }
}

</mosaic_0001>

<bundles_post_ra>
// kernel: forward.2
= control target key start
LH: loop header
LB: loop body
LE: loop exit
PB: predicated region body
PF: predicated region fallthrough
CT: control target
= control target key end

     0   :  { %s10270_s27 = smov 0   ;;  %s13196_s0 = inlined_call_operand.vmem [shape: bf16[8192,32], index: 0, kind: input, shape index: {}]   ;;  %s13197_s1 = inlined_call_operand.vmem [shape: bf16[64,4096], index: 1, kind: input, shape index: {}]   ;;  %s13198_s2 = inlined_call_operand.vmem [shape: bf16[32,16], index: 2, kind: input, shape index: {}]   ;;  %s13199_s3 = inlined_call_operand.vmem [shape: f32[1,16], index: 3, kind: input, shape index: {}]   ;;  %s13200_s4 = inlined_call_operand.vmem [shape: bf16[16,32], index: 4, kind: input, shape index: {}]   ;;  %s13201_s5 = inlined_call_operand.vmem [shape: f32[1,32], index: 5, kind: input, shape index: {}]   ;;  %s13202_s6 = inlined_call_operand.vmem [shape: bf16[32,8], index: 6, kind: input, shape index: {}]   ;;  %s13203_s7 = inlined_call_operand.vmem [shape: f32[1,8], index: 7, kind: input, shape index: {}]   ;;  %s13204_s8 = inlined_call_operand.vmem [shape: f32[128,8], index: 8, kind: output, shape index: {}]  }
   0x1 LB: > { %s7825_s28 = sadd.s32 4294967295, %s10223_s27   ;;  %p7829_p0 = scmp.ge.s32.totalorder %s10223_s27, 1  ;;  %s10223_s27 = sphi %s10270_s27, %s18_s27  }
   0x2   : > { %p263_p1 = scmp.lt.s32.totalorder %s10223_s27, 3 }
   0x4   : > { %p264_p2 = pnand %p7829_p0, %p263_p1 }
   0x6   : > { %267 = sbr.rel (%p264_p2) target bundleno = 1780 (0x6f4), region = 52 }
   0xb   : > { %v9951_v0 = vld [vmem:[%s13198_s2 + $0x8] sm:$0xff]   ;;  %s7830_s9 = sshll.u32 %s7825_s28, 9  ;;  %v9952_v1 = vld [vmem:[%s13198_s2] sm:$0xff]   ;;  %vm2125_vm0 = vcmask 261120   ;;  %vm7570_vm1 = vcmask 130048   ;;  %s7832_s19 = sshll.u32 %s7825_s28, 3 }
   0xc   : > { %p298_p3 = scmp.lt.s32.totalorder %s7830_s9, 1023  ;;  %9401 = vmatprep.subr.bf16.mxu0 %v9951_v0  ;;  %9939 = vmatprep.subr.bf16.mxu1 %v9951_v0  ;;  %p304_p4 = scmp.lt.s32.totalorder %s7832_s19, 15  ;;  %vm7760_vm2 = vcmask 64512  }
   0xd   : > { %9402 = vmatpush3.bf16.msra.mxu0 %v9951_v0  ;;  %9941 = vmatpush3.bf16.msra.mxu1 %v9951_v0 }
   0xe   : > { %s13350_s9 = smov (!%p298_p3, %s7830_s9), 1023  ;;  %9403 = vmatprep.subr.bf16.mxu0 %v9952_v1  ;;  %9940 = vmatprep.subr.bf16.mxu1 %v9952_v1  ;;  %s13352_s19 = smov (!%p304_p4, %s7832_s19), 15 }
   0xf   : > { %s7831_s12 = sshll.u32 %s13350_s9, 2  ;;  %s7833_s20 = sshll.u32 %s13352_s19, 3 }
  0x10   : > { %s10289_s15 = scalar_lea.vmem %s13196_s0, %s7831_s12 }
  0x11   : > { %9404 = vmatpush3.bf16.msra.mxu0 %v9952_v1  ;;  %v9953_v2 = vld [vmem:[%s10289_s15] sm:$0xff]   ;;  %9942 = vmatpush3.bf16.msra.mxu1 %v9952_v1  ;;  %v9954_v3 = vld [vmem:[%s10289_s15 + $0x8] sm:$0xff]   ;;  %v9955_v4 = vld [vmem:[%s10289_s15 + $0x10] sm:$0xff]  }
  0x12   : > { %9405 = vmatprep.mubr.msk.bf16.mxu0 %vm2125_vm0, %v9953_v2  ;;  %v9956_v5 = vld [vmem:[%s10289_s15 + $0x18] sm:$0xff]   ;;  %v9957_v6 = vld [vmem:[%s10289_s15 + $0x20] sm:$0xff]   ;;  %v9958_v7 = vld [vmem:[%s10289_s15 + $0x28] sm:$0xff]  }
  0x13   : > { %v9959_v8 = vld [vmem:[%s10289_s15 + $0x30] sm:$0xff]   ;;  %v9960_v9 = vld [vmem:[%s10289_s15 + $0x38] sm:$0xff]   ;;  %v9975_v10 = vld [vmem:[%s10289_s15 + $0x620] sm:$0xff]  }
  0x14   : > { %9406 = vmatmul.mubr.msk.bf16.vlgmr.msra.gmra.mxu0 %vm2125_vm0, %v9954_v3  ;;  %v9976_v11 = vld [vmem:[%s10289_s15 + $0x628] sm:$0xff]   ;;  %v9961_v12 = vld [vmem:[%s10289_s15 + $0x40] sm:$0xff]   ;;  %9797 = vmatprep.mubr.msk.bf16.mxu1 %vm2125_vm0, %v9975_v10  ;;  %v9979_v13 = vld [vmem:[%s10289_s15 + $0x630] sm:$0xff]  }
  0x15   : > { %9409 = vmatprep.mubr.msk.bf16.mxu0 %vm2125_vm0, %v9955_v4  ;;  %9798 = vmatmul.mubr.msk.bf16.vlgmr.msra.gmra.mxu1 %vm2125_vm0, %v9976_v11  ;;  %v9980_v14 = vld [vmem:[%s10289_s15 + $0x638] sm:$0xff]   ;;  %v9983_v15 = vld [vmem:[%s10289_s15 + $0x640] sm:$0xff]   ;;  %v9962_v16 = vld [vmem:[%s10289_s15 + $0x48] sm:$0xff]  }
  0x16   : > { %9801 = vmatprep.mubr.msk.bf16.mxu1 %vm2125_vm0, %v9979_v13  ;;  %v9963_v17 = vld [vmem:[%s10289_s15 + $0x50] sm:$0xff]   ;;  %v9984_v18 = vld [vmem:[%s10289_s15 + $0x648] sm:$0xff]   ;;  %v9964_v20 = vld [vmem:[%s10289_s15 + $0x58] sm:$0xff]  }
  0x17   : > { %v9987_v19 = vld [vmem:[%s10289_s15 + $0x650] sm:$0xff]   ;;  %v9965_v21 = vld [vmem:[%s10289_s15 + $0x60] sm:$0xff]   ;;  %v9988_v22 = vld [vmem:[%s10289_s15 + $0x658] sm:$0xff]  }
  0x18   : > { %v9991_v23 = vld [vmem:[%s10289_s15 + $0x660] sm:$0xff]   ;;  %v9966_v24 = vld [vmem:[%s10289_s15 + $0x68] sm:$0xff]   ;;  %v9967_v25 = vld [vmem:[%s10289_s15 + $0x70] sm:$0xff]  }
  0x19   : > { %v9992_v26 = vld [vmem:[%s10289_s15 + $0x668] sm:$0xff]   ;;  %v9995_v27 = vld [vmem:[%s10289_s15 + $0x670] sm:$0xff]   ;;  %v9968_v28 = vld [vmem:[%s10289_s15 + $0x78] sm:$0xff]  }
  0x1a   : > { %v9969_v29 = vld [vmem:[%s10289_s15 + $0x80] sm:$0xff]   ;;  %v9996_v30 = vld [vmem:[%s10289_s15 + $0x678] sm:$0xff]   ;;  %v9970_v32 = vld [vmem:[%s10289_s15 + $0x88] sm:$0xff]  }
  0x1b   : > { %v9999_v31 = vld [vmem:[%s10289_s15 + $0x680] sm:$0xff]   ;;  %v9971_v33 = vld [vmem:[%s10289_s15 + $0x90] sm:$0xff]   ;;  %v10000_v34 = vld [vmem:[%s10289_s15 + $0x688] sm:$0xff]  }
  0x1c   : > { %9410 = vmatmul.mubr.msk.bf16.gmra.mxu0 %vm2125_vm0, %v9956_v5  ;;  %v10003_v35 = vld [vmem:[%s10289_s15 + $0x690] sm:$0xff]   ;;  %v9972_v36 = vld [vmem:[%s10289_s15 + $0x98] sm:$0xff]   ;;  %v9973_v37 = vld [vmem:[%s10289_s15 + $0xa0] sm:$0xff]  }
  0x1d   : > { %9413 = vmatprep.mubr.msk.bf16.mxu0 %vm2125_vm0, %v9957_v6  ;;  %9802 = vmatmul.mubr.msk.bf16.gmra.mxu1 %vm2125_vm0, %v9980_v14  ;;  %v10004_v38 = vld [vmem:[%s10289_s15 + $0x698] sm:$0xff]   ;;  %v10007_v39 = vld [vmem:[%s10289_s15 + $0x6a0] sm:$0xff]   ;;  %v9974_v40 = vld [vmem:[%s10289_s15 + $0xa8] sm:$0xff]  }
  0x1e   : > { %9805 = vmatprep.mubr.msk.bf16.mxu1 %vm2125_vm0, %v9983_v15  ;;  %v9977_v41 = vld [vmem:[%s10289_s15 + $0xb0] sm:$0xff]   ;;  %v10008_v42 = vld [vmem:[%s10289_s15 + $0x6a8] sm:$0xff]   ;;  %v9978_v44 = vld [vmem:[%s10289_s15 + $0xb8] sm:$0xff]  }
  0x1f   : > { %v10011_v43 = vld [vmem:[%s10289_s15 + $0x6b0] sm:$0xff]   ;;  %v9981_v45 = vld [vmem:[%s10289_s15 + $0xc0] sm:$0xff]   ;;  %v10012_v46 = vld [vmem:[%s10289_s15 + $0x6b8] sm:$0xff]  }
  0x20   : > { %v9982_v47 = vld [vmem:[%s10289_s15 + $0xc8] sm:$0xff]   ;;  %v10015_v48 = vld [vmem:[%s10289_s15 + $0x6c0] sm:$0xff]   ;;  %v9985_v49 = vld [vmem:[%s10289_s15 + $0xd0] sm:$0xff]  }
  0x21   : > { %v10016_v50 = vld [vmem:[%s10289_s15 + $0x6c8] sm:$0xff]   ;;  %v9986_v51 = vld [vmem:[%s10289_s15 + $0xd8] sm:$0xff]   ;;  %v10019_v52 = vld [vmem:[%s10289_s15 + $0x6d0] sm:$0xff]  }
  0x22   : > { %v9989_v53 = vld [vmem:[%s10289_s15 + $0xe0] sm:$0xff]   ;;  %v10020_v54 = vld [vmem:[%s10289_s15 + $0x6d8] sm:$0xff]   ;;  %v9990_v55 = vld [vmem:[%s10289_s15 + $0xe8] sm:$0xff]  }
  0x23   : > { %v10023_v56 = vld [vmem:[%s10289_s15 + $0x6e0] sm:$0xff]   ;;  %v9993_v57 = vld [vmem:[%s10289_s15 + $0xf0] sm:$0xff]   ;;  %v10024_v58 = vld [vmem:[%s10289_s15 + $0x6e8] sm:$0xff]  }
  0x24   : > { %9414 = vmatmul.mubr.msk.bf16.gmra.mxu0 %vm2125_vm0, %v9958_v7  ;;  %v9994_v59 = vld [vmem:[%s10289_s15 + $0xf8] sm:$0xff]   ;;  %v10027_v60 = vld [vmem:[%s10289_s15 + $0x6f0] sm:$0xff]   ;;  %v9997_v61 = vld [vmem:[%s10289_s15 + $0x100] sm:$0xff]  }
  0x25   : > { %9417 = vmatprep.mubr.msk.bf16.mxu0 %vm2125_vm0, %v9959_v8  ;;  %9806 = vmatmul.mubr.msk.bf16.gmra.mxu1 %vm2125_vm0, %v9984_v18  ;;  %v10028_v62 = vld [vmem:[%s10289_s15 + $0x6f8] sm:$0xff]   ;;  %v9998_v63 = vld [vmem:[%s10289_s15 + $0x108] sm:$0xff]   ;;  %v10031_v0 = vld [vmem:[%s10289_s15 + $0x700] sm:$0xff]  }
  0x26   : > { %9809 = vmatprep.mubr.msk.bf16.mxu1 %vm2125_vm0, %v9987_v19  ;;  %v10001_v1 = vld [vmem:[%s10289_s15 + $0x110] sm:$0xff]   ;;  %v10032_v2 = vld [vmem:[%s10289_s15 + $0x708] sm:$0xff]   ;;  %v10002_v3 = vld [vmem:[%s10289_s15 + $0x118] sm:$0xff]  }
  0x27   : > { %v10035_v4 = vld [vmem:[%s10289_s15 + $0x710] sm:$0xff]   ;;  %v10005_v5 = vld [vmem:[%s10289_s15 + $0x120] sm:$0xff]   ;;  %v10036_v6 = vld [vmem:[%s10289_s15 + $0x718] sm:$0xff]  }
  0x28   : > { %v10006_v7 = vld [vmem:[%s10289_s15 + $0x128] sm:$0xff]   ;;  %v10039_v8 = vld [vmem:[%s10289_s15 + $0x720] sm:$0xff]   ;;  %v10010_v11 = vld [vmem:[%s10289_s15 + $0x138] sm:$0xff]  }
  0x29   : > { %v10040_v10 = vld [vmem:[%s10289_s15 + $0x728] sm:$0xff]   ;;  %v10013_v13 = vld [vmem:[%s10289_s15 + $0x140] sm:$0xff]   ;;  %v10044_v14 = vld [vmem:[%s10289_s15 + $0x738] sm:$0xff]  }
  0x2a   : > { %v10014_v15 = vld [vmem:[%s10289_s15 + $0x148] sm:$0xff]   ;;  %v10018_v19 = vld [vmem:[%s10289_s15 + $0x158] sm:$0xff]  }
  0x2b   : > { %v10048_v18 = vld [vmem:[%s10289_s15 + $0x748] sm:$0xff]  }
  0x2c   : > { %9418 = vmatmul.mubr.msk.bf16.gmra.mxu0 %vm2125_vm0, %v9960_v9  ;;  %v10009_v9 = vld [vmem:[%s10289_s15 + $0x130] sm:$0xff]  }
  0x2d   : > { %9421 = vmatprep.mubr.msk.bf16.mxu0 %vm2125_vm0, %v9961_v12  ;;  %9810 = vmatmul.mubr.msk.bf16.gmra.mxu1 %vm2125_vm0, %v9988_v22  ;;  %v10043_v12 = vld [vmem:[%s10289_s15 + $0x730] sm:$0xff]   ;;  %v10052_v22 = vld [vmem:[%s10289_s15 + $0x758] sm:$0xff]  }
  0x2e   : > { %9813 = vmatprep.mubr.msk.bf16.mxu1 %vm2125_vm0, %v9991_v23  ;;  %v10022_v23 = vld [vmem:[%s10289_s15 + $0x168] sm:$0xff]  }
  0x34   : > { %9422 = vmatmul.mubr.msk.bf16.gmra.mxu0 %vm2125_vm0, %v9962_v16  ;;  %v10047_v16 = vld [vmem:[%s10289_s15 + $0x740] sm:$0xff]  }
  0x35   : > { %9425 = vmatprep.mubr.msk.bf16.mxu0 %vm2125_vm0, %v9963_v17  ;;  %9814 = vmatmul.mubr.msk.bf16.gmra.mxu1 %vm2125_vm0, %v9992_v26  ;;  %v10017_v17 = vld [vmem:[%s10289_s15 + $0x150] sm:$0xff]   ;;  %v10056_v26 = vld [vmem:[%s10289_s15 + $0x768] sm:$0xff]  }
  0x36   : > { %9817 = vmatprep.mubr.msk.bf16.mxu1 %vm2125_vm0, %v9995_v27  ;;  %v10026_v27 = vld [vmem:[%s10289_s15 + $0x178] sm:$0xff]  }
  0x3c   : > { %9426 = vmatmul.mubr.msk.bf16.gmra.mxu0 %vm2125_vm0, %v9964_v20  ;;  %v10051_v20 = vld [vmem:[%s10289_s15 + $0x750] sm:$0xff]  }
  0x3d   : > { %9429 = vmatprep.mubr.msk.bf16.mxu0 %vm2125_vm0, %v9965_v21  ;;  %9818 = vmatmul.mubr.msk.bf16.gmra.mxu1 %vm2125_vm0, %v9996_v30  ;;  %v10021_v21 = vld [vmem:[%s10289_s15 + $0x160] sm:$0xff]   ;;  %v10060_v30 = vld [vmem:[%s10289_s15 + $0x778] sm:$0xff]  }
  0x3e   : > { %9821 = vmatprep.mubr.msk.bf16.mxu1 %vm2125_vm0, %v9999_v31  ;;  %v10030_v31 = vld [vmem:[%s10289_s15 + $0x188] sm:$0xff]  }
  0x44   : > { %9430 = vmatmul.mubr.msk.bf16.gmra.mxu0 %vm2125_vm0, %v9966_v24  ;;  %v10055_v24 = vld [vmem:[%s10289_s15 + $0x760] sm:$0xff]  }
  0x45   : > { %9433 = vmatprep.mubr.msk.bf16.mxu0 %vm2125_vm0, %v9967_v25  ;;  %9822 = vmatmul.mubr.msk.bf16.gmra.mxu1 %vm2125_vm0, %v10000_v34  ;;  %v10025_v25 = vld [vmem:[%s10289_s15 + $0x170] sm:$0xff]  }
  0x46   : > { %9825 = vmatprep.mubr.msk.bf16.mxu1 %vm2125_vm0, %v10003_v35  ;;  %v10484_v35 = vld [vmem:[%s13199_s3] ss:$0 sm:$0xff] }
  0x4c   : > { %9434 = vmatmul.mubr.msk.bf16.gmra.mxu0 %vm2125_vm0, %v9968_v28  ;;  %v10059_v28 = vld [vmem:[%s10289_s15 + $0x770] sm:$0xff]  }
  0x4d   : > { %9437 = vmatprep.mubr.msk.bf16.mxu0 %vm2125_vm0, %v9969_v29  ;;  %9826 = vmatmul.mubr.msk.bf16.gmra.mxu1 %vm2125_vm0, %v10004_v38  ;;  %v10029_v29 = vld [vmem:[%s10289_s15 + $0x180] sm:$0xff]   ;;  %v10034_v38 = vld [vmem:[%s10289_s15 + $0x198] sm:$0xff]  }
  0x4e   : > { %9829 = vmatprep.mubr.msk.bf16.mxu1 %vm2125_vm0, %v10007_v39 }
  0x54   : > { %9438 = vmatmul.mubr.msk.bf16.gmra.mxu0 %vm2125_vm0, %v9970_v32  ;;  %v10063_v32 = vld [vmem:[%s10289_s15 + $0x780] sm:$0xff]  }
  0x55   : > { %9441 = vmatprep.mubr.msk.bf16.mxu0 %vm2125_vm0, %v9971_v33  ;;  %9830 = vmatmul.mubr.msk.bf16.gmra.mxu1 %vm2125_vm0, %v10008_v42  ;;  %v10033_v33 = vld [vmem:[%s10289_s15 + $0x190] sm:$0xff]  }
  0x56   : > { %9833 = vmatprep.mubr.msk.bf16.mxu1 %vm2125_vm0, %v10011_v43 }
  0x5c   : > { %9442 = vmatmul.mubr.msk.bf16.gmra.mxu0 %vm2125_vm0, %v9972_v36  ;;  %v10064_v36 = vld [vmem:[%s10289_s15 + $0x788] sm:$0xff]  }
  0x5d   : > { %9445 = vmatprep.mubr.msk.bf16.mxu0 %vm2125_vm0, %v9973_v37  ;;  %9834 = vmatmul.mubr.msk.bf16.gmra.mxu1 %vm2125_vm0, %v10012_v46 }
  0x5e   : > { %9837 = vmatprep.mubr.msk.bf16.mxu1 %vm2125_vm0, %v10015_v48 }
  0x64   : > { %9446 = vmatmul.mubr.msk.bf16.gmra.mxu0 %vm2125_vm0, %v9974_v40  ;;  %v10067_v40 = vld [vmem:[%s10289_s15 + $0x790] sm:$0xff]  }
  0x65   : > { %9449 = vmatprep.mubr.msk.bf16.mxu0 %vm2125_vm0, %v9977_v41  ;;  %9838 = vmatmul.mubr.msk.bf16.gmra.mxu1 %vm2125_vm0, %v10016_v50  ;;  %v10068_v50 = vld [vmem:[%s10289_s15 + $0x798] sm:$0xff]  }
  0x66   : > { %9841 = vmatprep.mubr.msk.bf16.mxu1 %vm2125_vm0, %v10019_v52 }
  0x6c   : > { %9450 = vmatmul.mubr.msk.bf16.gmra.mxu0 %vm2125_vm0, %v9978_v44  ;;  %v10037_v44 = vld [vmem:[%s10289_s15 + $0x1a0] sm:$0xff]  }
  0x6d   : > { %9453 = vmatprep.mubr.msk.bf16.mxu0 %vm2125_vm0, %v9981_v45  ;;  %9842 = vmatmul.mubr.msk.bf16.gmra.mxu1 %vm2125_vm0, %v10020_v54 }
  0x6e   : > { %9845 = vmatprep.mubr.msk.bf16.mxu1 %vm2125_vm0, %v10023_v56 }
  0x74   : > { %9454 = vmatmul.mubr.msk.bf16.gmra.mxu0 %vm2125_vm0, %v9982_v47 }
  0x75   : > { %9457 = vmatprep.mubr.msk.bf16.mxu0 %vm2125_vm0, %v9985_v49  ;;  %9846 = vmatmul.mubr.msk.bf16.gmra.mxu1 %vm2125_vm0, %v10024_v58  ;;  %v10071_v58 = vld [vmem:[%s10289_s15 + $0x7a0] sm:$0xff]  }
  0x76   : > { %9849 = vmatprep.mubr.msk.bf16.mxu1 %vm2125_vm0, %v10027_v60 }
  0x7c   : > { %9458 = vmatmul.mubr.msk.bf16.gmra.mxu0 %vm2125_vm0, %v9986_v51 }
  0x7d   : > { %9461 = vmatprep.mubr.msk.bf16.mxu0 %vm2125_vm0, %v9989_v53  ;;  %9850 = vmatmul.mubr.msk.bf16.gmra.mxu1 %vm2125_vm0, %v10028_v62  ;;  %v10041_v62 = vld [vmem:[%s10289_s15 + $0x1b0] sm:$0xff]  }
  0x7e   : > { %9853 = vmatprep.mubr.msk.bf16.mxu1 %vm2125_vm0, %v10031_v0 }
  0x84   : > { %9462 = vmatmul.mubr.msk.bf16.gmra.mxu0 %vm2125_vm0, %v9990_v55  ;;  %v10038_v55 = vld [vmem:[%s10289_s15 + $0x1a8] sm:$0xff]  }
  0x85   : > { %9465 = vmatprep.mubr.msk.bf16.mxu0 %vm2125_vm0, %v9993_v57  ;;  %9854 = vmatmul.mubr.msk.bf16.gmra.mxu1 %vm2125_vm0, %v10032_v2 }
  0x86   : > { %9857 = vmatprep.mubr.msk.bf16.mxu1 %vm2125_vm0, %v10035_v4  ;;  %v10072_v4 = vld [vmem:[%s10289_s15 + $0x7a8] sm:$0xff]  }
  0x8c   : > { %9466 = vmatmul.mubr.msk.bf16.gmra.mxu0 %vm2125_vm0, %v9994_v59 }
  0x8d   : > { %9469 = vmatprep.mubr.msk.bf16.mxu0 %vm2125_vm0, %v9997_v61  ;;  %9858 = vmatmul.mubr.msk.bf16.gmra.mxu1 %vm2125_vm0, %v10036_v6 }
  0x8e   : > { %9861 = vmatprep.mubr.msk.bf16.mxu1 %vm2125_vm0, %v10039_v8 }
  0x94   : > { %9470 = vmatmul.mubr.msk.bf16.gmra.mxu0 %vm2125_vm0, %v9998_v63 }
  0x95   : > { %9473 = vmatprep.mubr.msk.bf16.mxu0 %vm2125_vm0, %v10001_v1  ;;  %9862 = vmatmul.mubr.msk.bf16.gmra.mxu1 %vm2125_vm0, %v10040_v10 }
  0x96   : > { %9865 = vmatprep.mubr.msk.bf16.mxu1 %vm2125_vm0, %v10043_v12 }
  0x9c   : > { %9474 = vmatmul.mubr.msk.bf16.gmra.mxu0 %vm2125_vm0, %v10002_v3 }
  0x9d   : > { %9477 = vmatprep.mubr.msk.bf16.mxu0 %vm2125_vm0, %v10005_v5  ;;  %9866 = vmatmul.mubr.msk.bf16.gmra.mxu1 %vm2125_vm0, %v10044_v14 }
  0x9e   : > { %9869 = vmatprep.mubr.msk.bf16.mxu1 %vm2125_vm0, %v10047_v16 }
  0xa4   : > { %9478 = vmatmul.mubr.msk.bf16.gmra.mxu0 %vm2125_vm0, %v10006_v7 }
  0xa5   : > { %9481 = vmatprep.mubr.msk.bf16.mxu0 %vm2125_vm0, %v10009_v9  ;;  %9870 = vmatmul.mubr.msk.bf16.gmra.mxu1 %vm2125_vm0, %v10048_v18  ;;  %v10042_v9 = vld [vmem:[%s10289_s15 + $0x1b8] sm:$0xff]  }
  0xa6   : > { %9873 = vmatprep.mubr.msk.bf16.mxu1 %vm2125_vm0, %v10051_v20 }
  0xac   : > { %9482 = vmatmul.mubr.msk.bf16.gmra.mxu0 %vm2125_vm0, %v10010_v11  ;;  %v10075_v11 = vld [vmem:[%s10289_s15 + $0x7b0] sm:$0xff]  }
  0xad   : > { %9485 = vmatprep.mubr.msk.bf16.mxu0 %vm2125_vm0, %v10013_v13  ;;  %9874 = vmatmul.mubr.msk.bf16.gmra.mxu1 %vm2125_vm0, %v10052_v22  ;;  %v10045_v13 = vld [vmem:[%s10289_s15 + $0x1c0] sm:$0xff]  }
  0xae   : > { %9877 = vmatprep.mubr.msk.bf16.mxu1 %vm2125_vm0, %v10055_v24 }
  0xb4   : > { %9486 = vmatmul.mubr.msk.bf16.gmra.mxu0 %vm2125_vm0, %v10014_v15 }
  0xb5   : > { %9489 = vmatprep.mubr.msk.bf16.mxu0 %vm2125_vm0, %v10017_v17  ;;  %9878 = vmatmul.mubr.msk.bf16.gmra.mxu1 %vm2125_vm0, %v10056_v26 }
  0xb6   : > { %9881 = vmatprep.mubr.msk.bf16.mxu1 %vm2125_vm0, %v10059_v28 }
  0xbc   : > { %9490 = vmatmul.mubr.msk.bf16.gmra.mxu0 %vm2125_vm0, %v10018_v19  ;;  %v10076_v19 = vld [vmem:[%s10289_s15 + $0x7b8] sm:$0xff]  }
  0xbd   : > { %9493 = vmatprep.mubr.msk.bf16.mxu0 %vm2125_vm0, %v10021_v21  ;;  %9882 = vmatmul.mubr.msk.bf16.gmra.mxu1 %vm2125_vm0, %v10060_v30 }
  0xbe   : > { %9885 = vmatprep.mubr.msk.bf16.mxu1 %vm2125_vm0, %v10063_v32 }
  0xc4   : > { %9494 = vmatmul.mubr.msk.bf16.gmra.mxu0 %vm2125_vm0, %v10022_v23  ;;  %v10079_v23 = vld [vmem:[%s10289_s15 + $0x7c0] sm:$0xff]  }
  0xc5   : > { %9497 = vmatprep.mubr.msk.bf16.mxu0 %vm2125_vm0, %v10025_v25  ;;  %9886 = vmatmul.mubr.msk.bf16.gmra.mxu1 %vm2125_vm0, %v10064_v36 }
  0xc6   : > { %9889 = vmatprep.mubr.msk.bf16.mxu1 %vm2125_vm0, %v10067_v40 }
  0xcc   : > { %9498 = vmatmul.mubr.msk.bf16.gmra.mxu0 %vm2125_vm0, %v10026_v27  ;;  %v10046_v27 = vld [vmem:[%s10289_s15 + $0x1c8] sm:$0xff]  }
  0xcd   : > { %9501 = vmatprep.mubr.msk.bf16.mxu0 %vm2125_vm0, %v10029_v29  ;;  %9890 = vmatmul.mubr.msk.bf16.gmra.mxu1 %vm2125_vm0, %v10068_v50  ;;  %v10049_v29 = vld [vmem:[%s10289_s15 + $0x1d0] sm:$0xff]   ;;  %v10050_v50 = vld [vmem:[%s10289_s15 + $0x1d8] sm:$0xff]  }
  0xce   : > { %9893 = vmatprep.mubr.msk.bf16.mxu1 %vm2125_vm0, %v10071_v58 }
  0xd4   : > { %v9407_v34 = vpop.f32.mrf.mxu0  ;;  %9502 = vmatmul.mubr.msk.bf16.gmra.mxu0 %vm2125_vm0, %v10030_v31 }
  0xd5   : > { %9505 = vmatprep.mubr.msk.bf16.mxu0 %vm2125_vm0, %v10033_v33  ;;  %v2937_v39 = vadd.f32 %v9407_v34, %v10484_v35  ;;  %9894 = vmatmul.mubr.msk.bf16.gmra.mxu1 %vm2125_vm0, %v10072_v4  ;;  %v9799_v15 = vpop.f32.mrf.mxu1  ;;  %v10084_v4 = vld [vmem:[%s10289_s15 + $0x7d8] sm:$0xff]  }
  0xd6   : > { %v2928_v37 = vpop.f32.mrf.mxu0  ;;  %9897 = vmatprep.mubr.msk.bf16.mxu1 %vm2125_vm0, %v10075_v11  ;;  %v4505_v16 = vadd.f32 %v9799_v15, %v10484_v35  ;;  %v10054_v15 = vld [vmem:[%s10289_s15 + $0x1e8] sm:$0xff]  }
  0xd7   : > { %v2929_v42 = vadd.f32 %v10484_v35, %v2928_v37  ;;  %v4977_v46 = vmax.f32 %v2937_v39, 0.0  ;;  %v4496_v18 = vpop.f32.mrf.mxu1 }
  0xd8   : > { %v9408_v41 = vpop.f32.mrf.mxu0  ;;  %v4497_v21 = vadd.f32 %v10484_v35, %v4496_v18  ;;  %v5369_v24 = vmax.f32 %v4505_v16, 0.0  ;;  %v10057_v18 = vld [vmem:[%s10289_s15 + $0x1f0] sm:$0xff]  }
  0xd9   : > { %v2940_v43 = vadd.f32 %v9408_v41, %v10484_v35  ;;  %v4975_v51 = vmax.f32 %v2929_v42, 0.0  ;;  %v9800_v22 = vpop.f32.mrf.mxu1 }
  0xda   : > { %v2931_v45 = vpop.f32.mrf.mxu0  ;;  %v4508_v25 = vadd.f32 %v9800_v22, %v10484_v35  ;;  %v5367_v30 = vmax.f32 %v4497_v21, 0.0 }
  0xdb   : > { %v4978_v47 = vmax.f32 %v2940_v43, 0.0  ;;  %v2932_v48 = vadd.f32 %v10484_v35, %v2931_v45  ;;  %v4499_v28 = vpop.f32.mrf.mxu1  ;;  %v10080_v43 = vld [vmem:[%s10289_s15 + $0x7c8] sm:$0xff]  }
  0xdc   : > { %v9411_v49 = vpop.f32.mrf.mxu0  ;;  %9506 = vmatmul.mubr.msk.bf16.gmra.mxu0 %vm2125_vm0, %v10034_v38  ;;  %v5370_v31 = vmax.f32 %v4508_v25, 0.0  ;;  %v4500_v32 = vadd.f32 %v10484_v35, %v4499_v28 }
  0xdd   : > { %v10500_v52 = vpack.c.bf16 %v4978_v47, %v4977_v46  ;;  %v4976_v53 = vmax.f32 %v2932_v48, 0.0  ;;  %9509 = vmatprep.mubr.msk.bf16.mxu0 %vm2125_vm0, %v10037_v44  ;;  %v2953_v57 = vadd.f32 %v9411_v49, %v10484_v35  ;;  %9898 = vmatmul.mubr.msk.bf16.gmra.mxu1 %vm2125_vm0, %v10076_v19  ;;  %v9803_v34 = vpop.f32.mrf.mxu1  ;;  %v10083_v46 = vld [vmem:[%s10289_s15 + $0x7d0] sm:$0xff]  }
  0xde   : > { %v2944_v54 = vpop.f32.mrf.mxu0  ;;  %9901 = vmatprep.mubr.msk.bf16.mxu1 %vm2125_vm0, %v10079_v23  ;;  %v10554_v36 = vpack.c.bf16 %v5370_v31, %v5369_v24  ;;  %v5368_v37 = vmax.f32 %v4500_v32, 0.0  ;;  %v4521_v39 = vadd.f32 %v9803_v34, %v10484_v35  ;;  %v10091_v31 = vld [vmem:[%s10289_s15 + $0x7f0] sm:$0xff]   ;;  %v10058_v34 = vld [vmem:[%s10289_s15 + $0x1f8] sm:$0xff]  }
  0xdf   : > { %v10504_v56 = vpack.c.bf16 %v4976_v53, %v4975_v51  ;;  %v2945_v60 = vadd.f32 %v10484_v35, %v2944_v54  ;;  %v4981_v0 = vmax.f32 %v2953_v57, 0.0  ;;  %v4512_v40 = vpop.f32.mrf.mxu1  ;;  %v10053_v53 = vld [vmem:[%s10289_s15 + $0x1e0] sm:$0xff]  }
  0xe0   : > { %v9412_v59 = vpop.f32.mrf.mxu0  ;;  %13205 = vst [vmem:[#allocation2_spill] sm:$0xff] %v10554_v36  ;;  %v10561_v41 = vpack.c.bf16 %v5368_v37, %v5367_v30  ;;  %v4513_v44 = vadd.f32 %v10484_v35, %v4512_v40  ;;  %v5373_v47 = vmax.f32 %v4521_v39, 0.0 }
  0xe1   : > { %v2956_v61 = vadd.f32 %v9412_v59, %v10484_v35  ;;  %v4979_v5 = vmax.f32 %v2945_v60, 0.0  ;;  %v9804_v45 = vpop.f32.mrf.mxu1 }
  0xe2   : > { %v2947_v63 = vpop.f32.mrf.mxu0  ;;  %13206 = vst [vmem:[#allocation3_spill] sm:$0xff] %v10561_v41  ;;  %v4524_v48 = vadd.f32 %v9804_v45, %v10484_v35  ;;  %v5371_v54 = vmax.f32 %v4513_v44, 0.0 }
  0xe3   : > { %v4982_v1 = vmax.f32 %v2956_v61, 0.0  ;;  %v2948_v2 = vadd.f32 %v10484_v35, %v2947_v63  ;;  %v4515_v51 = vpop.f32.mrf.mxu1 }
  0xe4   : > { %v10514_v3 = vpop.f32.mrf.mxu0  ;;  %9510 = vmatmul.mubr.msk.bf16.gmra.mxu0 %vm2125_vm0, %v10038_v55  ;;  %v5374_v55 = vmax.f32 %v4524_v48, 0.0  ;;  %v4516_v57 = vadd.f32 %v10484_v35, %v4515_v51  ;;  %v10632_v51 = vld [vmem:[%s13197_s1 + $0x80] sm:$0xff] }
  0xe5   : > { %v10518_v6 = vpack.c.bf16 %v4982_v1, %v4981_v0  ;;  %v4980_v7 = vmax.f32 %v2948_v2, 0.0  ;;  %9513 = vmatprep.mubr.msk.bf16.mxu0 %vm2125_vm0, %v10041_v62  ;;  %9902 = vmatmul.mubr.msk.bf16.gmra.mxu1 %vm2125_vm0, %v10080_v43  ;;  %v9807_v59 = vpop.f32.mrf.mxu1  ;;  %v10061_v43 = vld [vmem:[%s10289_s15 + $0x200] sm:$0xff]  }
  0xe6   : > { %v10521_v8 = vpop.f32.mrf.mxu0  ;;  %9905 = vmatprep.mubr.msk.bf16.mxu1 %vm2125_vm0, %v10083_v46  ;;  %v10578_v60 = vpack.c.bf16 %v5374_v55, %v5373_v47  ;;  %v5372_v61 = vmax.f32 %v4516_v57, 0.0  ;;  %v4537_v63 = vadd.f32 %v9807_v59, %v10484_v35  ;;  %v10092_v59 = vld [vmem:[%s10289_s15 + $0x7f8] sm:$0xff]  }
  0xe7   : > { %v10524_v10 = vpack.c.bf16 %v4980_v7, %v4979_v5  ;;  %v10584_v0 = vpop.f32.mrf.mxu1  ;;  %v10087_v7 = vld [vmem:[%s10289_s15 + $0x7e0] sm:$0xff]  }
  0xe8   : > { %v10527_v12 = vpop.f32.mrf.mxu0  ;;  %13207 = vst [vmem:[#allocation4_spill] sm:$0xff] %v10578_v60  ;;  %v10587_v1 = vpack.c.bf16 %v5372_v61, %v5371_v54 }
  0xe9   : > { %v9808_v5 = vpop.f32.mrf.mxu1 }
  0xea   : > { %v10530_v14 = vpop.f32.mrf.mxu0  ;;  %13208 = vst [vmem:[#allocation5_spill] sm:$0xff] %v10587_v1  ;;  %v4540_v11 = vadd.f32 %v9808_v5, %v10484_v35 }
  0xeb   : > { %v10597_v16 = vpop.f32.mrf.mxu1 }
  0xec   : > { %v10535_v17 = vpop.f32.mrf.mxu0  ;;  %9514 = vmatmul.mubr.msk.bf16.gmra.mxu0 %vm2125_vm0, %v10042_v9  ;;  %v5377_v9 = vmax.f32 %v4537_v63, 0.0  ;;  %v5378_v19 = vmax.f32 %v4540_v11, 0.0 }
  0xed   : > { %9517 = vmatprep.mubr.msk.bf16.mxu0 %vm2125_vm0, %v10045_v13  ;;  %9906 = vmatmul.mubr.msk.bf16.gmra.mxu1 %vm2125_vm0, %v10084_v4  ;;  %v9811_v22 = vpop.f32.mrf.mxu1  ;;  %v2985_v11 = vadd.f32 %v10535_v17, %v10484_v35 }
  0xee   : > { %v10540_v20 = vpop.f32.mrf.mxu0  ;;  %9909 = vmatprep.mubr.msk.bf16.mxu1 %vm2125_vm0, %v10087_v7  ;;  %v10604_v23 = vpack.c.bf16 %v5378_v19, %v5377_v9  ;;  %v4553_v25 = vadd.f32 %v9811_v22, %v10484_v35  ;;  %v10648_v9 = vadd.f32 %v10514_v3, %v10484_v35  ;;  %v10662_v3 = vadd.f32 %v10527_v12, %v10484_v35 }
  0xef   : > { %v2977_v17 = vadd.f32 %v10484_v35, %v10540_v20 }
  0xf0   : > { %v10545_v26 = vpop.f32.mrf.mxu0  ;;  %13209 = vst [vmem:[#allocation6_spill] sm:$0xff] %v10604_v23  ;;  %v5381_v37 = vmax.f32 %v4553_v25, 0.0 }
  0xf1   : > { %v2988_v55 = vadd.f32 %v10545_v26, %v10484_v35 }
  0xf2   : > { %v10550_v33 = vpop.f32.mrf.mxu0 }
  0xf3   : > { %v2980_v19 = vadd.f32 %v10484_v35, %v10550_v33 }
  0xf4   : > { %v10556_v38 = vpop.f32.mrf.mxu0  ;;  %9518 = vmatmul.mubr.msk.bf16.gmra.mxu0 %vm2125_vm0, %v10046_v27  ;;  %v10608_v27 = vpop.f32.mrf.mxu1 }
  0xf5   : > { %9521 = vmatprep.mubr.msk.bf16.mxu0 %vm2125_vm0, %v10049_v29  ;;  %v10088_v29 = vld [vmem:[%s10289_s15 + $0x7e8] sm:$0xff]  }
  0xf6   : > { %v10563_v42 = vpop.f32.mrf.mxu0  ;;  %v9812_v30 = vpop.f32.mrf.mxu1  ;;  %9910 = vmatmul.mubr.msk.bf16.gmra.mxu1 %vm2125_vm0, %v10088_v29  ;;  %v10065_v29 = vld [vmem:[%s10289_s15 + $0x210] sm:$0xff]  }
  0xf7   : > { %v4556_v39 = vadd.f32 %v9812_v30, %v10484_v35  ;;  %9913 = vmatprep.mubr.msk.bf16.mxu1 %vm2125_vm0, %v10091_v31  ;;  %v4990_v31 = vmax.f32 %v2988_v55, 0.0  ;;  %v4988_v55 = vmax.f32 %v2980_v19, 0.0 }
  0xf8   : > { %v10569_v49 = vpop.f32.mrf.mxu0  ;;  %v10617_v40 = vpop.f32.mrf.mxu1 }
  0xf9   : > { %v5382_v45 = vmax.f32 %v4556_v39, 0.0 }
  0xfa   : > { %v10574_v58 = vpop.f32.mrf.mxu0  ;;  %v9815_v46 = vpop.f32.mrf.mxu1 }
  0xfb   : > { %v4569_v47 = vadd.f32 %v9815_v46, %v10484_v35 }
  0xfc   : > { %v10580_v62 = vpop.f32.mrf.mxu0  ;;  %9522 = vmatmul.mubr.msk.bf16.gmra.mxu0 %vm2125_vm0, %v10050_v50  ;;  %v10627_v50 = vld [vmem:[%s13197_s1] sm:$0xff]  ;;  %v10636_v54 = vpop.f32.mrf.mxu1 }
  0xfd   : > { %9525 = vmatprep.mubr.msk.bf16.mxu0 %vm2125_vm0, %v10053_v53  ;;  %v10634_v53 = vpack.c.bf16 %v5382_v45, %v5381_v37  ;;  %v8350_v4 = vcombine.high %v10627_v50, %v10632_v51  ;;  %v5385_v5 = vmax.f32 %v4569_v47, 0.0  ;;  %v4989_v47 = vmax.f32 %v2985_v11, 0.0 }
  0xfe   : > { %v10589_v2 = vpop.f32.mrf.mxu0  ;;  %v9816_v61 = vpop.f32.mrf.mxu1  ;;  %9914 = vmatmul.mubr.msk.bf16.gmra.mxu1 %vm2125_vm0, %v10092_v59 }
  0xff   : > { %13210 = vst [vmem:[#allocation7_spill] sm:$0xff] %v10634_v53  ;;  %v4572_v7 = vadd.f32 %v9816_v61, %v10484_v35  ;;  %6543 = vmatprep.mubr.bf16.mxu1 %v8350_v4  ;;  %v5622_v4 = vpack.c.bf16 %v4990_v31, %v4989_v47 }
 0x100   : > { %v10594_v13 = vpop.f32.mrf.mxu0 }
 0x101   : > { %v5386_v30 = vmax.f32 %v4572_v7, 0.0 }
 0x102   : > { %v10600_v21 = vpop.f32.mrf.mxu0 }
 0x103   : > { %v10669_v46 = vpack.c.bf16 %v5386_v30, %v5385_v5 }
 0x104   : > { %v9431_v24 = vpop.f32.mrf.mxu0  ;;  %9526 = vmatmul.mubr.msk.bf16.gmra.mxu0 %vm2125_vm0, %v10054_v15  ;;  %v10062_v15 = vld [vmem:[%s10289_s15 + $0x208] sm:$0xff]  }
 0x105   : > { %9529 = vmatprep.mubr.msk.bf16.mxu0 %vm2125_vm0, %v10057_v18  ;;  %v10653_v18 = vpop.f32.mrf.mxu1  ;;  %13211 = vst [vmem:[#allocation8_spill] sm:$0xff] %v10669_v46  ;;  %v3033_v12 = vadd.f32 %v9431_v24, %v10484_v35 }
 0x106   : > { %v10611_v28 = vpop.f32.mrf.mxu0 }
 0x107   : > { %v9819_v33 = vpop.f32.mrf.mxu1 }
 0x108   : > { %v9432_v32 = vpop.f32.mrf.mxu0  ;;  %v4585_v20 = vadd.f32 %v9819_v33, %v10484_v35 }
 0x10a   : > { %v3027_v44 = vpop.f32.mrf.mxu0  ;;  %v5389_v31 = vmax.f32 %v4585_v20, 0.0 }
 0x10b   : > { %v3028_v24 = vadd.f32 %v10484_v35, %v3027_v44 }
 0x10c   : > { %v9435_v48 = vpop.f32.mrf.mxu0  ;;  %9530 = vmatmul.mubr.msk.bf16.gmra.mxu0 %vm2125_vm0, %v10058_v34  ;;  %v3036_v34 = vadd.f32 %v9432_v32, %v10484_v35  ;;  %v10674_v32 = vpop.f32.mrf.mxu1 }
 0x10d   : > { %9533 = vmatprep.mubr.msk.bf16.mxu0 %vm2125_vm0, %v10061_v43  ;;  %v3049_v63 = vadd.f32 %v9435_v48, %v10484_v35 }
 0x10e   : > { %v3040_v57 = vpop.f32.mrf.mxu0  ;;  %v5002_v5 = vmax.f32 %v3036_v34, 0.0  ;;  %v9820_v11 = vpop.f32.mrf.mxu1 }
 0x10f   : > { %v3041_v22 = vadd.f32 %v10484_v35, %v3040_v57  ;;  %v5005_v39 = vmax.f32 %v3049_v63, 0.0  ;;  %v4985_v63 = vmax.f32 %v10648_v9, 0.0  ;;  %v10066_v9 = vld [vmem:[%s10289_s15 + $0x218] sm:$0xff]   ;;  %v4588_v44 = vadd.f32 %v9820_v11, %v10484_v35 }
 0x110   : > { %v9436_v26 = vpop.f32.mrf.mxu0  ;;  %v10685_v34 = vpop.f32.mrf.mxu1 }
 0x111   : > { %v3052_v25 = vadd.f32 %v9436_v26, %v10484_v35  ;;  %v5003_v57 = vmax.f32 %v3041_v22, 0.0  ;;  %v4986_v26 = vmax.f32 %v10662_v3, 0.0  ;;  %v5001_v22 = vmax.f32 %v3033_v12, 0.0 }
 0x112   : > { %v3043_v37 = vpop.f32.mrf.mxu0  ;;  %v2964_v3 = vadd.f32 %v10484_v35, %v10530_v14  ;;  %v5390_v12 = vmax.f32 %v4588_v44, 0.0 }
 0x113   : > { %v5006_v43 = vmax.f32 %v3052_v25, 0.0  ;;  %v3044_v45 = vadd.f32 %v10484_v35, %v3043_v37 }
 0x114   : > { %v9439_v48 = vpop.f32.mrf.mxu0  ;;  %9534 = vmatmul.mubr.msk.bf16.gmra.mxu0 %vm2125_vm0, %v10062_v15  ;;  %v4987_v15 = vmax.f32 %v2977_v17, 0.0 }
 0x115   : > { %v5630_v59 = vpack.c.bf16 %v5006_v43, %v5005_v39  ;;  %v5004_v61 = vmax.f32 %v3044_v45, 0.0  ;;  %9537 = vmatprep.mubr.msk.bf16.mxu0 %vm2125_vm0, %v10065_v29  ;;  %v3065_v25 = vadd.f32 %v9439_v48, %v10484_v35  ;;  %v3025_v29 = vadd.f32 %v10484_v35, %v10611_v28  ;;  %v10069_v39 = vld [vmem:[%s10289_s15 + $0x220] sm:$0xff]   ;;  %v9823_v48 = vpop.f32.mrf.mxu1 }
 0x116   : > { %v3056_v7 = vpop.f32.mrf.mxu0  ;;  %v5621_v17 = vpack.c.bf16 %v4988_v55, %v4987_v15  ;;  %v3020_v28 = vadd.f32 %v10594_v13, %v10484_v35  ;;  %v5628_v43 = vpack.c.bf16 %v5002_v5, %v5001_v22  ;;  %v5000_v45 = vmax.f32 %v3028_v24, 0.0 }
 0x117   : > { %8750 = vmatprep.subr.bf16.mxu1 %v5630_v59  ;;  %v5629_v19 = vpack.c.bf16 %v5004_v61, %v5003_v57  ;;  %v3057_v37 = vadd.f32 %v10484_v35, %v3056_v7  ;;  %v5009_v20 = vmax.f32 %v3065_v25, 0.0  ;;  %v4601_v14 = vadd.f32 %v9823_v48, %v10484_v35  ;;  %v10703_v5 = vpop.f32.mrf.mxu1 }
 0x118   : > { %v9440_v30 = vpop.f32.mrf.mxu0  ;;  %8751 = vmatpush3.bf16.msra.mxu1 %v5622_v4  ;;  %v2961_v55 = vadd.f32 %v10484_v35, %v10521_v8  ;;  %v3017_v61 = vadd.f32 %v10580_v62, %v10484_v35  ;;  %v4999_v4 = vmax.f32 %v3025_v29, 0.0  ;;  %v10701_v13 = vpack.c.bf16 %v5390_v12, %v5389_v31  ;;  %13213 = vst [vmem:[#allocation10_spill] sm:$0xff] %v10703_v5 }
 0x119   : > { %v3068_v33 = vadd.f32 %v9440_v30, %v10484_v35  ;;  %8752 = vmatprep.subr.bf16.mxu1 %v5629_v19  ;;  %v5620_v24 = vpack.c.bf16 %v4986_v26, %v4985_v63  ;;  %v5007_v11 = vmax.f32 %v3057_v37, 0.0  ;;  %v4984_v8 = vmax.f32 %v2964_v3, 0.0  ;;  %v9824_v30 = vpop.f32.mrf.mxu1  ;;  %v10070_v3 = vld [vmem:[%s10289_s15 + $0x228] sm:$0xff]  }
 0x11a   : > { %v3059_v47 = vpop.f32.mrf.mxu0  ;;  %13212 = vst [vmem:[#allocation9_spill] sm:$0xff] %v10701_v13  ;;  %v4998_v62 = vmax.f32 %v3020_v28, 0.0  ;;  %v3012_v19 = vadd.f32 %v10484_v35, %v10600_v21  ;;  %v5627_v29 = vpack.c.bf16 %v5000_v45, %v4999_v4  ;;  %v5393_v26 = vmax.f32 %v4601_v14, 0.0  ;;  %v10073_v28 = vld [vmem:[%s10289_s15 + $0x230] sm:$0xff]  }
 0x11b   : > { %v5010_v57 = vmax.f32 %v3068_v33, 0.0  ;;  %v3060_v59 = vadd.f32 %v10484_v35, %v3059_v47  ;;  %v4604_v31 = vadd.f32 %v9824_v30, %v10484_v35  ;;  %v4983_v44 = vmax.f32 %v2961_v55, 0.0 }
 0x11c   : > { %v9443_v7 = vpop.f32.mrf.mxu0  ;;  %9538 = vmatmul.mubr.msk.bf16.gmra.mxu0 %vm2125_vm0, %v10066_v9  ;;  %8753 = vmatpush3.bf16.msra.mxu1 %v5621_v17  ;;  %v4997_v17 = vmax.f32 %v3017_v61, 0.0  ;;  %v3009_v33 = vadd.f32 %v10484_v35, %v10589_v2  ;;  %v3004_v47 = vadd.f32 %v10569_v49, %v10484_v35  ;;  %v4996_v48 = vmax.f32 %v3012_v19, 0.0 }
 0x11d   : > { %v10705_v15 = vpack.c.bf16 %v5010_v57, %v5009_v20  ;;  %v5008_v25 = vmax.f32 %v3060_v59, 0.0  ;;  %8754 = vmatprep.subr.bf16.mxu1 %v5628_v43  ;;  %9541 = vmatprep.mubr.msk.bf16.mxu0 %vm2125_vm0, %v10069_v39  ;;  %v3081_v63 = vadd.f32 %v9443_v7, %v10484_v35  ;;  %v5394_v43 = vmax.f32 %v4604_v31, 0.0 }
 0x11e   : > { %v3072_v22 = vpop.f32.mrf.mxu0  ;;  %v5619_v45 = vpack.c.bf16 %v4984_v8, %v4983_v44  ;;  %v5626_v12 = vpack.c.bf16 %v4998_v62, %v4997_v17  ;;  %v3001_v2 = vadd.f32 %v10556_v38, %v10484_v35  ;;  %v4995_v4 = vmax.f32 %v3009_v33, 0.0  ;;  %v10081_v33 = vld [vmem:[%s10289_s15 + $0x250] sm:$0xff]  }
 0x11f   : > { %v10710_v9 = vpack.c.bf16 %v5008_v25, %v5007_v11  ;;  %v3073_v21 = vadd.f32 %v10484_v35, %v3072_v22  ;;  %v5013_v57 = vmax.f32 %v3081_v63, 0.0  ;;  %v10723_v55 = vpack.c.bf16 %v5394_v43, %v5393_v26  ;;  %v10074_v22 = vld [vmem:[%s10289_s15 + $0x238] sm:$0xff]   ;;  %v10077_v63 = vld [vmem:[%s10289_s15 + $0x240] sm:$0xff]  }
 0x120   : > { %v9444_v37 = vpop.f32.mrf.mxu0  ;;  %8755 = vmatpush3.bf16.msra.mxu1 %v5620_v24  ;;  %v4994_v25 = vmax.f32 %v3004_v47, 0.0  ;;  %v2996_v38 = vadd.f32 %v10484_v35, %v10574_v58  ;;  %v5625_v62 = vpack.c.bf16 %v4996_v48, %v4995_v4  ;;  %v2993_v30 = vadd.f32 %v10484_v35, %v10563_v42  ;;  %v10780_v48 = vpop.f32.mrf.mxu1 }
 0x121   : > { %v3084_v39 = vadd.f32 %v9444_v37, %v10484_v35  ;;  %8756 = vmatprep.subr.bf16.mxu1 %v5627_v29  ;;  %13214 = vst [vmem:[#allocation11_spill] sm:$0xff] %v10723_v55  ;;  %v5011_v49 = vmax.f32 %v3073_v21, 0.0  ;;  %v4993_v29 = vmax.f32 %v3001_v2, 0.0  ;;  %v5535_v21 = vld [vmem:[%s13197_s1 + $0x180] sm:$0xff]  ;;  %13215 = vst [vmem:[#allocation12_spill] sm:$0xff] %v10780_v48 }
 0x122   : > { %v3075_v20 = vpop.f32.mrf.mxu0  ;;  %v4992_v58 = vmax.f32 %v2996_v38, 0.0 }
 0x123   : > { %v5014_v59 = vmax.f32 %v3084_v39, 0.0  ;;  %v3076_v14 = vadd.f32 %v10484_v35, %v3075_v20  ;;  %v5624_v31 = vpack.c.bf16 %v4994_v25, %v4993_v29  ;;  %v10085_v20 = vld [vmem:[%s10289_s15 + $0x260] sm:$0xff]   ;;  %v10089_v29 = vld [vmem:[%s10289_s15 + $0x270] sm:$0xff]  }
 0x124   : > { %v10727_v61 = vpop.f32.mrf.mxu0  ;;  %9542 = vmatmul.mubr.msk.bf16.gmra.mxu0 %vm2125_vm0, %v10070_v3  ;;  %8757 = vmatpush3.bf16.msra.mxu1 %v5619_v45  ;;  %v10078_v3 = vld [vmem:[%s10289_s15 + $0x248] sm:$0xff]  }
 0x125   : > { %v10730_v7 = vpack.c.bf16 %v5014_v59, %v5013_v57  ;;  %v5012_v24 = vmax.f32 %v3076_v14, 0.0  ;;  %8758 = vmatprep.subr.bf16.mxu1 %v5626_v12  ;;  %9545 = vmatprep.mubr.msk.bf16.mxu0 %vm2125_vm0, %v10073_v28  ;;  %v8349_v28 = vcombine.low %v10627_v50, %v10632_v51  ;;  %v10082_v12 = vld [vmem:[%s10289_s15 + $0x258] sm:$0xff]   ;;  %v5551_v50 = vld [vmem:[%s13197_s1 + $0x200] sm:$0xff]  ;;  %v9827_v57 = vpop.f32.mrf.mxu1 }
 0x126   : > { %v10733_v11 = vpop.f32.mrf.mxu0 }
 0x127   : > { %v10737_v8 = vpack.c.bf16 %v5012_v24, %v5011_v49  ;;  %v4608_v4 = vpop.f32.mrf.mxu1  ;;  %v4617_v49 = vadd.f32 %v9827_v57, %v10484_v35 }
 0x128   : > { %v10739_v19 = vpop.f32.mrf.mxu0  ;;  %8759 = vmatpush3.bf16.msra.mxu1 %v10518_v6  ;;  %v4991_v6 = vmax.f32 %v2993_v30, 0.0  ;;  %v5583_v30 = vld [vmem:[%s13197_s1 + $0x300] sm:$0xff] }
 0x129   : > { %8760 = vmatprep.subr.bf16.mxu1 %v5625_v62  ;;  %v9828_v25 = vpop.f32.mrf.mxu1  ;;  %v10086_v62 = vld [vmem:[%s10289_s15 + $0x268] sm:$0xff]  }
 0x12a   : > { %v10746_v26 = vpop.f32.mrf.mxu0  ;;  %v5623_v42 = vpack.c.bf16 %v4992_v58, %v4991_v6  ;;  %v4620_v58 = vadd.f32 %v9828_v25, %v10484_v35 }
 0x12c   : > { %v10748_v44 = vpop.f32.mrf.mxu0  ;;  %9546 = vmatmul.mubr.msk.bf16.gmra.mxu0 %vm2125_vm0, %v10074_v22  ;;  %8761 = vmatpush3.bf16.msra.mxu1 %v10524_v10  ;;  %v5519_v10 = vld [vmem:[%s13197_s1 + $0x100] sm:$0xff]  ;;  %v4611_v22 = vpop.f32.mrf.mxu1 }
 0x12d   : > { %8762 = vmatprep.subr.bf16.mxu1 %v5624_v31  ;;  %9549 = vmatprep.mubr.msk.bf16.mxu0 %vm2125_vm0, %v10077_v63  ;;  %v8381_v59 = vcombine.low %v5519_v10, %v5535_v21  ;;  %v5599_v63 = vld [vmem:[%s13197_s1 + $0x380] sm:$0xff]  ;;  %v5397_v31 = vmax.f32 %v4617_v49, 0.0 }
 0x12e   : > { %v10753_v17 = vpop.f32.mrf.mxu0 }
 0x130   : > { %v10755_v37 = vpop.f32.mrf.mxu0  ;;  %8763 = vmatpush3.bf16.msra.mxu1 %v10500_v52  ;;  %v8382_v52 = vcombine.high %v5519_v10, %v5535_v21  ;;  %v5398_v10 = vmax.f32 %v4620_v58, 0.0 }
 0x131   : > { %8764 = vmatprep.subr.bf16.mxu1 %v5623_v42  ;;  %v4609_v42 = vadd.f32 %v10484_v35, %v4608_v4  ;;  %v10090_v4 = vld [vmem:[%s10289_s15 + $0x278] sm:$0xff]   ;;  %v3116_v55 = vadd.f32 %v10755_v37, %v10484_v35 }
 0x132   : > { %v10766_v39 = vpop.f32.mrf.mxu0 }
 0x133   : > { %v5395_v57 = vmax.f32 %v4609_v42, 0.0 }
 0x134   : > { %v10770_v43 = vpop.f32.mrf.mxu0  ;;  %9550 = vmatmul.mubr.msk.bf16.gmra.mxu0 %vm2125_vm0, %v10078_v3  ;;  %8765 = vmatpush3.bf16.msra.mxu1 %v10504_v56  ;;  %v5567_v56 = vld [vmem:[%s13197_s1 + $0x280] sm:$0xff]  ;;  %v9831_v3 = vpop.f32.mrf.mxu1 }
 0x135   : > { %9553 = vmatprep.mubr.msk.bf16.mxu0 %vm2125_vm0, %v10081_v33  ;;  %v8414_v2 = vcombine.high %v5551_v50, %v5567_v56  ;;  %v8413_v33 = vcombine.low %v5551_v50, %v5567_v56 }
 0x136   : > { %v10775_v45 = vpop.f32.mrf.mxu0 }
 0x137   : > { %6544 = vmatmul.mubr.bf16.vlgmr.msra.gmra.mxu1 %v8349_v28  ;;  %v8446_v28 = vcombine.high %v5583_v30, %v5599_v63 }
 0x138   : > { %v10777_v47 = vpop.f32.mrf.mxu0  ;;  %6551 = vmatprep.mubr.bf16.mxu1 %v8382_v52  ;;  %v4624_v52 = vpop.f32.mrf.mxu1 }
 0x13a   : > { %v10789_v51 = vpop.f32.mrf.mxu0  ;;  %v9832_v50 = vpop.f32.mrf.mxu1 }
 0x13b   : > { %v4636_v58 = vadd.f32 %v9832_v50, %v10484_v35  ;;  %v3113_v50 = vadd.f32 %v10748_v44, %v10484_v35  ;;  %v10858_v44 = vadd.f32 %v10739_v19, %v10484_v35  ;;  %v10095_v19 = vld [vmem:[%s10289_s15 + $0x290] sm:$0xff]  }
 0x13c   : > { %v10791_v14 = vpop.f32.mrf.mxu0  ;;  %9554 = vmatmul.mubr.msk.bf16.gmra.mxu0 %vm2125_vm0, %v10082_v12  ;;  %v10816_v12 = vpack.c.bf16 %v5398_v10, %v5397_v31  ;;  %v4627_v25 = vpop.f32.mrf.mxu1  ;;  %v10832_v31 = vld [vmem:[%s13197_s1 + $0x88] sm:$0xff] }
 0x13d   : > { %9557 = vmatprep.mubr.msk.bf16.mxu0 %vm2125_vm0, %v10085_v20 }
 0x13e   : > { %v10796_v24 = vpop.f32.mrf.mxu0  ;;  %13216 = vst [vmem:[#allocation13_spill] sm:$0xff] %v10816_v12  ;;  %v9835_v10 = vpop.f32.mrf.mxu1 }
 0x13f   : > { %6552 = vmatmul.mubr.bf16.gmra.mxu1 %v8381_v59  ;;  %v4612_v59 = vadd.f32 %v10484_v35, %v4611_v22 }
 0x140   : > { %v10798_v38 = vpop.f32.mrf.mxu0  ;;  %6559 = vmatprep.mubr.bf16.mxu1 %v8414_v2  ;;  %v4633_v2 = vadd.f32 %v9831_v3, %v10484_v35 }
 0x141   : > { %v5396_v49 = vmax.f32 %v4612_v59, 0.0  ;;  %v5402_v59 = vmax.f32 %v4636_v58, 0.0  ;;  %v10854_v58 = vadd.f32 %v10727_v61, %v10484_v35 }
 0x142   : > { %v10809_v6 = vpop.f32.mrf.mxu0  ;;  %v5401_v22 = vmax.f32 %v4633_v2, 0.0  ;;  %v4640_v2 = vpop.f32.mrf.mxu1 }
 0x143   : > { %v10835_v3 = vpack.c.bf16 %v5396_v49, %v5395_v57  ;;  %v4628_v57 = vadd.f32 %v10484_v35, %v4627_v25 }
 0x144   : > { %v10812_v21 = vpop.f32.mrf.mxu0  ;;  %9558 = vmatmul.mubr.msk.bf16.gmra.mxu0 %vm2125_vm0, %v10086_v62  ;;  %v10093_v62 = vld [vmem:[%s10289_s15 + $0x280] sm:$0xff]   ;;  %v9836_v49 = vpop.f32.mrf.mxu1 }
 0x145   : > { %9561 = vmatprep.mubr.msk.bf16.mxu0 %vm2125_vm0, %v10089_v29  ;;  %v10827_v29 = vld [vmem:[%s13197_s1 + $0x8] sm:$0xff]  ;;  %13217 = vst [vmem:[#allocation14_spill] sm:$0xff] %v10835_v3 }
 0x146   : > { %v10818_v20 = vpop.f32.mrf.mxu0  ;;  %v8352_v5 = vcombine.high %v10827_v29, %v10832_v31  ;;  %v4643_v3 = vpop.f32.mrf.mxu1 }
 0x147   : > { %6560 = vmatmul.mubr.bf16.gmra.mxu1 %v8413_v33  ;;  %v4625_v33 = vadd.f32 %v10484_v35, %v4624_v52  ;;  %v10846_v52 = vpack.c.bf16 %v5402_v59, %v5401_v22  ;;  %v3108_v22 = vadd.f32 %v10484_v35, %v10766_v39  ;;  %v5400_v59 = vmax.f32 %v4628_v57, 0.0 }
 0x148   : > { %v9464_v56 = vpop.f32.mrf.mxu0  ;;  %6567 = vmatprep.mubr.bf16.mxu1 %v8446_v28  ;;  %v8445_v28 = vcombine.low %v5583_v30, %v5599_v63  ;;  %v3105_v30 = vadd.f32 %v10484_v35, %v10753_v17  ;;  %v5022_v17 = vmax.f32 %v3116_v55, 0.0  ;;  %v4641_v39 = vadd.f32 %v10484_v35, %v4640_v2 }
 0x149   : > { %13218 = vst [vmem:[#allocation15_spill] sm:$0xff] %v10846_v52  ;;  %v5399_v37 = vmax.f32 %v4625_v33, 0.0  ;;  %v3164_v25 = vadd.f32 %v9464_v56, %v10484_v35  ;;  %v9839_v56 = vpop.f32.mrf.mxu1  ;;  %v5020_v46 = vmax.f32 %v3108_v22, 0.0 }
 0x14a   : > { %v3155_v42 = vpop.f32.mrf.mxu0  ;;  %v5019_v55 = vmax.f32 %v3105_v30, 0.0 }
 0x14b   : > { %v10869_v53 = vpack.c.bf16 %v5400_v59, %v5399_v37 }
 0x14c   : > { %v9467_v48 = vpop.f32.mrf.mxu0  ;;  %9562 = vmatmul.mubr.msk.bf16.gmra.mxu0 %vm2125_vm0, %v10090_v4  ;;  %v4649_v4 = vadd.f32 %v9835_v10, %v10484_v35  ;;  %v10094_v10 = vld [vmem:[%s10289_s15 + $0x288] sm:$0xff]  }
 0x14d   : > { %9565 = vmatprep.mubr.msk.bf16.mxu0 %vm2125_vm0, %v10093_v62  ;;  %v3177_v62 = vadd.f32 %v9467_v48, %v10484_v35  ;;  %v4652_v48 = vadd.f32 %v9836_v49, %v10484_v35  ;;  %13219 = vst [vmem:[#allocation16_spill] sm:$0xff] %v10869_v53 }
 0x14e   : > { %v3168_v63 = vpop.f32.mrf.mxu0  ;;  %v5405_v52 = vmax.f32 %v4649_v4, 0.0  ;;  %v3161_v4 = vadd.f32 %v10812_v21, %v10484_v35  ;;  %v10885_v21 = vld [vmem:[%s13199_s3] ss:$0 sm:$0xff] }
 0x14f   : > { %6568 = vmatmul.mubr.bf16.gmra.mxu1 %v8445_v28  ;;  %v3169_v61 = vadd.f32 %v10484_v35, %v3168_v63  ;;  %v5021_v28 = vmax.f32 %v3113_v50, 0.0  ;;  %v5037_v41 = vmax.f32 %v3177_v62, 0.0  ;;  %v5406_v36 = vmax.f32 %v4652_v48, 0.0  ;;  %v10876_v50 = vpop.f32.mrf.mxu1 }
 0x150   : > { %v9468_v33 = vpop.f32.mrf.mxu0  ;;  %6608 = vmatprep.mubr.bf16.mxu1 %v8352_v5  ;;  %13220 = vst [vmem:[#allocation17_spill] sm:$0xff] %v10876_v50  ;;  %v4644_v22 = vadd.f32 %v10885_v21, %v4643_v3  ;;  %v3153_v59 = vadd.f32 %v10885_v21, %v10818_v20  ;;  %v10096_v3 = vld [vmem:[%s10289_s15 + $0x298] sm:$0xff]  }
 0x151   : > { %v3180_v12 = vadd.f32 %v9468_v33, %v10484_v35  ;;  %v5638_v63 = vpack.c.bf16 %v5022_v17, %v5021_v28  ;;  %v5034_v33 = vmax.f32 %v3164_v25, 0.0  ;;  %v5035_v30 = vmax.f32 %v3169_v61, 0.0  ;;  %v9840_v48 = vpop.f32.mrf.mxu1 }
 0x152   : > { %v3171_v23 = vpop.f32.mrf.mxu0  ;;  %v5403_v17 = vmax.f32 %v4641_v39, 0.0  ;;  %v4665_v25 = vadd.f32 %v10885_v21, %v9839_v56  ;;  %v4668_v56 = vadd.f32 %v10885_v21, %v9840_v48  ;;  %v10098_v48 = vld [vmem:[%s10289_s15 + $0x2a8] sm:$0xff]  }
 0x153   : > { %v5038_v5 = vmax.f32 %v3180_v12, 0.0  ;;  %v3172_v57 = vadd.f32 %v10484_v35, %v3171_v23  ;;  %v10879_v12 = vpack.c.bf16 %v5406_v36, %v5405_v52  ;;  %v3156_v23 = vadd.f32 %v10484_v35, %v3155_v42 }
 0x154   : > { %v9471_v49 = vpop.f32.mrf.mxu0  ;;  %9566 = vmatmul.mubr.msk.bf16.gmra.mxu0 %vm2125_vm0, %v10094_v10  ;;  %v3092_v36 = vadd.f32 %v10885_v21, %v10746_v26  ;;  %v5637_v52 = vpack.c.bf16 %v5020_v46, %v5019_v55  ;;  %v5033_v10 = vmax.f32 %v3161_v4, 0.0  ;;  %v10097_v26 = vld [vmem:[%s10289_s15 + $0x2a0] sm:$0xff]   ;;  %v5409_v39 = vmax.f32 %v4665_v25, 0.0 }
 0x155   : > { %v5646_v37 = vpack.c.bf16 %v5038_v5, %v5037_v41  ;;  %v5036_v2 = vmax.f32 %v3172_v57, 0.0  ;;  %9569 = vmatprep.mubr.msk.bf16.mxu0 %vm2125_vm0, %v10095_v19  ;;  %13221 = vst [vmem:[#allocation18_spill] sm:$0xff] %v10879_v12  ;;  %v5018_v41 = vmax.f32 %v10858_v44, 0.0  ;;  %v3193_v35 = vadd.f32 %v10885_v21, %v9471_v49 }
 0x156   : > { %v3184_v62 = vpop.f32.mrf.mxu0  ;;  %v5404_v19 = vmax.f32 %v4644_v22, 0.0  ;;  %v3148_v46 = vadd.f32 %v10885_v21, %v10798_v38  ;;  %v5644_v55 = vpack.c.bf16 %v5034_v33, %v5033_v10  ;;  %v5032_v5 = vmax.f32 %v3156_v23, 0.0 }
 0x157   : > { %8790 = vmatprep.subr.bf16.mxu1 %v5646_v37  ;;  %v5645_v42 = vpack.c.bf16 %v5036_v2, %v5035_v30  ;;  %v3185_v44 = vadd.f32 %v10885_v21, %v3184_v62  ;;  %v5410_v30 = vmax.f32 %v4668_v56, 0.0  ;;  %v5017_v37 = vmax.f32 %v10854_v58, 0.0 }
 0x158   : > { %v9472_v61 = vpop.f32.mrf.mxu0  ;;  %8791 = vmatpush3.bf16.msra.mxu1 %v5638_v63  ;;  %v10902_v57 = vpack.c.bf16 %v5404_v19, %v5403_v17  ;;  %v5041_v63 = vmax.f32 %v3193_v35, 0.0  ;;  %v3089_v2 = vadd.f32 %v10885_v21, %v10733_v11  ;;  %v3145_v62 = vadd.f32 %v10885_v21, %v10791_v14 }
 0x159   : > { %v3196_v28 = vadd.f32 %v10885_v21, %v9472_v61  ;;  %8792 = vmatprep.subr.bf16.mxu1 %v5645_v42  ;;  %v5031_v22 = vmax.f32 %v3153_v59, 0.0  ;;  %v5039_v33 = vmax.f32 %v3185_v44, 0.0  ;;  %v10914_v58 = vpack.c.bf16 %v5410_v30, %v5409_v39 }
 0x15a   : > { %v3187_v20 = vpop.f32.mrf.mxu0  ;;  %13222 = vst [vmem:[#allocation19_spill] sm:$0xff] %v10902_v57  ;;  %v5636_v25 = vpack.c.bf16 %v5018_v41, %v5017_v37  ;;  %v5016_v11 = vmax.f32 %v3092_v36, 0.0  ;;  %v5030_v35 = vmax.f32 %v3148_v46, 0.0  ;;  %v3140_v42 = vadd.f32 %v10885_v21, %v10809_v6 }
 0x15b   : > { %v5042_v4 = vmax.f32 %v3196_v28, 0.0  ;;  %v3188_v49 = vadd.f32 %v10885_v21, %v3187_v20  ;;  %13223 = vst [vmem:[#allocation20_spill] sm:$0xff] %v10914_v58  ;;  %v5643_v59 = vpack.c.bf16 %v5032_v5, %v5031_v22  ;;  %v5015_v61 = vmax.f32 %v3089_v2, 0.0  ;;  %v10099_v28 = vld [vmem:[%s10289_s15 + $0x2b0] sm:$0xff]  }
 0x15c   : > { %v9475_v38 = vpop.f32.mrf.mxu0  ;;  %9570 = vmatmul.mubr.msk.bf16.gmra.mxu0 %vm2125_vm0, %v10096_v3  ;;  %8793 = vmatpush3.bf16.msra.mxu1 %v5637_v52  ;;  %v5029_v3 = vmax.f32 %v3145_v62, 0.0  ;;  %v3137_v41 = vadd.f32 %v10885_v21, %v10796_v24  ;;  %v5028_v46 = vmax.f32 %v3140_v42, 0.0  ;;  %v3129_v24 = vadd.f32 %v10885_v21, %v10770_v43 }
 0x15d   : > { %v10911_v23 = vpack.c.bf16 %v5042_v4, %v5041_v63  ;;  %v5040_v17 = vmax.f32 %v3188_v49, 0.0  ;;  %8794 = vmatprep.subr.bf16.mxu1 %v5644_v55  ;;  %9573 = vmatprep.mubr.msk.bf16.mxu0 %vm2125_vm0, %v10097_v26  ;;  %v3209_v52 = vadd.f32 %v10885_v21, %v9475_v38  ;;  %v5635_v6 = vpack.c.bf16 %v5016_v11, %v5015_v61  ;;  %v10101_v11 = vld [vmem:[%s10289_s15 + $0x2c0] sm:$0xff]   ;;  %v10102_v61 = vld [vmem:[%s10289_s15 + $0x2c8] sm:$0xff]  }
 0x15e   : > { %v3200_v14 = vpop.f32.mrf.mxu0  ;;  %v3132_v26 = vadd.f32 %v10885_v21, %v10777_v47  ;;  %v5642_v39 = vpack.c.bf16 %v5030_v35, %v5029_v3  ;;  %v5027_v4 = vmax.f32 %v3137_v41, 0.0  ;;  %v3124_v43 = vadd.f32 %v10885_v21, %v10789_v51  ;;  %v10103_v3 = vld [vmem:[%s10289_s15 + $0x2d0] sm:$0xff]  }
 0x15f   : > { %v10918_v10 = vpack.c.bf16 %v5040_v17, %v5039_v33  ;;  %v3201_v36 = vadd.f32 %v10885_v21, %v3200_v14  ;;  %v5045_v55 = vmax.f32 %v3209_v52, 0.0  ;;  %v10100_v33 = vld [vmem:[%s10289_s15 + $0x2b8] sm:$0xff]   ;;  %v5025_v17 = vmax.f32 %v3129_v24, 0.0 }
 0x160   : > { %v9476_v19 = vpop.f32.mrf.mxu0  ;;  %8795 = vmatpush3.bf16.msra.mxu1 %v5636_v25  ;;  %v5026_v2 = vmax.f32 %v3132_v26, 0.0  ;;  %v5641_v22 = vpack.c.bf16 %v5028_v46, %v5027_v4  ;;  %v3121_v25 = vadd.f32 %v10885_v21, %v10775_v45  ;;  %v5024_v51 = vmax.f32 %v3124_v43, 0.0  ;;  %v10985_v26 = vpop.f32.mrf.mxu1 }
 0x161   : > { %v3212_v44 = vadd.f32 %v10885_v21, %v9476_v19  ;;  %8796 = vmatprep.subr.bf16.mxu1 %v5643_v59  ;;  %v5043_v49 = vmax.f32 %v3201_v36, 0.0  ;;  %v5536_v19 = vld [vmem:[%s13197_s1 + $0x188] sm:$0xff]  ;;  %v8351_v41 = vcombine.low %v10827_v29, %v10832_v31  ;;  %13224 = vst [vmem:[#allocation21_spill] sm:$0xff] %v10985_v26 }
 0x162   : > { %v3203_v56 = vpop.f32.mrf.mxu0  ;;  %v5640_v14 = vpack.c.bf16 %v5026_v2, %v5025_v17  ;;  %v5552_v29 = vld [vmem:[%s13197_s1 + $0x208] sm:$0xff] }
 0x163   : > { %v5046_v5 = vmax.f32 %v3212_v44, 0.0  ;;  %v3204_v20 = vadd.f32 %v10885_v21, %v3203_v56  ;;  %v9843_v56 = vpop.f32.mrf.mxu1  ;;  %v10106_v2 = vld [vmem:[%s10289_s15 + $0x2e8] sm:$0xff]  }
 0x164   : > { %v10932_v63 = vpop.f32.mrf.mxu0  ;;  %9574 = vmatmul.mubr.msk.bf16.gmra.mxu0 %vm2125_vm0, %v10098_v48  ;;  %8797 = vmatpush3.bf16.msra.mxu1 %v5635_v6  ;;  %v10104_v6 = vld [vmem:[%s10289_s15 + $0x2d8] sm:$0xff]   ;;  %v4681_v24 = vadd.f32 %v10885_v21, %v9843_v56  ;;  %v5600_v17 = vld [vmem:[%s13197_s1 + $0x388] sm:$0xff]  ;;  %v10109_v56 = vld [vmem:[%s10289_s15 + $0x300] sm:$0xff]  }
 0x165   : > { %v10935_v47 = vpack.c.bf16 %v5046_v5, %v5045_v55  ;;  %v5044_v30 = vmax.f32 %v3204_v20, 0.0  ;;  %8798 = vmatprep.subr.bf16.mxu1 %v5642_v39  ;;  %9577 = vmatprep.mubr.msk.bf16.mxu0 %vm2125_vm0, %v10099_v28  ;;  %v10105_v39 = vld [vmem:[%s10289_s15 + $0x2e0] sm:$0xff]   ;;  %v10999_v20 = vpop.f32.mrf.mxu1  ;;  %v10110_v26 = vld [vmem:[%s10289_s15 + $0x308] sm:$0xff]  }
 0x166   : > { %v10938_v37 = vpop.f32.mrf.mxu0 }
 0x167   : > { %v10942_v62 = vpack.c.bf16 %v5044_v30, %v5043_v49  ;;  %v9844_v49 = vpop.f32.mrf.mxu1 }
 0x168   : > { %v10944_v38 = vpop.f32.mrf.mxu0  ;;  %8799 = vmatpush3.bf16.msra.mxu1 %v10730_v7  ;;  %v5023_v7 = vmax.f32 %v3121_v25, 0.0  ;;  %v5413_v25 = vmax.f32 %v4681_v24, 0.0 }
 0x169   : > { %8800 = vmatprep.subr.bf16.mxu1 %v5641_v22  ;;  %v11008_v43 = vpop.f32.mrf.mxu1  ;;  %v10107_v22 = vld [vmem:[%s10289_s15 + $0x2f0] sm:$0xff]  }
 0x16a   : > { %v10951_v35 = vpop.f32.mrf.mxu0  ;;  %v5639_v45 = vpack.c.bf16 %v5024_v51, %v5023_v7 }
 0x16b   : > { %v9847_v51 = vpop.f32.mrf.mxu1 }
 0x16c   : > { %v10953_v42 = vpop.f32.mrf.mxu0  ;;  %9578 = vmatmul.mubr.msk.bf16.gmra.mxu0 %vm2125_vm0, %v10100_v33  ;;  %8801 = vmatpush3.bf16.msra.mxu1 %v10737_v8  ;;  %v5520_v8 = vld [vmem:[%s13197_s1 + $0x108] sm:$0xff] }
 0x16d   : > { %8802 = vmatprep.subr.bf16.mxu1 %v5640_v14  ;;  %9581 = vmatprep.mubr.msk.bf16.mxu0 %vm2125_vm0, %v10101_v11  ;;  %v8383_v46 = vcombine.low %v5520_v8, %v5536_v19  ;;  %v5584_v33 = vld [vmem:[%s13197_s1 + $0x308] sm:$0xff]  ;;  %v4684_v11 = vadd.f32 %v10885_v21, %v9844_v49 }
 0x16e   : > { %v10958_v52 = vpop.f32.mrf.mxu0 }
 0x170   : > { %v10960_v59 = vpop.f32.mrf.mxu0  ;;  %8803 = vmatpush3.bf16.msra.mxu1 %v10705_v15  ;;  %v8384_v15 = vcombine.high %v5520_v8, %v5536_v19  ;;  %v11021_v8 = vpop.f32.mrf.mxu1 }
 0x171   : > { %8804 = vmatprep.subr.bf16.mxu1 %v5639_v45  ;;  %v5414_v45 = vmax.f32 %v4684_v11, 0.0 }
 0x172   : > { %v10971_v48 = vpop.f32.mrf.mxu0 }
 0x173   : > { %v11024_v19 = vpack.c.bf16 %v5414_v45, %v5413_v25  ;;  %v8447_v25 = vcombine.low %v5584_v33, %v5600_v17 }
 0x174   : > { %v10975_v36 = vpop.f32.mrf.mxu0  ;;  %9582 = vmatmul.mubr.msk.bf16.gmra.mxu0 %vm2125_vm0, %v10102_v61  ;;  %8805 = vmatpush3.bf16.msra.mxu1 %v10710_v9  ;;  %v5568_v9 = vld [vmem:[%s13197_s1 + $0x288] sm:$0xff] }
 0x175   : > { %9585 = vmatprep.mubr.msk.bf16.mxu0 %vm2125_vm0, %v10103_v3  ;;  %v8416_v5 = vcombine.high %v5552_v29, %v5568_v9  ;;  %v8415_v7 = vcombine.low %v5552_v29, %v5568_v9  ;;  %v8448_v3 = vcombine.high %v5584_v33, %v5600_v17  ;;  %13225 = vst [vmem:[#allocation22_spill] sm:$0xff] %v11024_v19  ;;  %v10108_v29 = vld [vmem:[%s10289_s15 + $0x2f8] sm:$0xff]  }
 0x176   : > { %v10980_v44 = vpop.f32.mrf.mxu0  ;;  %v3241_v33 = vadd.f32 %v10885_v21, %v10953_v42 }
 0x177   : > { %6609 = vmatmul.mubr.bf16.vlgmr.msra.gmra.mxu1 %v8351_v41 }
 0x178   : > { %v10982_v28 = vpop.f32.mrf.mxu0  ;;  %6616 = vmatprep.mubr.bf16.mxu1 %v8384_v15  ;;  %v4697_v15 = vadd.f32 %v10885_v21, %v9847_v51  ;;  %v3244_v51 = vadd.f32 %v10885_v21, %v10960_v59 }
 0x17a   : > { %v10994_v31 = vpop.f32.mrf.mxu0  ;;  %v5417_v24 = vmax.f32 %v4697_v15, 0.0 }
 0x17c   : > { %v10996_v55 = vpop.f32.mrf.mxu0  ;;  %9586 = vmatmul.mubr.msk.bf16.gmra.mxu0 %vm2125_vm0, %v10104_v6  ;;  %v9848_v6 = vpop.f32.mrf.mxu1 }
 0x17d   : > { %9589 = vmatprep.mubr.msk.bf16.mxu0 %vm2125_vm0, %v10105_v39  ;;  %v4700_v49 = vadd.f32 %v10885_v21, %v9848_v6 }
 0x17e   : > { %v11003_v4 = vpop.f32.mrf.mxu0  ;;  %v11030_v9 = vpop.f32.mrf.mxu1 }
 0x17f   : > { %6617 = vmatmul.mubr.bf16.gmra.mxu1 %v8383_v46  ;;  %13226 = vst [vmem:[#allocation23_spill] sm:$0xff] %v11030_v9  ;;  %v11036_v46 = vld [vmem:[%s13197_s1 + $0x10] sm:$0xff]  ;;  %v5418_v11 = vmax.f32 %v4700_v49, 0.0 }
 0x180   : > { %v11005_v30 = vpop.f32.mrf.mxu0  ;;  %6624 = vmatprep.mubr.bf16.mxu1 %v8416_v5  ;;  %v11041_v5 = vld [vmem:[%s13197_s1 + $0x90] sm:$0xff] }
 0x181   : > { %v8354_v45 = vcombine.high %v11036_v46, %v11041_v5  ;;  %v11052_v15 = vpack.c.bf16 %v5418_v11, %v5417_v24  ;;  %v10111_v11 = vld [vmem:[%s10289_s15 + $0x310] sm:$0xff]  }
 0x182   : > { %v11018_v14 = vpop.f32.mrf.mxu0 }
 0x183   : > { %13228 = vst [vmem:[#allocation25_spill] sm:$0xff] %v11052_v15 }
 0x184   : > { %v9495_v61 = vpop.f32.mrf.mxu0  ;;  %9590 = vmatmul.mubr.msk.bf16.gmra.mxu0 %vm2125_vm0, %v10106_v2 }
 0x185   : > { %9593 = vmatprep.mubr.msk.bf16.mxu0 %vm2125_vm0, %v10107_v22  ;;  %v9851_v22 = vpop.f32.mrf.mxu1 }
 0x186   : > { %v11026_v41 = vpop.f32.mrf.mxu0  ;;  %v4713_v6 = vadd.f32 %v10885_v21, %v9851_v22  ;;  %v11067_v22 = vadd.f32 %v10885_v21, %v10944_v38  ;;  %v3289_v38 = vadd.f32 %v10885_v21, %v9495_v61 }
 0x187   : > { %6625 = vmatmul.mubr.bf16.gmra.mxu1 %v8415_v7 }
 0x188   : > { %v9496_v39 = vpop.f32.mrf.mxu0  ;;  %6632 = vmatprep.mubr.bf16.mxu1 %v8448_v3  ;;  %v11049_v3 = vpop.f32.mrf.mxu1  ;;  %v5421_v19 = vmax.f32 %v4713_v6, 0.0  ;;  %v3233_v6 = vadd.f32 %v10885_v21, %v10958_v52 }
 0x189   : > { %13227 = vst [vmem:[#allocation24_spill] sm:$0xff] %v11049_v3 }
 0x18a   : > { %v3283_v2 = vpop.f32.mrf.mxu0  ;;  %v9852_v59 = vpop.f32.mrf.mxu1 }
 0x18b   : > { %v4716_v42 = vadd.f32 %v10885_v21, %v9852_v59  ;;  %v3284_v52 = vadd.f32 %v10885_v21, %v3283_v2  ;;  %v3281_v2 = vadd.f32 %v10885_v21, %v11026_v41 }
 0x18c   : > { %v9499_v7 = vpop.f32.mrf.mxu0  ;;  %9594 = vmatmul.mubr.msk.bf16.gmra.mxu0 %vm2125_vm0, %v10108_v29  ;;  %v5054_v29 = vmax.f32 %v3244_v51, 0.0  ;;  %v11059_v50 = vpop.f32.mrf.mxu1  ;;  %v3292_v51 = vadd.f32 %v10885_v21, %v9496_v39 }
 0x18d   : > { %9597 = vmatprep.mubr.msk.bf16.mxu0 %vm2125_vm0, %v10109_v56  ;;  %v3305_v49 = vadd.f32 %v10885_v21, %v9499_v7  ;;  %13229 = vst [vmem:[#allocation26_spill] sm:$0xff] %v11059_v50  ;;  %v5053_v7 = vmax.f32 %v3241_v33, 0.0  ;;  %v5422_v57 = vmax.f32 %v4716_v42, 0.0 }
 0x18e   : > { %v3296_v17 = vpop.f32.mrf.mxu0  ;;  %v9855_v53 = vpop.f32.mrf.mxu1  ;;  %v5066_v42 = vmax.f32 %v3292_v51, 0.0 }
 0x18f   : > { %6633 = vmatmul.mubr.bf16.gmra.mxu1 %v8447_v25  ;;  %v3297_v56 = vadd.f32 %v10885_v21, %v3296_v17  ;;  %v3236_v25 = vadd.f32 %v10885_v21, %v10971_v48  ;;  %v5069_v15 = vmax.f32 %v3305_v49, 0.0  ;;  %v5654_v59 = vpack.c.bf16 %v5054_v29, %v5053_v7 }
 0x190   : > { %v9500_v58 = vpop.f32.mrf.mxu0  ;;  %6673 = vmatprep.mubr.bf16.mxu1 %v8354_v45  ;;  %v11077_v33 = vpop.f32.mrf.mxu1  ;;  %v11080_v49 = vpack.c.bf16 %v5422_v57, %v5421_v19  ;;  %v4729_v61 = vadd.f32 %v10885_v21, %v9855_v53  ;;  %v3220_v57 = vadd.f32 %v10885_v21, %v10951_v35  ;;  %v5051_v19 = vmax.f32 %v3233_v6, 0.0  ;;  %v10112_v53 = vld [vmem:[%s10289_s15 + $0x318] sm:$0xff]  }
 0x191   : > { %v3308_v24 = vadd.f32 %v10885_v21, %v9500_v58  ;;  %13230 = vst [vmem:[#allocation27_spill] sm:$0xff] %v11077_v33  ;;  %v5067_v48 = vmax.f32 %v3297_v56, 0.0  ;;  %v5050_v56 = vmax.f32 %v11067_v22, 0.0  ;;  %v5065_v7 = vmax.f32 %v3289_v38, 0.0 }
 0x192   : > { %v3299_v45 = vpop.f32.mrf.mxu0  ;;  %13231 = vst [vmem:[#allocation28_spill] sm:$0xff] %v11080_v49  ;;  %v9856_v51 = vpop.f32.mrf.mxu1  ;;  %v3276_v35 = vadd.f32 %v10885_v21, %v11005_v30  ;;  %v5064_v6 = vmax.f32 %v3284_v52, 0.0 }
 0x193   : > { %v5070_v17 = vmax.f32 %v3308_v24, 0.0  ;;  %v3300_v58 = vadd.f32 %v10885_v21, %v3299_v45  ;;  %v5052_v24 = vmax.f32 %v3236_v25, 0.0  ;;  %v5425_v45 = vmax.f32 %v4729_v61, 0.0 }
 0x194   : > { %v9503_v12 = vpop.f32.mrf.mxu0  ;;  %9598 = vmatmul.mubr.msk.bf16.gmra.mxu0 %vm2125_vm0, %v10110_v26  ;;  %v3225_v26 = vadd.f32 %v10885_v21, %v10932_v63  ;;  %v3273_v61 = vadd.f32 %v10885_v21, %v10996_v55 }
 0x195   : > { %v5662_v39 = vpack.c.bf16 %v5070_v17, %v5069_v15  ;;  %v5068_v1 = vmax.f32 %v3300_v58, 0.0  ;;  %9601 = vmatprep.mubr.msk.bf16.mxu0 %vm2125_vm0, %v10111_v11  ;;  %v3321_v15 = vadd.f32 %v10885_v21, %v9503_v12  ;;  %v10113_v12 = vld [vmem:[%s10289_s15 + $0x320] sm:$0xff]   ;;  %v5653_v17 = vpack.c.bf16 %v5052_v24, %v5051_v19 }
 0x196   : > { %v3312_v29 = vpop.f32.mrf.mxu0  ;;  %v5660_v58 = vpack.c.bf16 %v5066_v42, %v5065_v7  ;;  %v5062_v19 = vmax.f32 %v3276_v35, 0.0  ;;  %v3268_v7 = vadd.f32 %v10885_v21, %v11018_v14  ;;  %v3260_v35 = vadd.f32 %v10885_v21, %v10982_v28 }
 0x197   : > { %8830 = vmatprep.subr.bf16.mxu1 %v5662_v39  ;;  %v5661_v11 = vpack.c.bf16 %v5068_v1, %v5067_v48  ;;  %v3313_v63 = vadd.f32 %v10885_v21, %v3312_v29  ;;  %v4732_v1 = vadd.f32 %v10885_v21, %v9856_v51  ;;  %v5073_v38 = vmax.f32 %v3321_v15, 0.0 }
 0x198   : > { %v9504_v25 = vpop.f32.mrf.mxu0  ;;  %8831 = vmatpush3.bf16.msra.mxu1 %v5654_v59  ;;  %v5049_v29 = vmax.f32 %v3225_v26, 0.0 }
 0x199   : > { %v3324_v22 = vadd.f32 %v10885_v21, %v9504_v25  ;;  %8832 = vmatprep.subr.bf16.mxu1 %v5661_v11  ;;  %v5426_v39 = vmax.f32 %v4732_v1, 0.0  ;;  %v3217_v11 = vadd.f32 %v10885_v21, %v10938_v37  ;;  %v5063_v25 = vmax.f32 %v3281_v2, 0.0 }
 0x19a   : > { %v3315_v41 = vpop.f32.mrf.mxu0  ;;  %v5071_v30 = vmax.f32 %v3313_v63, 0.0  ;;  %v5652_v15 = vpack.c.bf16 %v5050_v56, %v5049_v29  ;;  %v5048_v37 = vmax.f32 %v3220_v57, 0.0  ;;  %v3265_v56 = vadd.f32 %v10885_v21, %v11003_v4 }
 0x19b   : > { %v5074_v59 = vmax.f32 %v3324_v22, 0.0  ;;  %v3316_v48 = vadd.f32 %v10885_v21, %v3315_v41  ;;  %v11108_v26 = vpack.c.bf16 %v5426_v39, %v5425_v45  ;;  %v5659_v51 = vpack.c.bf16 %v5064_v6, %v5063_v25 }
 0x19c   : > { %v9507_v24 = vpop.f32.mrf.mxu0  ;;  %9602 = vmatmul.mubr.msk.bf16.gmra.mxu0 %vm2125_vm0, %v10112_v53  ;;  %8833 = vmatpush3.bf16.msra.mxu1 %v5653_v17  ;;  %v5047_v63 = vmax.f32 %v3217_v11, 0.0  ;;  %v5061_v22 = vmax.f32 %v3273_v61, 0.0  ;;  %v10115_v17 = vld [vmem:[%s10289_s15 + $0x330] sm:$0xff]   ;;  %v5060_v41 = vmax.f32 %v3268_v7, 0.0  ;;  %v3257_v4 = vadd.f32 %v10885_v21, %v10975_v36  ;;  %v10117_v7 = vld [vmem:[%s10289_s15 + $0x340] sm:$0xff]  }
 0x19d   : > { %v11105_v42 = vpack.c.bf16 %v5074_v59, %v5073_v38  ;;  %v5072_v52 = vmax.f32 %v3316_v48, 0.0  ;;  %8834 = vmatprep.subr.bf16.mxu1 %v5660_v58  ;;  %9605 = vmatprep.mubr.msk.bf16.mxu0 %vm2125_vm0, %v10113_v12  ;;  %13232 = vst [vmem:[#allocation29_spill] sm:$0xff] %v11108_v26  ;;  %v3337_v53 = vadd.f32 %v10885_v21, %v9507_v24  ;;  %v10114_v12 = vld [vmem:[%s10289_s15 + $0x328] sm:$0xff]   ;;  %v5059_v29 = vmax.f32 %v3265_v56, 0.0  ;;  %v10119_v56 = vld [vmem:[%s10289_s15 + $0x350] sm:$0xff]  }
 0x19e   : > { %v3328_v55 = vpop.f32.mrf.mxu0  ;;  %v5651_v14 = vpack.c.bf16 %v5048_v37, %v5047_v63  ;;  %v5658_v58 = vpack.c.bf16 %v5062_v19, %v5061_v22  ;;  %v5058_v24 = vmax.f32 %v3260_v35, 0.0  ;;  %v3252_v36 = vadd.f32 %v10885_v21, %v10994_v31  ;;  %v10116_v37 = vld [vmem:[%s10289_s15 + $0x338] sm:$0xff]  }
 0x19f   : > { %v11112_v2 = vpack.c.bf16 %v5072_v52, %v5071_v30  ;;  %v3329_v57 = vadd.f32 %v10885_v21, %v3328_v55  ;;  %v5077_v38 = vmax.f32 %v3337_v53, 0.0  ;;  %v5657_v52 = vpack.c.bf16 %v5060_v41, %v5059_v29  ;;  %v11179_v41 = vpop.f32.mrf.mxu1 }
 0x1a0   : > { %v9508_v1 = vpop.f32.mrf.mxu0  ;;  %8835 = vmatpush3.bf16.msra.mxu1 %v5652_v15  ;;  %v5057_v19 = vmax.f32 %v3257_v4, 0.0  ;;  %v3249_v55 = vadd.f32 %v10885_v21, %v10980_v44  ;;  %v5056_v31 = vmax.f32 %v3252_v36, 0.0  ;;  %13233 = vst [vmem:[#allocation30_spill] sm:$0xff] %v11179_v41 }
 0x1a1   : > { %v3340_v45 = vadd.f32 %v10885_v21, %v9508_v1  ;;  %8836 = vmatprep.subr.bf16.mxu1 %v5659_v51  ;;  %v5075_v11 = vmax.f32 %v3329_v57, 0.0  ;;  %v5537_v57 = vld [vmem:[%s13197_s1 + $0x190] sm:$0xff] }
 0x1a2   : > { %v3331_v6 = vpop.f32.mrf.mxu0  ;;  %v5656_v51 = vpack.c.bf16 %v5058_v24, %v5057_v19 }
 0x1a3   : > { %v5078_v59 = vmax.f32 %v3340_v45, 0.0  ;;  %v3332_v48 = vadd.f32 %v10885_v21, %v3331_v6  ;;  %v10120_v6 = vld [vmem:[%s10289_s15 + $0x358] sm:$0xff]  }
 0x1a4   : > { %v11126_v39 = vpop.f32.mrf.mxu0  ;;  %9606 = vmatmul.mubr.msk.bf16.gmra.mxu0 %vm2125_vm0, %v10114_v12  ;;  %8837 = vmatpush3.bf16.msra.mxu1 %v5651_v14  ;;  %v10118_v12 = vld [vmem:[%s10289_s15 + $0x348] sm:$0xff]  }
 0x1a5   : > { %v11129_v28 = vpack.c.bf16 %v5078_v59, %v5077_v38  ;;  %v5076_v61 = vmax.f32 %v3332_v48, 0.0  ;;  %8838 = vmatprep.subr.bf16.mxu1 %v5658_v58  ;;  %9609 = vmatprep.mubr.msk.bf16.mxu0 %vm2125_vm0, %v10115_v17  ;;  %v8353_v17 = vcombine.low %v11036_v46, %v11041_v5  ;;  %v10121_v38 = vld [vmem:[%s10289_s15 + $0x360] sm:$0xff]   ;;  %v5553_v46 = vld [vmem:[%s13197_s1 + $0x210] sm:$0xff]  ;;  %v9859_v59 = vpop.f32.mrf.mxu1 }
 0x1a6   : > { %v11132_v25 = vpop.f32.mrf.mxu0 }
 0x1a7   : > { %v11136_v30 = vpack.c.bf16 %v5076_v61, %v5075_v11  ;;  %v4736_v11 = vpop.f32.mrf.mxu1  ;;  %v4745_v61 = vadd.f32 %v10885_v21, %v9859_v59 }
 0x1a8   : > { %v11138_v15 = vpop.f32.mrf.mxu0  ;;  %8839 = vmatpush3.bf16.msra.mxu1 %v10935_v47  ;;  %v5055_v47 = vmax.f32 %v3249_v55, 0.0  ;;  %v10123_v55 = vld [vmem:[%s10289_s15 + $0x370] sm:$0xff]  }
 0x1a9   : > { %8840 = vmatprep.subr.bf16.mxu1 %v5657_v52  ;;  %v9860_v36 = vpop.f32.mrf.mxu1 }
 0x1aa   : > { %v11145_v53 = vpop.f32.mrf.mxu0  ;;  %v5655_v44 = vpack.c.bf16 %v5056_v31, %v5055_v47  ;;  %v5429_v31 = vmax.f32 %v4745_v61, 0.0  ;;  %v4748_v47 = vadd.f32 %v10885_v21, %v9860_v36  ;;  %v10124_v61 = vld [vmem:[%s10289_s15 + $0x378] sm:$0xff]  }
 0x1ab   : > { %v4739_v19 = vpop.f32.mrf.mxu1 }
 0x1ac   : > { %v11147_v63 = vpop.f32.mrf.mxu0  ;;  %9610 = vmatmul.mubr.msk.bf16.gmra.mxu0 %vm2125_vm0, %v10116_v37  ;;  %8841 = vmatpush3.bf16.msra.mxu1 %v10942_v62  ;;  %v5521_v62 = vld [vmem:[%s13197_s1 + $0x110] sm:$0xff]  ;;  %v10122_v37 = vld [vmem:[%s10289_s15 + $0x368] sm:$0xff]  }
 0x1ad   : > { %8842 = vmatprep.subr.bf16.mxu1 %v5656_v51  ;;  %9613 = vmatprep.mubr.msk.bf16.mxu0 %vm2125_vm0, %v10117_v7  ;;  %v8385_v48 = vcombine.low %v5521_v62, %v5537_v57  ;;  %v5585_v7 = vld [vmem:[%s13197_s1 + $0x310] sm:$0xff] }
 0x1ae   : > { %v11152_v22 = vpop.f32.mrf.mxu0  ;;  %v5601_v51 = vld [vmem:[%s13197_s1 + $0x390] sm:$0xff] }
 0x1b0   : > { %v11154_v1 = vpop.f32.mrf.mxu0  ;;  %8843 = vmatpush3.bf16.msra.mxu1 %v10911_v23  ;;  %v8386_v23 = vcombine.high %v5521_v62, %v5537_v57  ;;  %v5430_v57 = vmax.f32 %v4748_v47, 0.0  ;;  %v10125_v47 = vld [vmem:[%s10289_s15 + $0x380] sm:$0xff]  }
 0x1b1   : > { %8844 = vmatprep.subr.bf16.mxu1 %v5655_v44  ;;  %v3372_v41 = vadd.f32 %v10885_v21, %v11154_v1 }
 0x1b2   : > { %v11165_v45 = vpop.f32.mrf.mxu0 }
 0x1b4   : > { %v11169_v14 = vpop.f32.mrf.mxu0  ;;  %9614 = vmatmul.mubr.msk.bf16.gmra.mxu0 %vm2125_vm0, %v10118_v12  ;;  %8845 = vmatpush3.bf16.msra.mxu1 %v10918_v10  ;;  %v5569_v10 = vld [vmem:[%s13197_s1 + $0x290] sm:$0xff]  ;;  %v4737_v12 = vadd.f32 %v10885_v21, %v4736_v11 }
 0x1b5   : > { %9617 = vmatprep.mubr.msk.bf16.mxu0 %vm2125_vm0, %v10119_v56  ;;  %v8418_v29 = vcombine.high %v5553_v46, %v5569_v10  ;;  %v9863_v56 = vpop.f32.mrf.mxu1  ;;  %v8417_v62 = vcombine.low %v5553_v46, %v5569_v10 }
 0x1b6   : > { %v11174_v35 = vpop.f32.mrf.mxu0  ;;  %v4761_v11 = vadd.f32 %v10885_v21, %v9863_v56 }
 0x1b7   : > { %6674 = vmatmul.mubr.bf16.vlgmr.msra.gmra.mxu1 %v8353_v17 }
 0x1b8   : > { %v11176_v58 = vpop.f32.mrf.mxu0  ;;  %6681 = vmatprep.mubr.bf16.mxu1 %v8386_v23  ;;  %v8450_v23 = vcombine.high %v5585_v7, %v5601_v51 }
 0x1ba   : > { %v11188_v5 = vpop.f32.mrf.mxu0 }
 0x1bc   : > { %v11190_v4 = vpop.f32.mrf.mxu0  ;;  %9618 = vmatmul.mubr.msk.bf16.gmra.mxu0 %vm2125_vm0, %v10120_v6  ;;  %v4752_v6 = vpop.f32.mrf.mxu1 }
 0x1bd   : > { %9621 = vmatprep.mubr.msk.bf16.mxu0 %vm2125_vm0, %v10121_v38  ;;  %v11215_v38 = vpack.c.bf16 %v5430_v57, %v5429_v31  ;;  %v11231_v31 = vld [vmem:[%s13197_s1 + $0x98] sm:$0xff]  ;;  %v4753_v57 = vadd.f32 %v10885_v21, %v4752_v6 }
 0x1be   : > { %v11195_v24 = vpop.f32.mrf.mxu0  ;;  %v9864_v46 = vpop.f32.mrf.mxu1 }
 0x1bf   : > { %6682 = vmatmul.mubr.bf16.gmra.mxu1 %v8385_v48  ;;  %13234 = vst [vmem:[#allocation31_spill] sm:$0xff] %v11215_v38  ;;  %v5427_v48 = vmax.f32 %v4737_v12, 0.0  ;;  %v4764_v12 = vadd.f32 %v10885_v21, %v9864_v46  ;;  %v3369_v46 = vadd.f32 %v10885_v21, %v11147_v63  ;;  %v5431_v1 = vmax.f32 %v4753_v57, 0.0  ;;  %v10126_v57 = vld [vmem:[%s10289_s15 + $0x388] sm:$0xff]  }
 0x1c0   : > { %v11197_v52 = vpop.f32.mrf.mxu0  ;;  %6689 = vmatprep.mubr.bf16.mxu1 %v8418_v29  ;;  %v4740_v29 = vadd.f32 %v10885_v21, %v4739_v19  ;;  %v5433_v19 = vmax.f32 %v4761_v11, 0.0  ;;  %v11257_v63 = vadd.f32 %v10885_v21, %v11138_v15  ;;  %v10127_v15 = vld [vmem:[%s10289_s15 + $0x390] sm:$0xff]  }
 0x1c1   : > { %v5434_v26 = vmax.f32 %v4764_v12, 0.0  ;;  %v11253_v12 = vadd.f32 %v10885_v21, %v11126_v39 }
 0x1c2   : > { %v11208_v44 = vpop.f32.mrf.mxu0  ;;  %v5428_v36 = vmax.f32 %v4740_v29, 0.0  ;;  %v8449_v29 = vcombine.low %v5585_v7, %v5601_v51  ;;  %v3361_v7 = vadd.f32 %v10885_v21, %v11152_v22  ;;  %v5086_v22 = vmax.f32 %v3372_v41, 0.0 }
 0x1c3   : > { %v11245_v6 = vpack.c.bf16 %v5434_v26, %v5433_v19 }
 0x1c4   : > { %v11211_v17 = vpop.f32.mrf.mxu0  ;;  %9622 = vmatmul.mubr.msk.bf16.gmra.mxu0 %vm2125_vm0, %v10122_v37  ;;  %v4755_v37 = vpop.f32.mrf.mxu1  ;;  %v5083_v41 = vmax.f32 %v3361_v7, 0.0 }
 0x1c5   : > { %9625 = vmatprep.mubr.msk.bf16.mxu0 %vm2125_vm0, %v10123_v55  ;;  %v11226_v55 = vld [vmem:[%s13197_s1 + $0x18] sm:$0xff]  ;;  %13236 = vst [vmem:[#allocation33_spill] sm:$0xff] %v11245_v6 }
 0x1c6   : > { %v11217_v59 = vpop.f32.mrf.mxu0  ;;  %v8356_v38 = vcombine.high %v11226_v55, %v11231_v31 }
 0x1c7   : > { %6690 = vmatmul.mubr.bf16.gmra.mxu1 %v8417_v62  ;;  %v11234_v62 = vpack.c.bf16 %v5428_v36, %v5427_v48  ;;  %v4756_v48 = vadd.f32 %v10885_v21, %v4755_v37 }
 0x1c8   : > { %v9528_v10 = vpop.f32.mrf.mxu0  ;;  %6697 = vmatprep.mubr.bf16.mxu1 %v8450_v23  ;;  %v9867_v23 = vpop.f32.mrf.mxu1 }
 0x1c9   : > { %13235 = vst [vmem:[#allocation32_spill] sm:$0xff] %v11234_v62  ;;  %v3420_v37 = vadd.f32 %v10885_v21, %v9528_v10 }
 0x1ca   : > { %v3411_v56 = vpop.f32.mrf.mxu0  ;;  %v4768_v11 = vpop.f32.mrf.mxu1 }
 0x1cc   : > { %v9531_v33 = vpop.f32.mrf.mxu0  ;;  %9626 = vmatmul.mubr.msk.bf16.gmra.mxu0 %vm2125_vm0, %v10124_v61  ;;  %v4777_v61 = vadd.f32 %v10885_v21, %v9867_v23  ;;  %v9868_v36 = vpop.f32.mrf.mxu1  ;;  %v5432_v23 = vmax.f32 %v4756_v48, 0.0 }
 0x1cd   : > { %9629 = vmatprep.mubr.msk.bf16.mxu0 %vm2125_vm0, %v10125_v47  ;;  %v3433_v26 = vadd.f32 %v10885_v21, %v9531_v33  ;;  %v3364_v47 = vadd.f32 %v10885_v21, %v11165_v45  ;;  %v4780_v33 = vadd.f32 %v10885_v21, %v9868_v36  ;;  %v4769_v45 = vadd.f32 %v10885_v21, %v4768_v11 }
 0x1ce   : > { %v3424_v51 = vpop.f32.mrf.mxu0  ;;  %v4771_v62 = vpop.f32.mrf.mxu1  ;;  %v5437_v49 = vmax.f32 %v4777_v61, 0.0  ;;  %v11268_v13 = vpack.c.bf16 %v5432_v23, %v5431_v1  ;;  %v3417_v61 = vadd.f32 %v10885_v21, %v11211_v17 }
 0x1cf   : > { %6698 = vmatmul.mubr.bf16.gmra.mxu1 %v8449_v29  ;;  %v3425_v39 = vadd.f32 %v10885_v21, %v3424_v51  ;;  %v5085_v29 = vmax.f32 %v3369_v46, 0.0  ;;  %v5101_v50 = vmax.f32 %v3433_v26, 0.0  ;;  %v5438_v3 = vmax.f32 %v4780_v33, 0.0 }
 0x1d0   : > { %v9532_v19 = vpop.f32.mrf.mxu0  ;;  %6738 = vmatprep.mubr.bf16.mxu1 %v8356_v38  ;;  %13237 = vst [vmem:[#allocation34_spill] sm:$0xff] %v11268_v13  ;;  %v9871_v10 = vpop.f32.mrf.mxu1  ;;  %v5084_v9 = vmax.f32 %v3364_v47, 0.0  ;;  %v4772_v17 = vadd.f32 %v10885_v21, %v4771_v62  ;;  %v5097_v23 = vmax.f32 %v3417_v61, 0.0  ;;  %v10128_v62 = vld [vmem:[%s10289_s15 + $0x398] sm:$0xff]   ;;  %v10143_v13 = vld [vmem:[%s10289_s15 + $0x410] sm:$0xff]  }
 0x1d1   : > { %v3436_v6 = vadd.f32 %v10885_v21, %v9532_v19  ;;  %v5670_v51 = vpack.c.bf16 %v5086_v22, %v5085_v29  ;;  %v5098_v19 = vmax.f32 %v3420_v37, 0.0  ;;  %v5099_v7 = vmax.f32 %v3425_v39, 0.0 }
 0x1d2   : > { %v3427_v60 = vpop.f32.mrf.mxu0  ;;  %v11275_v46 = vpop.f32.mrf.mxu1  ;;  %v5435_v22 = vmax.f32 %v4769_v45, 0.0  ;;  %v4793_v47 = vadd.f32 %v10885_v21, %v9871_v10  ;;  %v5082_v37 = vmax.f32 %v11257_v63, 0.0 }
 0x1d3   : > { %v5102_v38 = vmax.f32 %v3436_v6, 0.0  ;;  %v3428_v48 = vadd.f32 %v10885_v21, %v3427_v60  ;;  %13238 = vst [vmem:[#allocation35_spill] sm:$0xff] %v11275_v46  ;;  %v11278_v6 = vpack.c.bf16 %v5438_v3, %v5437_v49  ;;  %v3412_v60 = vadd.f32 %v10885_v21, %v3411_v56 }
 0x1d4   : > { %v9535_v36 = vpop.f32.mrf.mxu0  ;;  %9630 = vmatmul.mubr.msk.bf16.gmra.mxu0 %vm2125_vm0, %v10126_v57  ;;  %v5669_v49 = vpack.c.bf16 %v5084_v9, %v5083_v41  ;;  %v3409_v56 = vadd.f32 %v10885_v21, %v11217_v59  ;;  %v9872_v33 = vpop.f32.mrf.mxu1  ;;  %v5441_v45 = vmax.f32 %v4793_v47, 0.0  ;;  %v3404_v9 = vadd.f32 %v10885_v21, %v11197_v52 }
 0x1d5   : > { %v5678_v1 = vpack.c.bf16 %v5102_v38, %v5101_v50  ;;  %v5100_v11 = vmax.f32 %v3428_v48, 0.0  ;;  %9633 = vmatprep.mubr.msk.bf16.mxu0 %vm2125_vm0, %v10127_v15  ;;  %13239 = vst [vmem:[#allocation36_spill] sm:$0xff] %v11278_v6  ;;  %v11286_v50 = vadd.f32 %v10885_v21, %v11145_v53  ;;  %v3449_v57 = vadd.f32 %v10885_v21, %v9535_v36  ;;  %v10129_v53 = vld [vmem:[%s10289_s15 + $0x3a0] sm:$0xff]   ;;  %v10159_v6 = vld [vmem:[%s10289_s15 + $0x490] sm:$0xff]  }
 0x1d6   : > { %v3440_v26 = vpop.f32.mrf.mxu0  ;;  %v5436_v15 = vmax.f32 %v4772_v17, 0.0  ;;  %v4796_v10 = vadd.f32 %v10885_v21, %v9872_v33  ;;  %v5676_v41 = vpack.c.bf16 %v5098_v19, %v5097_v23  ;;  %v5096_v38 = vmax.f32 %v3412_v60, 0.0  ;;  %v11312_v47 = vpop.f32.mrf.mxu1 }
 0x1d7   : > { %8870 = vmatprep.subr.bf16.mxu1 %v5678_v1  ;;  %v5677_v3 = vpack.c.bf16 %v5100_v11, %v5099_v7  ;;  %v3441_v63 = vadd.f32 %v10885_v21, %v3440_v26  ;;  %v5081_v1 = vmax.f32 %v11253_v12, 0.0  ;;  %v3345_v11 = vadd.f32 %v10885_v21, %v11132_v25  ;;  %13242 = vst [vmem:[#allocation39_spill] sm:$0xff] %v11312_v47  ;;  %v10141_v47 = vld [vmem:[%s10289_s15 + $0x400] sm:$0xff]  }
 0x1d8   : > { %v9536_v39 = vpop.f32.mrf.mxu0  ;;  %8871 = vmatpush3.bf16.msra.mxu1 %v5670_v51  ;;  %v11298_v48 = vpack.c.bf16 %v5436_v15, %v5435_v22  ;;  %v5105_v51 = vmax.f32 %v3449_v57, 0.0  ;;  %v5442_v7 = vmax.f32 %v4796_v10, 0.0  ;;  %v3401_v26 = vadd.f32 %v10885_v21, %v11190_v4 }
 0x1d9   : > { %v3452_v29 = vadd.f32 %v10885_v21, %v9536_v39  ;;  %8872 = vmatprep.subr.bf16.mxu1 %v5677_v3  ;;  %v5095_v17 = vmax.f32 %v3409_v56, 0.0  ;;  %v5103_v19 = vmax.f32 %v3441_v63, 0.0  ;;  %v5668_v25 = vpack.c.bf16 %v5082_v37, %v5081_v1  ;;  %v11324_v37 = vld [vmem:[%s13199_s3] ss:$0 sm:$0xff] }
 0x1da   : > { %v3443_v59 = vpop.f32.mrf.mxu0  ;;  %13240 = vst [vmem:[#allocation37_spill] sm:$0xff] %v11298_v48  ;;  %v11310_v12 = vpack.c.bf16 %v5442_v7, %v5441_v45  ;;  %v5080_v4 = vmax.f32 %v11286_v50, 0.0  ;;  %v5094_v57 = vmax.f32 %v3404_v9, 0.0  ;;  %v5079_v15 = vmax.f32 %v3345_v11, 0.0 }
 0x1db   : > { %v5106_v61 = vmax.f32 %v3452_v29, 0.0  ;;  %v3444_v36 = vadd.f32 %v10885_v21, %v3443_v59  ;;  %v5675_v39 = vpack.c.bf16 %v5096_v38, %v5095_v17  ;;  %v5093_v33 = vmax.f32 %v3401_v26, 0.0  ;;  %v10130_v29 = vld [vmem:[%s10289_s15 + $0x3a8] sm:$0xff]  }
 0x1dc   : > { %v9539_v52 = vpop.f32.mrf.mxu0  ;;  %9634 = vmatmul.mubr.msk.bf16.gmra.mxu0 %vm2125_vm0, %v10128_v62  ;;  %8873 = vmatpush3.bf16.msra.mxu1 %v5669_v49  ;;  %13241 = vst [vmem:[#allocation38_spill] sm:$0xff] %v11310_v12  ;;  %v3396_v49 = vadd.f32 %v10885_v21, %v11208_v44  ;;  %v9875_v62 = vpop.f32.mrf.mxu1  ;;  %v3393_v50 = vadd.f32 %v11324_v37, %v11195_v24  ;;  %v10140_v12 = vld [vmem:[%s10289_s15 + $0x3f8] sm:$0xff]  }
 0x1dd   : > { %v11307_v60 = vpack.c.bf16 %v5106_v61, %v5105_v51  ;;  %v5104_v22 = vmax.f32 %v3444_v36, 0.0  ;;  %8874 = vmatprep.subr.bf16.mxu1 %v5676_v41  ;;  %9637 = vmatprep.mubr.msk.bf16.mxu0 %vm2125_vm0, %v10129_v53  ;;  %v3465_v56 = vadd.f32 %v10885_v21, %v9539_v52  ;;  %v10131_v21 = vld [vmem:[%s10289_s15 + $0x3b0] sm:$0xff]   ;;  %v5667_v10 = vpack.c.bf16 %v5080_v4, %v5079_v15 }
 0x1de   : > { %v3456_v3 = vpop.f32.mrf.mxu0  ;;  %v11331_v45 = vpop.f32.mrf.mxu1  ;;  %v3388_v9 = vadd.f32 %v11324_v37, %v11176_v58  ;;  %v5674_v41 = vpack.c.bf16 %v5094_v57, %v5093_v33  ;;  %v5092_v59 = vmax.f32 %v3396_v49, 0.0  ;;  %v3385_v7 = vadd.f32 %v11324_v37, %v11169_v14 }
 0x1df   : > { %v11317_v23 = vpack.c.bf16 %v5104_v22, %v5103_v19  ;;  %v3457_v44 = vadd.f32 %v11324_v37, %v3456_v3  ;;  %13243 = vst [vmem:[#allocation40_spill] sm:$0xff] %v11331_v45  ;;  %v5109_v51 = vmax.f32 %v3465_v56, 0.0  ;;  %v4809_v11 = vadd.f32 %v11324_v37, %v9875_v62  ;;  %v10132_v56 = vld [vmem:[%s10289_s15 + $0x3b8] sm:$0xff]  }
 0x1e0   : > { %v9540_v63 = vpop.f32.mrf.mxu0  ;;  %8875 = vmatpush3.bf16.msra.mxu1 %v5668_v25  ;;  %v9876_v24 = vpop.f32.mrf.mxu1  ;;  %v5091_v58 = vmax.f32 %v3393_v50, 0.0  ;;  %v5090_v22 = vmax.f32 %v3388_v9, 0.0  ;;  %v3380_v25 = vadd.f32 %v11324_v37, %v11188_v5  ;;  %v5089_v15 = vmax.f32 %v3385_v7, 0.0  ;;  %v10135_v7 = vld [vmem:[%s10289_s15 + $0x3d0] sm:$0xff]  }
 0x1e1   : > { %v3468_v53 = vadd.f32 %v11324_v37, %v9540_v63  ;;  %8876 = vmatprep.subr.bf16.mxu1 %v5675_v39  ;;  %v5107_v26 = vmax.f32 %v3457_v44, 0.0  ;;  %v5445_v39 = vmax.f32 %v4809_v11, 0.0  ;;  %v4812_v62 = vadd.f32 %v11324_v37, %v9876_v24  ;;  %v10133_v63 = vld [vmem:[%s10289_s15 + $0x3c0] sm:$0xff]   ;;  %v5522_v11 = vld [vmem:[%s13197_s1 + $0x118] sm:$0xff] }
 0x1e2   : > { %v3459_v38 = vpop.f32.mrf.mxu0  ;;  %v11345_v19 = vpop.f32.mrf.mxu1  ;;  %v5673_v57 = vpack.c.bf16 %v5092_v59, %v5091_v58  ;;  %v3377_v33 = vadd.f32 %v11324_v37, %v11174_v35  ;;  %v5672_v44 = vpack.c.bf16 %v5090_v22, %v5089_v15  ;;  %v5538_v58 = vld [vmem:[%s13197_s1 + $0x198] sm:$0xff] }
 0x1e3   : > { %v5110_v61 = vmax.f32 %v3468_v53, 0.0  ;;  %v3460_v36 = vadd.f32 %v11324_v37, %v3459_v38  ;;  %13244 = vst [vmem:[#allocation41_spill] sm:$0xff] %v11345_v19  ;;  %v5446_v50 = vmax.f32 %v4812_v62, 0.0  ;;  %v5088_v53 = vmax.f32 %v3380_v25, 0.0 }
 0x1e4   : > { %v11338_v1 = vpop.f32.mrf.mxu0  ;;  %9638 = vmatmul.mubr.msk.bf16.gmra.mxu0 %vm2125_vm0, %v10130_v29  ;;  %8877 = vmatpush3.bf16.msra.mxu1 %v5667_v10  ;;  %v9879_v3 = vpop.f32.mrf.mxu1  ;;  %v5087_v9 = vmax.f32 %v3377_v33, 0.0  ;;  %v4532_v25 = vadd.f32 %v11324_v37, %v10597_v16 }
 0x1e5   : > { %v11342_v17 = vpack.c.bf16 %v5110_v61, %v5109_v51  ;;  %v5108_v52 = vmax.f32 %v3460_v36, 0.0  ;;  %8878 = vmatprep.subr.bf16.mxu1 %v5674_v41  ;;  %9641 = vmatprep.mubr.msk.bf16.mxu0 %vm2125_vm0, %v10131_v21  ;;  %v11369_v10 = vpack.c.bf16 %v5446_v50, %v5445_v39  ;;  %v4825_v35 = vadd.f32 %v11324_v37, %v9879_v3  ;;  %v10136_v50 = vld [vmem:[%s10289_s15 + $0x3d8] sm:$0xff]  }
 0x1e6   : > { %v11347_v14 = vpop.f32.mrf.mxu0  ;;  %v11361_v29 = vpop.f32.mrf.mxu1  ;;  %v5671_v59 = vpack.c.bf16 %v5088_v53, %v5087_v9  ;;  %v8388_v39 = vcombine.high %v5522_v11, %v5538_v58  ;;  %v5376_v33 = vmax.f32 %v4532_v25, 0.0  ;;  %v10137_v53 = vld [vmem:[%s10289_s15 + $0x3e0] sm:$0xff]  }
 0x1e7   : > { %v11351_v4 = vpack.c.bf16 %v5108_v52, %v5107_v26  ;;  %13245 = vst [vmem:[#allocation42_spill] sm:$0xff] %v11361_v29  ;;  %13246 = vst [vmem:[#allocation43_spill] sm:$0xff] %v11369_v10  ;;  %v5449_v36 = vmax.f32 %v4825_v35, 0.0  ;;  %v5570_v35 = vld [vmem:[%s13197_s1 + $0x298] sm:$0xff] }
 0x1e8   : > { %v11353_v49 = vpop.f32.mrf.mxu0  ;;  %8879 = vmatpush3.bf16.msra.mxu1 %v11129_v28  ;;  %v9880_v21 = vpop.f32.mrf.mxu1 }
 0x1e9   : > { %8880 = vmatprep.subr.bf16.mxu1 %v5673_v57  ;;  %v4828_v24 = vadd.f32 %v11324_v37, %v9880_v21  ;;  %v8355_v57 = vcombine.low %v11226_v55, %v11231_v31  ;;  %v5554_v21 = vld [vmem:[%s13197_s1 + $0x218] sm:$0xff] }
 0x1ea   : > { %v11363_v5 = vpop.f32.mrf.mxu0  ;;  %v11373_v41 = vpop.f32.mrf.mxu1  ;;  %v8420_v25 = vcombine.high %v5554_v21, %v5570_v35 }
 0x1eb   : > { %13247 = vst [vmem:[#allocation44_spill] sm:$0xff] %v11373_v41  ;;  %v5450_v22 = vmax.f32 %v4828_v24, 0.0  ;;  %v8387_v24 = vcombine.low %v5522_v11, %v5538_v58 }
 0x1ec   : > { %v11365_v28 = vpop.f32.mrf.mxu0  ;;  %9642 = vmatmul.mubr.msk.bf16.gmra.mxu0 %vm2125_vm0, %v10132_v56  ;;  %8881 = vmatpush3.bf16.msra.mxu1 %v11136_v30  ;;  %v9883_v51 = vpop.f32.mrf.mxu1  ;;  %v10134_v30 = vld [vmem:[%s10289_s15 + $0x3c8] sm:$0xff]  }
 0x1ed   : > { %8882 = vmatprep.subr.bf16.mxu1 %v5672_v44  ;;  %9645 = vmatprep.mubr.msk.bf16.mxu0 %vm2125_vm0, %v10133_v63  ;;  %v11403_v62 = vpack.c.bf16 %v5450_v22, %v5449_v36  ;;  %v4545_v36 = vadd.f32 %v11324_v37, %v10608_v27  ;;  %v4548_v22 = vadd.f32 %v11324_v37, %v10617_v40 }
 0x1ee   : > { %v11375_v38 = vpop.f32.mrf.mxu0  ;;  %v11389_v26 = vpop.f32.mrf.mxu1 }
 0x1ef   : > { %13248 = vst [vmem:[#allocation45_spill] sm:$0xff] %v11389_v26  ;;  %13249 = vst [vmem:[#allocation46_spill] sm:$0xff] %v11403_v62 }
 0x1f0   : > { %v11377_v61 = vpop.f32.mrf.mxu0  ;;  %8883 = vmatpush3.bf16.msra.mxu1 %v11105_v42  ;;  %v4529_v42 = vadd.f32 %v11324_v37, %v10584_v0  ;;  %v9884_v3 = vpop.f32.mrf.mxu1  ;;  %v4841_v0 = vadd.f32 %v11324_v37, %v9883_v51 }
 0x1f1   : > { %8884 = vmatprep.subr.bf16.mxu1 %v5671_v59  ;;  %v4844_v44 = vadd.f32 %v11324_v37, %v9884_v3 }
 0x1f2   : > { %v11391_v52 = vpop.f32.mrf.mxu0  ;;  %v11407_v16 = vpop.f32.mrf.mxu1  ;;  %v5375_v31 = vmax.f32 %v4529_v42, 0.0 }
 0x1f3   : > { %13250 = vst [vmem:[#allocation47_spill] sm:$0xff] %v11407_v16  ;;  %v5454_v51 = vmax.f32 %v4844_v44, 0.0  ;;  %v10138_v44 = vld [vmem:[%s10289_s15 + $0x3e8] sm:$0xff]  }
 0x1f4   : > { %v11399_v56 = vpop.f32.mrf.mxu0  ;;  %9646 = vmatmul.mubr.msk.bf16.gmra.mxu0 %vm2125_vm0, %v10134_v30  ;;  %8885 = vmatpush3.bf16.msra.mxu1 %v11112_v2  ;;  %v9887_v55 = vpop.f32.mrf.mxu1  ;;  %v5453_v2 = vmax.f32 %v4841_v0, 0.0  ;;  %v11436_v3 = vpack.c.bf16 %v5376_v33, %v5375_v31  ;;  %v5379_v0 = vmax.f32 %v4545_v36, 0.0  ;;  %v10139_v31 = vld [vmem:[%s10289_s15 + $0x3f0] sm:$0xff]   ;;  %v5586_v33 = vld [vmem:[%s13197_s1 + $0x318] sm:$0xff] }
 0x1f5   : > { %9649 = vmatprep.mubr.msk.bf16.mxu0 %vm2125_vm0, %v10135_v7  ;;  %v4857_v30 = vadd.f32 %v11324_v37, %v9887_v55  ;;  %v5380_v55 = vmax.f32 %v4548_v22, 0.0 }
 0x1f6   : > { %v11409_v15 = vpop.f32.mrf.mxu0  ;;  %v11422_v9 = vpop.f32.mrf.mxu1 }
 0x1f7   : > { %6739 = vmatmul.mubr.bf16.vlgmr.msra.gmra.mxu1 %v8355_v57  ;;  %13251 = vst [vmem:[#allocation48_spill] sm:$0xff] %v11422_v9  ;;  %v11434_v57 = vpack.c.bf16 %v5454_v51, %v5453_v2  ;;  %v5457_v11 = vmax.f32 %v4857_v30, 0.0 }
 0x1f8   : > { %v11411_v63 = vpop.f32.mrf.mxu0  ;;  %6746 = vmatprep.mubr.bf16.mxu1 %v8388_v39  ;;  %v9888_v7 = vpop.f32.mrf.mxu1 }
 0x1f9   : > { %13252 = vst [vmem:[#allocation49_spill] sm:$0xff] %v11434_v57  ;;  %v4860_v40 = vadd.f32 %v11324_v37, %v9888_v7  ;;  %v8419_v7 = vcombine.low %v5554_v21, %v5570_v35 }
 0x1fa   : > { %v11424_v59 = vpop.f32.mrf.mxu0  ;;  %v11439_v39 = vpop.f32.mrf.mxu1 }
 0x1fb   : > { %13253 = vst [vmem:[#allocation50_spill] sm:$0xff] %v11439_v39  ;;  %v5458_v2 = vmax.f32 %v4860_v40, 0.0  ;;  %v4564_v40 = vadd.f32 %v11324_v37, %v10653_v18 }
 0x1fc   : > { %v11431_v42 = vpop.f32.mrf.mxu0  ;;  %9650 = vmatmul.mubr.msk.bf16.gmra.mxu0 %vm2125_vm0, %v10136_v50  ;;  %v9891_v58 = vpop.f32.mrf.mxu1 }
 0x1fd   : > { %9653 = vmatprep.mubr.msk.bf16.mxu0 %vm2125_vm0, %v10137_v53  ;;  %v5602_v53 = vld [vmem:[%s13197_s1 + $0x398] sm:$0xff]  ;;  %v11458_v36 = vpack.c.bf16 %v5458_v2, %v5457_v11  ;;  %v5384_v2 = vmax.f32 %v4564_v40, 0.0  ;;  %v4577_v40 = vadd.f32 %v11324_v37, %v10674_v32 }
 0x1fe   : > { %v11441_v27 = vpop.f32.mrf.mxu0  ;;  %v11454_v51 = vpop.f32.mrf.mxu1  ;;  %v8452_v9 = vcombine.high %v5586_v33, %v5602_v53 }
 0x1ff   : > { %6747 = vmatmul.mubr.bf16.gmra.mxu1 %v8387_v24  ;;  %13254 = vst [vmem:[#allocation51_spill] sm:$0xff] %v11454_v51  ;;  %13255 = vst [vmem:[#allocation52_spill] sm:$0xff] %v11458_v36  ;;  %v4873_v24 = vadd.f32 %v11324_v37, %v9891_v58  ;;  %v11468_v51 = vpack.c.bf16 %v5380_v55, %v5379_v0  ;;  %v11481_v0 = vld [vmem:[%s13197_s1 + $0x20] sm:$0xff] }
 0x200   : > { %v11444_v50 = vpop.f32.mrf.mxu0  ;;  %6754 = vmatprep.mubr.bf16.mxu1 %v8420_v25  ;;  %v9892_v22 = vpop.f32.mrf.mxu1  ;;  %v4561_v25 = vadd.f32 %v11324_v37, %v10636_v54  ;;  %v11486_v55 = vld [vmem:[%s13197_s1 + $0xa0] sm:$0xff] }
 0x201   : > { %v5461_v35 = vmax.f32 %v4873_v24, 0.0  ;;  %v4876_v54 = vadd.f32 %v11324_v37, %v9892_v22 }
 0x202   : > { %v11456_v30 = vpop.f32.mrf.mxu0  ;;  %v11471_v11 = vpop.f32.mrf.mxu1  ;;  %v5383_v18 = vmax.f32 %v4561_v25, 0.0 }
 0x203   : > { %13256 = vst [vmem:[#allocation53_spill] sm:$0xff] %v11471_v11 }
 0x204   : > { %v11465_v39 = vpop.f32.mrf.mxu0  ;;  %9654 = vmatmul.mubr.msk.bf16.gmra.mxu0 %vm2125_vm0, %v10138_v44  ;;  %v9895_v58 = vpop.f32.mrf.mxu1  ;;  %v5462_v44 = vmax.f32 %v4876_v54, 0.0  ;;  %v4580_v54 = vadd.f32 %v11324_v37, %v10685_v34  ;;  %v11500_v46 = vpack.c.bf16 %v5384_v2, %v5383_v18  ;;  %v5387_v2 = vmax.f32 %v4577_v40, 0.0 }
 0x205   : > { %9657 = vmatprep.mubr.msk.bf16.mxu0 %vm2125_vm0, %v10139_v31  ;;  %v4889_v22 = vadd.f32 %v11324_v37, %v9895_v58 }
 0x206   : > { %v11473_v21 = vpop.f32.mrf.mxu0  ;;  %v11488_v31 = vpop.f32.mrf.mxu1 }
 0x207   : > { %6755 = vmatmul.mubr.bf16.gmra.mxu1 %v8419_v7  ;;  %13257 = vst [vmem:[#allocation54_spill] sm:$0xff] %v11488_v31  ;;  %v11490_v7 = vpack.c.bf16 %v5462_v44, %v5461_v35  ;;  %v8358_v31 = vcombine.high %v11481_v0, %v11486_v55  ;;  %v3500_v35 = vadd.f32 %v11324_v37, %v11377_v61  ;;  %v5388_v44 = vmax.f32 %v4580_v54, 0.0  ;;  %v10142_v61 = vld [vmem:[%s10289_s15 + $0x408] sm:$0xff]  }
 0x208   : > { %v9560_v36 = vpop.f32.mrf.mxu0  ;;  %6762 = vmatprep.mubr.bf16.mxu1 %v8452_v9  ;;  %v8451_v9 = vcombine.low %v5586_v33, %v5602_v53  ;;  %v9896_v25 = vpop.f32.mrf.mxu1  ;;  %v5465_v53 = vmax.f32 %v4889_v22, 0.0 }
 0x209   : > { %13258 = vst [vmem:[#allocation55_spill] sm:$0xff] %v11490_v7  ;;  %v4892_v34 = vadd.f32 %v11324_v37, %v9896_v25  ;;  %v5118_v10 = vmax.f32 %v3500_v35, 0.0 }
 0x20a   : > { %v3539_v24 = vpop.f32.mrf.mxu0  ;;  %v11505_v33 = vpop.f32.mrf.mxu1 }
 0x20b   : > { %13259 = vst [vmem:[#allocation56_spill] sm:$0xff] %v11505_v33 }
 0x20c   : > { %v9563_v11 = vpop.f32.mrf.mxu0  ;;  %9658 = vmatmul.mubr.msk.bf16.gmra.mxu0 %vm2125_vm0, %v10140_v12  ;;  %v3497_v12 = vadd.f32 %v11324_v37, %v11365_v28  ;;  %v9899_v18 = vpop.f32.mrf.mxu1  ;;  %v3492_v28 = vadd.f32 %v11324_v37, %v11391_v52  ;;  %v3545_v52 = vadd.f32 %v11324_v37, %v11465_v39 }
 0x20d   : > { %9661 = vmatprep.mubr.msk.bf16.mxu0 %vm2125_vm0, %v10141_v47  ;;  %v3561_v58 = vadd.f32 %v11324_v37, %v9563_v11  ;;  %v5466_v47 = vmax.f32 %v4892_v34, 0.0  ;;  %v3548_v11 = vadd.f32 %v11324_v37, %v9560_v36  ;;  %v4905_v54 = vadd.f32 %v11324_v37, %v9899_v18 }
 0x20e   : > { %v3552_v32 = vpop.f32.mrf.mxu0  ;;  %v11515_v25 = vpop.f32.mrf.mxu1 }
 0x20f   : > { %6763 = vmatmul.mubr.bf16.gmra.mxu1 %v8451_v9  ;;  %v3553_v33 = vadd.f32 %v11324_v37, %v3552_v32  ;;  %13260 = vst [vmem:[#allocation57_spill] sm:$0xff] %v11515_v25  ;;  %v11520_v40 = vpack.c.bf16 %v5466_v47, %v5465_v53  ;;  %v5133_v34 = vmax.f32 %v3561_v58, 0.0  ;;  %v3489_v25 = vadd.f32 %v11324_v37, %v11375_v38 }
 0x210   : > { %v9564_v7 = vpop.f32.mrf.mxu0  ;;  %6803 = vmatprep.mubr.bf16.mxu1 %v8358_v31  ;;  %v5117_v31 = vmax.f32 %v3497_v12, 0.0  ;;  %v9900_v19 = vpop.f32.mrf.mxu1  ;;  %v11531_v53 = vpack.c.bf16 %v5388_v44, %v5387_v2  ;;  %v3540_v2 = vadd.f32 %v11324_v37, %v3539_v24 }
 0x211   : > { %v3564_v22 = vadd.f32 %v11324_v37, %v9564_v7  ;;  %13261 = vst [vmem:[#allocation58_spill] sm:$0xff] %v11520_v40  ;;  %v3484_v7 = vadd.f32 %v11324_v37, %v11353_v49  ;;  %v5131_v58 = vmax.f32 %v3553_v33, 0.0  ;;  %v5116_v49 = vmax.f32 %v3492_v28, 0.0 }
 0x212   : > { %v3555_v9 = vpop.f32.mrf.mxu0  ;;  %v5686_v12 = vpack.c.bf16 %v5118_v10, %v5117_v31  ;;  %v5469_v40 = vmax.f32 %v4905_v54, 0.0  ;;  %v4908_v39 = vadd.f32 %v11324_v37, %v9900_v19  ;;  %v5115_v31 = vmax.f32 %v3489_v25, 0.0 }
 0x213   : > { %v5134_v35 = vmax.f32 %v3564_v22, 0.0  ;;  %v3556_v32 = vadd.f32 %v11324_v37, %v3555_v9  ;;  %v11534_v22 = vpop.f32.mrf.mxu1  ;;  %v5130_v9 = vmax.f32 %v3548_v11, 0.0  ;;  %v5114_v44 = vmax.f32 %v3484_v7, 0.0  ;;  %v10144_v11 = vld [vmem:[%s10289_s15 + $0x418] sm:$0xff]  }
 0x214   : > { %v9567_v36 = vpop.f32.mrf.mxu0  ;;  %9662 = vmatmul.mubr.msk.bf16.gmra.mxu0 %vm2125_vm0, %v10142_v61  ;;  %13262 = vst [vmem:[#allocation59_spill] sm:$0xff] %v11534_v22  ;;  %v3481_v61 = vadd.f32 %v11324_v37, %v11338_v1  ;;  %v5129_v28 = vmax.f32 %v3545_v52, 0.0  ;;  %v5470_v54 = vmax.f32 %v4908_v39, 0.0  ;;  %v3476_v19 = vadd.f32 %v11324_v37, %v11363_v5 }
 0x215   : > { %v5694_v18 = vpack.c.bf16 %v5134_v35, %v5133_v34  ;;  %v5132_v47 = vmax.f32 %v3556_v32, 0.0  ;;  %9665 = vmatprep.mubr.msk.bf16.mxu0 %vm2125_vm0, %v10143_v13  ;;  %v3577_v10 = vadd.f32 %v11324_v37, %v9567_v36  ;;  %v9903_v13 = vpop.f32.mrf.mxu1  ;;  %v3537_v1 = vadd.f32 %v11324_v37, %v11473_v21  ;;  %v10145_v32 = vld [vmem:[%s10289_s15 + $0x420] sm:$0xff]  }
 0x216   : > { %v3568_v38 = vpop.f32.mrf.mxu0  ;;  %v5685_v25 = vpack.c.bf16 %v5116_v49, %v5115_v31  ;;  %v3532_v7 = vadd.f32 %v11324_v37, %v11444_v50  ;;  %v5692_v52 = vpack.c.bf16 %v5130_v9, %v5129_v28  ;;  %v5128_v5 = vmax.f32 %v3540_v2, 0.0 }
 0x217   : > { %8910 = vmatprep.subr.bf16.mxu1 %v5694_v18  ;;  %v5693_v33 = vpack.c.bf16 %v5132_v47, %v5131_v58  ;;  %v3569_v24 = vadd.f32 %v11324_v37, %v3568_v38  ;;  %v11549_v36 = vpop.f32.mrf.mxu1  ;;  %v11553_v58 = vpack.c.bf16 %v5470_v54, %v5469_v40  ;;  %v5137_v18 = vmax.f32 %v3577_v10, 0.0 }
 0x218   : > { %v9568_v34 = vpop.f32.mrf.mxu0  ;;  %8911 = vmatpush3.bf16.msra.mxu1 %v5686_v12  ;;  %13263 = vst [vmem:[#allocation60_spill] sm:$0xff] %v11549_v36  ;;  %v5113_v39 = vmax.f32 %v3481_v61, 0.0  ;;  %v3529_v49 = vadd.f32 %v11324_v37, %v11431_v42  ;;  %v4921_v50 = vadd.f32 %v11324_v37, %v9903_v13  ;;  %v5127_v40 = vmax.f32 %v3537_v1, 0.0  ;;  %v10154_v36 = vld [vmem:[%s10289_s15 + $0x468] sm:$0xff]  }
 0x219   : > { %v3580_v35 = vadd.f32 %v11324_v37, %v9568_v34  ;;  %8912 = vmatprep.subr.bf16.mxu1 %v5693_v33  ;;  %13264 = vst [vmem:[#allocation61_spill] sm:$0xff] %v11553_v58  ;;  %v9904_v38 = vpop.f32.mrf.mxu1  ;;  %v3473_v33 = vadd.f32 %v11324_v37, %v11347_v14  ;;  %v5135_v9 = vmax.f32 %v3569_v24, 0.0  ;;  %v5112_v28 = vmax.f32 %v3476_v19, 0.0 }
 0x21a   : > { %v3571_v12 = vpop.f32.mrf.mxu0  ;;  %v5684_v14 = vpack.c.bf16 %v5114_v44, %v5113_v39  ;;  %v5126_v42 = vmax.f32 %v3532_v7, 0.0  ;;  %v5691_v1 = vpack.c.bf16 %v5128_v5, %v5127_v40  ;;  %v4924_v44 = vadd.f32 %v11324_v37, %v9904_v38 }
 0x21b   : > { %v5138_v47 = vmax.f32 %v3580_v35, 0.0  ;;  %v3572_v21 = vadd.f32 %v11324_v37, %v3571_v12  ;;  %v11565_v61 = vpop.f32.mrf.mxu1  ;;  %v5111_v35 = vmax.f32 %v3473_v33, 0.0  ;;  %v5473_v12 = vmax.f32 %v4921_v50, 0.0 }
 0x21c   : > { %v9571_v31 = vpop.f32.mrf.mxu0  ;;  %9666 = vmatmul.mubr.msk.bf16.gmra.mxu0 %vm2125_vm0, %v10144_v11  ;;  %8913 = vmatpush3.bf16.msra.mxu1 %v5685_v25  ;;  %13265 = vst [vmem:[#allocation62_spill] sm:$0xff] %v11565_v61  ;;  %v3524_v11 = vadd.f32 %v11324_v37, %v11456_v30  ;;  %v5125_v25 = vmax.f32 %v3529_v49, 0.0  ;;  %v3521_v19 = vadd.f32 %v11324_v37, %v11441_v27  ;;  %v5474_v49 = vmax.f32 %v4924_v44, 0.0 }
 0x21d   : > { %v11562_v2 = vpack.c.bf16 %v5138_v47, %v5137_v18  ;;  %v5136_v10 = vmax.f32 %v3572_v21, 0.0  ;;  %8914 = vmatprep.subr.bf16.mxu1 %v5692_v52  ;;  %9669 = vmatprep.mubr.msk.bf16.mxu0 %vm2125_vm0, %v10145_v32  ;;  %v3593_v54 = vadd.f32 %v11324_v37, %v9571_v31  ;;  %v9907_v24 = vpop.f32.mrf.mxu1  ;;  %v10146_v32 = vld [vmem:[%s10289_s15 + $0x428] sm:$0xff]   ;;  %v10147_v18 = vld [vmem:[%s10289_s15 + $0x430] sm:$0xff]   ;;  %v5683_v5 = vpack.c.bf16 %v5112_v28, %v5111_v35 }
 0x21e   : > { %v3584_v34 = vpop.f32.mrf.mxu0  ;;  %v3516_v21 = vadd.f32 %v11324_v37, %v11411_v63  ;;  %v5690_v39 = vpack.c.bf16 %v5126_v42, %v5125_v25  ;;  %v5124_v31 = vmax.f32 %v3524_v11, 0.0  ;;  %v4937_v63 = vadd.f32 %v11324_v37, %v9907_v24 }
 0x21f   : > { %v11569_v13 = vpack.c.bf16 %v5136_v10, %v5135_v9  ;;  %v3585_v30 = vadd.f32 %v11324_v37, %v3584_v34  ;;  %v11579_v47 = vpop.f32.mrf.mxu1  ;;  %v5141_v38 = vmax.f32 %v3593_v54, 0.0  ;;  %v3513_v9 = vadd.f32 %v11324_v37, %v11399_v56 }
 0x220   : > { %v9572_v52 = vpop.f32.mrf.mxu0  ;;  %8915 = vmatpush3.bf16.msra.mxu1 %v5684_v14  ;;  %13266 = vst [vmem:[#allocation63_spill] sm:$0xff] %v11579_v47  ;;  %v11589_v14 = vpack.c.bf16 %v5474_v49, %v5473_v12  ;;  %v5123_v28 = vmax.f32 %v3521_v19, 0.0  ;;  %v3508_v35 = vadd.f32 %v11324_v37, %v11424_v59  ;;  %v10148_v12 = vld [vmem:[%s10289_s15 + $0x438] sm:$0xff]   ;;  %v5477_v44 = vmax.f32 %v4937_v63, 0.0 }
 0x221   : > { %v3596_v7 = vadd.f32 %v11324_v37, %v9572_v52  ;;  %8916 = vmatprep.subr.bf16.mxu1 %v5691_v1  ;;  %v9908_v40 = vpop.f32.mrf.mxu1  ;;  %v5139_v42 = vmax.f32 %v3585_v30, 0.0  ;;  %v5122_v1 = vmax.f32 %v3516_v21, 0.0  ;;  %v5121_v30 = vmax.f32 %v3513_v9, 0.0 }
 0x222   : > { %v3587_v33 = vpop.f32.mrf.mxu0  ;;  %13267 = vst [vmem:[#allocation64_spill] sm:$0xff] %v11589_v14  ;;  %v5689_v24 = vpack.c.bf16 %v5124_v31, %v5123_v28  ;;  %v4940_v19 = vadd.f32 %v11324_v37, %v9908_v40 }
 0x223   : > { %v5142_v50 = vmax.f32 %v3596_v7, 0.0  ;;  %v3588_v27 = vadd.f32 %v11324_v37, %v3587_v33  ;;  %v11595_v56 = vpop.f32.mrf.mxu1  ;;  %v3505_v7 = vadd.f32 %v11324_v37, %v11409_v15  ;;  %v5120_v33 = vmax.f32 %v3508_v35, 0.0  ;;  %v5539_v35 = vld [vmem:[%s13197_s1 + $0x1a0] sm:$0xff] }
 0x224   : > { %v11586_v10 = vpop.f32.mrf.mxu0  ;;  %9670 = vmatmul.mubr.msk.bf16.gmra.mxu0 %vm2125_vm0, %v10146_v32  ;;  %8917 = vmatpush3.bf16.msra.mxu1 %v5683_v5  ;;  %13268 = vst [vmem:[#allocation65_spill] sm:$0xff] %v11595_v56  ;;  %v5478_v21 = vmax.f32 %v4940_v19, 0.0 }
 0x225   : > { %v11592_v34 = vpack.c.bf16 %v5142_v50, %v5141_v38  ;;  %v5140_v11 = vmax.f32 %v3588_v27, 0.0  ;;  %8918 = vmatprep.subr.bf16.mxu1 %v5690_v39  ;;  %9673 = vmatprep.mubr.msk.bf16.mxu0 %vm2125_vm0, %v10147_v18  ;;  %v9911_v52 = vpop.f32.mrf.mxu1  ;;  %v10149_v18 = vld [vmem:[%s10289_s15 + $0x440] sm:$0xff]   ;;  %v5688_v39 = vpack.c.bf16 %v5122_v1, %v5121_v30  ;;  %v5119_v38 = vmax.f32 %v3505_v7, 0.0 }
 0x226   : > { %v11597_v54 = vpop.f32.mrf.mxu0  ;;  %v11619_v31 = vpack.c.bf16 %v5478_v21, %v5477_v44  ;;  %v4953_v15 = vadd.f32 %v11324_v37, %v9911_v52  ;;  %v5523_v1 = vld [vmem:[%s13197_s1 + $0x120] sm:$0xff] }
 0x227   : > { %v11601_v25 = vpack.c.bf16 %v5140_v11, %v5139_v42  ;;  %v11611_v5 = vpop.f32.mrf.mxu1  ;;  %v5687_v40 = vpack.c.bf16 %v5120_v33, %v5119_v38  ;;  %v10151_v11 = vld [vmem:[%s10289_s15 + $0x450] sm:$0xff]   ;;  %v8390_v30 = vcombine.high %v5523_v1, %v5539_v35  ;;  %v10152_v33 = vld [vmem:[%s10289_s15 + $0x458] sm:$0xff]   ;;  %v5555_v38 = vld [vmem:[%s13197_s1 + $0x220] sm:$0xff] }
 0x228   : > { %v11603_v32 = vpop.f32.mrf.mxu0  ;;  %8919 = vmatpush3.bf16.msra.mxu1 %v11342_v17  ;;  %13269 = vst [vmem:[#allocation66_spill] sm:$0xff] %v11611_v5  ;;  %13270 = vst [vmem:[#allocation67_spill] sm:$0xff] %v11619_v31  ;;  %v5481_v28 = vmax.f32 %v4953_v15, 0.0  ;;  %v10153_v15 = vld [vmem:[%s10289_s15 + $0x460] sm:$0xff]   ;;  %v10156_v5 = vld [vmem:[%s10289_s15 + $0x478] sm:$0xff]  }
 0x229   : > { %8920 = vmatprep.subr.bf16.mxu1 %v5689_v24  ;;  %v9912_v49 = vpop.f32.mrf.mxu1 }
 0x22a   : > { %v11613_v59 = vpop.f32.mrf.mxu0  ;;  %v4956_v42 = vadd.f32 %v11324_v37, %v9912_v49 }
 0x22b   : > { %v11623_v50 = vpop.f32.mrf.mxu1 }
 0x22c   : > { %v11615_v17 = vpop.f32.mrf.mxu0  ;;  %9674 = vmatmul.mubr.msk.bf16.gmra.mxu0 %vm2125_vm0, %v10148_v12  ;;  %8921 = vmatpush3.bf16.msra.mxu1 %v11351_v4  ;;  %13271 = vst [vmem:[#allocation68_spill] sm:$0xff] %v11623_v50  ;;  %v10150_v4 = vld [vmem:[%s10289_s15 + $0x448] sm:$0xff]   ;;  %v8357_v12 = vcombine.low %v11481_v0, %v11486_v55 }
 0x22d   : > { %8922 = vmatprep.subr.bf16.mxu1 %v5688_v39  ;;  %9677 = vmatprep.mubr.msk.bf16.mxu0 %vm2125_vm0, %v10149_v18  ;;  %v9915_v9 = vpop.f32.mrf.mxu1 }
 0x22e   : > { %v11625_v27 = vpop.f32.mrf.mxu0  ;;  %v4969_v18 = vadd.f32 %v11324_v37, %v9915_v9 }
 0x22f   : > { %v11639_v24 = vpop.f32.mrf.mxu1 }
 0x230   : > { %v11627_v63 = vpop.f32.mrf.mxu0  ;;  %8923 = vmatpush3.bf16.msra.mxu1 %v11307_v60  ;;  %13272 = vst [vmem:[#allocation69_spill] sm:$0xff] %v11639_v24  ;;  %v5482_v60 = vmax.f32 %v4956_v42, 0.0  ;;  %v5485_v49 = vmax.f32 %v4969_v18, 0.0  ;;  %v8389_v42 = vcombine.low %v5523_v1, %v5539_v35 }
 0x231   : > { %8924 = vmatprep.subr.bf16.mxu1 %v5687_v40  ;;  %v9916_v44 = vpop.f32.mrf.mxu1  ;;  %v5571_v40 = vld [vmem:[%s13197_s1 + $0x2a0] sm:$0xff] }
 0x232   : > { %v11641_v52 = vpop.f32.mrf.mxu0  ;;  %v11649_v7 = vpack.c.bf16 %v5482_v60, %v5481_v28  ;;  %v4673_v60 = vadd.f32 %v11324_v37, %v10999_v20 }
 0x233   : > { %v11653_v21 = vpop.f32.mrf.mxu1 }
 0x234   : > { %v11645_v19 = vpop.f32.mrf.mxu0  ;;  %9678 = vmatmul.mubr.msk.bf16.gmra.mxu0 %vm2125_vm0, %v10150_v4  ;;  %8925 = vmatpush3.bf16.msra.mxu1 %v11317_v23  ;;  %13273 = vst [vmem:[#allocation70_spill] sm:$0xff] %v11649_v7  ;;  %13274 = vst [vmem:[#allocation71_spill] sm:$0xff] %v11653_v21  ;;  %v4972_v23 = vadd.f32 %v11324_v37, %v9916_v44  ;;  %v5411_v14 = vmax.f32 %v4673_v60, 0.0  ;;  %v4689_v60 = vadd.f32 %v11324_v37, %v11021_v8 }
 0x235   : > { %9681 = vmatprep.mubr.msk.bf16.mxu0 %vm2125_vm0, %v10151_v11  ;;  %v8766_v0 = vpop.f32.mrf.mxu1 }
 0x236   : > { %v11655_v39 = vpop.f32.mrf.mxu0  ;;  %v5486_v28 = vmax.f32 %v4972_v23, 0.0  ;;  %v5415_v58 = vmax.f32 %v4689_v60, 0.0 }
 0x237   : > { %6804 = vmatmul.mubr.bf16.vlgmr.msra.gmra.mxu1 %v8357_v12  ;;  %v8767_v9 = vpop.f32.mrf.mxu1  ;;  %v4676_v12 = vadd.f32 %v11324_v37, %v11008_v43 }
 0x238   : > { %v11657_v55 = vpop.f32.mrf.mxu0  ;;  %6811 = vmatprep.mubr.bf16.mxu1 %v8390_v30  ;;  %v8422_v30 = vcombine.high %v5555_v38, %v5571_v40  ;;  %v11679_v18 = vpack.c.bf16 %v5486_v28, %v5485_v49  ;;  %v11682_v1 = vadd.f32 %v8767_v9, %v8766_v0  ;;  %v5587_v49 = vld [vmem:[%s13197_s1 + $0x320] sm:$0xff]  ;;  %v8421_v28 = vcombine.low %v5555_v38, %v5571_v40 }
 0x239   : > { %v11670_v11 = vpop.f32.mrf.mxu1  ;;  %v5412_v43 = vmax.f32 %v4676_v12, 0.0  ;;  %v5603_v0 = vld [vmem:[%s13197_s1 + $0x3a0] sm:$0xff]  ;;  %v13276_v12 = vld [vmem:[#allocation23_spill] sm:$0xff] }
 0x23a   : > { %v11668_v4 = vpop.f32.mrf.mxu0  ;;  %13275 = vst [vmem:[#allocation72_spill] sm:$0xff] %v11679_v18  ;;  %v8454_v56 = vcombine.high %v5587_v49, %v5603_v0  ;;  %v10157_v18 = vld [vmem:[%s10289_s15 + $0x480] sm:$0xff]  }
 0x23b   : > { %v11684_v35 = vpop.f32.mrf.mxu1  ;;  %v11707_v47 = vpack.c.bf16 %v5412_v43, %v5411_v14  ;;  %v11726_v14 = vld [vmem:[%s13197_s1 + $0xa8] sm:$0xff] }
 0x23c   : > { %v11676_v44 = vpop.f32.mrf.mxu0  ;;  %9682 = vmatmul.mubr.msk.bf16.gmra.mxu0 %vm2125_vm0, %v10152_v33  ;;  %v10155_v33 = vld [vmem:[%s10289_s15 + $0x470] sm:$0xff]  }
 0x23d   : > { %9685 = vmatprep.mubr.msk.bf16.mxu0 %vm2125_vm0, %v10153_v15  ;;  %v8772_v20 = vpop.f32.mrf.mxu1  ;;  %13277 = vst [vmem:[#allocation23_spill] sm:$0xff] %v11707_v47 }
 0x23e   : > { %v11686_v23 = vpop.f32.mrf.mxu0 }
 0x23f   : > { %6812 = vmatmul.mubr.bf16.gmra.mxu1 %v8389_v42  ;;  %v8773_v15 = vpop.f32.mrf.mxu1 }
 0x240   : > { %v11688_v61 = vpop.f32.mrf.mxu0  ;;  %6819 = vmatprep.mubr.bf16.mxu1 %v8422_v30  ;;  %v4692_v30 = vadd.f32 %v11324_v37, %v13276_v12  ;;  %v11710_v7 = vadd.f32 %v8773_v15, %v8772_v20 }
 0x241   : > { %v11700_v42 = vpop.f32.mrf.mxu1 }
 0x242   : > { %v11698_v9 = vpop.f32.mrf.mxu0  ;;  %v5416_v50 = vmax.f32 %v4692_v30, 0.0 }
 0x243   : > { %v11712_v38 = vpop.f32.mrf.mxu1 }
 0x244   : > { %v9591_v31 = vpop.f32.mrf.mxu0  ;;  %9686 = vmatmul.mubr.msk.bf16.gmra.mxu0 %vm2125_vm0, %v10154_v36  ;;  %v11721_v36 = vld [vmem:[%s13197_s1 + $0x28] sm:$0xff]  ;;  %v11737_v24 = vpack.c.bf16 %v5416_v50, %v5415_v58  ;;  %v3625_v58 = vadd.f32 %v11324_v37, %v11615_v17  ;;  %v3612_v17 = vadd.f32 %v11324_v37, %v11603_v32 }
 0x245   : > { %9689 = vmatprep.mubr.msk.bf16.mxu0 %vm2125_vm0, %v10155_v33  ;;  %v8778_v8 = vpop.f32.mrf.mxu1  ;;  %v8453_v33 = vcombine.low %v5587_v49, %v5603_v0  ;;  %v8360_v21 = vcombine.high %v11721_v36, %v11726_v14 }
 0x246   : > { %v11714_v40 = vpop.f32.mrf.mxu0  ;;  %v5149_v57 = vmax.f32 %v3625_v58, 0.0 }
 0x247   : > { %6820 = vmatmul.mubr.bf16.gmra.mxu1 %v8421_v28  ;;  %v8779_v20 = vpop.f32.mrf.mxu1  ;;  %v13278_v28 = vld [vmem:[#allocation24_spill] sm:$0xff] }
 0x248   : > { %v9592_v12 = vpop.f32.mrf.mxu0  ;;  %6827 = vmatprep.mubr.bf16.mxu1 %v8454_v56  ;;  %v4705_v60 = vadd.f32 %v11324_v37, %v13278_v28  ;;  %v13279_v56 = vld [vmem:[#allocation26_spill] sm:$0xff]  ;;  %v11740_v49 = vadd.f32 %v8779_v20, %v8778_v8  ;;  %v3628_v28 = vadd.f32 %v11324_v37, %v11627_v63  ;;  %v3609_v63 = vadd.f32 %v11324_v37, %v11586_v10 }
 0x249   : > { %v11728_v15 = vpop.f32.mrf.mxu1  ;;  %v4708_v30 = vadd.f32 %v11324_v37, %v13279_v56  ;;  %v3617_v10 = vadd.f32 %v11324_v37, %v11625_v27 }
 0x24a   : > { %v3667_v43 = vpop.f32.mrf.mxu0  ;;  %v5419_v62 = vmax.f32 %v4705_v60, 0.0  ;;  %v3676_v60 = vadd.f32 %v11324_v37, %v9592_v12 }
 0x24b   : > { %v11742_v0 = vpop.f32.mrf.mxu1  ;;  %v5420_v48 = vmax.f32 %v4708_v30, 0.0 }
 0x24c   : > { %v9595_v22 = vpop.f32.mrf.mxu0  ;;  %9690 = vmatmul.mubr.msk.bf16.gmra.mxu0 %vm2125_vm0, %v10156_v5  ;;  %v5162_v27 = vmax.f32 %v3676_v60, 0.0  ;;  %v10161_v60 = vld [vmem:[%s10289_s15 + $0x4a0] sm:$0xff]  }
 0x24d   : > { %9693 = vmatprep.mubr.msk.bf16.mxu0 %vm2125_vm0, %v10157_v18  ;;  %v3689_v45 = vadd.f32 %v11324_v37, %v9595_v22  ;;  %v8784_v5 = vpop.f32.mrf.mxu1  ;;  %v10158_v18 = vld [vmem:[%s10289_s15 + $0x488] sm:$0xff]   ;;  %v5150_v22 = vmax.f32 %v3628_v28, 0.0  ;;  %v3673_v28 = vadd.f32 %v11324_v37, %v9591_v31  ;;  %v3668_v31 = vadd.f32 %v11324_v37, %v3667_v43 }
 0x24e   : > { %v3680_v56 = vpop.f32.mrf.mxu0 }
 0x24f   : > { %6828 = vmatmul.mubr.bf16.gmra.mxu1 %v8453_v33  ;;  %v3681_v8 = vadd.f32 %v11324_v37, %v3680_v56  ;;  %v8785_v41 = vpop.f32.mrf.mxu1  ;;  %v3620_v33 = vadd.f32 %v11324_v37, %v11641_v52  ;;  %v11767_v52 = vpack.c.bf16 %v5420_v48, %v5419_v62  ;;  %v5702_v58 = vpack.c.bf16 %v5150_v22, %v5149_v57  ;;  %v10160_v57 = vld [vmem:[%s10289_s15 + $0x498] sm:$0xff]  }
 0x250   : > { %v9596_v50 = vpop.f32.mrf.mxu0  ;;  %6868 = vmatprep.mubr.bf16.mxu1 %v8360_v21  ;;  %v5165_v21 = vmax.f32 %v3689_v45, 0.0  ;;  %v11770_v45 = vadd.f32 %v8785_v41, %v8784_v5  ;;  %v3665_v41 = vadd.f32 %v11324_v37, %v11714_v40  ;;  %v5145_v22 = vmax.f32 %v3609_v63, 0.0 }
 0x251   : > { %v3692_v20 = vadd.f32 %v11324_v37, %v9596_v50  ;;  %v11761_v50 = vpop.f32.mrf.mxu1  ;;  %v5163_v12 = vmax.f32 %v3681_v8, 0.0  ;;  %v5147_v8 = vmax.f32 %v3617_v10, 0.0  ;;  %v5160_v10 = vmax.f32 %v3668_v31, 0.0 }
 0x252   : > { %v3683_v30 = vpop.f32.mrf.mxu0 }
 0x253   : > { %v5166_v29 = vmax.f32 %v3692_v20, 0.0  ;;  %v3684_v56 = vadd.f32 %v11324_v37, %v3683_v30  ;;  %v11772_v20 = vpop.f32.mrf.mxu1  ;;  %v5148_v30 = vmax.f32 %v3620_v33, 0.0 }
 0x254   : > { %v9599_v16 = vpop.f32.mrf.mxu0  ;;  %9694 = vmatmul.mubr.msk.bf16.gmra.mxu0 %vm2125_vm0, %v10158_v18  ;;  %v5146_v18 = vmax.f32 %v3612_v17, 0.0 }
 0x255   : > { %v5710_v26 = vpack.c.bf16 %v5166_v29, %v5165_v21  ;;  %v5164_v32 = vmax.f32 %v3684_v56, 0.0  ;;  %9697 = vmatprep.mubr.msk.bf16.mxu0 %vm2125_vm0, %v10159_v6  ;;  %v3705_v48 = vadd.f32 %v11324_v37, %v9599_v16  ;;  %v8806_v29 = vpop.f32.mrf.mxu1  ;;  %v5161_v6 = vmax.f32 %v3673_v28, 0.0 }
 0x256   : > { %v3696_v47 = vpop.f32.mrf.mxu0  ;;  %v5701_v17 = vpack.c.bf16 %v5148_v30, %v5147_v8  ;;  %v3660_v21 = vadd.f32 %v11324_v37, %v11688_v61 }
 0x257   : > { %8950 = vmatprep.subr.bf16.mxu1 %v5710_v26  ;;  %v5709_v62 = vpack.c.bf16 %v5164_v32, %v5163_v12  ;;  %v3697_v33 = vadd.f32 %v11324_v37, %v3696_v47  ;;  %v8807_v16 = vpop.f32.mrf.mxu1  ;;  %v3604_v26 = vadd.f32 %v11324_v37, %v11613_v59  ;;  %v5708_v56 = vpack.c.bf16 %v5162_v27, %v5161_v6 }
 0x258   : > { %v9600_v5 = vpop.f32.mrf.mxu0  ;;  %8951 = vmatpush3.bf16.msra.mxu1 %v5702_v58  ;;  %v5169_v28 = vmax.f32 %v3705_v48, 0.0  ;;  %v3601_v32 = vadd.f32 %v11324_v37, %v11597_v54  ;;  %v5700_v58 = vpack.c.bf16 %v5146_v18, %v5145_v22  ;;  %v5159_v59 = vmax.f32 %v3665_v41, 0.0 }
 0x259   : > { %v3708_v43 = vadd.f32 %v11324_v37, %v9600_v5  ;;  %8952 = vmatprep.subr.bf16.mxu1 %v5709_v62  ;;  %v8809_v47 = vpop.f32.mrf.mxu1  ;;  %v3657_v62 = vadd.f32 %v11324_v37, %v11676_v44  ;;  %v5167_v61 = vmax.f32 %v3697_v33, 0.0  ;;  %v8808_v48 = vadd.f32 %v8807_v16, %v8806_v29 }
 0x25a   : > { %v3699_v40 = vpop.f32.mrf.mxu0  ;;  %v5144_v6 = vmax.f32 %v3604_v26, 0.0  ;;  %v5158_v54 = vmax.f32 %v3660_v21, 0.0  ;;  %v8771_v41 = vadd.f32 %v11684_v35, %v11670_v11  ;;  %v10162_v26 = vld [vmem:[%s10289_s15 + $0x4a8] sm:$0xff]   ;;  %v10163_v21 = vld [vmem:[%s10289_s15 + $0x4b0] sm:$0xff]  }
 0x25b   : > { %v5170_v12 = vmax.f32 %v3708_v43, 0.0  ;;  %v3700_v63 = vadd.f32 %v11324_v37, %v3699_v40  ;;  %v8810_v8 = vpop.f32.mrf.mxu1  ;;  %v11798_v37 = vld [vmem:[%s13199_s3] ss:$0 sm:$0xff]  ;;  %v11808_v22 = vadd.f32 %v8808_v48, %v11682_v1  ;;  %v5143_v43 = vmax.f32 %v3601_v32, 0.0 }
 0x25c   : > { %v9603_v30 = vpop.f32.mrf.mxu0  ;;  %9698 = vmatmul.mubr.msk.bf16.gmra.mxu0 %vm2125_vm0, %v10160_v57  ;;  %8953 = vmatpush3.bf16.msra.mxu1 %v5701_v17  ;;  %v3652_v44 = vadd.f32 %v11798_v37, %v11698_v9  ;;  %v5707_v57 = vpack.c.bf16 %v5160_v10, %v5159_v59  ;;  %v3649_v16 = vadd.f32 %v11798_v37, %v11686_v23 }
 0x25d   : > { %v11792_v27 = vpack.c.bf16 %v5170_v12, %v5169_v28  ;;  %v5168_v31 = vmax.f32 %v3700_v63, 0.0  ;;  %8954 = vmatprep.subr.bf16.mxu1 %v5708_v56  ;;  %9701 = vmatprep.mubr.msk.bf16.mxu0 %vm2125_vm0, %v10161_v60  ;;  %v3721_v29 = vadd.f32 %v11798_v37, %v9603_v30  ;;  %v8812_v33 = vpop.f32.mrf.mxu1  ;;  %v5157_v60 = vmax.f32 %v3657_v62, 0.0 }
 0x25e   : > { %v3712_v18 = vpop.f32.mrf.mxu0  ;;  %v8811_v17 = vadd.f32 %v8810_v8, %v8809_v47  ;;  %v5699_v40 = vpack.c.bf16 %v5144_v6, %v5143_v43  ;;  %v3644_v1 = vadd.f32 %v11798_v37, %v11657_v55  ;;  %v5156_v23 = vmax.f32 %v3652_v44, 0.0 }
 0x25f   : > { %v11804_v5 = vpack.c.bf16 %v5168_v31, %v5167_v61  ;;  %v3713_v11 = vadd.f32 %v11798_v37, %v3712_v18  ;;  %v8813_v56 = vpop.f32.mrf.mxu1  ;;  %v5706_v10 = vpack.c.bf16 %v5158_v54, %v5157_v60  ;;  %v5173_v63 = vmax.f32 %v3721_v29, 0.0 }
 0x260   : > { %v9604_v9 = vpop.f32.mrf.mxu0  ;;  %8955 = vmatpush3.bf16.msra.mxu1 %v5700_v58  ;;  %v11818_v12 = vadd.f32 %v8811_v17, %v8771_v41  ;;  %v3641_v62 = vadd.f32 %v11798_v37, %v11645_v19  ;;  %v5155_v59 = vmax.f32 %v3649_v16, 0.0  ;;  %v8814_v48 = vadd.f32 %v8813_v56, %v8812_v33  ;;  %v10164_v33 = vld [vmem:[%s10289_s15 + $0x4b8] sm:$0xff]  }
 0x261   : > { %v3724_v35 = vadd.f32 %v11798_v37, %v9604_v9  ;;  %8956 = vmatprep.subr.bf16.mxu1 %v5707_v57  ;;  %v8815_v58 = vpop.f32.mrf.mxu1  ;;  %v5171_v55 = vmax.f32 %v3713_v11, 0.0  ;;  %v5154_v6 = vmax.f32 %v3644_v1, 0.0  ;;  %v8777_v19 = vadd.f32 %v11712_v38, %v11700_v42  ;;  %v10165_v38 = vld [vmem:[%s10289_s15 + $0x4c0] sm:$0xff]  }
 0x262   : > { %v3715_v28 = vpop.f32.mrf.mxu0  ;;  %v3636_v44 = vadd.f32 %v11798_v37, %v11668_v4  ;;  %v5705_v41 = vpack.c.bf16 %v5156_v23, %v5155_v59  ;;  %v11838_v29 = vadd.f32 %v8814_v48, %v11710_v7  ;;  %v5153_v16 = vmax.f32 %v3641_v62, 0.0 }
 0x263   : > { %v5174_v32 = vmax.f32 %v3724_v35, 0.0  ;;  %v3716_v47 = vadd.f32 %v11798_v37, %v3715_v28  ;;  %v8816_v8 = vpop.f32.mrf.mxu1  ;;  %v3633_v42 = vadd.f32 %v11798_v37, %v11655_v39 }
 0x264   : > { %v11823_v30 = vpop.f32.mrf.mxu0  ;;  %9702 = vmatmul.mubr.msk.bf16.gmra.mxu0 %vm2125_vm0, %v10162_v26  ;;  %8957 = vmatpush3.bf16.msra.mxu1 %v5699_v40  ;;  %v8817_v60 = vadd.f32 %v8816_v8, %v8815_v58  ;;  %v5704_v7 = vpack.c.bf16 %v5154_v6, %v5153_v16  ;;  %v5152_v17 = vmax.f32 %v3636_v44, 0.0  ;;  %v8783_v40 = vadd.f32 %v11742_v0, %v11728_v15  ;;  %v5540_v15 = vld [vmem:[%s13197_s1 + $0x1a8] sm:$0xff]  ;;  %v10168_v44 = vld [vmem:[%s10289_s15 + $0x4d8] sm:$0xff]  }
 0x265   : > { %v11826_v61 = vpack.c.bf16 %v5174_v32, %v5173_v63  ;;  %v5172_v31 = vmax.f32 %v3716_v47, 0.0  ;;  %8958 = vmatprep.subr.bf16.mxu1 %v5706_v10  ;;  %9705 = vmatprep.mubr.msk.bf16.mxu0 %vm2125_vm0, %v10163_v21  ;;  %v8818_v57 = vpop.f32.mrf.mxu1  ;;  %v10167_v32 = vld [vmem:[%s10289_s15 + $0x4d0] sm:$0xff]   ;;  %v5524_v47 = vld [vmem:[%s13197_s1 + $0x128] sm:$0xff]  ;;  %v8789_v6 = vadd.f32 %v11772_v20, %v11761_v50 }
 0x266   : > { %v11829_v54 = vpop.f32.mrf.mxu0  ;;  %v11849_v26 = vadd.f32 %v8817_v60, %v8777_v19  ;;  %v8391_v60 = vcombine.low %v5524_v47, %v5540_v15 }
 0x267   : > { %v11835_v18 = vpack.c.bf16 %v5172_v31, %v5171_v55  ;;  %v8819_v4 = vpop.f32.mrf.mxu1  ;;  %v8392_v55 = vcombine.high %v5524_v47, %v5540_v15 }
 0x268   : > { %v11840_v43 = vpop.f32.mrf.mxu0  ;;  %8959 = vmatpush3.bf16.msra.mxu1 %v11592_v34  ;;  %v5151_v34 = vmax.f32 %v3633_v42, 0.0  ;;  %v8820_v39 = vadd.f32 %v8819_v4, %v8818_v57  ;;  %v5556_v57 = vld [vmem:[%s13197_s1 + $0x228] sm:$0xff] }
 0x269   : > { %8960 = vmatprep.subr.bf16.mxu1 %v5705_v41  ;;  %v8821_v11 = vpop.f32.mrf.mxu1  ;;  %v10169_v41 = vld [vmem:[%s10289_s15 + $0x4e0] sm:$0xff]  }
 0x26a   : > { %v11847_v9 = vpop.f32.mrf.mxu0  ;;  %v5703_v1 = vpack.c.bf16 %v5152_v17, %v5151_v34  ;;  %v11861_v10 = vadd.f32 %v8820_v39, %v11740_v49 }
 0x26b   : > { %v8822_v21 = vpop.f32.mrf.mxu1 }
 0x26c   : > { %v11851_v35 = vpop.f32.mrf.mxu0  ;;  %9706 = vmatmul.mubr.msk.bf16.gmra.mxu0 %vm2125_vm0, %v10164_v33  ;;  %8961 = vmatpush3.bf16.msra.mxu1 %v11601_v25  ;;  %v10166_v25 = vld [vmem:[%s10289_s15 + $0x4c8] sm:$0xff]   ;;  %v8823_v63 = vadd.f32 %v8822_v21, %v8821_v11 }
 0x26d   : > { %8962 = vmatprep.subr.bf16.mxu1 %v5704_v7  ;;  %9709 = vmatprep.mubr.msk.bf16.mxu0 %vm2125_vm0, %v10165_v38  ;;  %v8824_v28 = vpop.f32.mrf.mxu1  ;;  %v5572_v33 = vld [vmem:[%s13197_s1 + $0x2a8] sm:$0xff] }
 0x26e   : > { %v11856_v56 = vpop.f32.mrf.mxu0  ;;  %v11876_v58 = vadd.f32 %v8823_v63, %v8783_v40  ;;  %v8424_v38 = vcombine.high %v5556_v57, %v5572_v33  ;;  %v10170_v21 = vld [vmem:[%s10289_s15 + $0x4e8] sm:$0xff]   ;;  %v8423_v47 = vcombine.low %v5556_v57, %v5572_v33  ;;  %v11947_v57 = vld [vmem:[%s13197_s1 + $0xb0] sm:$0xff] }
 0x26f   : > { %v8825_v0 = vpop.f32.mrf.mxu1 }
 0x270   : > { %v11863_v23 = vpop.f32.mrf.mxu0  ;;  %8963 = vmatpush3.bf16.msra.mxu1 %v11562_v2  ;;  %v8359_v2 = vcombine.low %v11721_v36, %v11726_v14  ;;  %v8826_v31 = vadd.f32 %v8825_v0, %v8824_v28  ;;  %v5588_v28 = vld [vmem:[%s13197_s1 + $0x328] sm:$0xff] }
 0x271   : > { %8964 = vmatprep.subr.bf16.mxu1 %v5703_v1  ;;  %v8827_v62 = vpop.f32.mrf.mxu1  ;;  %v10171_v1 = vld [vmem:[%s10289_s15 + $0x4f0] sm:$0xff]  }
 0x272   : > { %v11874_v49 = vpop.f32.mrf.mxu0  ;;  %v11890_v36 = vadd.f32 %v8826_v31, %v11770_v45 }
 0x273   : > { %v8828_v48 = vpop.f32.mrf.mxu1 }
 0x274   : > { %v11880_v59 = vpop.f32.mrf.mxu0  ;;  %9710 = vmatmul.mubr.msk.bf16.gmra.mxu0 %vm2125_vm0, %v10166_v25  ;;  %8965 = vmatpush3.bf16.msra.mxu1 %v11569_v13  ;;  %v8829_v13 = vadd.f32 %v8828_v48, %v8827_v62  ;;  %v5604_v25 = vld [vmem:[%s13197_s1 + $0x3a8] sm:$0xff] }
 0x275   : > { %9713 = vmatprep.mubr.msk.bf16.mxu0 %vm2125_vm0, %v10167_v32 }
 0x276   : > { %v11885_v8 = vpop.f32.mrf.mxu0  ;;  %v11904_v45 = vadd.f32 %v8829_v13, %v8789_v6  ;;  %v10173_v13 = vld [vmem:[%s10289_s15 + $0x500] sm:$0xff]  }
 0x277   : > { %6869 = vmatmul.mubr.bf16.vlgmr.msra.gmra.mxu1 %v8359_v2  ;;  %v8846_v14 = vpop.f32.mrf.mxu1  ;;  %v8456_v2 = vcombine.high %v5588_v28, %v5604_v25 }
 0x278   : > { %v11892_v19 = vpop.f32.mrf.mxu0  ;;  %6876 = vmatprep.mubr.bf16.mxu1 %v8392_v55 }
 0x279   : > { %v8847_v50 = vpop.f32.mrf.mxu1 }
 0x27a   : > { %v11902_v20 = vpop.f32.mrf.mxu0  ;;  %v8848_v4 = vadd.f32 %v8847_v50, %v8846_v14  ;;  %v10172_v14 = vld [vmem:[%s10289_s15 + $0x4f8] sm:$0xff]  }
 0x27b   : > { %v8849_v16 = vpop.f32.mrf.mxu1 }
 0x27c   : > { %v11906_v42 = vpop.f32.mrf.mxu0  ;;  %9714 = vmatmul.mubr.msk.bf16.gmra.mxu0 %vm2125_vm0, %v10168_v44  ;;  %v11913_v11 = vadd.f32 %v8848_v4, %v11808_v22 }
 0x27d   : > { %9717 = vmatprep.mubr.msk.bf16.mxu0 %vm2125_vm0, %v10169_v41  ;;  %v8850_v7 = vpop.f32.mrf.mxu1  ;;  %v11942_v41 = vld [vmem:[%s13197_s1 + $0x30] sm:$0xff] }
 0x27e   : > { %v11910_v17 = vpop.f32.mrf.mxu0  ;;  %v8851_v40 = vadd.f32 %v8850_v7, %v8849_v16  ;;  %v8362_v4 = vcombine.high %v11942_v41, %v11947_v57 }
 0x27f   : > { %6877 = vmatmul.mubr.bf16.gmra.mxu1 %v8391_v60  ;;  %v8852_v34 = vpop.f32.mrf.mxu1  ;;  %v8455_v60 = vcombine.low %v5588_v28, %v5604_v25  ;;  %v3753_v25 = vadd.f32 %v11798_v37, %v11851_v35 }
 0x280   : > { %v11915_v39 = vpop.f32.mrf.mxu0  ;;  %6884 = vmatprep.mubr.bf16.mxu1 %v8424_v38  ;;  %v11928_v22 = vadd.f32 %v8851_v40, %v11818_v12 }
 0x281   : > { %v8853_v63 = vpop.f32.mrf.mxu1 }
 0x282   : > { %v11925_v32 = vpop.f32.mrf.mxu0  ;;  %v8854_v62 = vadd.f32 %v8853_v63, %v8852_v34 }
 0x283   : > { %v8855_v15 = vpop.f32.mrf.mxu1 }
 0x284   : > { %v9623_v0 = vpop.f32.mrf.mxu0  ;;  %9718 = vmatmul.mubr.msk.bf16.gmra.mxu0 %vm2125_vm0, %v10170_v21  ;;  %v11935_v48 = vadd.f32 %v8854_v62, %v11838_v29  ;;  %v3756_v21 = vadd.f32 %v11798_v37, %v11863_v23  ;;  %v10175_v23 = vld [vmem:[%s10289_s15 + $0x510] sm:$0xff]  }
 0x285   : > { %9721 = vmatprep.mubr.msk.bf16.mxu0 %vm2125_vm0, %v10171_v1  ;;  %v8856_v55 = vpop.f32.mrf.mxu1 }
 0x286   : > { %v11932_v31 = vpop.f32.mrf.mxu0  ;;  %v8857_v44 = vadd.f32 %v8856_v55, %v8855_v15 }
 0x287   : > { %6885 = vmatmul.mubr.bf16.gmra.mxu1 %v8423_v47  ;;  %v8858_v6 = vpop.f32.mrf.mxu1  ;;  %v10174_v47 = vld [vmem:[%s10289_s15 + $0x508] sm:$0xff]  }
 0x288   : > { %v9624_v12 = vpop.f32.mrf.mxu0  ;;  %6892 = vmatprep.mubr.bf16.mxu1 %v8456_v2  ;;  %v11950_v29 = vadd.f32 %v8857_v44, %v11849_v26 }
 0x289   : > { %v8859_v33 = vpop.f32.mrf.mxu1 }
 0x28a   : > { %v3795_v50 = vpop.f32.mrf.mxu0  ;;  %v8860_v7 = vadd.f32 %v8859_v33, %v8858_v6  ;;  %v5182_v6 = vmax.f32 %v3756_v21, 0.0 }
 0x28b   : > { %v8861_v16 = vpop.f32.mrf.mxu1 }
 0x28c   : > { %v9627_v38 = vpop.f32.mrf.mxu0  ;;  %9722 = vmatmul.mubr.msk.bf16.gmra.mxu0 %vm2125_vm0, %v10172_v14  ;;  %v11960_v1 = vadd.f32 %v8860_v7, %v11861_v10  ;;  %v3748_v14 = vadd.f32 %v11798_v37, %v11874_v49  ;;  %v3804_v10 = vadd.f32 %v11798_v37, %v9624_v12  ;;  %v3745_v7 = vadd.f32 %v11798_v37, %v11856_v56 }
 0x28d   : > { %9725 = vmatprep.mubr.msk.bf16.mxu0 %vm2125_vm0, %v10173_v13  ;;  %v8862_v34 = vpop.f32.mrf.mxu1  ;;  %v3817_v26 = vadd.f32 %v11798_v37, %v9627_v38  ;;  %v3740_v38 = vadd.f32 %v11798_v37, %v11840_v43  ;;  %v3801_v49 = vadd.f32 %v11798_v37, %v9623_v0  ;;  %v3796_v56 = vadd.f32 %v11798_v37, %v3795_v50 }
 0x28e   : > { %v3808_v40 = vpop.f32.mrf.mxu0  ;;  %v8863_v15 = vadd.f32 %v8862_v34, %v8861_v16  ;;  %v3793_v50 = vadd.f32 %v11798_v37, %v11932_v31 }
 0x28f   : > { %6893 = vmatmul.mubr.bf16.gmra.mxu1 %v8455_v60  ;;  %v8864_v28 = vpop.f32.mrf.mxu1  ;;  %v3809_v2 = vadd.f32 %v11798_v37, %v3808_v40  ;;  %v5197_v35 = vmax.f32 %v3817_v26, 0.0  ;;  %v3737_v26 = vadd.f32 %v11798_v37, %v11823_v30 }
 0x290   : > { %v9628_v63 = vpop.f32.mrf.mxu0  ;;  %6933 = vmatprep.mubr.bf16.mxu1 %v8362_v4  ;;  %v11972_v13 = vadd.f32 %v8863_v15, %v11876_v58  ;;  %v5181_v4 = vmax.f32 %v3753_v25, 0.0  ;;  %v5180_v25 = vmax.f32 %v3748_v14, 0.0 }
 0x291   : > { %v3820_v62 = vadd.f32 %v11798_v37, %v9628_v63  ;;  %v8865_v55 = vpop.f32.mrf.mxu1  ;;  %v5195_v12 = vmax.f32 %v3809_v2, 0.0  ;;  %v5194_v63 = vmax.f32 %v3804_v10, 0.0  ;;  %v3732_v10 = vadd.f32 %v11798_v37, %v11847_v9 }
 0x292   : > { %v3811_v44 = vpop.f32.mrf.mxu0  ;;  %v8866_v40 = vadd.f32 %v8865_v55, %v8864_v28  ;;  %v5718_v43 = vpack.c.bf16 %v5182_v6, %v5181_v4  ;;  %v5178_v28 = vmax.f32 %v3740_v38, 0.0  ;;  %v5193_v55 = vmax.f32 %v3801_v49, 0.0  ;;  %v10176_v6 = vld [vmem:[%s10289_s15 + $0x518] sm:$0xff]  }
 0x293   : > { %v5198_v33 = vmax.f32 %v3820_v62, 0.0  ;;  %v3812_v60 = vadd.f32 %v11798_v37, %v3811_v44  ;;  %v8867_v16 = vpop.f32.mrf.mxu1 }
 0x294   : > { %v9631_v34 = vpop.f32.mrf.mxu0  ;;  %9726 = vmatmul.mubr.msk.bf16.gmra.mxu0 %vm2125_vm0, %v10174_v47  ;;  %v11987_v2 = vadd.f32 %v8866_v40, %v11890_v36  ;;  %v10177_v36 = vld [vmem:[%s10289_s15 + $0x520] sm:$0xff]   ;;  %v5724_v38 = vpack.c.bf16 %v5194_v63, %v5193_v55  ;;  %v10178_v55 = vld [vmem:[%s10289_s15 + $0x528] sm:$0xff]  }
 0x295   : > { %v5726_v58 = vpack.c.bf16 %v5198_v33, %v5197_v35  ;;  %v5196_v21 = vmax.f32 %v3812_v60, 0.0  ;;  %9729 = vmatprep.mubr.msk.bf16.mxu0 %vm2125_vm0, %v10175_v23  ;;  %v3833_v0 = vadd.f32 %v11798_v37, %v9631_v34  ;;  %v8868_v62 = vpop.f32.mrf.mxu1  ;;  %v5179_v23 = vmax.f32 %v3745_v7, 0.0 }
 0x296   : > { %v3824_v15 = vpop.f32.mrf.mxu0  ;;  %v8869_v14 = vadd.f32 %v8868_v62, %v8867_v16  ;;  %v3788_v60 = vadd.f32 %v11798_v37, %v11915_v39  ;;  %v5192_v7 = vmax.f32 %v3796_v56, 0.0  ;;  %v5177_v34 = vmax.f32 %v3737_v26, 0.0 }
 0x297   : > { %8990 = vmatprep.subr.bf16.mxu1 %v5726_v58  ;;  %v5725_v47 = vpack.c.bf16 %v5196_v21, %v5195_v12  ;;  %v3825_v44 = vadd.f32 %v11798_v37, %v3824_v15  ;;  %v5717_v33 = vpack.c.bf16 %v5180_v25, %v5179_v23  ;;  %v5201_v9 = vmax.f32 %v3833_v0, 0.0 }
 0x298   : > { %v9632_v30 = vpop.f32.mrf.mxu0  ;;  %8991 = vmatpush3.bf16.msra.mxu1 %v5718_v43  ;;  %v12000_v16 = vadd.f32 %v8869_v14, %v11904_v45  ;;  %v3729_v12 = vadd.f32 %v11798_v37, %v11829_v54  ;;  %v3785_v58 = vadd.f32 %v11798_v37, %v11906_v42  ;;  %v5191_v39 = vmax.f32 %v3793_v50, 0.0  ;;  %v10179_v14 = vld [vmem:[%s10289_s15 + $0x530] sm:$0xff]  }
 0x299   : > { %v3836_v35 = vadd.f32 %v11798_v37, %v9632_v30  ;;  %8992 = vmatprep.subr.bf16.mxu1 %v5725_v47  ;;  %v5199_v40 = vmax.f32 %v3825_v44, 0.0  ;;  %v5716_v26 = vpack.c.bf16 %v5178_v28, %v5177_v34  ;;  %v5176_v25 = vmax.f32 %v3732_v10, 0.0 }
 0x29a   : > { %v3827_v4 = vpop.f32.mrf.mxu0  ;;  %v5190_v54 = vmax.f32 %v3788_v60, 0.0  ;;  %v3780_v42 = vadd.f32 %v11798_v37, %v11925_v32  ;;  %v5723_v0 = vpack.c.bf16 %v5192_v7, %v5191_v39  ;;  %v5175_v47 = vmax.f32 %v3729_v12, 0.0 }
 0x29b   : > { %v5202_v49 = vmax.f32 %v3836_v35, 0.0  ;;  %v3828_v31 = vadd.f32 %v11798_v37, %v3827_v4  ;;  %v5189_v62 = vmax.f32 %v3785_v58, 0.0  ;;  %v3777_v28 = vadd.f32 %v11798_v37, %v11910_v17 }
 0x29c   : > { %v9635_v21 = vpop.f32.mrf.mxu0  ;;  %9730 = vmatmul.mubr.msk.bf16.gmra.mxu0 %vm2125_vm0, %v10176_v6  ;;  %8993 = vmatpush3.bf16.msra.mxu1 %v5717_v33  ;;  %v5715_v32 = vpack.c.bf16 %v5176_v25, %v5175_v47  ;;  %v3772_v10 = vadd.f32 %v11798_v37, %v11892_v19  ;;  %v5188_v35 = vmax.f32 %v3780_v42, 0.0  ;;  %v3769_v17 = vadd.f32 %v11798_v37, %v11880_v59  ;;  %v5541_v47 = vld [vmem:[%s13197_s1 + $0x1b0] sm:$0xff] }
 0x29d   : > { %v12008_v45 = vpack.c.bf16 %v5202_v49, %v5201_v9  ;;  %v5200_v43 = vmax.f32 %v3828_v31, 0.0  ;;  %8994 = vmatprep.subr.bf16.mxu1 %v5724_v38  ;;  %9733 = vmatprep.mubr.msk.bf16.mxu0 %vm2125_vm0, %v10177_v36  ;;  %v3849_v56 = vadd.f32 %v11798_v37, %v9635_v21  ;;  %v5722_v50 = vpack.c.bf16 %v5190_v54, %v5189_v62  ;;  %v10180_v21 = vld [vmem:[%s10289_s15 + $0x538] sm:$0xff]  }
 0x29e   : > { %v3840_v63 = vpop.f32.mrf.mxu0  ;;  %v5187_v4 = vmax.f32 %v3777_v28, 0.0  ;;  %v5186_v31 = vmax.f32 %v3772_v10, 0.0  ;;  %v3764_v59 = vadd.f32 %v11798_v37, %v11902_v20  ;;  %v5185_v39 = vmax.f32 %v3769_v17, 0.0 }
 0x29f   : > { %v12013_v15 = vpack.c.bf16 %v5200_v43, %v5199_v40  ;;  %v3841_v30 = vadd.f32 %v11798_v37, %v3840_v63  ;;  %v5205_v36 = vmax.f32 %v3849_v56, 0.0  ;;  %v3761_v40 = vadd.f32 %v11798_v37, %v11885_v8  ;;  %v10181_v43 = vld [vmem:[%s10289_s15 + $0x540] sm:$0xff]   ;;  %v10182_v56 = vld [vmem:[%s10289_s15 + $0x548] sm:$0xff]  }
 0x2a0   : > { %v9636_v23 = vpop.f32.mrf.mxu0  ;;  %8995 = vmatpush3.bf16.msra.mxu1 %v5716_v26  ;;  %v5721_v12 = vpack.c.bf16 %v5188_v35, %v5187_v4  ;;  %v5720_v25 = vpack.c.bf16 %v5186_v31, %v5185_v39  ;;  %v5184_v20 = vmax.f32 %v3764_v59, 0.0  ;;  %v10186_v59 = vld [vmem:[%s10289_s15 + $0x568] sm:$0xff]   ;;  %v5605_v39 = vld [vmem:[%s13197_s1 + $0x3b0] sm:$0xff] }
 0x2a1   : > { %v3852_v6 = vadd.f32 %v11798_v37, %v9636_v23  ;;  %8996 = vmatprep.subr.bf16.mxu1 %v5723_v0  ;;  %v5203_v7 = vmax.f32 %v3841_v30, 0.0  ;;  %v10183_v0 = vld [vmem:[%s10289_s15 + $0x550] sm:$0xff]   ;;  %v8361_v23 = vcombine.low %v11942_v41, %v11947_v57 }
 0x2a2   : > { %v3843_v44 = vpop.f32.mrf.mxu0  ;;  %v5557_v41 = vld [vmem:[%s13197_s1 + $0x230] sm:$0xff] }
 0x2a3   : > { %v5206_v33 = vmax.f32 %v3852_v6, 0.0  ;;  %v3844_v60 = vadd.f32 %v11798_v37, %v3843_v44 }
 0x2a4   : > { %v12027_v38 = vpop.f32.mrf.mxu0  ;;  %9734 = vmatmul.mubr.msk.bf16.gmra.mxu0 %vm2125_vm0, %v10178_v55  ;;  %8997 = vmatpush3.bf16.msra.mxu1 %v5715_v32  ;;  %v10185_v32 = vld [vmem:[%s10289_s15 + $0x560] sm:$0xff]  }
 0x2a5   : > { %v12030_v19 = vpack.c.bf16 %v5206_v33, %v5205_v36  ;;  %v5204_v9 = vmax.f32 %v3844_v60, 0.0  ;;  %8998 = vmatprep.subr.bf16.mxu1 %v5722_v50  ;;  %9737 = vmatprep.mubr.msk.bf16.mxu0 %vm2125_vm0, %v10179_v14  ;;  %v10184_v14 = vld [vmem:[%s10289_s15 + $0x558] sm:$0xff]  }
 0x2a6   : > { %v12033_v49 = vpop.f32.mrf.mxu0 }
 0x2a7   : > { %v12037_v34 = vpack.c.bf16 %v5204_v9, %v5203_v7 }
 0x2a8   : > { %v12039_v58 = vpop.f32.mrf.mxu0  ;;  %8999 = vmatpush3.bf16.msra.mxu1 %v11826_v61  ;;  %v5183_v61 = vmax.f32 %v3761_v40, 0.0 }
 0x2a9   : > { %9000 = vmatprep.subr.bf16.mxu1 %v5721_v12 }
 0x2aa   : > { %v12046_v26 = vpop.f32.mrf.mxu0  ;;  %v5719_v8 = vpack.c.bf16 %v5184_v20, %v5183_v61 }
 0x2ac   : > { %v12048_v54 = vpop.f32.mrf.mxu0  ;;  %9738 = vmatmul.mubr.msk.bf16.gmra.mxu0 %vm2125_vm0, %v10180_v21  ;;  %9001 = vmatpush3.bf16.msra.mxu1 %v11835_v18  ;;  %v5525_v18 = vld [vmem:[%s13197_s1 + $0x130] sm:$0xff] }
 0x2ad   : > { %9002 = vmatprep.subr.bf16.mxu1 %v5720_v25  ;;  %9741 = vmatprep.mubr.msk.bf16.mxu0 %vm2125_vm0, %v10181_v43  ;;  %v8393_v44 = vcombine.low %v5525_v18, %v5541_v47  ;;  %v10187_v21 = vld [vmem:[%s10289_s15 + $0x570] sm:$0xff]  }
 0x2ae   : > { %v12053_v63 = vpop.f32.mrf.mxu0 }
 0x2b0   : > { %v12055_v42 = vpop.f32.mrf.mxu0  ;;  %9003 = vmatpush3.bf16.msra.mxu1 %v11792_v27  ;;  %v8394_v27 = vcombine.high %v5525_v18, %v5541_v47 }
 0x2b1   : > { %9004 = vmatprep.subr.bf16.mxu1 %v5719_v8 }
 0x2b2   : > { %v12066_v62 = vpop.f32.mrf.mxu0 }
 0x2b4   : > { %v12070_v55 = vpop.f32.mrf.mxu0  ;;  %9742 = vmatmul.mubr.msk.bf16.gmra.mxu0 %vm2125_vm0, %v10182_v56  ;;  %9005 = vmatpush3.bf16.msra.mxu1 %v11804_v5  ;;  %v5573_v5 = vld [vmem:[%s13197_s1 + $0x2b0] sm:$0xff] }
 0x2b5   : > { %9745 = vmatprep.mubr.msk.bf16.mxu0 %vm2125_vm0, %v10183_v0  ;;  %v8426_v33 = vcombine.high %v5557_v41, %v5573_v5  ;;  %v8425_v20 = vcombine.low %v5557_v41, %v5573_v5  ;;  %v12133_v41 = vld [vmem:[%s13197_s1 + $0xb8] sm:$0xff] }
 0x2b6   : > { %v12075_v28 = vpop.f32.mrf.mxu0 }
 0x2b7   : > { %6934 = vmatmul.mubr.bf16.vlgmr.msra.gmra.mxu1 %v8361_v23  ;;  %v8886_v30 = vpop.f32.mrf.mxu1 }
 0x2b8   : > { %v12077_v6 = vpop.f32.mrf.mxu0  ;;  %6941 = vmatprep.mubr.bf16.mxu1 %v8394_v27 }
 0x2b9   : > { %v8887_v57 = vpop.f32.mrf.mxu1 }
 0x2ba   : > { %v12087_v10 = vpop.f32.mrf.mxu0  ;;  %v8888_v50 = vadd.f32 %v8887_v57, %v8886_v30  ;;  %v10188_v30 = vld [vmem:[%s10289_s15 + $0x578] sm:$0xff]  }
 0x2bb   : > { %v8889_v35 = vpop.f32.mrf.mxu1 }
 0x2bc   : > { %v12089_v36 = vpop.f32.mrf.mxu0  ;;  %9746 = vmatmul.mubr.msk.bf16.gmra.mxu0 %vm2125_vm0, %v10184_v14  ;;  %v12093_v60 = vadd.f32 %v8888_v50, %v11913_v11  ;;  %v5589_v11 = vld [vmem:[%s13197_s1 + $0x330] sm:$0xff] }
 0x2bd   : > { %9749 = vmatprep.mubr.msk.bf16.mxu0 %vm2125_vm0, %v10185_v32  ;;  %v8890_v17 = vpop.f32.mrf.mxu1  ;;  %v10189_v32 = vld [vmem:[%s10289_s15 + $0x580] sm:$0xff]  }
 0x2be   : > { %v12096_v4 = vpop.f32.mrf.mxu0  ;;  %v8891_v7 = vadd.f32 %v8890_v17, %v8889_v35 }
 0x2bf   : > { %6942 = vmatmul.mubr.bf16.gmra.mxu1 %v8393_v44  ;;  %v8892_v9 = vpop.f32.mrf.mxu1  ;;  %v8457_v44 = vcombine.low %v5589_v11, %v5605_v39 }
 0x2c0   : > { %v12098_v31 = vpop.f32.mrf.mxu0  ;;  %6949 = vmatprep.mubr.bf16.mxu1 %v8426_v33  ;;  %v12102_v12 = vadd.f32 %v8891_v7, %v11928_v22  ;;  %v8458_v22 = vcombine.high %v5589_v11, %v5605_v39 }
 0x2c1   : > { %v8893_v40 = vpop.f32.mrf.mxu1 }
 0x2c2   : > { %v12111_v43 = vpop.f32.mrf.mxu0  ;;  %v8894_v25 = vadd.f32 %v8893_v40, %v8892_v9  ;;  %v3884_v9 = vadd.f32 %v11798_v37, %v12055_v42  ;;  %v3881_v40 = vadd.f32 %v11798_v37, %v12048_v54  ;;  %v10191_v42 = vld [vmem:[%s10289_s15 + $0x590] sm:$0xff]  }
 0x2c3   : > { %v8895_v61 = vpop.f32.mrf.mxu1 }
 0x2c4   : > { %v9655_v8 = vpop.f32.mrf.mxu0  ;;  %9750 = vmatmul.mubr.msk.bf16.gmra.mxu0 %vm2125_vm0, %v10186_v59  ;;  %v12115_v56 = vadd.f32 %v8894_v25, %v11935_v48  ;;  %v12128_v48 = vld [vmem:[%s13197_s1 + $0x38] sm:$0xff] }
 0x2c5   : > { %9753 = vmatprep.mubr.msk.bf16.mxu0 %vm2125_vm0, %v10187_v21  ;;  %v8896_v0 = vpop.f32.mrf.mxu1 }
 0x2c6   : > { %v12118_v18 = vpop.f32.mrf.mxu0  ;;  %v8897_v47 = vadd.f32 %v8896_v0, %v8895_v61 }
 0x2c7   : > { %6950 = vmatmul.mubr.bf16.gmra.mxu1 %v8425_v20  ;;  %v8898_v23 = vpop.f32.mrf.mxu1  ;;  %v10190_v20 = vld [vmem:[%s10289_s15 + $0x588] sm:$0xff]  }
 0x2c8   : > { %v9656_v27 = vpop.f32.mrf.mxu0  ;;  %6957 = vmatprep.mubr.bf16.mxu1 %v8458_v22  ;;  %v12122_v14 = vadd.f32 %v8897_v47, %v11950_v29  ;;  %v8364_v29 = vcombine.high %v12128_v48, %v12133_v41  ;;  %v5214_v47 = vmax.f32 %v3884_v9, 0.0 }
 0x2c9   : > { %v8899_v5 = vpop.f32.mrf.mxu1 }
 0x2ca   : > { %v3923_v57 = vpop.f32.mrf.mxu0  ;;  %v8900_v50 = vadd.f32 %v8899_v5, %v8898_v23  ;;  %v3876_v23 = vadd.f32 %v11798_v37, %v12066_v62 }
 0x2cb   : > { %v8901_v35 = vpop.f32.mrf.mxu1 }
 0x2cc   : > { %v9659_v33 = vpop.f32.mrf.mxu0  ;;  %9754 = vmatmul.mubr.msk.bf16.gmra.mxu0 %vm2125_vm0, %v10188_v30  ;;  %v12139_v17 = vadd.f32 %v8900_v50, %v11960_v1  ;;  %v3932_v30 = vadd.f32 %v11798_v37, %v9656_v27  ;;  %v3868_v27 = vadd.f32 %v11798_v37, %v12039_v58  ;;  %v3865_v58 = vadd.f32 %v11798_v37, %v12027_v38 }
 0x2cd   : > { %9757 = vmatprep.mubr.msk.bf16.mxu0 %vm2125_vm0, %v10189_v32  ;;  %v8902_v7 = vpop.f32.mrf.mxu1  ;;  %v3945_v11 = vadd.f32 %v11798_v37, %v9659_v33  ;;  %v3873_v33 = vadd.f32 %v11798_v37, %v12053_v63  ;;  %v5212_v63 = vmax.f32 %v3876_v23, 0.0  ;;  %v3860_v38 = vadd.f32 %v11798_v37, %v12046_v26 }
 0x2ce   : > { %v3936_v59 = vpop.f32.mrf.mxu0  ;;  %v8903_v21 = vadd.f32 %v8902_v7, %v8901_v35  ;;  %v5213_v35 = vmax.f32 %v3881_v40, 0.0  ;;  %v5226_v40 = vmax.f32 %v3932_v30, 0.0  ;;  %v5210_v23 = vmax.f32 %v3868_v27, 0.0 }
 0x2cf   : > { %6958 = vmatmul.mubr.bf16.gmra.mxu1 %v8457_v44  ;;  %v8904_v39 = vpop.f32.mrf.mxu1  ;;  %v3937_v61 = vadd.f32 %v11798_v37, %v3936_v59  ;;  %v5229_v5 = vmax.f32 %v3945_v11, 0.0  ;;  %v3857_v27 = vadd.f32 %v11798_v37, %v12033_v49 }
 0x2d0   : > { %v9660_v25 = vpop.f32.mrf.mxu0  ;;  %6998 = vmatprep.mubr.bf16.mxu1 %v8364_v29  ;;  %v12149_v1 = vadd.f32 %v8903_v21, %v11972_v13  ;;  %v3929_v29 = vadd.f32 %v11798_v37, %v9655_v8 }
 0x2d1   : > { %v3948_v22 = vadd.f32 %v11798_v37, %v9660_v25  ;;  %v8905_v0 = vpop.f32.mrf.mxu1  ;;  %v5227_v9 = vmax.f32 %v3937_v61, 0.0  ;;  %v5211_v61 = vmax.f32 %v3873_v33, 0.0 }
 0x2d2   : > { %v3939_v32 = vpop.f32.mrf.mxu0  ;;  %v8906_v54 = vadd.f32 %v8905_v0, %v8904_v39  ;;  %v5734_v39 = vpack.c.bf16 %v5214_v47, %v5213_v35  ;;  %v5225_v0 = vmax.f32 %v3929_v29, 0.0 }
 0x2d3   : > { %v5230_v50 = vmax.f32 %v3948_v22, 0.0  ;;  %v3940_v44 = vadd.f32 %v11798_v37, %v3939_v32  ;;  %v8907_v13 = vpop.f32.mrf.mxu1  ;;  %v10192_v32 = vld [vmem:[%s10289_s15 + $0x598] sm:$0xff]  }
 0x2d4   : > { %v9663_v7 = vpop.f32.mrf.mxu0  ;;  %9758 = vmatmul.mubr.msk.bf16.gmra.mxu0 %vm2125_vm0, %v10190_v20  ;;  %v12163_v62 = vadd.f32 %v8906_v54, %v11987_v2  ;;  %v3924_v20 = vadd.f32 %v11798_v37, %v3923_v57  ;;  %v3921_v57 = vadd.f32 %v11798_v37, %v12118_v18 }
 0x2d5   : > { %v5742_v59 = vpack.c.bf16 %v5230_v50, %v5229_v5  ;;  %v5228_v21 = vmax.f32 %v3940_v44, 0.0  ;;  %9761 = vmatprep.mubr.msk.bf16.mxu0 %vm2125_vm0, %v10191_v42  ;;  %v8908_v11 = vpop.f32.mrf.mxu1  ;;  %v3961_v2 = vadd.f32 %v11798_v37, %v9663_v7  ;;  %v10193_v5 = vld [vmem:[%s10289_s15 + $0x5a0] sm:$0xff]   ;;  %v5733_v50 = vpack.c.bf16 %v5212_v63, %v5211_v61  ;;  %v10194_v61 = vld [vmem:[%s10289_s15 + $0x5a8] sm:$0xff]  }
 0x2d6   : > { %v3952_v8 = vpop.f32.mrf.mxu0  ;;  %v8909_v25 = vadd.f32 %v8908_v11, %v8907_v13  ;;  %v3916_v44 = vadd.f32 %v11798_v37, %v12098_v31  ;;  %v5740_v13 = vpack.c.bf16 %v5226_v40, %v5225_v0  ;;  %v5224_v35 = vmax.f32 %v3924_v20, 0.0 }
 0x2d7   : > { %9030 = vmatprep.subr.bf16.mxu1 %v5742_v59  ;;  %v5741_v22 = vpack.c.bf16 %v5228_v21, %v5227_v9  ;;  %v3953_v30 = vadd.f32 %v11798_v37, %v3952_v8  ;;  %v5233_v33 = vmax.f32 %v3961_v2, 0.0  ;;  %v5209_v7 = vmax.f32 %v3865_v58, 0.0 }
 0x2d8   : > { %v9664_v42 = vpop.f32.mrf.mxu0  ;;  %9031 = vmatpush3.bf16.msra.mxu1 %v5734_v39  ;;  %v12174_v47 = vadd.f32 %v8909_v25, %v12000_v16  ;;  %v3913_v9 = vadd.f32 %v11798_v37, %v12089_v36  ;;  %v5223_v26 = vmax.f32 %v3921_v57, 0.0  ;;  %v5208_v63 = vmax.f32 %v3860_v38, 0.0 }
 0x2d9   : > { %v3964_v54 = vadd.f32 %v11798_v37, %v9664_v42  ;;  %9032 = vmatprep.subr.bf16.mxu1 %v5741_v22  ;;  %v5231_v31 = vmax.f32 %v3953_v30, 0.0  ;;  %v5732_v39 = vpack.c.bf16 %v5210_v23, %v5209_v7  ;;  %v5222_v49 = vmax.f32 %v3916_v44, 0.0  ;;  %v10195_v23 = vld [vmem:[%s10289_s15 + $0x5b0] sm:$0xff]  }
 0x2da   : > { %v3955_v16 = vpop.f32.mrf.mxu0  ;;  %v3908_v36 = vadd.f32 %v11798_v37, %v12111_v43  ;;  %v5739_v20 = vpack.c.bf16 %v5224_v35, %v5223_v26  ;;  %v5207_v2 = vmax.f32 %v3857_v27, 0.0  ;;  %v5221_v22 = vmax.f32 %v3913_v9, 0.0 }
 0x2db   : > { %v5234_v29 = vmax.f32 %v3964_v54, 0.0  ;;  %v3956_v18 = vadd.f32 %v11798_v37, %v3955_v16  ;;  %v3905_v0 = vadd.f32 %v11798_v37, %v12096_v4  ;;  %v3900_v57 = vadd.f32 %v11798_v37, %v12077_v6 }
 0x2dc   : > { %v9667_v59 = vpop.f32.mrf.mxu0  ;;  %9762 = vmatmul.mubr.msk.bf16.gmra.mxu0 %vm2125_vm0, %v10192_v32  ;;  %9033 = vmatpush3.bf16.msra.mxu1 %v5733_v50  ;;  %v5731_v43 = vpack.c.bf16 %v5208_v63, %v5207_v2  ;;  %v5738_v30 = vpack.c.bf16 %v5222_v49, %v5221_v22  ;;  %v3897_v4 = vadd.f32 %v11798_v37, %v12070_v55 }
 0x2dd   : > { %v12191_v21 = vpack.c.bf16 %v5234_v29, %v5233_v33  ;;  %v5232_v11 = vmax.f32 %v3956_v18, 0.0  ;;  %9034 = vmatprep.subr.bf16.mxu1 %v5740_v13  ;;  %9765 = vmatprep.mubr.msk.bf16.mxu0 %vm2125_vm0, %v10193_v5  ;;  %v3977_v25 = vadd.f32 %v11798_v37, %v9667_v59  ;;  %v5220_v5 = vmax.f32 %v3908_v36, 0.0  ;;  %v10196_v59 = vld [vmem:[%s10289_s15 + $0x5b8] sm:$0xff]   ;;  %v10198_v36 = vld [vmem:[%s10289_s15 + $0x5c8] sm:$0xff]  }
 0x2de   : > { %v3968_v40 = vpop.f32.mrf.mxu0  ;;  %v5219_v16 = vmax.f32 %v3905_v0, 0.0  ;;  %v5218_v18 = vmax.f32 %v3900_v57, 0.0  ;;  %v3892_v55 = vadd.f32 %v11798_v37, %v12087_v10  ;;  %v5217_v26 = vmax.f32 %v3897_v4, 0.0 }
 0x2df   : > { %v12196_v8 = vpack.c.bf16 %v5232_v11, %v5231_v31  ;;  %v3969_v42 = vadd.f32 %v11798_v37, %v3968_v40  ;;  %v5237_v38 = vmax.f32 %v3977_v25, 0.0  ;;  %v3889_v31 = vadd.f32 %v11798_v37, %v12075_v28  ;;  %v10197_v11 = vld [vmem:[%s10289_s15 + $0x5c0] sm:$0xff]   ;;  %v10199_v25 = vld [vmem:[%s10289_s15 + $0x5d0] sm:$0xff]  }
 0x2e0   : > { %v9668_v58 = vpop.f32.mrf.mxu0  ;;  %9035 = vmatpush3.bf16.msra.mxu1 %v5732_v39  ;;  %v5737_v27 = vpack.c.bf16 %v5220_v5, %v5219_v16  ;;  %v5736_v63 = vpack.c.bf16 %v5218_v18, %v5217_v26  ;;  %v5216_v10 = vmax.f32 %v3892_v55, 0.0  ;;  %v8363_v22 = vcombine.low %v12128_v48, %v12133_v41  ;;  %v5558_v48 = vld [vmem:[%s13197_s1 + $0x238] sm:$0xff]  ;;  %v10202_v18 = vld [vmem:[%s10289_s15 + $0x5e8] sm:$0xff]  }
 0x2e1   : > { %v3980_v32 = vadd.f32 %v11798_v37, %v9668_v58  ;;  %9036 = vmatprep.subr.bf16.mxu1 %v5739_v20  ;;  %v5235_v35 = vmax.f32 %v3969_v42, 0.0  ;;  %v5542_v20 = vld [vmem:[%s13197_s1 + $0x1b8] sm:$0xff] }
 0x2e2   : > { %v3971_v54 = vpop.f32.mrf.mxu0 }
 0x2e3   : > { %v5238_v50 = vmax.f32 %v3980_v32, 0.0  ;;  %v3972_v44 = vadd.f32 %v11798_v37, %v3971_v54  ;;  %v10200_v32 = vld [vmem:[%s10289_s15 + $0x5d8] sm:$0xff]  }
 0x2e4   : > { %v12210_v13 = vpop.f32.mrf.mxu0  ;;  %9766 = vmatmul.mubr.msk.bf16.gmra.mxu0 %vm2125_vm0, %v10194_v61  ;;  %9037 = vmatpush3.bf16.msra.mxu1 %v5731_v43 }
 0x2e5   : > { %v12213_v6 = vpack.c.bf16 %v5238_v50, %v5237_v38  ;;  %v5236_v33 = vmax.f32 %v3972_v44, 0.0  ;;  %9038 = vmatprep.subr.bf16.mxu1 %v5738_v30  ;;  %9769 = vmatprep.mubr.msk.bf16.mxu0 %vm2125_vm0, %v10195_v23  ;;  %v10201_v23 = vld [vmem:[%s10289_s15 + $0x5e0] sm:$0xff]  }
 0x2e6   : > { %v12216_v29 = vpop.f32.mrf.mxu0 }
 0x2e7   : > { %v12220_v7 = vpack.c.bf16 %v5236_v33, %v5235_v35 }
 0x2e8   : > { %v12222_v9 = vpop.f32.mrf.mxu0  ;;  %9039 = vmatpush3.bf16.msra.mxu1 %v12030_v19  ;;  %v5215_v19 = vmax.f32 %v3889_v31, 0.0 }
 0x2e9   : > { %9040 = vmatprep.subr.bf16.mxu1 %v5737_v27  ;;  %v10203_v27 = vld [vmem:[%s10289_s15 + $0x5f0] sm:$0xff]  }
 0x2ea   : > { %v12229_v39 = vpop.f32.mrf.mxu0  ;;  %v5735_v37 = vpack.c.bf16 %v5216_v10, %v5215_v19 }
 0x2ec   : > { %v12231_v49 = vpop.f32.mrf.mxu0  ;;  %9770 = vmatmul.mubr.msk.bf16.gmra.mxu0 %vm2125_vm0, %v10196_v59  ;;  %9041 = vmatpush3.bf16.msra.mxu1 %v12037_v34  ;;  %v5526_v34 = vld [vmem:[%s13197_s1 + $0x138] sm:$0xff] }
 0x2ed   : > { %9042 = vmatprep.subr.bf16.mxu1 %v5736_v63  ;;  %9773 = vmatprep.mubr.msk.bf16.mxu0 %vm2125_vm0, %v10197_v11  ;;  %v8395_v30 = vcombine.low %v5526_v34, %v5542_v20  ;;  %v5606_v59 = vld [vmem:[%s13197_s1 + $0x3b8] sm:$0xff] }
 0x2ee   : > { %v12236_v40 = vpop.f32.mrf.mxu0 }
 0x2f0   : > { %v12238_v28 = vpop.f32.mrf.mxu0  ;;  %9043 = vmatpush3.bf16.msra.mxu1 %v12008_v45  ;;  %v8396_v45 = vcombine.high %v5526_v34, %v5542_v20 }
 0x2f1   : > { %9044 = vmatprep.subr.bf16.mxu1 %v5735_v37 }
 0x2f2   : > { %v12249_v2 = vpop.f32.mrf.mxu0 }
 0x2f4   : > { %v12253_v58 = vpop.f32.mrf.mxu0  ;;  %9774 = vmatmul.mubr.msk.bf16.gmra.mxu0 %vm2125_vm0, %v10198_v36  ;;  %9045 = vmatpush3.bf16.msra.mxu1 %v12013_v15  ;;  %v5574_v15 = vld [vmem:[%s13197_s1 + $0x2b8] sm:$0xff] }
 0x2f5   : > { %9777 = vmatprep.mubr.msk.bf16.mxu0 %vm2125_vm0, %v10199_v25  ;;  %v8428_v38 = vcombine.high %v5558_v48, %v5574_v15  ;;  %v8427_v63 = vcombine.low %v5558_v48, %v5574_v15 }
 0x2f6   : > { %v12258_v61 = vpop.f32.mrf.mxu0 }
 0x2f7   : > { %6999 = vmatmul.mubr.bf16.vlgmr.msra.gmra.mxu1 %v8363_v22  ;;  %v8926_v0 = vpop.f32.mrf.mxu1 }
 0x2f8   : > { %v12260_v42 = vpop.f32.mrf.mxu0  ;;  %7006 = vmatprep.mubr.bf16.mxu1 %v8396_v45  ;;  %v10204_v45 = vld [vmem:[%s10289_s15 + $0x5f8] sm:$0xff]  }
 0x2f9   : > { %v8927_v41 = vpop.f32.mrf.mxu1 }
 0x2fa   : > { %v12270_v43 = vpop.f32.mrf.mxu0  ;;  %v8928_v57 = vadd.f32 %v8927_v41, %v8926_v0 }
 0x2fb   : > { %v8929_v54 = vpop.f32.mrf.mxu1 }
 0x2fc   : > { %v12272_v5 = vpop.f32.mrf.mxu0  ;;  %9778 = vmatmul.mubr.msk.bf16.gmra.mxu0 %vm2125_vm0, %v10200_v32  ;;  %v12276_v50 = vadd.f32 %v8928_v57, %v12093_v60  ;;  %v5590_v60 = vld [vmem:[%s13197_s1 + $0x338] sm:$0xff]  ;;  %v10205_v32 = vld [vmem:[%s10289_s15 + $0x600] sm:$0xff]  }
 0x2fd   : > { %9781 = vmatprep.mubr.msk.bf16.mxu0 %vm2125_vm0, %v10201_v23  ;;  %v8930_v44 = vpop.f32.mrf.mxu1  ;;  %v12316_v23 = vld [vmem:[%s13197_s1 + $0xc0] sm:$0xff]  ;;  %v8459_v57 = vcombine.low %v5590_v60, %v5606_v59 }
 0x2fe   : > { %v12279_v4 = vpop.f32.mrf.mxu0  ;;  %v8931_v16 = vadd.f32 %v8930_v44, %v8929_v54 }
 0x2ff   : > { %7007 = vmatmul.mubr.bf16.gmra.mxu1 %v8395_v30  ;;  %v8932_v35 = vpop.f32.mrf.mxu1 }
 0x300   : > { %v12281_v33 = vpop.f32.mrf.mxu0  ;;  %7014 = vmatprep.mubr.bf16.mxu1 %v8428_v38  ;;  %v12285_v55 = vadd.f32 %v8931_v16, %v12102_v12  ;;  %v8460_v12 = vcombine.high %v5590_v60, %v5606_v59  ;;  %v12328_v16 = vld [vmem:[%s13199_s3] ss:$0 sm:$0xff] }
 0x301   : > { %v8933_v26 = vpop.f32.mrf.mxu1 }
 0x302   : > { %v12294_v31 = vpop.f32.mrf.mxu0  ;;  %v8934_v11 = vadd.f32 %v8933_v26, %v8932_v35  ;;  %v4012_v35 = vadd.f32 %v12328_v16, %v12238_v28  ;;  %v10207_v28 = vld [vmem:[%s10289_s15 + $0x610] sm:$0xff]  }
 0x303   : > { %v8935_v10 = vpop.f32.mrf.mxu1 }
 0x304   : > { %v9687_v19 = vpop.f32.mrf.mxu0  ;;  %9782 = vmatmul.mubr.msk.bf16.gmra.mxu0 %vm2125_vm0, %v10202_v18  ;;  %v12298_v37 = vadd.f32 %v8934_v11, %v12115_v56  ;;  %v12311_v56 = vld [vmem:[%s13197_s1 + $0x40] sm:$0xff]  ;;  %v10206_v11 = vld [vmem:[%s10289_s15 + $0x608] sm:$0xff]  }
 0x305   : > { %9785 = vmatprep.mubr.msk.bf16.mxu0 %vm2125_vm0, %v10203_v27  ;;  %v8936_v36 = vpop.f32.mrf.mxu1 }
 0x306   : > { %v12301_v25 = vpop.f32.mrf.mxu0  ;;  %v8937_v34 = vadd.f32 %v8936_v36, %v8935_v10 }
 0x307   : > { %7015 = vmatmul.mubr.bf16.gmra.mxu1 %v8427_v63  ;;  %v8938_v20 = vpop.f32.mrf.mxu1 }
 0x308   : > { %v9688_v22 = vpop.f32.mrf.mxu0  ;;  %7022 = vmatprep.mubr.bf16.mxu1 %v8460_v12  ;;  %v12305_v0 = vadd.f32 %v8937_v34, %v12122_v14  ;;  %v8366_v14 = vcombine.high %v12311_v56, %v12316_v23  ;;  %v5246_v34 = vmax.f32 %v4012_v35, 0.0 }
 0x309   : > { %v8939_v48 = vpop.f32.mrf.mxu1 }
 0x30a   : > { %v4051_v15 = vpop.f32.mrf.mxu0  ;;  %v8940_v41 = vadd.f32 %v8939_v48, %v8938_v20  ;;  %v4004_v20 = vadd.f32 %v12328_v16, %v12249_v2 }
 0x30b   : > { %v8941_v30 = vpop.f32.mrf.mxu1 }
 0x30c   : > { %v9691_v54 = vpop.f32.mrf.mxu0  ;;  %9786 = vmatmul.mubr.msk.bf16.gmra.mxu0 %vm2125_vm0, %v10204_v45  ;;  %v12322_v38 = vadd.f32 %v8940_v41, %v12139_v17  ;;  %v4009_v17 = vadd.f32 %v12328_v16, %v12231_v49  ;;  %v4060_v45 = vadd.f32 %v12328_v16, %v9688_v22  ;;  %v3996_v22 = vadd.f32 %v12328_v16, %v12222_v9 }
 0x30d   : > { %9789 = vmatprep.mubr.msk.bf16.mxu0 %vm2125_vm0, %v10205_v32  ;;  %v8942_v44 = vpop.f32.mrf.mxu1  ;;  %v4073_v60 = vadd.f32 %v12328_v16, %v9691_v54  ;;  %v4001_v54 = vadd.f32 %v12328_v16, %v12236_v40  ;;  %v5244_v40 = vmax.f32 %v4004_v20, 0.0  ;;  %v3993_v9 = vadd.f32 %v12328_v16, %v12210_v13 }
 0x30e   : > { %v4064_v18 = vpop.f32.mrf.mxu0  ;;  %v8943_v27 = vadd.f32 %v8942_v44, %v8941_v30  ;;  %v5245_v30 = vmax.f32 %v4009_v17, 0.0  ;;  %v5258_v17 = vmax.f32 %v4060_v45, 0.0  ;;  %v5242_v20 = vmax.f32 %v3996_v22, 0.0 }
 0x30f   : > { %7023 = vmatmul.mubr.bf16.gmra.mxu1 %v8459_v57  ;;  %v8944_v59 = vpop.f32.mrf.mxu1  ;;  %v4065_v10 = vadd.f32 %v12328_v16, %v4064_v18  ;;  %v5261_v48 = vmax.f32 %v4073_v60, 0.0  ;;  %v4049_v45 = vadd.f32 %v12328_v16, %v12301_v25  ;;  %v3988_v13 = vadd.f32 %v12328_v16, %v12229_v39 }
 0x310   : > { %v9692_v26 = vpop.f32.mrf.mxu0  ;;  %7063 = vmatprep.mubr.bf16.mxu1 %v8366_v14  ;;  %v12337_v63 = vadd.f32 %v8943_v27, %v12149_v1  ;;  %v4057_v14 = vadd.f32 %v12328_v16, %v9687_v19  ;;  %v5241_v25 = vmax.f32 %v3993_v9, 0.0  ;;  %v4041_v22 = vadd.f32 %v12328_v16, %v12272_v5 }
 0x311   : > { %v4076_v12 = vadd.f32 %v12328_v16, %v9692_v26  ;;  %v8945_v36 = vpop.f32.mrf.mxu1  ;;  %v5259_v35 = vmax.f32 %v4065_v10, 0.0  ;;  %v5243_v10 = vmax.f32 %v4001_v54, 0.0  ;;  %v5255_v39 = vmax.f32 %v4049_v45, 0.0 }
 0x312   : > { %v4067_v32 = vpop.f32.mrf.mxu0  ;;  %v8946_v49 = vadd.f32 %v8945_v36, %v8944_v59  ;;  %v5750_v59 = vpack.c.bf16 %v5246_v34, %v5245_v30  ;;  %v5257_v36 = vmax.f32 %v4057_v14, 0.0  ;;  %v4033_v9 = vadd.f32 %v12328_v16, %v12279_v4 }
 0x313   : > { %v5262_v41 = vmax.f32 %v4076_v12, 0.0  ;;  %v4068_v57 = vadd.f32 %v12328_v16, %v4067_v32  ;;  %v8947_v1 = vpop.f32.mrf.mxu1 }
 0x314   : > { %v9695_v44 = vpop.f32.mrf.mxu0  ;;  %9790 = vmatmul.mubr.msk.bf16.gmra.mxu0 %vm2125_vm0, %v10206_v11  ;;  %v12351_v2 = vadd.f32 %v8946_v49, %v12163_v62  ;;  %v4052_v11 = vadd.f32 %v12328_v16, %v4051_v15 }
 0x315   : > { %v5758_v18 = vpack.c.bf16 %v5262_v41, %v5261_v48  ;;  %v5260_v27 = vmax.f32 %v4068_v57, 0.0  ;;  %9793 = vmatprep.mubr.msk.bf16.mxu0 %vm2125_vm0, %v10207_v28  ;;  %v8948_v60 = vpop.f32.mrf.mxu1  ;;  %v4089_v62 = vadd.f32 %v12328_v16, %v9695_v44  ;;  %v10208_v28 = vld [vmem:[%s10289_s15 + $0x618] sm:$0xff]   ;;  %v5749_v48 = vpack.c.bf16 %v5244_v40, %v5243_v10  ;;  %s307_s15 = scalar_lea.vmem %s13204_s8, %s7833_s20 }
 0x316   : > { %v4080_v19 = vpop.f32.mrf.mxu0  ;;  %v8949_v26 = vadd.f32 %v8948_v60, %v8947_v1  ;;  %v4044_v41 = vadd.f32 %v12328_v16, %v12281_v33  ;;  %v5756_v57 = vpack.c.bf16 %v5258_v17, %v5257_v36  ;;  %v3985_v44 = vadd.f32 %v12328_v16, %v12216_v29 }
 0x317   : > { %v5757_v12 = vpack.c.bf16 %v5260_v27, %v5259_v35  ;;  %9070 = vmatprep.subr.bf16.mxu1 %v5758_v18  ;;  %v4081_v15 = vadd.f32 %v12328_v16, %v4080_v19  ;;  %v5265_v30 = vmax.f32 %v4089_v62, 0.0  ;;  %v5748_v60 = vpack.c.bf16 %v5242_v20, %v5241_v25 }
 0x318   : > { %v9696_v32 = vpop.f32.mrf.mxu0  ;;  %9071 = vmatpush3.bf16.msra.mxu1 %v5750_v59  ;;  %v12362_v34 = vadd.f32 %v8949_v26, %v12174_v47  ;;  %v5256_v47 = vmax.f32 %v4052_v11, 0.0  ;;  %v5240_v59 = vmax.f32 %v3988_v13, 0.0  ;;  %v5254_v40 = vmax.f32 %v4044_v41, 0.0 }
 0x319   : > { %v4092_v49 = vadd.f32 %v12328_v16, %v9696_v32  ;;  %9072 = vmatprep.subr.bf16.mxu1 %v5757_v12  ;;  %v5263_v33 = vmax.f32 %v4081_v15, 0.0  ;;  %v4036_v29 = vadd.f32 %v12328_v16, %v12294_v31  ;;  %v5239_v11 = vmax.f32 %v3985_v44, 0.0 }
 0x31a   : > { %v4083_v1 = vpop.f32.mrf.mxu0  ;;  %v5755_v19 = vpack.c.bf16 %v5256_v47, %v5255_v39  ;;  %v5253_v12 = vmax.f32 %v4041_v22, 0.0  ;;  %v4028_v31 = vadd.f32 %v12328_v16, %v12260_v42  ;;  %v5251_v41 = vmax.f32 %v4033_v9, 0.0 }
 0x31b   : > { %v5266_v54 = vmax.f32 %v4092_v49, 0.0  ;;  %v4084_v14 = vadd.f32 %v12328_v16, %v4083_v1  ;;  %v5747_v32 = vpack.c.bf16 %v5240_v59, %v5239_v11  ;;  %v5252_v45 = vmax.f32 %v4036_v29, 0.0 }
 0x31c   : > { %v9699_v35 = vpop.f32.mrf.mxu0  ;;  %9073 = vmatpush3.bf16.msra.mxu1 %v5749_v48  ;;  %9794 = vmatmul.mubr.msk.bf16.gmra.mxu0 %vm2125_vm0, %v10208_v28  ;;  %v5754_v28 = vpack.c.bf16 %v5254_v40, %v5253_v12  ;;  %v4025_v48 = vadd.f32 %v12328_v16, %v12253_v58  ;;  %v4017_v22 = vadd.f32 %v12328_v16, %v12258_v61  ;;  %v5543_v61 = vld [vmem:[%s13197_s1 + $0x1c0] sm:$0xff] }
 0x31d   : > { %v12378_v18 = vpack.c.bf16 %v5266_v54, %v5265_v30  ;;  %v5264_v27 = vmax.f32 %v4084_v14, 0.0  ;;  %9074 = vmatprep.subr.bf16.mxu1 %v5756_v57  ;;  %v4105_v5 = vadd.f32 %v12328_v16, %v9699_v35  ;;  %v5250_v30 = vmax.f32 %v4028_v31, 0.0  ;;  %v5559_v12 = vld [vmem:[%s13197_s1 + $0x240] sm:$0xff] }
 0x31e   : > { %v4096_v17 = vpop.f32.mrf.mxu0  ;;  %v4020_v54 = vadd.f32 %v12328_v16, %v12270_v43  ;;  %v5753_v25 = vpack.c.bf16 %v5252_v45, %v5251_v41  ;;  %v5249_v58 = vmax.f32 %v4025_v48, 0.0  ;;  %v5247_v43 = vmax.f32 %v4017_v22, 0.0  ;;  %v5591_v48 = vld [vmem:[%s13197_s1 + $0x340] sm:$0xff] }
 0x31f   : > { %v12382_v26 = vpack.c.bf16 %v5264_v27, %v5263_v33  ;;  %v4097_v10 = vadd.f32 %v12328_v16, %v4096_v17  ;;  %v5269_v15 = vmax.f32 %v4105_v5, 0.0 }
 0x320   : > { %v9700_v62 = vpop.f32.mrf.mxu0  ;;  %9075 = vmatpush3.bf16.msra.mxu1 %v5748_v60  ;;  %v5752_v39 = vpack.c.bf16 %v5250_v30, %v5249_v58  ;;  %v5248_v33 = vmax.f32 %v4020_v54, 0.0 }
 0x321   : > { %v4108_v36 = vadd.f32 %v12328_v16, %v9700_v62  ;;  %9076 = vmatprep.subr.bf16.mxu1 %v5755_v19  ;;  %v5267_v57 = vmax.f32 %v4097_v10, 0.0 }
 0x322   : > { %v4099_v20 = vpop.f32.mrf.mxu0  ;;  %v5751_v59 = vpack.c.bf16 %v5248_v33, %v5247_v43 }
 0x323   : > { %v5270_v49 = vmax.f32 %v4108_v36, 0.0  ;;  %v4100_v13 = vadd.f32 %v12328_v16, %v4099_v20 }
 0x324   : > { %v12394_v4 = vpop.f32.mrf.mxu0  ;;  %9077 = vmatpush3.bf16.msra.mxu1 %v5747_v32 }
 0x325   : > { %v12396_v1 = vpack.c.bf16 %v5270_v49, %v5269_v15  ;;  %v5268_v47 = vmax.f32 %v4100_v13, 0.0  ;;  %9078 = vmatprep.subr.bf16.mxu1 %v5754_v28 }
 0x326   : > { %v12398_v42 = vpop.f32.mrf.mxu0 }
 0x327   : > { %v12402_v14 = vpack.c.bf16 %v5268_v47, %v5267_v57 }
 0x328   : > { %v12404_v44 = vpop.f32.mrf.mxu0  ;;  %9079 = vmatpush3.bf16.msra.mxu1 %v12213_v6  ;;  %v5527_v6 = vld [vmem:[%s13197_s1 + $0x140] sm:$0xff] }
 0x329   : > { %9080 = vmatprep.subr.bf16.mxu1 %v5753_v25  ;;  %v8398_v19 = vcombine.high %v5527_v6, %v5543_v61  ;;  %v8397_v9 = vcombine.low %v5527_v6, %v5543_v61 }
 0x32a   : > { %v12409_v35 = vpop.f32.mrf.mxu0 }
 0x32c   : > { %v12411_v27 = vpop.f32.mrf.mxu0  ;;  %9081 = vmatpush3.bf16.msra.mxu1 %v12220_v7  ;;  %v8365_v7 = vcombine.low %v12311_v56, %v12316_v23  ;;  %v5575_v56 = vld [vmem:[%s13197_s1 + $0x2c0] sm:$0xff] }
 0x32d   : > { %9082 = vmatprep.subr.bf16.mxu1 %v5752_v39  ;;  %v8430_v32 = vcombine.high %v5559_v12, %v5575_v56  ;;  %v8429_v30 = vcombine.low %v5559_v12, %v5575_v56 }
 0x32e   : > { %v12414_v60 = vpop.f32.mrf.mxu0 }
 0x330   : > { %v9708_v40 = vpop.f32.mrf.mxu0  ;;  %9083 = vmatpush3.bf16.msra.mxu1 %v12191_v21 }
 0x331   : > { %9084 = vmatprep.subr.bf16.mxu1 %v5751_v59 }
 0x332   : > { %v12423_v17 = vpop.f32.mrf.mxu0 }
 0x334   : > { %v12427_v29 = vpop.f32.mrf.mxu0  ;;  %9085 = vmatpush3.bf16.msra.mxu1 %v12196_v8 }
 0x336   : > { %v12430_v21 = vpop.f32.mrf.mxu0 }
 0x337   : > { %7064 = vmatmul.mubr.bf16.vlgmr.msra.gmra.mxu1 %v8365_v7  ;;  %v8966_v5 = vpop.f32.mrf.mxu1  ;;  %v12473_v7 = vld [vmem:[%s13197_s1 + $0x48] sm:$0xff] }
 0x338   : > { %v12432_v11 = vpop.f32.mrf.mxu0  ;;  %7071 = vmatprep.mubr.bf16.mxu1 %v8398_v19 }
 0x339   : > { %v8967_v23 = vpop.f32.mrf.mxu1 }
 0x33a   : > { %v12440_v62 = vpop.f32.mrf.mxu0  ;;  %v8968_v8 = vadd.f32 %v8967_v23, %v8966_v5 }
 0x33b   : > { %v8969_v10 = vpop.f32.mrf.mxu1 }
 0x33c   : > { %v12442_v36 = vpop.f32.mrf.mxu0  ;;  %v12445_v31 = vadd.f32 %v8968_v8, %v12276_v50  ;;  %v5607_v50 = vld [vmem:[%s13197_s1 + $0x3c0] sm:$0xff] }
 0x33d   : > { %v8970_v28 = vpop.f32.mrf.mxu1  ;;  %v8462_v58 = vcombine.high %v5591_v48, %v5607_v50  ;;  %v8461_v12 = vcombine.low %v5591_v48, %v5607_v50  ;;  %v4137_v48 = vadd.f32 %v12328_v16, %v12411_v27 }
 0x33e   : > { %v12447_v20 = vpop.f32.mrf.mxu0  ;;  %v8971_v45 = vadd.f32 %v8970_v28, %v8969_v10  ;;  %v4140_v10 = vadd.f32 %v12328_v16, %v9708_v40 }
 0x33f   : > { %7072 = vmatmul.mubr.bf16.gmra.mxu1 %v8397_v9  ;;  %v8972_v15 = vpop.f32.mrf.mxu1 }
 0x340   : > { %v12449_v49 = vpop.f32.mrf.mxu0  ;;  %7079 = vmatprep.mubr.bf16.mxu1 %v8430_v32  ;;  %v12452_v13 = vadd.f32 %v8971_v45, %v12285_v55  ;;  %v5278_v40 = vmax.f32 %v4140_v10, 0.0 }
 0x341   : > { %v8973_v41 = vpop.f32.mrf.mxu1 }
 0x342   : > { %v12460_v57 = vpop.f32.mrf.mxu0  ;;  %v8974_v47 = vadd.f32 %v8973_v41, %v8972_v15 }
 0x343   : > { %v8975_v54 = vpop.f32.mrf.mxu1 }
 0x344   : > { %v9719_v25 = vpop.f32.mrf.mxu0  ;;  %v12463_v22 = vadd.f32 %v8974_v47, %v12298_v37  ;;  %v12478_v37 = vld [vmem:[%s13197_s1 + $0xc8] sm:$0xff] }
 0x345   : > { %v8976_v55 = vpop.f32.mrf.mxu1 }
 0x346   : > { %v12465_v39 = vpop.f32.mrf.mxu0  ;;  %v8977_v33 = vadd.f32 %v8976_v55, %v8975_v54  ;;  %v4132_v54 = vadd.f32 %v12328_v16, %v12423_v17  ;;  %v4124_v17 = vadd.f32 %v12328_v16, %v12404_v44 }
 0x347   : > { %7080 = vmatmul.mubr.bf16.gmra.mxu1 %v8429_v30  ;;  %v8978_v43 = vpop.f32.mrf.mxu1 }
 0x348   : > { %v9720_v59 = vpop.f32.mrf.mxu0  ;;  %7087 = vmatprep.mubr.bf16.mxu1 %v8462_v58  ;;  %v12468_v6 = vadd.f32 %v8977_v33, %v12305_v0  ;;  %v8368_v0 = vcombine.high %v12473_v7, %v12478_v37 }
 0x349   : > { %v8979_v61 = vpop.f32.mrf.mxu1  ;;  %v4188_v58 = vadd.f32 %v12328_v16, %v9720_v59 }
 0x34a   : > { %v4179_v19 = vpop.f32.mrf.mxu0  ;;  %v8980_v5 = vadd.f32 %v8979_v61, %v8978_v43 }
 0x34b   : > { %v8981_v56 = vpop.f32.mrf.mxu1 }
 0x34c   : > { %v9723_v23 = vpop.f32.mrf.mxu0  ;;  %v12481_v8 = vadd.f32 %v8980_v5, %v12322_v38  ;;  %v5277_v5 = vmax.f32 %v4137_v48, 0.0 }
 0x34d   : > { %v8982_v9 = vpop.f32.mrf.mxu1  ;;  %v4201_v45 = vadd.f32 %v12328_v16, %v9723_v23 }
 0x34e   : > { %v4192_v32 = vpop.f32.mrf.mxu0  ;;  %v8983_v28 = vadd.f32 %v8982_v9, %v8981_v56  ;;  %v4185_v56 = vadd.f32 %v12328_v16, %v9719_v25 }
 0x34f   : > { %7088 = vmatmul.mubr.bf16.gmra.mxu1 %v8461_v12  ;;  %v8984_v15 = vpop.f32.mrf.mxu1  ;;  %v4193_v38 = vadd.f32 %v12328_v16, %v4192_v32  ;;  %v5293_v43 = vmax.f32 %v4201_v45, 0.0  ;;  %v4129_v12 = vadd.f32 %v12328_v16, %v12414_v60  ;;  %v5276_v45 = vmax.f32 %v4132_v54, 0.0 }
 0x350   : > { %v9724_v50 = vpop.f32.mrf.mxu0  ;;  %v12490_v41 = vadd.f32 %v8983_v28, %v12337_v63  ;;  %7128 = vmatprep.mubr.bf16.mxu1 %v8368_v0  ;;  %v5766_v28 = vpack.c.bf16 %v5278_v40, %v5277_v5  ;;  %v4180_v60 = vadd.f32 %v12328_v16, %v4179_v19  ;;  %v5289_v44 = vmax.f32 %v4185_v56, 0.0 }
 0x351   : > { %v4204_v47 = vadd.f32 %v12328_v16, %v9724_v50  ;;  %v8985_v30 = vpop.f32.mrf.mxu1  ;;  %v5291_v59 = vmax.f32 %v4193_v38, 0.0  ;;  %v5274_v40 = vmax.f32 %v4124_v17, 0.0  ;;  %v4177_v54 = vadd.f32 %v12328_v16, %v12465_v39 }
 0x352   : > { %v4195_v55 = vpop.f32.mrf.mxu0  ;;  %v8986_v33 = vadd.f32 %v8985_v30, %v8984_v15  ;;  %v5290_v15 = vmax.f32 %v4188_v58, 0.0  ;;  %v5275_v30 = vmax.f32 %v4129_v12, 0.0  ;;  %v4113_v56 = vadd.f32 %v12328_v16, %v12398_v42 }
 0x353   : > { %v5294_v27 = vmax.f32 %v4204_v47, 0.0  ;;  %v4196_v61 = vadd.f32 %v12328_v16, %v4195_v55  ;;  %v8987_v63 = vpop.f32.mrf.mxu1 }
 0x354   : > { %v9727_v23 = vpop.f32.mrf.mxu0  ;;  %v12502_v0 = vadd.f32 %v8986_v33, %v12351_v2  ;;  %v4121_v2 = vadd.f32 %v12328_v16, %v12394_v4  ;;  %v4116_v33 = vadd.f32 %v12328_v16, %v12409_v35  ;;  %v5765_v4 = vpack.c.bf16 %v5276_v45, %v5275_v30 }
 0x355   : > { %v5774_v9 = vpack.c.bf16 %v5294_v27, %v5293_v43  ;;  %v5292_v10 = vmax.f32 %v4196_v61, 0.0  ;;  %v8988_v32 = vpop.f32.mrf.mxu1  ;;  %v4217_v25 = vadd.f32 %v12328_v16, %v9727_v23  ;;  %v4172_v43 = vadd.f32 %v12328_v16, %v12449_v49 }
 0x356   : > { %v4208_v48 = vpop.f32.mrf.mxu0  ;;  %v8989_v50 = vadd.f32 %v8988_v32, %v8987_v63  ;;  %v5772_v27 = vpack.c.bf16 %v5290_v15, %v5289_v44  ;;  %v5273_v39 = vmax.f32 %v4121_v2, 0.0  ;;  %v4169_v23 = vadd.f32 %v12328_v16, %v12442_v36 }
 0x357   : > { %v5773_v47 = vpack.c.bf16 %v5292_v10, %v5291_v59  ;;  %9110 = vmatprep.subr.bf16.mxu1 %v5774_v9  ;;  %v4209_v19 = vadd.f32 %v12328_v16, %v4208_v48  ;;  %v5297_v63 = vmax.f32 %v4217_v25, 0.0  ;;  %v5287_v35 = vmax.f32 %v4177_v54, 0.0 }
 0x358   : > { %v9728_v38 = vpop.f32.mrf.mxu0  ;;  %9111 = vmatpush3.bf16.msra.mxu1 %v5766_v28  ;;  %v12511_v55 = vadd.f32 %v8989_v50, %v12362_v34  ;;  %v5288_v34 = vmax.f32 %v4180_v60, 0.0  ;;  %v5764_v10 = vpack.c.bf16 %v5274_v40, %v5273_v39  ;;  %v5272_v32 = vmax.f32 %v4116_v33, 0.0 }
 0x359   : > { %v4220_v58 = vadd.f32 %v12328_v16, %v9728_v38  ;;  %9112 = vmatprep.subr.bf16.mxu1 %v5773_v47  ;;  %v5295_v59 = vmax.f32 %v4209_v19, 0.0  ;;  %v5286_v28 = vmax.f32 %v4172_v43, 0.0  ;;  %v4164_v15 = vadd.f32 %v12328_v16, %v12460_v57 }
 0x35a   : > { %v4211_v61 = vpop.f32.mrf.mxu0  ;;  %v5771_v48 = vpack.c.bf16 %v5288_v34, %v5287_v35  ;;  %v5271_v50 = vmax.f32 %v4113_v56, 0.0  ;;  %v5285_v60 = vmax.f32 %v4169_v23, 0.0  ;;  %v4161_v25 = vadd.f32 %v12328_v16, %v12447_v20 }
 0x35b   : > { %v5298_v5 = vmax.f32 %v4220_v58, 0.0  ;;  %v4212_v12 = vadd.f32 %v12328_v16, %v4211_v61  ;;  %v4156_v57 = vadd.f32 %v12328_v16, %v12432_v11  ;;  %v5284_v54 = vmax.f32 %v4164_v15, 0.0 }
 0x35c   : > { %v9731_v17 = vpop.f32.mrf.mxu0  ;;  %9113 = vmatpush3.bf16.msra.mxu1 %v5765_v4  ;;  %v5763_v44 = vpack.c.bf16 %v5272_v32, %v5271_v50  ;;  %v5770_v38 = vpack.c.bf16 %v5286_v28, %v5285_v60  ;;  %v4153_v4 = vadd.f32 %v12328_v16, %v12427_v29  ;;  %v5283_v43 = vmax.f32 %v4161_v25, 0.0 }
 0x35d   : > { %v12526_v9 = vpack.c.bf16 %v5298_v5, %v5297_v63  ;;  %v5296_v49 = vmax.f32 %v4212_v12, 0.0  ;;  %9114 = vmatprep.subr.bf16.mxu1 %v5772_v27  ;;  %v4233_v36 = vadd.f32 %v12328_v16, %v9731_v17  ;;  %v5282_v63 = vmax.f32 %v4156_v57, 0.0 }
 0x35e   : > { %v4224_v45 = vpop.f32.mrf.mxu0  ;;  %v4148_v5 = vadd.f32 %v12328_v16, %v12440_v62  ;;  %v5769_v12 = vpack.c.bf16 %v5284_v54, %v5283_v43  ;;  %v5281_v29 = vmax.f32 %v4153_v4, 0.0  ;;  %v4145_v23 = vadd.f32 %v12328_v16, %v12430_v21  ;;  %v5544_v21 = vld [vmem:[%s13197_s1 + $0x1c8] sm:$0xff] }
 0x35f   : > { %v12530_v42 = vpack.c.bf16 %v5296_v49, %v5295_v59  ;;  %v4225_v2 = vadd.f32 %v12328_v16, %v4224_v45  ;;  %v5301_v19 = vmax.f32 %v4233_v36, 0.0  ;;  %v5608_v43 = vld [vmem:[%s13197_s1 + $0x3c8] sm:$0xff] }
 0x360   : > { %v9732_v47 = vpop.f32.mrf.mxu0  ;;  %9115 = vmatpush3.bf16.msra.mxu1 %v5764_v10  ;;  %v5768_v35 = vpack.c.bf16 %v5282_v63, %v5281_v29  ;;  %v5280_v59 = vmax.f32 %v4148_v5, 0.0  ;;  %v5279_v62 = vmax.f32 %v4145_v23, 0.0 }
 0x361   : > { %v4236_v30 = vadd.f32 %v12328_v16, %v9732_v47  ;;  %9116 = vmatprep.subr.bf16.mxu1 %v5771_v48  ;;  %v5299_v27 = vmax.f32 %v4225_v2, 0.0  ;;  %v5560_v47 = vld [vmem:[%s13197_s1 + $0x248] sm:$0xff] }
 0x362   : > { %v4227_v40 = vpop.f32.mrf.mxu0  ;;  %v5767_v32 = vpack.c.bf16 %v5280_v59, %v5279_v62 }
 0x363   : > { %v5302_v58 = vmax.f32 %v4236_v30, 0.0  ;;  %v4228_v33 = vadd.f32 %v12328_v16, %v4227_v40 }
 0x364   : > { %v12542_v20 = vpop.f32.mrf.mxu0  ;;  %9117 = vmatpush3.bf16.msra.mxu1 %v5763_v44 }
 0x365   : > { %v12544_v61 = vpack.c.bf16 %v5302_v58, %v5301_v19  ;;  %v5300_v34 = vmax.f32 %v4228_v33, 0.0  ;;  %9118 = vmatprep.subr.bf16.mxu1 %v5770_v38 }
 0x366   : > { %v12546_v11 = vpop.f32.mrf.mxu0 }
 0x367   : > { %v12550_v39 = vpack.c.bf16 %v5300_v34, %v5299_v27 }
 0x368   : > { %v12552_v56 = vpop.f32.mrf.mxu0  ;;  %9119 = vmatpush3.bf16.msra.mxu1 %v12396_v1  ;;  %v5528_v1 = vld [vmem:[%s13197_s1 + $0x148] sm:$0xff] }
 0x369   : > { %9120 = vmatprep.subr.bf16.mxu1 %v5769_v12  ;;  %v8400_v48 = vcombine.high %v5528_v1, %v5544_v21  ;;  %v8399_v2 = vcombine.low %v5528_v1, %v5544_v21 }
 0x36a   : > { %v12557_v17 = vpop.f32.mrf.mxu0 }
 0x36c   : > { %v12559_v49 = vpop.f32.mrf.mxu0  ;;  %9121 = vmatpush3.bf16.msra.mxu1 %v12402_v14  ;;  %v8367_v14 = vcombine.low %v12473_v7, %v12478_v37  ;;  %v5576_v7 = vld [vmem:[%s13197_s1 + $0x2c8] sm:$0xff] }
 0x36d   : > { %9122 = vmatprep.subr.bf16.mxu1 %v5768_v35  ;;  %v8432_v57 = vcombine.high %v5560_v47, %v5576_v7  ;;  %v8431_v5 = vcombine.low %v5560_v47, %v5576_v7 }
 0x36e   : > { %v12562_v10 = vpop.f32.mrf.mxu0 }
 0x370   : > { %v9740_v28 = vpop.f32.mrf.mxu0  ;;  %9123 = vmatpush3.bf16.msra.mxu1 %v12378_v18 }
 0x371   : > { %9124 = vmatprep.subr.bf16.mxu1 %v5767_v32 }
 0x372   : > { %v12571_v45 = vpop.f32.mrf.mxu0 }
 0x374   : > { %v12575_v15 = vpop.f32.mrf.mxu0  ;;  %9125 = vmatpush3.bf16.msra.mxu1 %v12382_v26 }
 0x376   : > { %v12578_v18 = vpop.f32.mrf.mxu0 }
 0x377   : > { %v9006_v36 = vpop.f32.mrf.mxu1  ;;  %7129 = vmatmul.mubr.bf16.vlgmr.msra.gmra.mxu1 %v8367_v14  ;;  %v12621_v14 = vld [vmem:[%s13197_s1 + $0x50] sm:$0xff] }
 0x378   : > { %v12580_v50 = vpop.f32.mrf.mxu0  ;;  %7136 = vmatprep.mubr.bf16.mxu1 %v8400_v48 }
 0x379   : > { %v9007_v60 = vpop.f32.mrf.mxu1 }
 0x37a   : > { %v9008_v37 = vadd.f32 %v9007_v60, %v9006_v36  ;;  %v12588_v25 = vpop.f32.mrf.mxu0 }
 0x37b   : > { %v9009_v26 = vpop.f32.mrf.mxu1 }
 0x37c   : > { %v12591_v30 = vadd.f32 %v9008_v37, %v12445_v31  ;;  %v12593_v44 = vpop.f32.mrf.mxu0  ;;  %v5592_v31 = vld [vmem:[%s13197_s1 + $0x348] sm:$0xff] }
 0x37d   : > { %v9010_v38 = vpop.f32.mrf.mxu1  ;;  %v8464_v29 = vcombine.high %v5592_v31, %v5608_v43  ;;  %v8463_v47 = vcombine.low %v5592_v31, %v5608_v43 }
 0x37e   : > { %v9011_v40 = vadd.f32 %v9010_v38, %v9009_v26  ;;  %v12595_v54 = vpop.f32.mrf.mxu0 }
 0x37f   : > { %v9012_v19 = vpop.f32.mrf.mxu1  ;;  %7137 = vmatmul.mubr.bf16.gmra.mxu1 %v8399_v2  ;;  %v4268_v2 = vadd.f32 %v12328_v16, %v9740_v28 }
 0x380   : > { %v12598_v58 = vadd.f32 %v9011_v40, %v12452_v13  ;;  %v12600_v33 = vpop.f32.mrf.mxu0  ;;  %7144 = vmatprep.mubr.bf16.mxu1 %v8432_v57 }
 0x381   : > { %v9013_v4 = vpop.f32.mrf.mxu1  ;;  %v5310_v28 = vmax.f32 %v4268_v2, 0.0 }
 0x382   : > { %v9014_v27 = vadd.f32 %v9013_v4, %v9012_v19  ;;  %v12608_v34 = vpop.f32.mrf.mxu0  ;;  %v4265_v4 = vadd.f32 %v12328_v16, %v12559_v49 }
 0x383   : > { %v9015_v63 = vpop.f32.mrf.mxu1 }
 0x384   : > { %v12611_v13 = vadd.f32 %v9014_v27, %v12463_v22  ;;  %v9751_v12 = vpop.f32.mrf.mxu0  ;;  %v12626_v22 = vld [vmem:[%s13197_s1 + $0xd0] sm:$0xff] }
 0x385   : > { %v9016_v23 = vpop.f32.mrf.mxu1  ;;  %v8370_v37 = vcombine.high %v12621_v14, %v12626_v22 }
 0x386   : > { %v9017_v35 = vadd.f32 %v9016_v23, %v9015_v63  ;;  %v12613_v59 = vpop.f32.mrf.mxu0 }
 0x387   : > { %v9018_v62 = vpop.f32.mrf.mxu1  ;;  %7145 = vmatmul.mubr.bf16.gmra.mxu1 %v8431_v5  ;;  %v4260_v5 = vadd.f32 %v12328_v16, %v12571_v45  ;;  %v4252_v45 = vadd.f32 %v12328_v16, %v12552_v56 }
 0x388   : > { %v12616_v32 = vadd.f32 %v9017_v35, %v12468_v6  ;;  %v9752_v1 = vpop.f32.mrf.mxu0  ;;  %7152 = vmatprep.mubr.bf16.mxu1 %v8464_v29 }
 0x389   : > { %v9019_v21 = vpop.f32.mrf.mxu1  ;;  %v4316_v29 = vadd.f32 %v12328_v16, %v9752_v1 }
 0x38a   : > { %v9020_v48 = vadd.f32 %v9019_v21, %v9018_v62  ;;  %v4307_v36 = vpop.f32.mrf.mxu0 }
 0x38b   : > { %v9021_v60 = vpop.f32.mrf.mxu1 }
 0x38c   : > { %v12629_v6 = vadd.f32 %v9020_v48, %v12481_v8  ;;  %v9755_v7 = vpop.f32.mrf.mxu0  ;;  %v5309_v48 = vmax.f32 %v4265_v4, 0.0 }
 0x38d   : > { %v9022_v26 = vpop.f32.mrf.mxu1  ;;  %v4329_v40 = vadd.f32 %v12328_v16, %v9755_v7 }
 0x38e   : > { %v9023_v57 = vadd.f32 %v9022_v26, %v9021_v60  ;;  %v4320_v38 = vpop.f32.mrf.mxu0  ;;  %v4257_v60 = vadd.f32 %v12328_v16, %v12562_v10  ;;  %v4308_v10 = vadd.f32 %v12328_v16, %v4307_v36 }
 0x38f   : > { %v9024_v19 = vpop.f32.mrf.mxu1  ;;  %7153 = vmatmul.mubr.bf16.gmra.mxu1 %v8463_v47  ;;  %v4321_v43 = vadd.f32 %v12328_v16, %v4320_v38  ;;  %v5325_v62 = vmax.f32 %v4329_v40, 0.0  ;;  %v4313_v47 = vadd.f32 %v12328_v16, %v9751_v12  ;;  %v5782_v38 = vpack.c.bf16 %v5310_v28, %v5309_v48 }
 0x390   : > { %v12638_v31 = vadd.f32 %v9023_v57, %v12490_v41  ;;  %v9756_v8 = vpop.f32.mrf.mxu0  ;;  %7193 = vmatprep.mubr.bf16.mxu1 %v8370_v37  ;;  %v5308_v40 = vmax.f32 %v4260_v5, 0.0  ;;  %v5306_v28 = vmax.f32 %v4252_v45, 0.0  ;;  %v4305_v5 = vadd.f32 %v12328_v16, %v12613_v59 }
 0x391   : > { %v4332_v27 = vadd.f32 %v12328_v16, %v9756_v8  ;;  %v9025_v63 = vpop.f32.mrf.mxu1  ;;  %v5323_v1 = vmax.f32 %v4321_v43, 0.0  ;;  %v5321_v56 = vmax.f32 %v4313_v47, 0.0  ;;  %v4241_v47 = vadd.f32 %v12328_v16, %v12546_v11 }
 0x392   : > { %v9026_v23 = vadd.f32 %v9025_v63, %v9024_v19  ;;  %v4323_v35 = vpop.f32.mrf.mxu0  ;;  %v5322_v19 = vmax.f32 %v4316_v29, 0.0  ;;  %v5307_v63 = vmax.f32 %v4257_v60, 0.0 }
 0x393   : > { %v5326_v49 = vmax.f32 %v4332_v27, 0.0  ;;  %v4324_v41 = vadd.f32 %v12328_v16, %v4323_v35  ;;  %v9027_v21 = vpop.f32.mrf.mxu1  ;;  %v4244_v35 = vadd.f32 %v12328_v16, %v12557_v17  ;;  %v5319_v17 = vmax.f32 %v4305_v5, 0.0 }
 0x394   : > { %v12650_v7 = vadd.f32 %v9026_v23, %v12502_v0  ;;  %v9759_v37 = vpop.f32.mrf.mxu0  ;;  %v4249_v0 = vadd.f32 %v12328_v16, %v12542_v20  ;;  %v5781_v20 = vpack.c.bf16 %v5308_v40, %v5307_v63 }
 0x395   : > { %v5790_v26 = vpack.c.bf16 %v5326_v49, %v5325_v62  ;;  %v5324_v2 = vmax.f32 %v4324_v41, 0.0  ;;  %v9028_v57 = vpop.f32.mrf.mxu1  ;;  %v4345_v12 = vadd.f32 %v12328_v16, %v9759_v37  ;;  %v4300_v62 = vadd.f32 %v12328_v16, %v12600_v33 }
 0x396   : > { %v9029_v4 = vadd.f32 %v9028_v57, %v9027_v21  ;;  %v4336_v8 = vpop.f32.mrf.mxu0  ;;  %v5320_v41 = vmax.f32 %v4308_v10, 0.0  ;;  %v5305_v59 = vmax.f32 %v4249_v0, 0.0  ;;  %v4297_v37 = vadd.f32 %v12328_v16, %v12593_v44 }
 0x397   : > { %v5789_v27 = vpack.c.bf16 %v5324_v2, %v5323_v1  ;;  %9150 = vmatprep.subr.bf16.mxu1 %v5790_v26  ;;  %v4337_v36 = vadd.f32 %v12328_v16, %v4336_v8  ;;  %v5329_v21 = vmax.f32 %v4345_v12, 0.0  ;;  %v5304_v57 = vmax.f32 %v4244_v35, 0.0 }
 0x398   : > { %v12659_v43 = vadd.f32 %v9029_v4, %v12511_v55  ;;  %v9760_v23 = vpop.f32.mrf.mxu0  ;;  %9151 = vmatpush3.bf16.msra.mxu1 %v5782_v38  ;;  %v5788_v55 = vpack.c.bf16 %v5322_v19, %v5321_v56  ;;  %v5780_v2 = vpack.c.bf16 %v5306_v28, %v5305_v59  ;;  %v5318_v38 = vmax.f32 %v4300_v62, 0.0 }
 0x399   : > { %v4348_v29 = vadd.f32 %v12328_v16, %v9760_v23  ;;  %9152 = vmatprep.subr.bf16.mxu1 %v5789_v27  ;;  %v5327_v1 = vmax.f32 %v4337_v36, 0.0  ;;  %v4292_v19 = vadd.f32 %v12328_v16, %v12608_v34  ;;  %v5787_v4 = vpack.c.bf16 %v5320_v41, %v5319_v17 }
 0x39a   : > { %v4339_v49 = vpop.f32.mrf.mxu0  ;;  %v5303_v8 = vmax.f32 %v4241_v47, 0.0  ;;  %v5317_v10 = vmax.f32 %v4297_v37, 0.0  ;;  %v4289_v12 = vadd.f32 %v12328_v16, %v12595_v54  ;;  %v4284_v34 = vadd.f32 %v12328_v16, %v12580_v50 }
 0x39b   : > { %v5330_v48 = vmax.f32 %v4348_v29, 0.0  ;;  %v4340_v60 = vadd.f32 %v12328_v16, %v4339_v49  ;;  %v5316_v5 = vmax.f32 %v4292_v19, 0.0  ;;  %v4273_v37 = vadd.f32 %v12328_v16, %v12578_v18 }
 0x39c   : > { %v9763_v45 = vpop.f32.mrf.mxu0  ;;  %9153 = vmatpush3.bf16.msra.mxu1 %v5781_v20  ;;  %v5779_v56 = vpack.c.bf16 %v5304_v57, %v5303_v8  ;;  %v5786_v23 = vpack.c.bf16 %v5318_v38, %v5317_v10  ;;  %v4281_v20 = vadd.f32 %v12328_v16, %v12575_v15  ;;  %v5315_v62 = vmax.f32 %v4289_v12, 0.0  ;;  %v5561_v10 = vld [vmem:[%s13197_s1 + $0x250] sm:$0xff] }
 0x39d   : > { %v12674_v26 = vpack.c.bf16 %v5330_v48, %v5329_v21  ;;  %v5328_v33 = vmax.f32 %v4340_v60, 0.0  ;;  %9154 = vmatprep.subr.bf16.mxu1 %v5788_v55  ;;  %v4361_v44 = vadd.f32 %v12328_v16, %v9763_v45  ;;  %v5314_v21 = vmax.f32 %v4284_v34, 0.0 }
 0x39e   : > { %v4352_v40 = vpop.f32.mrf.mxu0  ;;  %v4276_v48 = vadd.f32 %v12328_v16, %v12588_v25  ;;  %v5785_v60 = vpack.c.bf16 %v5316_v5, %v5315_v62  ;;  %v5313_v15 = vmax.f32 %v4281_v20, 0.0  ;;  %v5311_v25 = vmax.f32 %v4273_v37, 0.0  ;;  %v5609_v20 = vld [vmem:[%s13197_s1 + $0x3d0] sm:$0xff] }
 0x39f   : > { %v12678_v11 = vpack.c.bf16 %v5328_v33, %v5327_v1  ;;  %v4353_v0 = vadd.f32 %v12328_v16, %v4352_v40  ;;  %v5333_v36 = vmax.f32 %v4361_v44, 0.0 }
 0x3a0   : > { %v9764_v27 = vpop.f32.mrf.mxu0  ;;  %9155 = vmatpush3.bf16.msra.mxu1 %v5780_v2  ;;  %v5784_v17 = vpack.c.bf16 %v5314_v21, %v5313_v15  ;;  %v5312_v1 = vmax.f32 %v4276_v48, 0.0 }
 0x3a1   : > { %v4364_v63 = vadd.f32 %v12328_v16, %v9764_v27  ;;  %9156 = vmatprep.subr.bf16.mxu1 %v5787_v4  ;;  %v5331_v55 = vmax.f32 %v4353_v0, 0.0 }
 0x3a2   : > { %v4355_v28 = vpop.f32.mrf.mxu0  ;;  %v5783_v57 = vpack.c.bf16 %v5312_v1, %v5311_v25 }
 0x3a3   : > { %v5334_v29 = vmax.f32 %v4364_v63, 0.0  ;;  %v4356_v35 = vadd.f32 %v12328_v16, %v4355_v28  ;;  %v5529_v16 = vld [vmem:[%s13197_s1 + $0x150] sm:$0xff] }
 0x3a4   : > { %v12690_v54 = vpop.f32.mrf.mxu0  ;;  %9157 = vmatpush3.bf16.msra.mxu1 %v5779_v56 }
 0x3a5   : > { %v12692_v49 = vpack.c.bf16 %v5334_v29, %v5333_v36  ;;  %v5332_v41 = vmax.f32 %v4356_v35, 0.0  ;;  %9158 = vmatprep.subr.bf16.mxu1 %v5786_v23 }
 0x3a6   : > { %v12694_v50 = vpop.f32.mrf.mxu0 }
 0x3a7   : > { %v12698_v59 = vpack.c.bf16 %v5332_v41, %v5331_v55 }
 0x3a8   : > { %v12700_v47 = vpop.f32.mrf.mxu0  ;;  %9159 = vmatpush3.bf16.msra.mxu1 %v12544_v61  ;;  %v5545_v61 = vld [vmem:[%s13197_s1 + $0x1d0] sm:$0xff] }
 0x3a9   : > { %9160 = vmatprep.subr.bf16.mxu1 %v5785_v60  ;;  %v8402_v19 = vcombine.high %v5529_v16, %v5545_v61  ;;  %v8401_v12 = vcombine.low %v5529_v16, %v5545_v61  ;;  %v12769_v61 = vld [vmem:[%s13197_s1 + $0x58] sm:$0xff] }
 0x3aa   : > { %v12705_v45 = vpop.f32.mrf.mxu0 }
 0x3ac   : > { %v12707_v33 = vpop.f32.mrf.mxu0  ;;  %9161 = vmatpush3.bf16.msra.mxu1 %v12550_v39  ;;  %v8369_v39 = vcombine.low %v12621_v14, %v12626_v22  ;;  %v5577_v14 = vld [vmem:[%s13197_s1 + $0x2d0] sm:$0xff] }
 0x3ad   : > { %9162 = vmatprep.subr.bf16.mxu1 %v5784_v17  ;;  %v8434_v56 = vcombine.high %v5561_v10, %v5577_v14  ;;  %v8433_v21 = vcombine.low %v5561_v10, %v5577_v14 }
 0x3ae   : > { %v12710_v2 = vpop.f32.mrf.mxu0 }
 0x3b0   : > { %v12712_v38 = vpop.f32.mrf.mxu0  ;;  %9163 = vmatpush3.bf16.msra.mxu1 %v12526_v9 }
 0x3b1   : > { %9164 = vmatprep.subr.bf16.mxu1 %v5783_v57 }
 0x3b2   : > { %v12721_v18 = vpop.f32.mrf.mxu0 }
 0x3b4   : > { %v12725_v40 = vpop.f32.mrf.mxu0  ;;  %9165 = vmatpush3.bf16.msra.mxu1 %v12530_v42 }
 0x3b6   : > { %v12728_v9 = vpop.f32.mrf.mxu0 }
 0x3b7   : > { %v9046_v4 = vpop.f32.mrf.mxu1  ;;  %7194 = vmatmul.mubr.bf16.vlgmr.msra.gmra.mxu1 %v8369_v39 }
 0x3b8   : > { %v12730_v44 = vpop.f32.mrf.mxu0  ;;  %7201 = vmatprep.mubr.bf16.mxu1 %v8402_v19 }
 0x3b9   : > { %v9047_v8 = vpop.f32.mrf.mxu1 }
 0x3ba   : > { %v9048_v22 = vadd.f32 %v9047_v8, %v9046_v4  ;;  %v12738_v27 = vpop.f32.mrf.mxu0 }
 0x3bb   : > { %v9049_v42 = vpop.f32.mrf.mxu1 }
 0x3bc   : > { %v12741_v0 = vadd.f32 %v9048_v22, %v12591_v30  ;;  %v12743_v63 = vpop.f32.mrf.mxu0  ;;  %v5593_v30 = vld [vmem:[%s13197_s1 + $0x350] sm:$0xff] }
 0x3bd   : > { %v9050_v34 = vpop.f32.mrf.mxu1  ;;  %v8466_v60 = vcombine.high %v5593_v30, %v5609_v20  ;;  %v8465_v8 = vcombine.low %v5593_v30, %v5609_v20 }
 0x3be   : > { %v9051_v23 = vadd.f32 %v9050_v34, %v9049_v42  ;;  %v12745_v28 = vpop.f32.mrf.mxu0  ;;  %v12784_v42 = vld [vmem:[%s13199_s3] ss:$0 sm:$0xff] }
 0x3bf   : > { %v9052_v5 = vpop.f32.mrf.mxu1  ;;  %7202 = vmatmul.mubr.bf16.gmra.mxu1 %v8401_v12  ;;  %v4396_v12 = vadd.f32 %v12784_v42, %v12712_v38 }
 0x3c0   : > { %v12748_v36 = vadd.f32 %v9051_v23, %v12598_v58  ;;  %v12750_v29 = vpop.f32.mrf.mxu0  ;;  %7209 = vmatprep.mubr.bf16.mxu1 %v8434_v56 }
 0x3c1   : > { %v9053_v35 = vpop.f32.mrf.mxu1  ;;  %v5342_v38 = vmax.f32 %v4396_v12, 0.0 }
 0x3c2   : > { %v9054_v62 = vadd.f32 %v9053_v35, %v9052_v5  ;;  %v12758_v55 = vpop.f32.mrf.mxu0 }
 0x3c3   : > { %v9055_v41 = vpop.f32.mrf.mxu1 }
 0x3c4   : > { %v12761_v58 = vadd.f32 %v9054_v62, %v12611_v13  ;;  %v9783_v48 = vpop.f32.mrf.mxu0  ;;  %v12774_v13 = vld [vmem:[%s13197_s1 + $0xd8] sm:$0xff] }
 0x3c5   : > { %v9056_v15 = vpop.f32.mrf.mxu1  ;;  %v8372_v14 = vcombine.high %v12769_v61, %v12774_v13 }
 0x3c6   : > { %v9057_v37 = vadd.f32 %v9056_v15, %v9055_v41  ;;  %v4432_v17 = vpop.f32.mrf.mxu0 }
 0x3c7   : > { %v9058_v1 = vpop.f32.mrf.mxu1  ;;  %7210 = vmatmul.mubr.bf16.gmra.mxu1 %v8433_v21  ;;  %v4388_v21 = vadd.f32 %v12784_v42, %v12721_v18 }
 0x3c8   : > { %v12764_v25 = vadd.f32 %v9057_v37, %v12616_v32  ;;  %v9784_v57 = vpop.f32.mrf.mxu0  ;;  %7217 = vmatprep.mubr.bf16.mxu1 %v8466_v60 }
 0x3c9   : > { %v9059_v16 = vpop.f32.mrf.mxu1  ;;  %v4444_v37 = vadd.f32 %v12784_v42, %v9784_v57  ;;  %v4380_v57 = vadd.f32 %v12784_v42, %v12700_v47 }
 0x3ca   : > { %v9060_v39 = vadd.f32 %v9059_v16, %v9058_v1  ;;  %v4435_v19 = vpop.f32.mrf.mxu0 }
 0x3cb   : > { %v9061_v4 = vpop.f32.mrf.mxu1  ;;  %v5338_v47 = vmax.f32 %v4380_v57, 0.0 }
 0x3cc   : > { %v12777_v32 = vadd.f32 %v9060_v39, %v12629_v6  ;;  %v9787_v10 = vpop.f32.mrf.mxu0  ;;  %v4393_v6 = vadd.f32 %v12784_v42, %v12707_v33 }
 0x3cd   : > { %v9062_v22 = vpop.f32.mrf.mxu1  ;;  %v4457_v23 = vadd.f32 %v12784_v42, %v9787_v10  ;;  %v4441_v10 = vadd.f32 %v12784_v42, %v9783_v48 }
 0x3ce   : > { %v9063_v56 = vadd.f32 %v9062_v22, %v9061_v4  ;;  %v4448_v34 = vpop.f32.mrf.mxu0  ;;  %v5341_v39 = vmax.f32 %v4393_v6, 0.0  ;;  %v4385_v4 = vadd.f32 %v12784_v42, %v12710_v2  ;;  %v4436_v6 = vadd.f32 %v12784_v42, %v4435_v19 }
 0x3cf   : > { %v9064_v5 = vpop.f32.mrf.mxu1  ;;  %7218 = vmatmul.mubr.bf16.gmra.mxu1 %v8465_v8  ;;  %v4449_v20 = vadd.f32 %v12784_v42, %v4448_v34  ;;  %v5357_v1 = vmax.f32 %v4457_v23, 0.0  ;;  %v5340_v34 = vmax.f32 %v4388_v21, 0.0  ;;  %v4428_v19 = vadd.f32 %v12784_v42, %v12750_v29 }
 0x3d0   : > { %v12792_v35 = vadd.f32 %v9063_v56, %v12638_v31  ;;  %v9788_v30 = vpop.f32.mrf.mxu0  ;;  %7258 = vmatprep.mubr.bf16.mxu1 %v8372_v14  ;;  %v5798_v56 = vpack.c.bf16 %v5342_v38, %v5341_v39  ;;  %v5339_v2 = vmax.f32 %v4385_v4, 0.0  ;;  %v4417_v39 = vadd.f32 %v12784_v42, %v12745_v28 }
 0x3d1   : > { %v4460_v62 = vadd.f32 %v12784_v42, %v9788_v30  ;;  %v9065_v41 = vpop.f32.mrf.mxu1  ;;  %v5355_v14 = vmax.f32 %v4449_v20, 0.0  ;;  %v5353_v20 = vmax.f32 %v4441_v10, 0.0 }
 0x3d2   : > { %v9066_v60 = vadd.f32 %v9065_v41, %v9064_v5  ;;  %v4451_v15 = vpop.f32.mrf.mxu0  ;;  %v5354_v5 = vmax.f32 %v4444_v37, 0.0  ;;  %v4372_v41 = vadd.f32 %v12784_v42, %v12705_v45  ;;  %v5797_v38 = vpack.c.bf16 %v5340_v34, %v5339_v2  ;;  %v13280_v2 = vld [vmem:[#allocation9_spill] sm:$0xff] }
 0x3d3   : > { %v5358_v33 = vmax.f32 %v4460_v62, 0.0  ;;  %v4452_v31 = vadd.f32 %v12784_v42, %v4451_v15  ;;  %v9067_v16 = vpop.f32.mrf.mxu1  ;;  %v4433_v62 = vadd.f32 %v12784_v42, %v4432_v17  ;;  %v4425_v15 = vadd.f32 %v12784_v42, %v12743_v63 }
 0x3d4   : > { %v12803_v8 = vadd.f32 %v9066_v60, %v12650_v7  ;;  %v4377_v7 = vadd.f32 %v12784_v42, %v12690_v54  ;;  %v5804_v21 = vpack.c.bf16 %v5354_v5, %v5353_v20  ;;  %v5352_v60 = vmax.f32 %v4436_v6, 0.0 }
 0x3d5   : > { %v5806_v18 = vpack.c.bf16 %v5358_v33, %v5357_v1  ;;  %v5356_v22 = vmax.f32 %v4452_v31, 0.0  ;;  %v9068_v12 = vpop.f32.mrf.mxu1  ;;  %v5351_v17 = vmax.f32 %v4433_v62, 0.0  ;;  %v5336_v1 = vmax.f32 %v4372_v41, 0.0  ;;  %v13281_v62 = vld [vmem:[#allocation4_spill] sm:$0xff]  ;;  %v5562_v41 = vld [vmem:[%s13197_s1 + $0x258] sm:$0xff] }
 0x3d6   : > { %v9069_v23 = vadd.f32 %v9068_v12, %v9067_v16  ;;  %v5337_v54 = vmax.f32 %v4377_v7, 0.0  ;;  %v5350_v33 = vmax.f32 %v4428_v19, 0.0  ;;  %v4420_v45 = vadd.f32 %v12784_v42, %v12758_v55 }
 0x3d7   : > { %v5805_v30 = vpack.c.bf16 %v5356_v22, %v5355_v14  ;;  %9190 = vmatprep.subr.bf16.mxu1 %v5806_v18  ;;  %v5803_v31 = vpack.c.bf16 %v5352_v60, %v5351_v17  ;;  %v5349_v16 = vmax.f32 %v4425_v15, 0.0  ;;  %v4412_v63 = vadd.f32 %v12784_v42, %v12730_v44  ;;  %v12829_v14 = vpop.f32.mrf.mxu0  ;;  %v13282_v60 = vld [vmem:[#allocation5_spill] sm:$0xff]  ;;  %v13283_v15 = vld [vmem:[#allocation8_spill] sm:$0xff] }
 0x3d8   : > { %v12812_v48 = vadd.f32 %v9069_v23, %v12659_v43  ;;  %9191 = vmatpush3.bf16.msra.mxu1 %v5798_v56  ;;  %v4369_v43 = vadd.f32 %v12784_v42, %v12694_v50  ;;  %v5796_v37 = vpack.c.bf16 %v5338_v47, %v5337_v54  ;;  %v5348_v10 = vmax.f32 %v4420_v45, 0.0 }
 0x3d9   : > { %9192 = vmatprep.subr.bf16.mxu1 %v5805_v30  ;;  %v5802_v4 = vpack.c.bf16 %v5350_v33, %v5349_v16  ;;  %v4409_v55 = vadd.f32 %v12784_v42, %v12725_v40  ;;  %v5347_v18 = vmax.f32 %v4417_v39, 0.0  ;;  %v5346_v22 = vmax.f32 %v4412_v63, 0.0  ;;  %v12835_v57 = vpop.f32.mrf.mxu0  ;;  %v5594_v16 = vld [vmem:[%s13197_s1 + $0x358] sm:$0xff] }
 0x3da   : > { %v5335_v29 = vmax.f32 %v4369_v43, 0.0  ;;  %v4404_v12 = vadd.f32 %v12784_v42, %v12738_v27  ;;  %v4401_v56 = vadd.f32 %v12784_v42, %v12728_v9  ;;  %v5546_v9 = vld [vmem:[%s13197_s1 + $0x1d8] sm:$0xff]  ;;  %v8371_v27 = vcombine.low %v12769_v61, %v12774_v13 }
 0x3db   : > { %v5801_v28 = vpack.c.bf16 %v5348_v10, %v5347_v18  ;;  %v5345_v44 = vmax.f32 %v4409_v55, 0.0  ;;  %v9792_v5 = vpop.f32.mrf.mxu0  ;;  %v5610_v39 = vld [vmem:[%s13197_s1 + $0x3d8] sm:$0xff] }
 0x3dc   : > { %9193 = vmatpush3.bf16.msra.mxu1 %v5797_v38  ;;  %v5795_v50 = vpack.c.bf16 %v5336_v1, %v5335_v29  ;;  %v5344_v23 = vmax.f32 %v4404_v12, 0.0  ;;  %v5343_v40 = vmax.f32 %v4401_v56, 0.0  ;;  %v4473_v12 = vadd.f32 %v12784_v42, %v12829_v14  ;;  %v13286_v56 = vld [vmem:[#allocation7_spill] sm:$0xff] }
 0x3dd   : > { %9194 = vmatprep.subr.bf16.mxu1 %v5804_v21  ;;  %v5800_v34 = vpack.c.bf16 %v5346_v22, %v5345_v44  ;;  %v12841_v30 = vpop.f32.mrf.mxu0  ;;  %v8468_v22 = vcombine.high %v5594_v16, %v5610_v39  ;;  %v4465_v14 = vadd.f32 %v12784_v42, %v12835_v57 }
 0x3de   : > { %v5799_v6 = vpack.c.bf16 %v5344_v23, %v5343_v40 }
 0x3e0   : > { %9195 = vmatpush3.bf16.msra.mxu1 %v5796_v37 }
 0x3e1   : > { %9196 = vmatprep.subr.bf16.mxu1 %v5803_v31  ;;  %v13284_v31 = vld [vmem:[#allocation2_spill] sm:$0xff] }
 0x3e4   : > { %9197 = vmatpush3.bf16.msra.mxu1 %v5795_v50 }
 0x3e5   : > { %9198 = vmatprep.subr.bf16.mxu1 %v5802_v4 }
 0x3e8   : > { %9199 = vmatpush3.bf16.msra.mxu1 %v12692_v49  ;;  %v5530_v49 = vld [vmem:[%s13197_s1 + $0x158] sm:$0xff] }
 0x3e9   : > { %9200 = vmatprep.subr.bf16.mxu1 %v5801_v28  ;;  %v8404_v7 = vcombine.high %v5530_v49, %v5546_v9  ;;  %v8403_v19 = vcombine.low %v5530_v49, %v5546_v9  ;;  %v4476_v28 = vadd.f32 %v12784_v42, %v9792_v5  ;;  %v5361_v9 = vmax.f32 %v4473_v12, 0.0  ;;  %v5499_v5 = vld [vmem:[%s13197_s1 + $0x60] sm:$0xff] }
 0x3ec   : > { %9201 = vmatpush3.bf16.msra.mxu1 %v12698_v59  ;;  %v9795_v59 = vpop.f32.mrf.mxu0 }
 0x3ed   : > { %9202 = vmatprep.subr.bf16.mxu1 %v5800_v34 }
 0x3f0   : > { %9203 = vmatpush3.bf16.msra.mxu1 %v12674_v26  ;;  %v4480_v26 = vpop.f32.mrf.mxu0 }
 0x3f1   : > { %9204 = vmatprep.subr.bf16.mxu1 %v5799_v6  ;;  %v4481_v50 = vadd.f32 %v12784_v42, %v4480_v26 }
 0x3f2   : > { %v9796_v13 = vpop.f32.mrf.mxu0 }
 0x3f3   : > { %v4492_v17 = vadd.f32 %v12784_v42, %v9796_v13  ;;  %v5363_v34 = vmax.f32 %v4481_v50, 0.0 }
 0x3f4   : > { %9205 = vmatpush3.bf16.msra.mxu1 %v12678_v11  ;;  %v5578_v11 = vld [vmem:[%s13197_s1 + $0x2d8] sm:$0xff]  ;;  %v4483_v1 = vpop.f32.mrf.mxu0 }
 0x3f5   : > { %9230 = vmatprep.subr.bf16.mxu1 %v13280_v2  ;;  %v8436_v54 = vcombine.high %v5562_v41, %v5578_v11  ;;  %v5366_v63 = vmax.f32 %v4492_v17, 0.0  ;;  %v8435_v55 = vcombine.low %v5562_v41, %v5578_v11  ;;  %v13287_v41 = vld [vmem:[#allocation6_spill] sm:$0xff]  ;;  %v5359_v11 = vmax.f32 %v4465_v14, 0.0 }
 0x3f7   : > { %v9086_v20 = vpop.f32.mrf.mxu1  ;;  %7259 = vmatmul.mubr.bf16.vlgmr.msra.gmra.mxu1 %v8371_v27 }
 0x3f8   : > { %9231 = vmatpush3.bf16.msra.mxu1 %v13281_v62  ;;  %7266 = vmatprep.mubr.bf16.mxu1 %v8404_v7  ;;  %v5362_v7 = vmax.f32 %v4476_v28, 0.0  ;;  %v8467_v62 = vcombine.low %v5594_v16, %v5610_v39  ;;  %v13290_v39 = vld [vmem:[#allocation19_spill] sm:$0xff]  ;;  %v13296_v28 = vld [vmem:[#allocation21_spill] sm:$0xff] }
 0x3f9   : > { %v9087_v47 = vpop.f32.mrf.mxu1  ;;  %9232 = vmatprep.subr.bf16.mxu1 %v11531_v53  ;;  %v4489_v53 = vadd.f32 %v12784_v42, %v9795_v59  ;;  %v5515_v59 = vld [vmem:[%s13197_s1 + $0xe0] sm:$0xff] }
 0x3fa   : > { %v9088_v61 = vadd.f32 %v9087_v47, %v9086_v20  ;;  %v8373_v17 = vcombine.low %v5499_v5, %v5515_v59 }
 0x3fb   : > { %v9089_v38 = vpop.f32.mrf.mxu1 }
 0x3fc   : > { %v12863_v21 = vadd.f32 %v9088_v61, %v12741_v0  ;;  %9233 = vmatpush3.bf16.msra.mxu1 %v13282_v60  ;;  %v5365_v0 = vmax.f32 %v4489_v53, 0.0  ;;  %v5808_v61 = vpack.c.bf16 %v5362_v7, %v5361_v9 }
 0x3fd   : > { %v9090_v43 = vpop.f32.mrf.mxu1  ;;  %9234 = vmatprep.subr.bf16.mxu1 %v13283_v15 }
 0x3fe   : > { %v9091_v37 = vadd.f32 %v9090_v43, %v9089_v38  ;;  %v5810_v23 = vpack.c.bf16 %v5366_v63, %v5365_v0  ;;  %v13289_v0 = vld [vmem:[#allocation18_spill] sm:$0xff]  ;;  %v13291_v63 = vld [vmem:[#allocation25_spill] sm:$0xff] }
 0x3ff   : > { %v9092_v33 = vpop.f32.mrf.mxu1  ;;  %7267 = vmatmul.mubr.bf16.gmra.mxu1 %v8403_v19 }
 0x400   : > { %v12870_v45 = vadd.f32 %v9091_v37, %v12748_v36  ;;  %9235 = vmatpush3.bf16.msra.mxu1 %v13284_v31  ;;  %7274 = vmatprep.mubr.bf16.mxu1 %v8436_v54  ;;  %v4484_v36 = vadd.f32 %v12784_v42, %v4483_v1  ;;  %v5547_v54 = vld [vmem:[%s13197_s1 + $0x1e0] sm:$0xff] }
 0x401   : > { %v9093_v29 = vpop.f32.mrf.mxu1  ;;  %9236 = vmatprep.subr.bf16.mxu1 %v11500_v46  ;;  %v13285_v46 = vld [vmem:[#allocation3_spill] sm:$0xff] }
 0x402   : > { %v9094_v4 = vadd.f32 %v9093_v29, %v9092_v33  ;;  %v5364_v40 = vmax.f32 %v4484_v36, 0.0  ;;  %v13288_v33 = vld [vmem:[#allocation28_spill] sm:$0xff]  ;;  %v5579_v29 = vld [vmem:[%s13197_s1 + $0x2e0] sm:$0xff] }
 0x403   : > { %v9095_v10 = vpop.f32.mrf.mxu1  ;;  %v5611_v36 = vld [vmem:[%s13197_s1 + $0x3e0] sm:$0xff] }
 0x404   : > { %v12883_v18 = vadd.f32 %v9094_v4, %v12761_v58  ;;  %9237 = vmatpush3.bf16.msra.mxu1 %v13285_v46  ;;  %v5809_v2 = vpack.c.bf16 %v5364_v40, %v5363_v34  ;;  %v13294_v46 = vld [vmem:[#allocation22_spill] sm:$0xff]  ;;  %v5500_v34 = vld [vmem:[%s13197_s1 + $0x68] sm:$0xff] }
 0x405   : > { %v9096_v44 = vpop.f32.mrf.mxu1  ;;  %9238 = vmatprep.subr.bf16.mxu1 %v13286_v56  ;;  %v13298_v56 = vld [vmem:[#allocation23_spill] sm:$0xff]  ;;  %v13299_v40 = vld [vmem:[#allocation10_spill] sm:$0xff] }
 0x406   : > { %v9097_v6 = vadd.f32 %v9096_v44, %v9095_v10  ;;  %v13293_v10 = vld [vmem:[#allocation16_spill] sm:$0xff]  ;;  %v13297_v44 = vld [vmem:[#allocation13_spill] sm:$0xff] }
 0x407   : > { %v9098_v49 = vpop.f32.mrf.mxu1  ;;  %7275 = vmatmul.mubr.bf16.gmra.mxu1 %v8435_v55 }
 0x408   : > { %v12891_v58 = vadd.f32 %v9097_v6, %v12764_v25  ;;  %9239 = vmatpush3.bf16.msra.mxu1 %v5810_v23  ;;  %7282 = vmatprep.mubr.bf16.mxu1 %v8468_v22  ;;  %v4468_v25 = vadd.f32 %v12784_v42, %v12841_v30  ;;  %v13295_v22 = vld [vmem:[#allocation17_spill] sm:$0xff]  ;;  %v5516_v23 = vld [vmem:[%s13197_s1 + $0xe8] sm:$0xff]  ;;  %v4593_v6 = vadd.f32 %v12784_v42, %v13299_v40 }
 0x409   : > { %v9099_v27 = vpop.f32.mrf.mxu1  ;;  %9240 = vmatprep.subr.bf16.mxu1 %v11468_v51  ;;  %v8374_v51 = vcombine.high %v5499_v5, %v5515_v59  ;;  %v4657_v12 = vadd.f32 %v12784_v42, %v13295_v22  ;;  %v13301_v59 = vld [vmem:[#allocation14_spill] sm:$0xff]  ;;  %v8376_v7 = vcombine.high %v5500_v34, %v5516_v23  ;;  %v13312_v22 = vld [vmem:[#allocation40_spill] sm:$0xff]  ;;  %v5596_v40 = vld [vmem:[%s13197_s1 + $0x368] sm:$0xff] }
 0x40a   : > { %v9100_v20 = vadd.f32 %v9099_v27, %v9098_v49  ;;  %v5360_v13 = vmax.f32 %v4468_v25, 0.0  ;;  %v13300_v49 = vld [vmem:[#allocation12_spill] sm:$0xff] }
 0x40b   : > { %v9101_v26 = vpop.f32.mrf.mxu1  ;;  %v4596_v9 = vadd.f32 %v12784_v42, %v13300_v49  ;;  %v5407_v14 = vmax.f32 %v4657_v12, 0.0  ;;  %v13302_v25 = vld [vmem:[#allocation20_spill] sm:$0xff]  ;;  %v4801_v12 = vadd.f32 %v12784_v42, %v13312_v22 }
 0x40c   : > { %v12905_v57 = vadd.f32 %v9100_v20, %v12777_v32  ;;  %9241 = vmatpush3.bf16.msra.mxu1 %v5809_v2  ;;  %v5531_v32 = vld [vmem:[%s13197_s1 + $0x160] sm:$0xff]  ;;  %v5807_v53 = vpack.c.bf16 %v5360_v13, %v5359_v11  ;;  %v5391_v2 = vmax.f32 %v4593_v6, 0.0  ;;  %v13305_v11 = vld [vmem:[#allocation11_spill] sm:$0xff]  ;;  %v5533_v22 = vld [vmem:[%s13197_s1 + $0x170] sm:$0xff] }
 0x40d   : > { %v9102_v47 = vpop.f32.mrf.mxu1  ;;  %9242 = vmatprep.subr.bf16.mxu1 %v13287_v41  ;;  %v8406_v37 = vcombine.high %v5531_v32, %v5547_v54  ;;  %v8405_v16 = vcombine.low %v5531_v32, %v5547_v54  ;;  %v5392_v20 = vmax.f32 %v4596_v9, 0.0  ;;  %v5548_v13 = vld [vmem:[%s13197_s1 + $0x1e8] sm:$0xff]  ;;  %v8375_v32 = vcombine.low %v5500_v34, %v5516_v23 }
 0x40e   : > { %v9103_v38 = vadd.f32 %v9102_v47, %v9101_v26  ;;  %v13303_v26 = vld [vmem:[#allocation45_spill] sm:$0xff]  ;;  %v5612_v6 = vld [vmem:[%s13197_s1 + $0x3e8] sm:$0xff]  ;;  %v5443_v9 = vmax.f32 %v4801_v12, 0.0  ;;  %v5549_v12 = vld [vmem:[%s13197_s1 + $0x1f0] sm:$0xff] }
 0x40f   : > { %v9104_v19 = vpop.f32.mrf.mxu1  ;;  %7283 = vmatmul.mubr.bf16.gmra.mxu1 %v8467_v62  ;;  %v4833_v62 = vadd.f32 %v12784_v42, %v13303_v26  ;;  %v13317_v26 = vld [vmem:[#allocation35_spill] sm:$0xff] }
 0x410   : > { %v12909_v30 = vadd.f32 %v9103_v38, %v12792_v35  ;;  %9243 = vmatpush3.bf16.msra.mxu1 %v5808_v61  ;;  %7323 = vmatprep.mubr.bf16.mxu1 %v8374_v51  ;;  %v13304_v51 = vld [vmem:[#allocation47_spill] sm:$0xff]  ;;  %v5823_v38 = vpack.c.bf16 %v5392_v20, %v5391_v2 }
 0x411   : > { %v9105_v60 = vpop.f32.mrf.mxu1  ;;  %9244 = vmatprep.subr.bf16.mxu1 %v11436_v3  ;;  %v4836_v47 = vadd.f32 %v12784_v42, %v13304_v51  ;;  %v5532_v61 = vld [vmem:[%s13197_s1 + $0x168] sm:$0xff] }
 0x412   : > { %v9106_v43 = vadd.f32 %v9105_v60, %v9104_v19  ;;  %v5451_v19 = vmax.f32 %v4833_v62, 0.0  ;;  %v8408_v54 = vcombine.high %v5532_v61, %v5548_v13  ;;  %v13316_v2 = vld [vmem:[#allocation43_spill] sm:$0xff]  ;;  %v4785_v62 = vadd.f32 %v12784_v42, %v13317_v26  ;;  %v13331_v26 = vld [vmem:[#allocation68_spill] sm:$0xff] }
 0x413   : > { %v9107_v15 = vpop.f32.mrf.mxu1  ;;  %v5452_v60 = vmax.f32 %v4836_v47, 0.0  ;;  %v13318_v51 = vld [vmem:[#allocation39_spill] sm:$0xff] }
 0x414   : > { %v12919_v35 = vadd.f32 %v9106_v43, %v12803_v8  ;;  %9245 = vmatpush3.bf16.msra.mxu1 %v5807_v53  ;;  %v5563_v8 = vld [vmem:[%s13197_s1 + $0x260] sm:$0xff]  ;;  %v13306_v53 = vld [vmem:[#allocation49_spill] sm:$0xff]  ;;  %v4788_v47 = vadd.f32 %v12784_v42, %v13318_v51 }
 0x415   : > { %v9108_v1 = vpop.f32.mrf.mxu1  ;;  %9270 = vmatprep.subr.bf16.mxu1 %v13288_v33  ;;  %v8438_v50 = vcombine.high %v5563_v8, %v5579_v29  ;;  %v8437_v4 = vcombine.low %v5563_v8, %v5579_v29  ;;  %v13307_v43 = vld [vmem:[#allocation42_spill] sm:$0xff]  ;;  %v5853_v33 = vpack.c.bf16 %v5452_v60, %v5451_v19  ;;  %v5564_v8 = vld [vmem:[%s13197_s1 + $0x268] sm:$0xff]  ;;  %v5517_v19 = vld [vmem:[%s13197_s1 + $0xf0] sm:$0xff] }
 0x416   : > { %v9109_v3 = vadd.f32 %v9108_v1, %v9107_v15  ;;  %v4817_v15 = vadd.f32 %v12784_v42, %v13307_v43  ;;  %v5580_v29 = vld [vmem:[%s13197_s1 + $0x2e8] sm:$0xff]  ;;  %v5439_v43 = vmax.f32 %v4785_v62, 0.0  ;;  %v4948_v62 = vadd.f32 %v12784_v42, %v13331_v26  ;;  %v13347_v26 = vld [vmem:[#allocation64_spill] sm:$0xff] }
 0x417   : > { %7324 = vmatmul.mubr.bf16.vlgmr.msra.gmra.mxu1 %v8373_v17  ;;  %v13308_v17 = vld [vmem:[#allocation44_spill] sm:$0xff]  ;;  %v13320_v60 = vld [vmem:[#allocation27_spill] sm:$0xff] }
 0x418   : > { %v12923_v31 = vadd.f32 %v9109_v3, %v12812_v48  ;;  %9271 = vmatpush3.bf16.msra.mxu1 %v13289_v0  ;;  %7331 = vmatprep.mubr.bf16.mxu1 %v8406_v37  ;;  %v13292_v48 = vld [vmem:[#allocation15_spill] sm:$0xff]  ;;  %v4820_v37 = vadd.f32 %v12784_v42, %v13308_v17  ;;  %v13309_v3 = vld [vmem:[#allocation36_spill] sm:$0xff] }
 0x419   : > { %9272 = vmatprep.subr.bf16.mxu1 %v11767_v52  ;;  %v5595_v52 = vld [vmem:[%s13197_s1 + $0x360] sm:$0xff] }
 0x41a   : > { %v8470_v55 = vcombine.high %v5595_v52, %v5611_v36  ;;  %v8469_v5 = vcombine.low %v5595_v52, %v5611_v36  ;;  %v13310_v36 = vld [vmem:[#allocation37_spill] sm:$0xff] }
 0x41c   : > { %9273 = vmatpush3.bf16.msra.mxu1 %v13290_v39  ;;  %v5447_v39 = vmax.f32 %v4817_v15, 0.0  ;;  %v5440_v15 = vmax.f32 %v4788_v47, 0.0 }
 0x41d   : > { %9274 = vmatprep.subr.bf16.mxu1 %v13291_v63 }
 0x41f   : > { %7332 = vmatmul.mubr.bf16.gmra.mxu1 %v8405_v16 }
 0x420   : > { %9275 = vmatpush3.bf16.msra.mxu1 %v13292_v48  ;;  %7339 = vmatprep.mubr.bf16.mxu1 %v8438_v50  ;;  %v5448_v50 = vmax.f32 %v4820_v37, 0.0  ;;  %v8407_v48 = vcombine.low %v5532_v61, %v5548_v13  ;;  %v8471_v37 = vcombine.low %v5596_v40, %v5612_v6 }
 0x421   : > { %9276 = vmatprep.subr.bf16.mxu1 %v11737_v24  ;;  %v4660_v24 = vadd.f32 %v12784_v42, %v13296_v28  ;;  %v13313_v28 = vld [vmem:[#allocation41_spill] sm:$0xff] }
 0x423   : > { %v5408_v27 = vmax.f32 %v4660_v24, 0.0  ;;  %v4804_v24 = vadd.f32 %v12784_v42, %v13313_v28 }
 0x424   : > { %9277 = vmatpush3.bf16.msra.mxu1 %v13293_v10 }
 0x425   : > { %9278 = vmatprep.subr.bf16.mxu1 %v13294_v46  ;;  %v5831_v41 = vpack.c.bf16 %v5408_v27, %v5407_v14  ;;  %v5444_v14 = vmax.f32 %v4804_v24, 0.0  ;;  %v13327_v24 = vld [vmem:[#allocation57_spill] sm:$0xff] }
 0x427   : > { %7340 = vmatmul.mubr.bf16.gmra.mxu1 %v8437_v4  ;;  %v8440_v4 = vcombine.high %v5564_v8, %v5580_v29 }
 0x428   : > { %9279 = vmatpush3.bf16.msra.mxu1 %v13297_v44  ;;  %7347 = vmatprep.mubr.bf16.mxu1 %v8470_v55  ;;  %v13311_v55 = vld [vmem:[#allocation46_spill] sm:$0xff] }
 0x429   : > { %9280 = vmatprep.subr.bf16.mxu1 %v13298_v56  ;;  %v5851_v56 = vpack.c.bf16 %v5448_v50, %v5447_v39  ;;  %v13324_v50 = vld [vmem:[#allocation69_spill] sm:$0xff] }
 0x42c   : > { %9281 = vmatpush3.bf16.msra.mxu1 %v13301_v59  ;;  %v13315_v59 = vld [vmem:[#allocation34_spill] sm:$0xff] }
 0x42d   : > { %9282 = vmatprep.subr.bf16.mxu1 %v13302_v25 }
 0x42f   : > { %7348 = vmatmul.mubr.bf16.gmra.mxu1 %v8469_v5  ;;  %v8439_v5 = vcombine.low %v5564_v8, %v5580_v29  ;;  %v13323_v8 = vld [vmem:[#allocation38_spill] sm:$0xff] }
 0x430   : > { %9283 = vmatpush3.bf16.msra.mxu1 %v13305_v11  ;;  %7388 = vmatprep.mubr.bf16.mxu1 %v8376_v7  ;;  %v8472_v7 = vcombine.high %v5596_v40, %v5612_v6  ;;  %v5849_v11 = vpack.c.bf16 %v5444_v14, %v5443_v9  ;;  %v8410_v14 = vcombine.high %v5533_v22, %v5549_v12 }
 0x431   : > { %9284 = vmatprep.subr.bf16.mxu1 %v5831_v41 }
 0x434   : > { %9285 = vmatpush3.bf16.msra.mxu1 %v5823_v38  ;;  %v5501_v38 = vld [vmem:[%s13197_s1 + $0x70] sm:$0xff] }
 0x435   : > { %9310 = vmatprep.subr.bf16.mxu1 %v13306_v53 }
 0x437   : > { %v9126_v1 = vpop.f32.mrf.mxu1  ;;  %7389 = vmatmul.mubr.bf16.vlgmr.msra.gmra.mxu1 %v8375_v32  ;;  %v4721_v32 = vadd.f32 %v12784_v42, %v13320_v60 }
 0x438   : > { %9311 = vmatpush3.bf16.msra.mxu1 %v13309_v3  ;;  %7396 = vmatprep.mubr.bf16.mxu1 %v8408_v54  ;;  %v13321_v54 = vld [vmem:[#allocation30_spill] sm:$0xff]  ;;  %v8378_v3 = vcombine.high %v5501_v38, %v5517_v19 }
 0x439   : > { %v9127_v0 = vpop.f32.mrf.mxu1  ;;  %9312 = vmatprep.subr.bf16.mxu1 %v5853_v33  ;;  %v13322_v33 = vld [vmem:[#allocation32_spill] sm:$0xff]  ;;  %v5423_v29 = vmax.f32 %v4721_v32, 0.0  ;;  %v5480_v32 = vmax.f32 %v4948_v62, 0.0 }
 0x43a   : > { %v9128_v16 = vadd.f32 %v9127_v0, %v9126_v1 }
 0x43b   : > { %v9129_v63 = vpop.f32.mrf.mxu1 }
 0x43c   : > { %v12987_v52 = vadd.f32 %v9128_v16, %v12863_v21  ;;  %9313 = vmatpush3.bf16.msra.mxu1 %v13310_v36  ;;  %v13314_v21 = vld [vmem:[#allocation33_spill] sm:$0xff] }
 0x43d   : > { %v9130_v10 = vpop.f32.mrf.mxu1  ;;  %9314 = vmatprep.subr.bf16.mxu1 %v13311_v55  ;;  %v13326_v55 = vld [vmem:[#allocation29_spill] sm:$0xff] }
 0x43e   : > { %v9131_v46 = vadd.f32 %v9130_v10, %v9129_v63  ;;  %v4961_v63 = vadd.f32 %v12784_v42, %v13324_v50  ;;  %v5847_v10 = vpack.c.bf16 %v5440_v15, %v5439_v43 }
 0x43f   : > { %v9132_v44 = vpop.f32.mrf.mxu1  ;;  %7397 = vmatmul.mubr.bf16.gmra.mxu1 %v8407_v48  ;;  %v13325_v48 = vld [vmem:[#allocation71_spill] sm:$0xff] }
 0x440   : > { %v12996_v34 = vadd.f32 %v9131_v46, %v12870_v45  ;;  %9315 = vmatpush3.bf16.msra.mxu1 %v13314_v21  ;;  %7404 = vmatprep.mubr.bf16.mxu1 %v8440_v4  ;;  %v4964_v36 = vadd.f32 %v12784_v42, %v13325_v48 }
 0x441   : > { %v9133_v23 = vpop.f32.mrf.mxu1  ;;  %9316 = vmatprep.subr.bf16.mxu1 %v5851_v56  ;;  %v13328_v56 = vld [vmem:[#allocation59_spill] sm:$0xff] }
 0x442   : > { %v9134_v49 = vadd.f32 %v9133_v23, %v9132_v44  ;;  %v4897_v44 = vadd.f32 %v12784_v42, %v13327_v24  ;;  %v5483_v23 = vmax.f32 %v4961_v63, 0.0  ;;  %v5484_v40 = vmax.f32 %v4964_v36, 0.0  ;;  %v13340_v63 = vld [vmem:[#allocation53_spill] sm:$0xff]  ;;  %v13342_v24 = vld [vmem:[#allocation60_spill] sm:$0xff] }
 0x443   : > { %v9135_v27 = vpop.f32.mrf.mxu1  ;;  %v4868_v48 = vadd.f32 %v12784_v42, %v13340_v63 }
 0x444   : > { %v13006_v45 = vadd.f32 %v9134_v49, %v12883_v18  ;;  %9317 = vmatpush3.bf16.msra.mxu1 %v13315_v59  ;;  %v13319_v18 = vld [vmem:[#allocation31_spill] sm:$0xff]  ;;  %v8377_v49 = vcombine.low %v5501_v38, %v5517_v19  ;;  %v5467_v59 = vmax.f32 %v4897_v44, 0.0  ;;  %v5869_v51 = vpack.c.bf16 %v5484_v40, %v5483_v23  ;;  %v13334_v38 = vld [vmem:[#allocation56_spill] sm:$0xff]  ;;  %v5502_v40 = vld [vmem:[%s13197_s1 + $0x78] sm:$0xff] }
 0x445   : > { %v9136_v25 = vpop.f32.mrf.mxu1  ;;  %9318 = vmatprep.subr.bf16.mxu1 %v13316_v2  ;;  %v13330_v2 = vld [vmem:[#allocation66_spill] sm:$0xff]  ;;  %v4884_v19 = vadd.f32 %v12784_v42, %v13334_v38  ;;  %v4913_v44 = vadd.f32 %v12784_v42, %v13342_v24  ;;  %v13344_v23 = vld [vmem:[#allocation55_spill] sm:$0xff] }
 0x446   : > { %v9137_v20 = vadd.f32 %v9136_v25, %v9135_v27 }
 0x447   : > { %v9138_v41 = vpop.f32.mrf.mxu1  ;;  %7405 = vmatmul.mubr.bf16.gmra.mxu1 %v8439_v5  ;;  %v13329_v5 = vld [vmem:[#allocation72_spill] sm:$0xff]  ;;  %v5464_v15 = vmax.f32 %v4884_v19, 0.0 }
 0x448   : > { %v13015_v61 = vadd.f32 %v9137_v20, %v12891_v58  ;;  %9319 = vmatpush3.bf16.msra.mxu1 %v13319_v18  ;;  %7412 = vmatprep.mubr.bf16.mxu1 %v8472_v7  ;;  %v4724_v58 = vadd.f32 %v12784_v42, %v13321_v54  ;;  %v4945_v20 = vadd.f32 %v12784_v42, %v13330_v2  ;;  %v13333_v18 = vld [vmem:[#allocation54_spill] sm:$0xff] }
 0x449   : > { %v9139_v13 = vpop.f32.mrf.mxu1  ;;  %9320 = vmatprep.subr.bf16.mxu1 %v5849_v11  ;;  %v5581_v11 = vld [vmem:[%s13197_s1 + $0x2f0] sm:$0xff]  ;;  %v8409_v54 = vcombine.low %v5533_v22, %v5549_v12  ;;  %v13341_v22 = vld [vmem:[#allocation67_spill] sm:$0xff] }
 0x44a   : > { %v9140_v53 = vadd.f32 %v9139_v13, %v9138_v41  ;;  %v5424_v16 = vmax.f32 %v4724_v58, 0.0  ;;  %v5565_v41 = vld [vmem:[%s13197_s1 + $0x270] sm:$0xff]  ;;  %v4881_v13 = vadd.f32 %v12784_v42, %v13333_v18  ;;  %v5479_v60 = vmax.f32 %v4945_v20, 0.0 }
 0x44b   : > { %v9141_v17 = vpop.f32.mrf.mxu1  ;;  %v8442_v58 = vcombine.high %v5565_v41, %v5581_v11 }
 0x44c   : > { %v13029_v1 = vadd.f32 %v9140_v53, %v12905_v57  ;;  %9321 = vmatpush3.bf16.msra.mxu1 %v13322_v33  ;;  %v5839_v28 = vpack.c.bf16 %v5424_v16, %v5423_v29  ;;  %v13335_v53 = vld [vmem:[#allocation70_spill] sm:$0xff]  ;;  %v5463_v43 = vmax.f32 %v4881_v13, 0.0  ;;  %v13337_v33 = vld [vmem:[#allocation65_spill] sm:$0xff]  ;;  %v5597_v29 = vld [vmem:[%s13197_s1 + $0x370] sm:$0xff] }
 0x44d   : > { %v9142_v0 = vpop.f32.mrf.mxu1  ;;  %9322 = vmatprep.subr.bf16.mxu1 %v13323_v8  ;;  %v13338_v8 = vld [vmem:[#allocation58_spill] sm:$0xff]  ;;  %v5613_v16 = vld [vmem:[%s13197_s1 + $0x3f0] sm:$0xff] }
 0x44e   : > { %v9143_v39 = vadd.f32 %v9142_v0, %v9141_v17  ;;  %v13336_v17 = vld [vmem:[#allocation63_spill] sm:$0xff]  ;;  %v5867_v0 = vpack.c.bf16 %v5480_v32, %v5479_v60  ;;  %v5859_v36 = vpack.c.bf16 %v5464_v15, %v5463_v43  ;;  %v8473_v2 = vcombine.low %v5597_v29, %v5613_v16  ;;  %v5566_v60 = vld [vmem:[%s13197_s1 + $0x278] sm:$0xff] }
 0x44f   : > { %v9144_v4 = vpop.f32.mrf.mxu1  ;;  %7413 = vmatmul.mubr.bf16.gmra.mxu1 %v8471_v37  ;;  %v4929_v37 = vadd.f32 %v12784_v42, %v13336_v17  ;;  %v5582_v32 = vld [vmem:[%s13197_s1 + $0x2f8] sm:$0xff] }
 0x450   : > { %v13038_v57 = vadd.f32 %v9143_v39, %v12909_v30  ;;  %9323 = vmatpush3.bf16.msra.mxu1 %v13326_v55  ;;  %7453 = vmatprep.mubr.bf16.mxu1 %v8378_v3  ;;  %v4900_v30 = vadd.f32 %v12784_v42, %v13328_v56  ;;  %v4932_v3 = vadd.f32 %v12784_v42, %v13337_v33  ;;  %v13339_v39 = vld [vmem:[#allocation51_spill] sm:$0xff]  ;;  %v13343_v56 = vld [vmem:[#allocation62_spill] sm:$0xff] }
 0x451   : > { %v9145_v46 = vpop.f32.mrf.mxu1  ;;  %9324 = vmatprep.subr.bf16.mxu1 %v5847_v10  ;;  %v4865_v50 = vadd.f32 %v12784_v42, %v13339_v39  ;;  %v8441_v55 = vcombine.low %v5565_v41, %v5581_v11  ;;  %v13348_v41 = vld [vmem:[#allocation52_spill] sm:$0xff]  ;;  %v5550_v11 = vld [vmem:[%s13197_s1 + $0x1f8] sm:$0xff]  ;;  %v8444_v15 = vcombine.high %v5566_v60, %v5582_v32 }
 0x452   : > { %v9146_v21 = vadd.f32 %v9145_v46, %v9144_v4  ;;  %v5468_v7 = vmax.f32 %v4900_v30, 0.0  ;;  %v5475_v4 = vmax.f32 %v4929_v37, 0.0  ;;  %v5476_v10 = vmax.f32 %v4932_v3, 0.0 }
 0x453   : > { %v9147_v6 = vpop.f32.mrf.mxu1  ;;  %v8474_v46 = vcombine.high %v5597_v29, %v5613_v16  ;;  %v5459_v12 = vmax.f32 %v4865_v50, 0.0  ;;  %v4916_v30 = vadd.f32 %v12784_v42, %v13343_v56  ;;  %v5614_v29 = vld [vmem:[%s13197_s1 + $0x3f8] sm:$0xff] }
 0x454   : > { %v13052_v9 = vadd.f32 %v9146_v21, %v12919_v35  ;;  %9325 = vmatpush3.bf16.msra.mxu1 %v5839_v28  ;;  %v13332_v35 = vld [vmem:[#allocation61_spill] sm:$0xff]  ;;  %v5460_v28 = vmax.f32 %v4868_v48, 0.0  ;;  %v5865_v21 = vpack.c.bf16 %v5476_v10, %v5475_v4 }
 0x455   : > { %v9148_v27 = vpop.f32.mrf.mxu1  ;;  %9350 = vmatprep.subr.bf16.mxu1 %v13329_v5 }
 0x456   : > { %v9149_v25 = vadd.f32 %v9148_v27, %v9147_v6  ;;  %v5518_v6 = vld [vmem:[%s13197_s1 + $0xf8] sm:$0xff]  ;;  %v13346_v27 = vld [vmem:[#allocation50_spill] sm:$0xff] }
 0x457   : > { %7454 = vmatmul.mubr.bf16.vlgmr.msra.gmra.mxu1 %v8377_v49  ;;  %v13345_v49 = vld [vmem:[#allocation48_spill] sm:$0xff]  ;;  %v4852_v5 = vadd.f32 %v12784_v42, %v13346_v27  ;;  %v8380_v20 = vcombine.high %v5502_v40, %v5518_v6  ;;  %v8379_v13 = vcombine.low %v5502_v40, %v5518_v6 }
 0x458   : > { %v13060_v47 = vadd.f32 %v9149_v25, %v12923_v31  ;;  %9351 = vmatpush3.bf16.msra.mxu1 %v13332_v35  ;;  %7461 = vmatprep.mubr.bf16.mxu1 %v8410_v14  ;;  %v5861_v31 = vpack.c.bf16 %v5468_v7, %v5467_v59  ;;  %v4849_v14 = vadd.f32 %v12784_v42, %v13345_v49  ;;  %v5471_v7 = vmax.f32 %v4913_v44, 0.0  ;;  %v5534_v42 = vld [vmem:[%s13197_s1 + $0x178] sm:$0xff]  ;;  %v10209_v49 = vld [vmem:[%s13200_s4] sm:$0xff]  }
 0x459   : > { %9352 = vmatprep.subr.bf16.mxu1 %v5869_v51  ;;  %v5857_v59 = vpack.c.bf16 %v5460_v28, %v5459_v12  ;;  %v5472_v25 = vmax.f32 %v4916_v30, 0.0  ;;  %v5456_v51 = vmax.f32 %v4852_v5, 0.0  ;;  %v8412_v38 = vcombine.high %v5534_v42, %v5550_v11 }
 0x45a   : > { %v5455_v62 = vmax.f32 %v4849_v14, 0.0 }
 0x45b   : > { %v5863_v35 = vpack.c.bf16 %v5472_v25, %v5471_v7 }
 0x45c   : > { %9353 = vmatpush3.bf16.msra.mxu1 %v5861_v31  ;;  %v5855_v18 = vpack.c.bf16 %v5456_v51, %v5455_v62 }
 0x45d   : > { %9354 = vmatprep.subr.bf16.mxu1 %v13335_v53  ;;  %v8411_v53 = vcombine.low %v5534_v42, %v5550_v11 }
 0x45f   : > { %7462 = vmatmul.mubr.bf16.gmra.mxu1 %v8409_v54 }
 0x460   : > { %9355 = vmatpush3.bf16.msra.mxu1 %v13338_v8  ;;  %7469 = vmatprep.mubr.bf16.mxu1 %v8442_v58  ;;  %v5598_v8 = vld [vmem:[%s13197_s1 + $0x378] sm:$0xff] }
 0x461   : > { %9356 = vmatprep.subr.bf16.mxu1 %v5867_v0  ;;  %v8476_v63 = vcombine.high %v5598_v8, %v5614_v29 }
 0x464   : > { %9357 = vmatpush3.bf16.msra.mxu1 %v5859_v36 }
 0x465   : > { %9358 = vmatprep.subr.bf16.mxu1 %v13341_v22  ;;  %v8475_v22 = vcombine.low %v5598_v8, %v5614_v29 }
 0x467   : > { %7470 = vmatmul.mubr.bf16.gmra.mxu1 %v8441_v55 }
 0x468   : > { %9359 = vmatpush3.bf16.msra.mxu1 %v13344_v23  ;;  %7477 = vmatprep.mubr.bf16.mxu1 %v8474_v46 }
 0x469   : > { %9360 = vmatprep.subr.bf16.mxu1 %v5865_v21 }
 0x46c   : > { %9361 = vmatpush3.bf16.msra.mxu1 %v5857_v59 }
 0x46d   : > { %9362 = vmatprep.subr.bf16.mxu1 %v13347_v26 }
 0x46f   : > { %7478 = vmatmul.mubr.bf16.gmra.mxu1 %v8473_v2 }
 0x470   : > { %9363 = vmatpush3.bf16.msra.mxu1 %v13348_v41  ;;  %7518 = vmatprep.mubr.bf16.mxu1 %v8380_v20 }
 0x471   : > { %9364 = vmatprep.subr.bf16.mxu1 %v5863_v35 }
 0x474   : > { %9365 = vmatpush3.bf16.msra.mxu1 %v5855_v18 }
 0x475   : > { %9917 = vmatprep.subr.bf16.mxu1 %v10209_v49 }
 0x477   : > { %v9166_v19 = vpop.f32.mrf.mxu1  ;;  %7519 = vmatmul.mubr.bf16.vlgmr.msra.gmra.mxu1 %v8379_v13 }
 0x478   : > { %7526 = vmatprep.mubr.bf16.mxu1 %v8412_v38  ;;  %9918 = vmatpush3.bf16.msra.mxu1 %v10209_v49 }
 0x479   : > { %v9167_v31 = vpop.f32.mrf.mxu1 }
 0x47a   : > { %v9168_v54 = vadd.f32 %v9167_v31, %v9166_v19 }
 0x47b   : > { %v9169_v58 = vpop.f32.mrf.mxu1 }
 0x47c   : > { %v7196_v43 = vadd.f32 %v9168_v54, %v12987_v52  ;;  %v8443_v52 = vcombine.low %v5566_v60, %v5582_v32 }
 0x47d   : > { %v9170_v17 = vpop.f32.mrf.mxu1 }
 0x47e   : > { %v9171_v37 = vadd.f32 %v9170_v17, %v9169_v58 }
 0x47f   : > { %v9172_v33 = vpop.f32.mrf.mxu1  ;;  %7527 = vmatmul.mubr.bf16.gmra.mxu1 %v8411_v53 }
 0x480   : > { %v7199_v3 = vadd.f32 %v9171_v37, %v12996_v34  ;;  %7534 = vmatprep.mubr.bf16.mxu1 %v8444_v15 }
 0x481   : > { %v9173_v0 = vpop.f32.mrf.mxu1 }
 0x482   : > { %v9174_v16 = vadd.f32 %v9173_v0, %v9172_v33 }
 0x483   : > { %v9175_v39 = vpop.f32.mrf.mxu1 }
 0x484   : > { %v7204_v50 = vadd.f32 %v9174_v16, %v13006_v45 }
 0x485   : > { %v9176_v48 = vpop.f32.mrf.mxu1 }
 0x486   : > { %v9177_v36 = vadd.f32 %v9176_v48, %v9175_v39 }
 0x487   : > { %v9178_v4 = vpop.f32.mrf.mxu1  ;;  %7535 = vmatmul.mubr.bf16.gmra.mxu1 %v8443_v52 }
 0x488   : > { %v7207_v34 = vadd.f32 %v9177_v36, %v13015_v61  ;;  %7542 = vmatprep.mubr.bf16.mxu1 %v8476_v63 }
 0x489   : > { %v9179_v10 = vpop.f32.mrf.mxu1 }
 0x48a   : > { %v9180_v55 = vadd.f32 %v9179_v10, %v9178_v4 }
 0x48b   : > { %v9181_v46 = vpop.f32.mrf.mxu1 }
 0x48c   : > { %v7212_v12 = vadd.f32 %v9180_v55, %v13029_v1 }
 0x48d   : > { %v9182_v28 = vpop.f32.mrf.mxu1 }
 0x48e   : > { %v9183_v24 = vadd.f32 %v9182_v28, %v9181_v46 }
 0x48f   : > { %v9184_v44 = vpop.f32.mrf.mxu1  ;;  %7543 = vmatmul.mubr.bf16.gmra.mxu1 %v8475_v22 }
 0x490   : > { %v7215_v45 = vadd.f32 %v9183_v24, %v13038_v57 }
 0x491   : > { %v9185_v56 = vpop.f32.mrf.mxu1 }
 0x492   : > { %v9186_v30 = vadd.f32 %v9185_v56, %v9184_v44 }
 0x493   : > { %v9187_v21 = vpop.f32.mrf.mxu1 }
 0x494   : > { %v7220_v23 = vadd.f32 %v9186_v30, %v13052_v9 }
 0x495   : > { %v9188_v40 = vpop.f32.mrf.mxu1 }
 0x496   : > { %v9189_v61 = vadd.f32 %v9188_v40, %v9187_v21 }
 0x498   : > { %v7223_v6 = vadd.f32 %v9189_v61, %v13060_v47 }
 0x4b7   : > { %v9206_v1 = vpop.f32.mrf.mxu1 }
 0x4b9   : > { %v9207_v14 = vpop.f32.mrf.mxu1 }
 0x4ba   : > { %v9208_v27 = vadd.f32 %v9207_v14, %v9206_v1 }
 0x4bb   : > { %v9209_v5 = vpop.f32.mrf.mxu1 }
 0x4bc   : > { %v7261_v57 = vadd.f32 %v9208_v27, %v7196_v43 }
 0x4bd   : > { %v9210_v59 = vpop.f32.mrf.mxu1 }
 0x4be   : > { %v9211_v7 = vadd.f32 %v9210_v59, %v9209_v5 }
 0x4bf   : > { %v9212_v25 = vpop.f32.mrf.mxu1 }
 0x4c0   : > { %v7264_v2 = vadd.f32 %v9211_v7, %v7199_v3 }
 0x4c1   : > { %v9213_v9 = vpop.f32.mrf.mxu1 }
 0x4c2   : > { %v9214_v20 = vadd.f32 %v9213_v9, %v9212_v25 }
 0x4c3   : > { %v9215_v26 = vpop.f32.mrf.mxu1 }
 0x4c4   : > { %v7269_v62 = vadd.f32 %v9214_v20, %v7204_v50 }
 0x4c5   : > { %v9216_v47 = vpop.f32.mrf.mxu1 }
 0x4c6   : > { %v9217_v51 = vadd.f32 %v9216_v47, %v9215_v26 }
 0x4c7   : > { %v9218_v35 = vpop.f32.mrf.mxu1 }
 0x4c8   : > { %v7272_v41 = vadd.f32 %v9217_v51, %v7207_v34 }
 0x4c9   : > { %v9219_v42 = vpop.f32.mrf.mxu1 }
 0x4ca   : > { %v9220_v11 = vadd.f32 %v9219_v42, %v9218_v35 }
 0x4cb   : > { %v9221_v18 = vpop.f32.mrf.mxu1 }
 0x4cc   : > { %v7277_v13 = vadd.f32 %v9220_v11, %v7212_v12 }
 0x4cd   : > { %v9222_v38 = vpop.f32.mrf.mxu1 }
 0x4ce   : > { %v9223_v19 = vadd.f32 %v9222_v38, %v9221_v18 }
 0x4cf   : > { %v9224_v31 = vpop.f32.mrf.mxu1 }
 0x4d0   : > { %v7280_v60 = vadd.f32 %v9223_v19, %v7215_v45 }
 0x4d1   : > { %v9225_v32 = vpop.f32.mrf.mxu1 }
 0x4d2   : > { %v9226_v54 = vadd.f32 %v9225_v32, %v9224_v31 }
 0x4d3   : > { %v9227_v58 = vpop.f32.mrf.mxu1 }
 0x4d4   : > { %v7285_v53 = vadd.f32 %v9226_v54, %v7220_v23 }
 0x4d5   : > { %v9228_v43 = vpop.f32.mrf.mxu1 }
 0x4d6   : > { %v9229_v15 = vadd.f32 %v9228_v43, %v9227_v58 }
 0x4d7   : > { %v9246_v17 = vpop.f32.mrf.mxu1 }
 0x4d8   : > { %v7288_v37 = vadd.f32 %v9229_v15, %v7223_v6 }
 0x4d9   : > { %v9247_v33 = vpop.f32.mrf.mxu1 }
 0x4da   : > { %v9248_v3 = vadd.f32 %v9247_v33, %v9246_v17 }
 0x4db   : > { %v9249_v0 = vpop.f32.mrf.mxu1 }
 0x4dc   : > { %v7326_v8 = vadd.f32 %v9248_v3, %v7261_v57 }
 0x4dd   : > { %v9250_v29 = vpop.f32.mrf.mxu1 }
 0x4de   : > { %v9251_v16 = vadd.f32 %v9250_v29, %v9249_v0 }
 0x4df   : > { %v9252_v39 = vpop.f32.mrf.mxu1 }
 0x4e0   : > { %v13136_v52 = vadd.f32 %v9251_v16, %v7264_v2 }
 0x4e1   : > { %v9253_v50 = vpop.f32.mrf.mxu1 }
 0x4e2   : > { %v9254_v63 = vadd.f32 %v9253_v50, %v9252_v39 }
 0x4e3   : > { %v9255_v48 = vpop.f32.mrf.mxu1 }
 0x4e4   : > { %v7334_v36 = vadd.f32 %v9254_v63, %v7269_v62 }
 0x4e5   : > { %v9256_v4 = vpop.f32.mrf.mxu1 }
 0x4e6   : > { %v9257_v34 = vadd.f32 %v9256_v4, %v9255_v48 }
 0x4e7   : > { %v9258_v10 = vpop.f32.mrf.mxu1 }
 0x4e8   : > { %v13138_v55 = vadd.f32 %v9257_v34, %v7272_v41 }
 0x4e9   : > { %v9259_v46 = vpop.f32.mrf.mxu1 }
 0x4ea   : > { %v9260_v22 = vadd.f32 %v9259_v46, %v9258_v10 }
 0x4eb   : > { %v9261_v12 = vpop.f32.mrf.mxu1 }
 0x4ec   : > { %v7342_v28 = vadd.f32 %v9260_v22, %v7277_v13 }
 0x4ed   : > { %v9262_v24 = vpop.f32.mrf.mxu1 }
 0x4ee   : > { %v9263_v44 = vadd.f32 %v9262_v24, %v9261_v12 }
 0x4ef   : > { %v9264_v45 = vpop.f32.mrf.mxu1 }
 0x4f0   : > { %v13140_v56 = vadd.f32 %v9263_v44, %v7280_v60 }
 0x4f1   : > { %v9265_v30 = vpop.f32.mrf.mxu1 }
 0x4f2   : > { %v9266_v21 = vadd.f32 %v9265_v30, %v9264_v45 }
 0x4f3   : > { %v9267_v23 = vpop.f32.mrf.mxu1 }
 0x4f4   : > { %v7350_v40 = vadd.f32 %v9266_v21, %v7285_v53 }
 0x4f5   : > { %v9268_v61 = vpop.f32.mrf.mxu1 }
 0x4f6   : > { %v9269_v6 = vadd.f32 %v9268_v61, %v9267_v23 }
 0x4f7   : > { %v9286_v49 = vpop.f32.mrf.mxu1 }
 0x4f8   : > { %v13142_v1 = vadd.f32 %v9269_v6, %v7288_v37 }
 0x4f9   : > { %v9287_v14 = vpop.f32.mrf.mxu1 }
 0x4fa   : > { %v9288_v27 = vadd.f32 %v9287_v14, %v9286_v49 }
 0x4fb   : > { %v9289_v5 = vpop.f32.mrf.mxu1 }
 0x4fc   : > { %v7391_v57 = vadd.f32 %v9288_v27, %v7326_v8 }
 0x4fd   : > { %v9290_v59 = vpop.f32.mrf.mxu1 }
 0x4fe   : > { %v9291_v63 = vadd.f32 %v9290_v59, %v9289_v5 }
 0x4ff   : > { %v9292_v7 = vpop.f32.mrf.mxu1 }
 0x500   : > { %v7394_v10 = vadd.f32 %v9291_v63, %v13136_v52 }
 0x501   : > { %v9293_v25 = vpop.f32.mrf.mxu1 }
 0x502   : > { %v9294_v2 = vadd.f32 %v9293_v25, %v9292_v7 }
 0x503   : > { %v9295_v9 = vpop.f32.mrf.mxu1 }
 0x504   : > { %v7399_v20 = vadd.f32 %v9294_v2, %v7334_v36 }
 0x505   : > { %v9296_v26 = vpop.f32.mrf.mxu1 }
 0x506   : > { %v9297_v45 = vadd.f32 %v9296_v26, %v9295_v9 }
 0x507   : > { %v9298_v62 = vpop.f32.mrf.mxu1 }
 0x508   : > { %v7402_v14 = vadd.f32 %v9297_v45, %v13138_v55 }
 0x509   : > { %v9299_v47 = vpop.f32.mrf.mxu1 }
 0x50a   : > { %v9300_v51 = vadd.f32 %v9299_v47, %v9298_v62 }
 0x50b   : > { %v9301_v35 = vpop.f32.mrf.mxu1 }
 0x50c   : > { %v13144_v41 = vadd.f32 %v9300_v51, %v7342_v28 }
 0x50d   : > { %v9302_v42 = vpop.f32.mrf.mxu1 }
 0x50e   : > { %v9303_v25 = vadd.f32 %v9302_v42, %v9301_v35 }
 0x50f   : > { %v9304_v11 = vpop.f32.mrf.mxu1 }
 0x511   : > { %v9305_v18 = vpop.f32.mrf.mxu1 }
 0x512   : > { %v9306_v13 = vadd.f32 %v9305_v18, %v9304_v11  ;;  %v7410_v18 = vadd.f32 %v9303_v25, %v13140_v56 }
 0x513   : > { %v13146_v38 = vpop.f32.mrf.mxu1 }
 0x514   : > { %v13148_v19 = vadd.f32 %v9306_v13, %v7350_v40 }
 0x515   : > { %v13150_v31 = vpop.f32.mrf.mxu1 }
 0x516   : > { %v9309_v35 = vadd.f32 %v13150_v31, %v13146_v38  ;;  %v10210_v31 = vld [vmem:[%s13202_s6 + $0x8] sm:$0xff]  }
 0x517   : > { %v9326_v60 = vpop.f32.mrf.mxu1  ;;  %9927 = vmatprep.subr.bf16.mxu1 %v10210_v31 }
 0x518   : > { %v7418_v56 = vadd.f32 %v9309_v35, %v13142_v1  ;;  %v10211_v1 = vld [vmem:[%s13202_s6] sm:$0xff]  }
 0x519   : > { %v9327_v32 = vpop.f32.mrf.mxu1 }
 0x51a   : > { %v9328_v36 = vadd.f32 %v9327_v32, %v9326_v60 }
 0x51b   : > { %v9329_v54 = vpop.f32.mrf.mxu1 }
 0x51c   : > { %v7456_v12 = vadd.f32 %v9328_v36, %v7391_v57 }
 0x51d   : > { %v9330_v58 = vpop.f32.mrf.mxu1 }
 0x51e   : > { %v9331_v4 = vadd.f32 %v9330_v58, %v9329_v54 }
 0x51f   : > { %v9332_v53 = vpop.f32.mrf.mxu1 }
 0x520   : > { %v7459_v28 = vadd.f32 %v9331_v4, %v7394_v10 }
 0x521   : > { %v9333_v43 = vpop.f32.mrf.mxu1 }
 0x522   : > { %v9334_v40 = vadd.f32 %v9333_v43, %v9332_v53 }
 0x523   : > { %v9335_v15 = vpop.f32.mrf.mxu1 }
 0x524   : > { %v7464_v5 = vadd.f32 %v9334_v40, %v7399_v20 }
 0x525   : > { %v9336_v17 = vpop.f32.mrf.mxu1 }
 0x526   : > { %v9337_v61 = vadd.f32 %v9336_v17, %v9335_v15 }
 0x527   : > { %v9338_v37 = vpop.f32.mrf.mxu1 }
 0x528   : > { %v7467_v57 = vadd.f32 %v9337_v61, %v7402_v14 }
 0x529   : > { %v9339_v33 = vpop.f32.mrf.mxu1 }
 0x52a   : > { %v9340_v62 = vadd.f32 %v9339_v33, %v9338_v37 }
 0x52b   : > { %v9341_v3 = vpop.f32.mrf.mxu1 }
 0x52c   : > { %v7472_v60 = vadd.f32 %v9340_v62, %v13144_v41 }
 0x52d   : > { %v9342_v0 = vpop.f32.mrf.mxu1 }
 0x52e   : > { %v9343_v47 = vadd.f32 %v9342_v0, %v9341_v3 }
 0x52f   : > { %v9344_v8 = vpop.f32.mrf.mxu1 }
 0x530   : > { %v7475_v20 = vadd.f32 %v9343_v47, %v7410_v18 }
 0x531   : > { %v9345_v29 = vpop.f32.mrf.mxu1 }
 0x532   : > { %v9346_v43 = vadd.f32 %v9345_v29, %v9344_v8  ;;  %v8477_v29 = vld [vmem:[%s13201_s5] ss:$0 sm:$0xff] }
 0x533   : > { %v9347_v16 = vpop.f32.mrf.mxu1 }
 0x534   : > { %v7480_v41 = vadd.f32 %v9346_v43, %v13148_v19 }
 0x535   : > { %v9348_v39 = vpop.f32.mrf.mxu1 }
 0x536   : > { %v9349_v15 = vadd.f32 %v9348_v39, %v9347_v16 }
 0x537   : > { %v9366_v50 = vpop.f32.mrf.mxu1 }
 0x538   : > { %v7483_v0 = vadd.f32 %v9349_v15, %v7418_v56 }
 0x539   : > { %v9367_v48 = vpop.f32.mrf.mxu1 }
 0x53a   : > { %v9368_v46 = vadd.f32 %v9367_v48, %v9366_v50 }
 0x53b   : > { %v9369_v34 = vpop.f32.mrf.mxu1 }
 0x53c   : > { %v7521_v30 = vadd.f32 %v9368_v46, %v7456_v12 }
 0x53d   : > { %v9370_v22 = vpop.f32.mrf.mxu1 }
 0x53e   : > { %v9371_v24 = vadd.f32 %v9370_v22, %v9369_v34 }
 0x53f   : > { %v9372_v44 = vpop.f32.mrf.mxu1 }
 0x540   : > { %v7524_v21 = vadd.f32 %v9371_v24, %v7459_v28 }
 0x541   : > { %v9373_v23 = vpop.f32.mrf.mxu1 }
 0x542   : > { %v7551_v6 = vpack.c.bf16 %v7524_v21, %v7521_v30  ;;  %v9374_v27 = vadd.f32 %v9373_v23, %v9372_v44 }
 0x543   : > { %v9375_v49 = vpop.f32.mrf.mxu1 }
 0x544   : > { %9919 = vmatprep.mubr.msk.bf16.mxu1 %vm7570_vm1, %v7551_v6  ;;  %v7529_v2 = vadd.f32 %v9374_v27, %v7464_v5 }
 0x545   : > { %v9376_v52 = vpop.f32.mrf.mxu1 }
 0x546   : > { %v9377_v59 = vadd.f32 %v9376_v52, %v9375_v49 }
 0x547   : > { %v9378_v7 = vpop.f32.mrf.mxu1 }
 0x548   : > { %v7532_v9 = vadd.f32 %v9377_v59, %v7467_v57 }
 0x549   : > { %v9379_v26 = vpop.f32.mrf.mxu1 }
 0x54a   : > { %v7552_v51 = vpack.c.bf16 %v7532_v9, %v7529_v2  ;;  %v9380_v13 = vadd.f32 %v9379_v26, %v9378_v7  ;;  %v8483_v7 = vld [vmem:[%s13203_s7] ss:$0 sm:$0xff] }
 0x54b   : > { %v9381_v11 = vpop.f32.mrf.mxu1 }
 0x54c   : > { %9920 = vmatmul.mubr.msk.bf16.vlgmr.msra.gmra.mxu1 %vm7570_vm1, %v7552_v51  ;;  %v7537_v42 = vadd.f32 %v9380_v13, %v7472_v60 }
 0x54d   : > { %v9382_v55 = vpop.f32.mrf.mxu1  ;;  %9928 = vmatpush3.bf16.msra.mxu1 %v10210_v31 }
 0x54e   : > { %v9383_v32 = vadd.f32 %v9382_v55, %v9381_v11  ;;  %9929 = vmatprep.subr.bf16.mxu1 %v10211_v1 }
 0x54f   : > { %v9384_v54 = vpop.f32.mrf.mxu1 }
 0x550   : > { %v7540_v58 = vadd.f32 %v9383_v32, %v7475_v20 }
 0x551   : > { %v9385_v53 = vpop.f32.mrf.mxu1  ;;  %9930 = vmatpush3.bf16.msra.mxu1 %v10211_v1 }
 0x552   : > { %v7553_v17 = vpack.c.bf16 %v7540_v58, %v7537_v42  ;;  %v9386_v33 = vadd.f32 %v9385_v53, %v9384_v54 }
 0x553   : > { %v9387_v37 = vpop.f32.mrf.mxu1 }
 0x554   : > { %9923 = vmatprep.mubr.msk.bf16.mxu1 %vm7570_vm1, %v7553_v17  ;;  %v7545_v63 = vadd.f32 %v9386_v33, %v7480_v41 }
 0x555   : > { %v9388_v3 = vpop.f32.mrf.mxu1 }
 0x556   : > { %v9389_v50 = vadd.f32 %v9388_v3, %v9387_v37 }
 0x558   : > { %v7548_v48 = vadd.f32 %v9389_v50, %v7483_v0 }
 0x55a   : > { %v7554_v38 = vpack.c.bf16 %v7548_v48, %v7545_v63 }
 0x55c   : > { %9924 = vmatmul.mubr.msk.bf16.gmra.mxu1 %vm7570_vm1, %v7554_v38 }
 0x60c   : > { %v9921_v19 = vpop.f32.mrf.mxu1 }
 0x60d   : > { %v7626_v4 = vadd.f32 %v9921_v19, %v8477_v29 }
 0x60e   : > { %v7617_v8 = vpop.f32.mrf.mxu1 }
 0x60f   : > { %v7618_v39 = vadd.f32 %v8477_v29, %v7617_v8  ;;  %v7650_v28 = vmax.f32 %v7626_v4, 0.0 }
 0x610   : > { %v9922_v16 = vpop.f32.mrf.mxu1 }
 0x611   : > { %v7629_v36 = vadd.f32 %v9922_v16, %v8477_v29  ;;  %v7648_v22 = vmax.f32 %v7618_v39, 0.0 }
 0x612   : > { %v7620_v34 = vpop.f32.mrf.mxu1 }
 0x613   : > { %v7621_v10 = vadd.f32 %v8477_v29, %v7620_v34  ;;  %v7651_v46 = vmax.f32 %v7629_v36, 0.0 }
 0x615   : > { %v7649_v12 = vmax.f32 %v7621_v10, 0.0  ;;  %v7657_v44 = vpack.c.bf16 %v7651_v46, %v7650_v28 }
 0x617   : > { %v7656_v24 = vpack.c.bf16 %v7649_v12, %v7648_v22 }
 0x619   : > { %9931 = vmatprep.mubr.msk.bf16.mxu1 %vm2125_vm0, %v7656_v24 }
 0x61a   : > { %9932 = vmatmul.mubr.msk.bf16.vlgmr.msra.gmra.mxu1 %vm2125_vm0, %v7657_v44 }
 0x61c   : > { %v9925_v45 = vpop.f32.mrf.mxu1 }
 0x61d   : > { %v7642_v61 = vadd.f32 %v9925_v45, %v8477_v29 }
 0x61e   : > { %v7633_v30 = vpop.f32.mrf.mxu1 }
 0x61f   : > { %v7634_v23 = vadd.f32 %v8477_v29, %v7633_v30  ;;  %v7654_v5 = vmax.f32 %v7642_v61, 0.0 }
 0x620   : > { %v9926_v21 = vpop.f32.mrf.mxu1 }
 0x621   : > { %v7645_v40 = vadd.f32 %v9926_v21, %v8477_v29  ;;  %v7652_v27 = vmax.f32 %v7634_v23, 0.0 }
 0x622   : > { %v7636_v6 = vpop.f32.mrf.mxu1 }
 0x623   : > { %v7637_v49 = vadd.f32 %v8477_v29, %v7636_v6  ;;  %v7655_v14 = vmax.f32 %v7645_v40, 0.0 }
 0x625   : > { %v7653_v52 = vmax.f32 %v7637_v49, 0.0  ;;  %v7659_v59 = vpack.c.bf16 %v7655_v14, %v7654_v5 }
 0x627   : > { %v7658_v57 = vpack.c.bf16 %v7653_v52, %v7652_v27 }
 0x629   : > { %9935 = vmatprep.mubr.msk.bf16.mxu1 %vm2125_vm0, %v7658_v57 }
 0x62a   : > { %9936 = vmatmul.mubr.msk.bf16.gmra.mxu1 %vm2125_vm0, %v7659_v59 }
 0x6da   : > { %v9933_v25 = vpop.f32.mrf.mxu1 }
 0x6db   : > { %v7738_v2 = vadd.f32 %v9933_v25, %v8483_v7 }
 0x6dc   : > { %v7729_v9 = vpop.f32.mrf.mxu1 }
 0x6dd   : > { %7763 = vst.msk [vmem:[%s307_s15 + $0x10] sm:$0xff] %vm7760_vm2, %v7738_v2  ;;  %v7730_v26 = vadd.f32 %v8483_v7, %v7729_v9 }
 0x6de   : > { %v9934_v62 = vpop.f32.mrf.mxu1 }
 0x6df   : > { %7761 = vst.msk [vmem:[%s307_s15] sm:$0xff] %vm7760_vm2, %v7730_v26  ;;  %v7741_v47 = vadd.f32 %v9934_v62, %v8483_v7 }
 0x6e0   : > { %v7732_v51 = vpop.f32.mrf.mxu1 }
 0x6e1   : > { %7764 = vst.msk [vmem:[%s307_s15 + $0x18] sm:$0xff] %vm7760_vm2, %v7741_v47  ;;  %v7733_v11 = vadd.f32 %v8483_v7, %v7732_v51 }
 0x6e3   : > { %7762 = vst.msk [vmem:[%s307_s15 + $0x8] sm:$0xff] %vm7760_vm2, %v7733_v11 }
 0x6ea   : > { %v9937_v18 = vpop.f32.mrf.mxu1 }
 0x6eb   : > { %v7754_v13 = vadd.f32 %v9937_v18, %v8483_v7 }
 0x6ec   : > { %v7745_v55 = vpop.f32.mrf.mxu1 }
 0x6ed   : > { %7767 = vst.msk [vmem:[%s307_s15 + $0x30] sm:$0xff] %vm7760_vm2, %v7754_v13  ;;  %v7746_v60 = vadd.f32 %v8483_v7, %v7745_v55 }
 0x6ee   : > { %v9938_v20 = vpop.f32.mrf.mxu1 }
 0x6ef   : > { %7765 = vst.msk [vmem:[%s307_s15 + $0x20] sm:$0xff] %vm7760_vm2, %v7746_v60  ;;  %v7757_v32 = vadd.f32 %v9938_v20, %v8483_v7 }
 0x6f0   : > { %v7748_v54 = vpop.f32.mrf.mxu1 }
 0x6f1   : > { %7768 = vst.msk [vmem:[%s307_s15 + $0x38] sm:$0xff] %vm7760_vm2, %v7757_v32  ;;  %v7749_v35 = vadd.f32 %v8483_v7, %v7748_v54 }
 0x6f3   : > { %7766 = vst.msk [vmem:[%s307_s15 + $0x28] sm:$0xff] %vm7760_vm2, %v7749_v35 }
 0x6f4 PF: > { %s18_s27 = sadd.s32 1, %s10223_s27  }
 0x6f5   : > { %p15_p5 = scmp.ge.s32.totalorder %s18_s27, 4  }
 0x6f7   :  { %17 = sbr.rel (!%p15_p5) target bundleno = 1 (0x1), region = 82 }

// kernel: forward.3
= control target key start
LH: loop header
LB: loop body
LE: loop exit
PB: predicated region body
PF: predicated region fallthrough
CT: control target
= control target key end

     0   :  { %s2317_s6 = smov 0   ;;  %s2858_s0 = inlined_call_operand.vmem [shape: f32[2,32,16], index: 0, kind: input, shape index: {}]   ;;  %s2859_s1 = inlined_call_operand.vmem [shape: f32[2,1,1], index: 1, kind: output, shape index: {}]  }
   0x1 LB: > { %s1976_s7 = sadd.s32 4294967295, %s2285_s6   ;;  %p1980_p0 = scmp.ge.s32.totalorder %s2285_s6, 1  ;;  %s2285_s6 = sphi %s2317_s6, %s11_s6  }
   0x2   : > { %p87_p1 = scmp.lt.s32.totalorder %s2285_s6, 3 }
   0x4   : > { %p88_p2 = pnand %p1980_p0, %p87_p1 }
   0x5   : > { %p105_p3 = scmp.lt.s32.totalorder (!%p88_p2), %s1976_s7, 1  ;;  %s2305_s12 = smov (!%p88_p2), 120  }
   0x6   : > { %91 = sbr.rel (%p88_p2) target bundleno = 4275 (0x10b3), region = 24  ;;  %s2306_s13 = smov (!%p88_p2), 8  }
   0xb   : > { %s2861_s7 = smov (!%p105_p3, %s1976_s7), 1  ;;  %vm117_vm0 = vcmask 130048   ;;  %vm174_vm1 = vcmask 261120   ;;  %v2287_v24 = vmov 0   ;;  %v137_v25 = vlaneseq }
   0xc   : > { %s2027_s8 = sshll.u32 %s2861_s7, 5  ;;  %2093 = vset.pattern.permute.xlu1 %v2287_v24  ;;  %vm2288_vm3 = vmmov 1   ;;  %v2289_v29 = vmov 0.0   ;;  %v2290_v43 = vmov 1   ;;  %v2291_v56 = vmov 2   ;;  %s112_s21 = scalar_lea.vmem %s2859_s1, %s2861_s7 }
   0xd   : > { %s2331_s11 = scalar_lea.vmem %s2858_s0, %s2027_s8  ;;  %v2359_v26 = vand.u32 127, %v137_v25  ;;  %v2363_v34 = vshrl.u32 %v137_v25, 7 }
   0xe   : > { %v113_v0 = vld [vmem:[%s2331_s11] sm:$0xff]  ;;  %v114_v1 = vld [vmem:[%s2331_s11 + $0x8] sm:$0xff]  ;;  %v115_v2 = vld [vmem:[%s2331_s11 + $0x10] sm:$0xff] }
   0xf   : > { %v116_v3 = vld [vmem:[%s2331_s11 + $0x18] sm:$0xff]  ;;  %v118_v4 = vsel %vm117_vm0, %v113_v0, 0.0  ;;  %v119_v5 = vsel %vm117_vm0, %v114_v1, 0.0  ;;  %v121_v6 = vsel %vm117_vm0, %v115_v2, 0.0  ;;  %vm261_vm2 = vcmp.lt.s32.totalorder %v2359_v26, 8 }
  0x10   : > { %v120_v7 = vadd.f32 %v119_v5, %v118_v4  ;;  %v123_v8 = vsel %vm117_vm0, %v116_v3, 0.0  ;;  %vm268_vm4 = vmxor %vm2288_vm3, %vm261_vm2  ;;  %v2366_v36 = vsub.s32 0, %v2363_v34  ;;  %v2376_v51 = vsub.s32 1, %v2363_v34 }
  0x11   : > { %vm270_vm5 = vmxor %vm268_vm4, %vm2288_vm3  ;;  %vm328_vm7 = vcmp.ge.s32.totalorder %v2363_v34, 1  ;;  %vm338_vm8 = vcmp.ge.s32.totalorder %v2359_v26, 1  ;;  %vm376_vm9 = vcmp.ge.s32.totalorder %v2363_v34, 2  ;;  %vm386_vm10 = vcmp.ge.s32.totalorder %v2359_v26, 2 }
  0x12   : > { %v122_v9 = vadd.f32 %v121_v6, %v120_v7  ;;  %v1985_v30 = vsel %vm270_vm5, 1.0, %v2289_v29  ;;  %vm271_vm6 = vmxor %vm261_vm2, %vm2288_vm3  ;;  %vm424_vm11 = vcmp.ge.s32.totalorder %v2363_v34, 3  ;;  %vm434_vm12 = vcmp.ge.s32.totalorder %v2359_v26, 3 }
  0x13   : > { %v1986_v37 = vsel %vm271_vm6, 1.0, %v2289_v29  ;;  %vm472_vm13 = vcmp.ge.s32.totalorder %v2363_v34, 4  ;;  %vm482_vm14 = vcmp.ge.s32.totalorder %v2359_v26, 4  ;;  %vm520_vm15 = vcmp.ge.s32.totalorder %v2363_v34, 5 }
  0x14   : > { %v124_v10 = vadd.f32 %v123_v8, %v122_v9  ;;  %vm568_vm2 = vcmp.ge.s32.totalorder %v2363_v34, 6  ;;  %vm578_vm3 = vcmp.ge.s32.totalorder %v2359_v26, 6  ;;  %vm346_vm4 = vcmp.eq.s32.totalorder %v2363_v34, 1 }
  0x15   : > { %vm298_vm5 = vcmp.eq.s32.totalorder %v2363_v34, 0  ;;  %vm394_vm6 = vcmp.eq.s32.totalorder %v2363_v34, 2 }
  0x16   : > { %v125_v11 = vrot.slane %v124_v10, 4 }
  0x18   : > { %v126_v12 = vadd.f32 %v125_v11, %v124_v10  ;;  %v2292_v10 = vmov 3  }
  0x1a   : > { %v127_v13 = vrot.slane %v126_v12, 2 }
  0x1c   : > { %v128_v14 = vadd.f32 %v127_v13, %v126_v12 }
  0x1e   : > { %v129_v15 = vrot.slane %v128_v14, 1 }
  0x20   : > { %v130_v16 = vadd.f32 %v129_v15, %v128_v14 }
  0x22   : > { %v132_v17 = vmul.f32 0.03125, %v130_v16 }
  0x24   : > { %v133_v18 = vsub.f32 %v113_v0, %v132_v17  ;;  %v2341_v19 = vsub.f32 %v116_v3, %v132_v17  ;;  %v2343_v20 = vsub.f32 %v114_v1, %v132_v17  ;;  %v2345_v21 = vsub.f32 %v115_v2, %v132_v17 }
  0x25   : > { %v2387_v1 = vsub.s32 2, %v2363_v34 }
  0x26   : > { %142 = vxpose.xlu0.b32.start [1/4] (short) (narrow) %v133_v18, 16  ;;  %2040 = vmatprep.subr.mxu0 %v2341_v19 }
  0x27   : > { %2041 = vmatpush3.msra.mxu0 %v2341_v19  ;;  %2055 = vmatprep.mubr.msk.f32.mxu1 %vm117_vm0, %v133_v18 }
  0x28   : > { %2042 = vmatprep.subr.mxu0 %v2345_v21 }
  0x29   : > { %2043 = vmatpush3.msra.mxu0 %v2345_v21 }
  0x2a   : > { %143 = vxpose.xlu0.b32.cont [2/4] (short) (narrow) %v2343_v20, 16  ;;  %2044 = vmatprep.subr.mxu0 %v2343_v20 }
  0x2b   : > { %2045 = vmatpush3.msra.mxu0 %v2343_v20 }
  0x2c   : > { %2046 = vmatprep.subr.mxu0 %v133_v18 }
  0x2d   : > { %2047 = vmatpush3.msra.mxu0 %v133_v18 }
  0x2e   : > { %144 = vxpose.xlu0.b32.cont [3/4] (short) (narrow) %v2345_v21, 16 }
  0x32   : > { %145 = vxpose.xlu0.b32.end [4/4] (short) (narrow) %v2341_v19, 16 }
  0x5b   : > { %2095 = vset.pattern.permute.xlu0 %v2287_v24 }
  0xa2   : > { %v158_v22 = vpop.trf.xlu0 }
  0xa3   : > { %2048 = vmatprep.mubr.msk.f32.mxu0 %vm174_vm1, %v158_v22 }
  0xa6   : > { %v159_v23 = vpop.trf.xlu0 }
  0xa7   : > { %2049 = vmatmul.mubr.msk.f32.vlgmr.msra.gmra.mxu0 %vm174_vm1, %v159_v23  ;;  %v2400_v23 = vsub.s32 3, %v2363_v34  ;;  %vm530_vm1 = vcmp.ge.s32.totalorder %v2359_v26, 5 }
 0x167   : > { %v2050_v27 = vpop.f32.mrf.mxu0 }
 0x168   : > { %v258_v35 = vmul.f32 0.032258064, %v2050_v27 }
 0x169   : > { %v247_v28 = vpop.f32.mrf.mxu0 }
 0x16a   : > { %v257_v31 = vmul.f32 0.032258064, %v247_v28  ;;  %v277_v39 = vmul.f32 %v1986_v37, %v258_v35 }
 0x16c   : > { %v276_v32 = vmul.f32 %v1985_v30, %v257_v31 }
 0x16e   : > { %v278_v33 = vmax.f32 %v276_v32, 1e-20 }
 0x170   : > { %2147 = vrsqrt.f32 %v278_v33 }
 0x17d   : > { %v2148_v38 = vpop.eup %2147 }
 0x17e   : > { %294 = vperm.xlu1 %2093, %v2148_v38   ;;  %v287_v40 = vrot.slane %v2148_v38, %v2366_v36 }
 0x180   : > { %v289_v41 = vmul.f32 %v287_v40, %v277_v39  ;;  %v288_v42 = vmul.f32 %v287_v40, %v276_v32 }
 0x182   : > { %319 = vperm.xlu0 %2095, %v289_v41   ;;  %314 = vperm.xlu1 %2093, %v288_v42  }
 0x186   : > { %2094 = vset.pattern.permute.xlu1 %v2290_v43 }
 0x1f9   : > { %v295_v44 = vpop.permute.xlu1 %294 }
 0x1fa   : > { %v297_v45 = vmul.f32 %v295_v44, %v276_v32 }
 0x1fc   : > { %v2372_v46 = vrot.slane %v297_v45, %v2366_v36 }
 0x1fd   : > { %v315_v47 = vpop.permute.xlu1 %314  ;;  %v320_v2 = vpop.permute.xlu0 %319 }
 0x1fe   : > { %v322_v48 = vmul.f32 %v315_v47, %v2372_v46  ;;  %v323_v5 = vmul.f32 %v320_v2, %v2372_v46 }
 0x200   : > { %v324_v49 = vsub.f32 %v276_v32, %v322_v48  ;;  %v325_v8 = vsub.f32 %v277_v39, %v323_v5 }
 0x202   : > { %v326_v50 = vmax.f32 %v324_v49, 1e-20  ;;  %v330_v54 = vsel %vm328_vm7, %v324_v49, 0.0  ;;  %v339_v57 = vsel %vm338_vm8, %v324_v49, 0.0  ;;  %vm442_vm7 = vcmp.eq.s32.totalorder %v2363_v34, 3 }
 0x203   : > { %vm490_vm8 = vcmp.eq.s32.totalorder %v2363_v34, 4 }
 0x204   : > { %2149 = vrsqrt.f32 %v326_v50  ;;  %v2293_v50 = vmov 4  }
 0x211   : > { %v2150_v52 = vpop.eup %2149 }
 0x212   : > { %342 = vperm.xlu1 %2094, %v2150_v52   ;;  %v335_v53 = vrot.slane %v2150_v52, %v2376_v51  ;;  %v2415_v52 = vsub.s32 4, %v2363_v34 }
 0x214   : > { %v336_v55 = vmul.f32 %v335_v53, %v330_v54  ;;  %v337_v9 = vmul.f32 %v335_v53, %v325_v8 }
 0x216   : > { %362 = vperm.xlu1 %2094, %v336_v55  }
 0x21a   : > { %2096 = vset.pattern.permute.xlu1 %v2291_v56 }
 0x28d   : > { %v343_v58 = vpop.permute.xlu1 %342 }
 0x28e   : > { %v345_v59 = vmul.f32 %v343_v58, %v339_v57  ;;  %v2294_v58 = vmov 5  }
 0x28f   : > { %2103 = vset.pattern.permute.xlu0 %v2294_v58 }
 0x290   : > { %v2383_v60 = vrot.slane %v345_v59, %v2376_v51 }
 0x291   : > { %v363_v61 = vpop.permute.xlu1 %362 }
 0x292   : > { %v370_v62 = vmul.f32 %v363_v61, %v2383_v60 }
 0x294   : > { %v372_v63 = vsub.f32 %v324_v49, %v370_v62 }
 0x296   : > { %v374_v0 = vmax.f32 %v372_v63, 1e-20  ;;  %v378_v6 = vsel %vm376_vm9, %v372_v63, 0.0  ;;  %v387_v11 = vsel %vm386_vm10, %v372_v63, 0.0  ;;  %vm538_vm9 = vcmp.eq.s32.totalorder %v2363_v34, 5 }
 0x297   : > { %vm586_vm10 = vcmp.eq.s32.totalorder %v2363_v34, 6 }
 0x298   : > { %2151 = vrsqrt.f32 %v374_v0 }
 0x2a5   : > { %v2152_v3 = vpop.eup %2151 }
 0x2a6   : > { %390 = vperm.xlu1 %2096, %v2152_v3   ;;  %v383_v4 = vrot.slane %v2152_v3, %v2387_v1 }
 0x2a8   : > { %v384_v7 = vmul.f32 %v383_v4, %v378_v6 }
 0x2aa   : > { %410 = vperm.xlu1 %2096, %v384_v7  }
 0x2ae   : > { %2097 = vset.pattern.permute.xlu1 %v2290_v43 }
 0x2af   : > { %367 = vperm.xlu1 %2097, %v337_v9   ;;  %v2428_v9 = vsub.s32 5, %v2363_v34 }
 0x2b3   : > { %2098 = vset.pattern.permute.xlu1 %v2292_v10 }
 0x321   : > { %v391_v12 = vpop.permute.xlu1 %390 }
 0x322   : > { %v393_v13 = vmul.f32 %v391_v12, %v387_v11 }
 0x324   : > { %v2396_v14 = vrot.slane %v393_v13, %v2387_v1 }
 0x325   : > { %v411_v15 = vpop.permute.xlu1 %410 }
 0x326   : > { %v418_v16 = vmul.f32 %v411_v15, %v2396_v14 }
 0x328   : > { %v420_v17 = vsub.f32 %v372_v63, %v418_v16  ;;  %v2295_v16 = vmov 6  }
 0x32a   : > { %v422_v18 = vmax.f32 %v420_v17, 1e-20  ;;  %v368_v22 = vpop.permute.xlu1 %367  ;;  %v426_v30 = vsel %vm424_vm11, %v420_v17, 0.0  ;;  %v435_v35 = vsel %vm434_vm12, %v420_v17, 0.0  ;;  %vm623_vm11 = vcmp.ge.s32.totalorder %v2359_v26, 7 }
 0x32b   : > { %v371_v27 = vmul.f32 %v368_v22, %v2383_v60  ;;  %vm631_vm12 = vcmp.eq.s32.totalorder %v2363_v34, 7 }
 0x32c   : > { %2153 = vrsqrt.f32 %v422_v18 }
 0x32d   : > { %v373_v32 = vsub.f32 %v325_v8, %v371_v27 }
 0x32f   : > { %v385_v33 = vmul.f32 %v383_v4, %v373_v32 }
 0x339   : > { %v2154_v25 = vpop.eup %2153 }
 0x33a   : > { %438 = vperm.xlu1 %2098, %v2154_v25   ;;  %v431_v28 = vrot.slane %v2154_v25, %v2400_v23 }
 0x33c   : > { %v432_v31 = vmul.f32 %v431_v28, %v426_v30 }
 0x33e   : > { %458 = vperm.xlu1 %2098, %v432_v31  }
 0x342   : > { %2099 = vset.pattern.permute.xlu1 %v2291_v56 }
 0x343   : > { %415 = vperm.xlu1 %2099, %v385_v33  }
 0x347   : > { %2100 = vset.pattern.permute.xlu1 %v2292_v10 }
 0x3b5   : > { %v439_v37 = vpop.permute.xlu1 %438 }
 0x3b6   : > { %v441_v38 = vmul.f32 %v439_v37, %v435_v35 }
 0x3b8   : > { %v2409_v39 = vrot.slane %v441_v38, %v2400_v23  ;;  %v2441_v38 = vsub.s32 6, %v2363_v34 }
 0x3b9   : > { %v459_v40 = vpop.permute.xlu1 %458 }
 0x3ba   : > { %v466_v41 = vmul.f32 %v459_v40, %v2409_v39 }
 0x3bc   : > { %v468_v42 = vsub.f32 %v420_v17, %v466_v41 }
 0x3be   : > { %v470_v44 = vmax.f32 %v468_v42, 1e-20  ;;  %v416_v45 = vpop.permute.xlu1 %415  ;;  %v474_v55 = vsel %vm472_vm13, %v468_v42, 0.0  ;;  %v483_v0 = vsel %vm482_vm14, %v468_v42, 0.0  ;;  %vm661_vm13 = vcmp.ge.s32.totalorder %v2359_v26, 8 }
 0x3bf   : > { %v419_v47 = vmul.f32 %v416_v45, %v2396_v14  ;;  %v2296_v45 = vmov 7  }
 0x3c0   : > { %2155 = vrsqrt.f32 %v470_v44 }
 0x3c1   : > { %v421_v48 = vsub.f32 %v373_v32, %v419_v47 }
 0x3c3   : > { %v433_v49 = vmul.f32 %v431_v28, %v421_v48 }
 0x3c5   : > { %463 = vperm.xlu1 %2100, %v433_v49  }
 0x3c9   : > { %2101 = vset.pattern.permute.xlu1 %v2293_v50 }
 0x3cd   : > { %v2156_v53 = vpop.eup %2155 }
 0x3ce   : > { %486 = vperm.xlu1 %2101, %v2156_v53   ;;  %v479_v54 = vrot.slane %v2156_v53, %v2415_v52 }
 0x3d0   : > { %v480_v57 = vmul.f32 %v479_v54, %v474_v55 }
 0x3d2   : > { %506 = vperm.xlu1 %2101, %v480_v57  }
 0x440   : > { %v464_v59 = vpop.permute.xlu1 %463 }
 0x441   : > { %v467_v61 = vmul.f32 %v464_v59, %v2409_v39 }
 0x443   : > { %v469_v62 = vsub.f32 %v421_v48, %v467_v61 }
 0x445   : > { %v481_v63 = vmul.f32 %v479_v54, %v469_v62 }
 0x447   : > { %511 = vperm.xlu1 %2101, %v481_v63  }
 0x449   : > { %v487_v2 = vpop.permute.xlu1 %486 }
 0x44a   : > { %v489_v3 = vmul.f32 %v487_v2, %v483_v0 }
 0x44b   : > { %2102 = vset.pattern.permute.xlu1 %v2294_v58 }
 0x44c   : > { %v2424_v4 = vrot.slane %v489_v3, %v2415_v52  ;;  %v2451_v3 = vsub.s32 7, %v2363_v34 }
 0x44d   : > { %v507_v5 = vpop.permute.xlu1 %506 }
 0x44e   : > { %v514_v6 = vmul.f32 %v507_v5, %v2424_v4 }
 0x450   : > { %v516_v7 = vsub.f32 %v468_v42, %v514_v6 }
 0x452   : > { %v518_v8 = vmax.f32 %v516_v7, 1e-20  ;;  %v522_v13 = vsel %vm520_vm15, %v516_v7, 0.0  ;;  %v531_v27 = vsel %vm530_vm1, %v516_v7, 0.0  ;;  %vm699_vm1 = vcmp.ge.s32.totalorder %v2359_v26, 9 }
 0x454   : > { %2157 = vrsqrt.f32 %v518_v8 }
 0x461   : > { %v2158_v11 = vpop.eup %2157 }
 0x462   : > { %534 = vperm.xlu1 %2102, %v2158_v11   ;;  %v527_v12 = vrot.slane %v2158_v11, %v2428_v9 }
 0x464   : > { %v528_v15 = vmul.f32 %v527_v12, %v522_v13  ;;  %v2459_v13 = vsel %vm346_vm4, 1.0, %v2289_v29  ;;  %vm737_vm4 = vcmp.ge.s32.totalorder %v2359_v26, 10 }
 0x466   : > { %554 = vperm.xlu0 %2103, %v528_v15   ;;  %v2463_v15 = vsel %vm298_vm5, 1.0, %v2289_v29 }
 0x46a   : > { %2105 = vset.pattern.permute.xlu0 %v2295_v16 }
 0x4c2   : > { %v512_v17 = vpop.permute.xlu1 %511 }
 0x4c3   : > { %v515_v18 = vmul.f32 %v512_v17, %v2424_v4  ;;  %v2466_v17 = vsel %vm394_vm6, 1.0, %v2289_v29 }
 0x4c5   : > { %v517_v22 = vsub.f32 %v469_v62, %v515_v18  ;;  %v356_v18 = vmul.f32 %v2459_v13, %v2383_v60 }
 0x4c7   : > { %v529_v25 = vmul.f32 %v527_v12, %v517_v22  ;;  %v2297_v12 = vmov 8  }
 0x4c9   : > { %559 = vperm.xlu1 %2102, %v529_v25   ;;  %v2473_v25 = vsel %vm442_vm7, 1.0, %v2289_v29  ;;  %vm775_vm7 = vcmp.ge.s32.totalorder %v2359_v26, 11 }
 0x4cd   : > { %2104 = vset.pattern.permute.xlu1 %v2295_v16 }
 0x4dd   : > { %v535_v28 = vpop.permute.xlu1 %534 }
 0x4de   : > { %v537_v30 = vmul.f32 %v535_v28, %v531_v27  ;;  %v308_v27 = vmul.f32 %v2463_v15, %v2372_v46  ;;  %v404_v28 = vmul.f32 %v2466_v17, %v2396_v14 }
 0x4e0   : > { %v2437_v31 = vrot.slane %v537_v30, %v2428_v9  ;;  %v309_v30 = vmul.f32 0.0, %v2372_v46 }
 0x4e1   : > { %v555_v32 = vpop.permute.xlu0 %554 }
 0x4e2   : > { %v562_v33 = vmul.f32 %v555_v32, %v2437_v31  ;;  %v405_v32 = vmul.f32 0.0, %v2396_v14  ;;  %v2492_v14 = vsel %vm538_vm9, 1.0, %v2289_v29 }
 0x4e4   : > { %v564_v35 = vsub.f32 %v516_v7, %v562_v33  ;;  %v2482_v33 = vsel %vm490_vm8, 1.0, %v2289_v29 }
 0x4e5   : > { %v500_v46 = vmul.f32 %v2482_v33, %v2424_v4 }
 0x4e6   : > { %v566_v37 = vmax.f32 %v564_v35, 1e-20  ;;  %v570_v42 = vsel %vm568_vm2, %v564_v35, 0.0  ;;  %v579_v54 = vsel %vm578_vm3, %v564_v35, 0.0 }
 0x4e8   : > { %2159 = vrsqrt.f32 %v566_v37 }
 0x4f5   : > { %v2160_v40 = vpop.eup %2159 }
 0x4f6   : > { %582 = vperm.xlu1 %2104, %v2160_v40   ;;  %v575_v41 = vrot.slane %v2160_v40, %v2441_v38  ;;  %v453_v40 = vmul.f32 0.0, %v2409_v39 }
 0x4f8   : > { %v576_v44 = vmul.f32 %v575_v41, %v570_v42 }
 0x4fa   : > { %602 = vperm.xlu0 %2105, %v576_v44   ;;  %v501_v44 = vmul.f32 0.0, %v2424_v4 }
 0x4fe   : > { %2107 = vset.pattern.permute.xlu0 %v2296_v45 }
 0x544   : > { %v560_v47 = vpop.permute.xlu1 %559 }
 0x545   : > { %v563_v48 = vmul.f32 %v560_v47, %v2437_v31 }
 0x547   : > { %v565_v49 = vsub.f32 %v517_v22, %v563_v48  ;;  %v357_v22 = vmul.f32 0.0, %v2383_v60  ;;  %v452_v60 = vmul.f32 %v2473_v25, %v2409_v39  ;;  %v2497_v48 = vsel %vm586_vm10, 1.0, %v2289_v29 }
 0x548   : > { %v548_v39 = vmul.f32 %v2492_v14, %v2437_v31  ;;  %vm813_vm10 = vcmp.ge.s32.totalorder %v2359_v26, 12 }
 0x549   : > { %v577_v53 = vmul.f32 %v575_v41, %v565_v49  ;;  %v359_v37 = vadd.f32 %v357_v22, %v309_v30 }
 0x54b   : > { %607 = vperm.xlu1 %2104, %v577_v53   ;;  %v407_v42 = vadd.f32 %v405_v32, %v359_v37  ;;  %v549_v53 = vmul.f32 0.0, %v2437_v31 }
 0x54f   : > { %2106 = vset.pattern.permute.xlu1 %v2296_v45 }
 0x571   : > { %v583_v55 = vpop.permute.xlu1 %582 }
 0x572   : > { %v585_v57 = vmul.f32 %v583_v55, %v579_v54 }
 0x574   : > { %v595_v59 = vrot.slane %v585_v57, %v2441_v38 }
 0x575   : > { %v603_v61 = vpop.permute.xlu0 %602 }
 0x576   : > { %v610_v62 = vmul.f32 %v603_v61, %v595_v59  ;;  %v596_v4 = vmul.f32 %v2497_v48, %v595_v59 }
 0x578   : > { %v612_v63 = vsub.f32 %v564_v35, %v610_v62  ;;  %v358_v35 = vadd.f32 %v356_v18, %v308_v27  ;;  %v597_v62 = vmul.f32 0.0, %v595_v59 }
 0x57a   : > { %v614_v0 = vmax.f32 %v612_v63, 1e-20  ;;  %v406_v41 = vadd.f32 %v404_v28, %v358_v35  ;;  %v624_v55 = vsel %vm623_vm11, %v612_v63, 0.0 }
 0x57c   : > { %2161 = vrsqrt.f32 %v614_v0  ;;  %v454_v47 = vadd.f32 %v452_v60, %v406_v41  ;;  %v2513_v41 = vadd.s32 8, %v2363_v34 }
 0x57e   : > { %v502_v54 = vadd.f32 %v500_v46, %v454_v47  ;;  %vm670_vm14 = vcmp.eq.s32.totalorder %v2513_v41, 8  ;;  %vm692_vm15 = vcmp.ge.s32.totalorder %v2513_v41, 9  ;;  %vm708_vm2 = vcmp.eq.s32.totalorder %v2513_v41, 9 }
 0x57f   : > { %vm730_vm3 = vcmp.ge.s32.totalorder %v2513_v41, 10  ;;  %vm746_vm5 = vcmp.eq.s32.totalorder %v2513_v41, 10  ;;  %vm768_vm6 = vcmp.ge.s32.totalorder %v2513_v41, 11  ;;  %vm784_vm8 = vcmp.eq.s32.totalorder %v2513_v41, 11 }
 0x580   : > { %vm806_vm9 = vcmp.ge.s32.totalorder %v2513_v41, 12  ;;  %vm822_vm11 = vcmp.eq.s32.totalorder %v2513_v41, 12 }
 0x589   : > { %v2162_v2 = vpop.eup %2161 }
 0x58a   : > { %627 = vperm.xlu1 %2106, %v2162_v2   ;;  %v621_v8 = vrot.slane %v2162_v2, %v2451_v3  ;;  %v2505_v2 = vsel %vm631_vm12, 1.0, %v2289_v29  ;;  %vm844_vm12 = vcmp.ge.s32.totalorder %v2513_v41, 13 }
 0x58e   : > { %2108 = vset.pattern.permute.xlu1 %v2297_v12 }
 0x5c6   : > { %v608_v5 = vpop.permute.xlu1 %607 }
 0x5c7   : > { %v611_v6 = vmul.f32 %v608_v5, %v595_v59  ;;  %v550_v5 = vadd.f32 %v548_v39, %v502_v54 }
 0x5c9   : > { %v613_v7 = vsub.f32 %v565_v49, %v611_v6  ;;  %v455_v49 = vadd.f32 %v453_v40, %v407_v42  ;;  %v2298_v40 = vmov 9  }
 0x5cb   : > { %v622_v11 = vmul.f32 %v621_v8, %v613_v7  ;;  %v503_v61 = vadd.f32 %v501_v44, %v455_v49  ;;  %v2518_v44 = vsel %vm670_vm14, 1.0, %v2289_v29  ;;  %vm860_vm14 = vcmp.eq.s32.totalorder %v2513_v41, 13 }
 0x5cd   : > { %647 = vperm.xlu0 %2107, %v622_v11   ;;  %v551_v6 = vadd.f32 %v549_v53, %v503_v61  ;;  %v598_v11 = vadd.f32 %v596_v4, %v550_v5 }
 0x5cf   : > { %v599_v18 = vadd.f32 %v597_v62, %v551_v6  ;;  %v2299_v6 = vmov 10  }
 0x5d1   : > { %2109 = vset.pattern.permute.xlu0 %v2298_v40 }
 0x605   : > { %v628_v57 = vpop.permute.xlu1 %627 }
 0x606   : > { %v630_v0 = vmul.f32 %v628_v57, %v624_v55 }
 0x608   : > { %v640_v8 = vrot.slane %v630_v0, %v2451_v3 }
 0x60a   : > { %v641_v31 = vmul.f32 %v2505_v2, %v640_v8  ;;  %v642_v22 = vmul.f32 0.0, %v640_v8 }
 0x60c   : > { %v643_v27 = vadd.f32 %v641_v31, %v598_v11  ;;  %v644_v63 = vadd.f32 %v642_v22, %v599_v18  ;;  %v2529_v31 = vsel %vm708_vm2, 1.0, %v2289_v29  ;;  %vm898_vm2 = vcmp.eq.s32.totalorder %v2513_v41, 14 }
 0x648   : > { %v648_v28 = vpop.permute.xlu0 %647 }
 0x649   : > { %v650_v30 = vmul.f32 %v648_v28, %v640_v8 }
 0x64b   : > { %v651_v32 = vsub.f32 %v613_v7, %v650_v30 }
 0x64d   : > { %v652_v35 = vmax.f32 %v651_v32, 1e-20  ;;  %v662_v7 = vsel %vm661_vm13, %v651_v32, 0.0  ;;  %vm851_vm13 = vcmp.ge.s32.totalorder %v2359_v26, 13 }
 0x64f   : > { %2163 = vrsqrt.f32 %v652_v35 }
 0x65c   : > { %v2164_v59 = vpop.eup %2163 }
 0x65d   : > { %665 = vperm.xlu1 %2108, %v2164_v59   ;;  %v659_v60 = vrot.slane %v2164_v59, %v2366_v36 }
 0x65f   : > { %v660_v37 = vmul.f32 %v659_v60, %v651_v32 }
 0x661   : > { %685 = vperm.xlu1 %2108, %v660_v37  }
 0x665   : > { %2110 = vset.pattern.permute.xlu1 %v2298_v40 }
 0x6d8   : > { %v666_v46 = vpop.permute.xlu1 %665 }
 0x6d9   : > { %v668_v42 = vmul.f32 %v666_v46, %v662_v7 }
 0x6db   : > { %v678_v47 = vrot.slane %v668_v42, %v2366_v36 }
 0x6dc   : > { %v686_v49 = vpop.permute.xlu1 %685 }
 0x6dd   : > { %v679_v39 = vmul.f32 0.0, %v678_v47  ;;  %v680_v53 = vmul.f32 %v2518_v44, %v678_v47  ;;  %v688_v54 = vmul.f32 %v686_v49, %v678_v47  ;;  %v2300_v47 = vmov 11  }
 0x6df   : > { %v681_v55 = vadd.f32 %v679_v39, %v643_v27  ;;  %v682_v34 = vadd.f32 %v680_v53, %v644_v63  ;;  %v689_v57 = vsub.f32 %v651_v32, %v688_v54  ;;  %v2539_v54 = vsel %vm746_vm5, 1.0, %v2289_v29 }
 0x6e0   : > { %vm961_vm5 = vcmp.eq.s32.totalorder %v2359_v26, 0 }
 0x6e1   : > { %v690_v61 = vmax.f32 %v689_v57, 1e-20  ;;  %v693_v0 = vsel %vm692_vm15, %v689_v57, 0.0  ;;  %v700_v8 = vsel %vm699_vm1, %v689_v57, 0.0  ;;  %vm882_vm15 = vcmp.ge.s32.totalorder %v2513_v41, 14 }
 0x6e2   : > { %vm889_vm1 = vcmp.ge.s32.totalorder %v2359_v26, 14 }
 0x6e3   : > { %2165 = vrsqrt.f32 %v690_v61 }
 0x6f0   : > { %v2166_v4 = vpop.eup %2165 }
 0x6f1   : > { %703 = vperm.xlu0 %2109, %v2166_v4   ;;  %v697_v62 = vrot.slane %v2166_v4, %v2376_v51 }
 0x6f3   : > { %v698_v5 = vmul.f32 %v697_v62, %v693_v0 }
 0x6f5   : > { %723 = vperm.xlu1 %2110, %v698_v5   ;;  %2112 = vset.pattern.permute.xlu0 %v2299_v6 }
 0x6f9   : > { %2111 = vset.pattern.permute.xlu1 %v2299_v6 }
 0x76c   : > { %v704_v11 = vpop.permute.xlu0 %703 }
 0x76d   : > { %v706_v18 = vmul.f32 %v704_v11, %v700_v8 }
 0x76f   : > { %v716_v22 = vrot.slane %v706_v18, %v2376_v51 }
 0x770   : > { %v724_v27 = vpop.permute.xlu1 %723 }
 0x771   : > { %v717_v63 = vmul.f32 0.0, %v716_v22  ;;  %v718_v28 = vmul.f32 %v2529_v31, %v716_v22  ;;  %v726_v30 = vmul.f32 %v724_v27, %v716_v22 }
 0x773   : > { %v719_v32 = vadd.f32 %v717_v63, %v681_v55  ;;  %v720_v35 = vadd.f32 %v718_v28, %v682_v34  ;;  %v727_v59 = vsub.f32 %v689_v57, %v726_v30  ;;  %v2301_v63 = vmov 12  }
 0x775   : > { %v728_v60 = vmax.f32 %v727_v59, 1e-20  ;;  %v731_v46 = vsel %vm730_vm3, %v727_v59, 0.0  ;;  %v738_v49 = vsel %vm737_vm4, %v727_v59, 0.0  ;;  %vm920_vm3 = vcmp.ge.s32.totalorder %v2359_v26, 15 }
 0x776   : > { %vm929_vm4 = vcmp.eq.s32.totalorder %v2513_v41, 15 }
 0x777   : > { %2167 = vrsqrt.f32 %v728_v60 }
 0x784   : > { %v2168_v37 = vpop.eup %2167 }
 0x785   : > { %741 = vperm.xlu1 %2111, %v2168_v37   ;;  %v735_v7 = vrot.slane %v2168_v37, %v2387_v1 }
 0x787   : > { %v736_v42 = vmul.f32 %v735_v7, %v731_v46 }
 0x789   : > { %761 = vperm.xlu0 %2112, %v736_v42   ;;  %2113 = vset.pattern.permute.xlu1 %v2300_v47 }
 0x78d   : > { %2114 = vset.pattern.permute.xlu0 %v2301_v63 }
 0x800   : > { %v742_v39 = vpop.permute.xlu1 %741 }
 0x801   : > { %v744_v53 = vmul.f32 %v742_v39, %v738_v49 }
 0x803   : > { %v754_v55 = vrot.slane %v744_v53, %v2387_v1 }
 0x804   : > { %v762_v34 = vpop.permute.xlu0 %761 }
 0x805   : > { %v755_v57 = vmul.f32 0.0, %v754_v55  ;;  %v756_v61 = vmul.f32 %v2539_v54, %v754_v55  ;;  %v764_v4 = vmul.f32 %v762_v34, %v754_v55 }
 0x807   : > { %v757_v62 = vadd.f32 %v755_v57, %v719_v32  ;;  %v758_v0 = vadd.f32 %v756_v61, %v720_v35  ;;  %v765_v5 = vsub.f32 %v727_v59, %v764_v4  ;;  %v2550_v35 = vsel %vm784_vm8, 1.0, %v2289_v29 }
 0x808   : > { %v2302_v4 = vmov 13   ;;  %vm1060_vm8 = vcmp.eq.s32.totalorder %v2359_v26, 3 }
 0x809   : > { %v766_v8 = vmax.f32 %v765_v5, 1e-20  ;;  %v769_v22 = vsel %vm768_vm6, %v765_v5, 0.0  ;;  %v776_v28 = vsel %vm775_vm7, %v765_v5, 0.0  ;;  %vm994_vm6 = vcmp.eq.s32.totalorder %v2359_v26, 1 }
 0x80a   : > { %vm1027_vm7 = vcmp.eq.s32.totalorder %v2359_v26, 2 }
 0x80b   : > { %2169 = vrsqrt.f32 %v766_v8  ;;  %v2561_v8 = vsel %vm822_vm11, 1.0, %v2289_v29  ;;  %vm1159_vm11 = vcmp.eq.s32.totalorder %v2359_v26, 6 }
 0x818   : > { %v2170_v11 = vpop.eup %2169 }
 0x819   : > { %779 = vperm.xlu1 %2113, %v2170_v11   ;;  %v773_v18 = vrot.slane %v2170_v11, %v2400_v23 }
 0x81b   : > { %v774_v27 = vmul.f32 %v773_v18, %v769_v22 }
 0x81d   : > { %799 = vperm.xlu1 %2113, %v774_v27  }
 0x821   : > { %2115 = vset.pattern.permute.xlu1 %v2301_v63 }
 0x894   : > { %v780_v30 = vpop.permute.xlu1 %779 }
 0x895   : > { %v782_v32 = vmul.f32 %v780_v30, %v776_v28 }
 0x897   : > { %v792_v59 = vrot.slane %v782_v32, %v2400_v23 }
 0x898   : > { %v800_v60 = vpop.permute.xlu1 %799 }
 0x899   : > { %v793_v37 = vmul.f32 0.0, %v792_v59  ;;  %v794_v7 = vmul.f32 %v2550_v35, %v792_v59  ;;  %v802_v46 = vmul.f32 %v800_v60, %v792_v59 }
 0x89b   : > { %v795_v42 = vadd.f32 %v793_v37, %v757_v62  ;;  %v796_v49 = vadd.f32 %v794_v7, %v758_v0  ;;  %v803_v39 = vsub.f32 %v765_v5, %v802_v46 }
 0x89d   : > { %v804_v53 = vmax.f32 %v803_v39, 1e-20  ;;  %v807_v57 = vsel %vm806_vm9, %v803_v39, 0.0  ;;  %v814_v62 = vsel %vm813_vm10, %v803_v39, 0.0  ;;  %vm1093_vm9 = vcmp.eq.s32.totalorder %v2359_v26, 4 }
 0x89e   : > { %vm1126_vm10 = vcmp.eq.s32.totalorder %v2359_v26, 5 }
 0x89f   : > { %2171 = vrsqrt.f32 %v804_v53 }
 0x8ac   : > { %v2172_v55 = vpop.eup %2171 }
 0x8ad   : > { %817 = vperm.xlu0 %2114, %v2172_v55   ;;  %v811_v34 = vrot.slane %v2172_v55, %v2415_v52  ;;  %v2303_v55 = vmov 14  }
 0x8af   : > { %v812_v61 = vmul.f32 %v811_v34, %v807_v57  ;;  %v2571_v34 = vsel %vm860_vm14, 1.0, %v2289_v29  ;;  %vm1258_vm14 = vcmp.eq.s32.totalorder %v2359_v26, 9 }
 0x8b1   : > { %837 = vperm.xlu1 %2115, %v812_v61   ;;  %2117 = vset.pattern.permute.xlu0 %v2302_v4 }
 0x8b5   : > { %2116 = vset.pattern.permute.xlu1 %v2302_v4 }
 0x928   : > { %v818_v0 = vpop.permute.xlu0 %817 }
 0x929   : > { %v820_v5 = vmul.f32 %v818_v0, %v814_v62 }
 0x92b   : > { %v830_v11 = vrot.slane %v820_v5, %v2415_v52 }
 0x92c   : > { %v838_v18 = vpop.permute.xlu1 %837 }
 0x92d   : > { %v831_v22 = vmul.f32 0.0, %v830_v11  ;;  %v832_v27 = vmul.f32 %v2561_v8, %v830_v11  ;;  %v840_v28 = vmul.f32 %v838_v18, %v830_v11 }
 0x92f   : > { %v833_v30 = vadd.f32 %v831_v22, %v795_v42  ;;  %v834_v32 = vadd.f32 %v832_v27, %v796_v49  ;;  %v841_v59 = vsub.f32 %v803_v39, %v840_v28 }
 0x931   : > { %v842_v60 = vmax.f32 %v841_v59, 1e-20  ;;  %v845_v46 = vsel %vm844_vm12, %v841_v59, 0.0  ;;  %v852_v42 = vsel %vm851_vm13, %v841_v59, 0.0  ;;  %vm1192_vm12 = vcmp.eq.s32.totalorder %v2359_v26, 7 }
 0x932   : > { %vm1225_vm13 = vcmp.eq.s32.totalorder %v2359_v26, 8 }
 0x933   : > { %2173 = vrsqrt.f32 %v842_v60 }
 0x940   : > { %v2174_v37 = vpop.eup %2173 }
 0x941   : > { %855 = vperm.xlu1 %2116, %v2174_v37   ;;  %v849_v7 = vrot.slane %v2174_v37, %v2428_v9 }
 0x943   : > { %v850_v53 = vmul.f32 %v849_v7, %v845_v46  ;;  %v2304_v46 = vmov 15  }
 0x945   : > { %875 = vperm.xlu0 %2117, %v850_v53   ;;  %2118 = vset.pattern.permute.xlu1 %v2303_v55  ;;  %v2582_v53 = vsel %vm898_vm2, 1.0, %v2289_v29  ;;  %vm1357_vm2 = vcmp.eq.s32.totalorder %v2359_v26, 12 }
 0x949   : > { %2119 = vset.pattern.permute.xlu0 %v2304_v46 }
 0x9bc   : > { %v856_v49 = vpop.permute.xlu1 %855 }
 0x9bd   : > { %v858_v39 = vmul.f32 %v856_v49, %v852_v42 }
 0x9bf   : > { %v868_v57 = vrot.slane %v858_v39, %v2428_v9 }
 0x9c0   : > { %v876_v61 = vpop.permute.xlu0 %875 }
 0x9c1   : > { %v869_v62 = vmul.f32 0.0, %v868_v57  ;;  %v870_v0 = vmul.f32 %v2571_v34, %v868_v57  ;;  %v878_v5 = vmul.f32 %v876_v61, %v868_v57 }
 0x9c3   : > { %v871_v11 = vadd.f32 %v869_v62, %v833_v30  ;;  %v872_v18 = vadd.f32 %v870_v0, %v834_v32  ;;  %v879_v22 = vsub.f32 %v841_v59, %v878_v5 }
 0x9c5   : > { %v880_v27 = vmax.f32 %v879_v22, 1e-20  ;;  %v883_v37 = vsel %vm882_vm15, %v879_v22, 0.0  ;;  %v890_v30 = vsel %vm889_vm1, %v879_v22, 0.0  ;;  %vm1291_vm15 = vcmp.eq.s32.totalorder %v2359_v26, 10 }
 0x9c6   : > { %vm1324_vm1 = vcmp.eq.s32.totalorder %v2359_v26, 11 }
 0x9c7   : > { %2175 = vrsqrt.f32 %v880_v27 }
 0x9d4   : > { %v2176_v28 = vpop.eup %2175 }
 0x9d5   : > { %893 = vperm.xlu1 %2118, %v2176_v28   ;;  %v887_v60 = vrot.slane %v2176_v28, %v2441_v38 }
 0x9d7   : > { %v888_v7 = vmul.f32 %v887_v60, %v883_v37 }
 0x9d9   : > { %913 = vperm.xlu1 %2118, %v888_v7   ;;  %v2590_v7 = vsel %vm929_vm4, 1.0, %v2289_v29  ;;  %vm1423_vm4 = vcmp.eq.s32.totalorder %v2359_v26, 14 }
 0x9dd   : > { %2120 = vset.pattern.permute.xlu1 %v2287_v24 }
 0xa50   : > { %v894_v32 = vpop.permute.xlu1 %893 }
 0xa51   : > { %v896_v59 = vmul.f32 %v894_v32, %v890_v30 }
 0xa53   : > { %v906_v42 = vrot.slane %v896_v59, %v2441_v38 }
 0xa54   : > { %v914_v49 = vpop.permute.xlu1 %913 }
 0xa55   : > { %v907_v39 = vmul.f32 0.0, %v906_v42  ;;  %v908_v57 = vmul.f32 %v2582_v53, %v906_v42  ;;  %v916_v61 = vmul.f32 %v914_v49, %v906_v42 }
 0xa57   : > { %v917_v62 = vsub.f32 %v879_v22, %v916_v61  ;;  %v909_v0 = vadd.f32 %v907_v39, %v871_v11  ;;  %v910_v24 = vadd.f32 %v908_v57, %v872_v18 }
 0xa59   : > { %v918_v5 = vmax.f32 %v917_v62, 1e-20  ;;  %v921_v28 = vsel %vm920_vm3, %v917_v62, 0.0  ;;  %vm1390_vm3 = vcmp.eq.s32.totalorder %v2359_v26, 13 }
 0xa5b   : > { %2177 = vrsqrt.f32 %v918_v5 }
 0xa68   : > { %v2178_v27 = vpop.eup %2177 }
 0xa69   : > { %924 = vperm.xlu0 %2119, %v2178_v27  }
 0xa6d   : > { %2121 = vset.pattern.permute.xlu0 %v2290_v43 }
 0xae4   : > { %v925_v60 = vpop.permute.xlu0 %924 }
 0xae5   : > { %v927_v37 = vmul.f32 %v925_v60, %v921_v28 }
 0xae7   : > { %v937_v22 = vrot.slane %v927_v37, %v2451_v3 }
 0xae9   : > { %v938_v11 = vmul.f32 0.0, %v937_v22  ;;  %v939_v18 = vmul.f32 %v2590_v7, %v937_v22 }
 0xaeb   : > { %v940_v30 = vadd.f32 %v938_v11, %v909_v0  ;;  %v941_v32 = vadd.f32 %v939_v18, %v910_v24 }
 0xaed   : > { %976 = vperm.xlu0 %2121, %v940_v30   ;;  %944 = vperm.xlu1 %2120, %v940_v30  }
 0xaf1   : > { %2124 = vset.pattern.permute.xlu0 %v2291_v56  ;;  %949 = vperm.xlu1 %2120, %v941_v32  }
 0xaf2   : > { %1013 = vperm.xlu0 %2124, %v941_v32  }
 0xaf5   : > { %2122 = vset.pattern.permute.xlu1 %v2290_v43 }
 0xaf6   : > { %2126 = vset.pattern.permute.xlu0 %v2293_v50  ;;  %980 = vperm.xlu1 %2122, %v941_v32  }
 0xaf7   : > { %1075 = vperm.xlu0 %2126, %v940_v30  }
 0xafa   : > { %2123 = vset.pattern.permute.xlu1 %v2291_v56 }
 0xafb   : > { %2129 = vset.pattern.permute.xlu0 %v2294_v58  ;;  %1009 = vperm.xlu1 %2123, %v940_v30  }
 0xafc   : > { %1112 = vperm.xlu0 %2129, %v941_v32  }
 0xaff   : > { %2125 = vset.pattern.permute.xlu1 %v2292_v10 }
 0xb00   : > { %2131 = vset.pattern.permute.xlu0 %v2296_v45  ;;  %1042 = vperm.xlu1 %2125, %v940_v30  }
 0xb01   : > { %1174 = vperm.xlu0 %2131, %v940_v30  }
 0xb04   : > { %1046 = vperm.xlu1 %2125, %v941_v32  }
 0xb05   : > { %2134 = vset.pattern.permute.xlu0 %v2297_v12 }
 0xb06   : > { %1211 = vperm.xlu0 %2134, %v941_v32  }
 0xb08   : > { %2127 = vset.pattern.permute.xlu1 %v2293_v50 }
 0xb09   : > { %1079 = vperm.xlu1 %2127, %v941_v32  }
 0xb0a   : > { %2136 = vset.pattern.permute.xlu0 %v2299_v6 }
 0xb0b   : > { %1273 = vperm.xlu0 %2136, %v940_v30  }
 0xb0d   : > { %2128 = vset.pattern.permute.xlu1 %v2294_v58 }
 0xb0e   : > { %1108 = vperm.xlu1 %2128, %v940_v30  }
 0xb0f   : > { %2139 = vset.pattern.permute.xlu0 %v2300_v47 }
 0xb10   : > { %1310 = vperm.xlu0 %2139, %v941_v32  }
 0xb12   : > { %2130 = vset.pattern.permute.xlu1 %v2295_v16 }
 0xb13   : > { %1141 = vperm.xlu1 %2130, %v940_v30  }
 0xb14   : > { %2141 = vset.pattern.permute.xlu0 %v2302_v4 }
 0xb15   : > { %1372 = vperm.xlu0 %2141, %v940_v30  }
 0xb17   : > { %1145 = vperm.xlu1 %2130, %v941_v32  }
 0xb19   : > { %2144 = vset.pattern.permute.xlu0 %v2303_v55 }
 0xb1a   : > { %1409 = vperm.xlu0 %2144, %v941_v32  }
 0xb1b   : > { %2132 = vset.pattern.permute.xlu1 %v2296_v45 }
 0xb1c   : > { %1178 = vperm.xlu1 %2132, %v941_v32  }
 0xb1e   : > { %2146 = vset.pattern.permute.xlu0 %v2304_v46 }
 0xb20   : > { %2133 = vset.pattern.permute.xlu1 %v2297_v12 }
 0xb21   : > { %1207 = vperm.xlu1 %2133, %v940_v30  }
 0xb25   : > { %2135 = vset.pattern.permute.xlu1 %v2298_v40 }
 0xb26   : > { %1240 = vperm.xlu1 %2135, %v940_v30  }
 0xb2a   : > { %1244 = vperm.xlu1 %2135, %v941_v32  }
 0xb2e   : > { %2137 = vset.pattern.permute.xlu1 %v2299_v6  ;;  %v2003_v6 = vsel %vm961_vm5, 1.0, %v2289_v29  ;;  %vm1456_vm5 = vcmp.eq.s32.totalorder %v2359_v26, 15 }
 0xb2f   : > { %1277 = vperm.xlu1 %2137, %v941_v32  }
 0xb33   : > { %2138 = vset.pattern.permute.xlu1 %v2300_v47 }
 0xb34   : > { %1306 = vperm.xlu1 %2138, %v940_v30  }
 0xb38   : > { %2140 = vset.pattern.permute.xlu1 %v2301_v63 }
 0xb39   : > { %1339 = vperm.xlu1 %2140, %v940_v30  }
 0xb3d   : > { %1343 = vperm.xlu1 %2140, %v941_v32  }
 0xb41   : > { %2142 = vset.pattern.permute.xlu1 %v2302_v4 }
 0xb42   : > { %1376 = vperm.xlu1 %2142, %v941_v32  }
 0xb46   : > { %2143 = vset.pattern.permute.xlu1 %v2303_v55 }
 0xb47   : > { %1405 = vperm.xlu1 %2143, %v940_v30  }
 0xb4b   : > { %2145 = vset.pattern.permute.xlu1 %v2304_v46 }
 0xb4c   : > { %1438 = vperm.xlu1 %2145, %v940_v30  }
 0xb50   : > { %1442 = vperm.xlu1 %2145, %v941_v32  }
 0xb68   : > { %v945_v43 = vpop.permute.xlu1 %944  ;;  %v977_v49 = vpop.permute.xlu0 %976 }
 0xb69   : > { %v952_v10 = vmul.f32 0.0, %v945_v43  ;;  %2179 = vrcp.f32 %v945_v43 }
 0xb6a   : > { %2181 = vrcp.f32 %v977_v49 }
 0xb6c   : > { %v950_v56 = vpop.permute.xlu1 %949 }
 0xb6d   : > { %v953_v50 = vmul.f32 0.0, %v950_v56 }
 0xb6f   : > { %v954_v58 = vadd.f32 %v953_v50, %v952_v10 }
 0xb71   : > { %v955_v16 = vrot.slane %v954_v58, 4  ;;  %v981_v39 = vpop.permute.xlu1 %980 }
 0xb73   : > { %v956_v45 = vadd.f32 %v955_v16, %v954_v58  ;;  %v1014_v58 = vpop.permute.xlu0 %1013 }
 0xb75   : > { %v957_v12 = vrot.slane %v956_v45, 2 }
 0xb76   : > { %v2180_v4 = vpop.eup %2179  ;;  %v1010_v16 = vpop.permute.xlu1 %1009 }
 0xb77   : > { %v958_v40 = vadd.f32 %v957_v12, %v956_v45  ;;  %v2182_v18 = vpop.eup %2181  ;;  %2183 = vrcp.f32 %v1010_v16 }
 0xb79   : > { %v959_v41 = vrot.slane %v958_v40, 1 }
 0xb7b   : > { %v960_v47 = vadd.f32 %v959_v41, %v958_v40 }
 0xb7d   : > { %v964_v63 = vsub.f32 %v2003_v6, %v960_v47 }
 0xb7f   : > { %v966_v55 = vmul.f32 %v2180_v4, %v964_v63 }
 0xb81   : > { %v970_v46 = vrot.slane %v966_v55, %v2366_v36 }
 0xb83   : > { %v971_v59 = vmul.f32 %v2463_v15, %v970_v46  ;;  %v972_v42 = vmul.f32 0.0, %v970_v46  ;;  %v2004_v15 = vsel %vm994_vm6, 1.0, %v2289_v29  ;;  %vm1577_vm6 = vcmask 64512  }
 0xb85   : > { %v983_v57 = vmul.f32 %v977_v49, %v971_v59  ;;  %v984_v61 = vmul.f32 %v981_v39, %v972_v42  ;;  %v2184_v49 = vpop.eup %2183 }
 0xb87   : > { %v985_v62 = vsel %vm117_vm0, %v983_v57, 0.0  ;;  %v986_v0 = vsel %vm117_vm0, %v984_v61, 0.0  ;;  %v1043_v57 = vpop.permute.xlu1 %1042 }
 0xb88   : > { %v987_v24 = vadd.f32 %v986_v0, %v985_v62  ;;  %2185 = vrcp.f32 %v1043_v57 }
 0xb8a   : > { %v988_v5 = vrot.slane %v987_v24, 4 }
 0xb8c   : > { %v989_v27 = vadd.f32 %v988_v5, %v987_v24 }
 0xb8e   : > { %v990_v28 = vrot.slane %v989_v27, 2 }
 0xb90   : > { %v991_v60 = vadd.f32 %v990_v28, %v989_v27  ;;  %v1047_v27 = vpop.permute.xlu1 %1046 }
 0xb92   : > { %v992_v37 = vrot.slane %v991_v60, 1 }
 0xb94   : > { %v993_v22 = vadd.f32 %v992_v37, %v991_v60 }
 0xb96   : > { %v997_v11 = vsub.f32 %v2004_v15, %v993_v22 }
 0xb98   : > { %v999_v30 = vmul.f32 %v2182_v18, %v997_v11 }
 0xb9a   : > { %v1003_v32 = vrot.slane %v999_v30, %v2376_v51 }
 0xb9c   : > { %v1005_v43 = vmul.f32 0.0, %v1003_v32  ;;  %v1004_v56 = vmul.f32 %v2459_v13, %v1003_v32  ;;  %v2005_v13 = vsel %vm1027_vm7, 1.0, %v2289_v29 }
 0xb9e   : > { %v1007_v10 = vadd.f32 %v1005_v43, %v972_v42  ;;  %v1006_v50 = vadd.f32 %v1004_v56, %v971_v59 }
 0xba0   : > { %v1017_v45 = vmul.f32 %v1014_v58, %v1007_v10  ;;  %v1016_v12 = vmul.f32 %v1010_v16, %v1006_v50 }
 0xba2   : > { %v1019_v40 = vsel %vm117_vm0, %v1017_v45, 0.0  ;;  %v1018_v41 = vsel %vm117_vm0, %v1016_v12, 0.0 }
 0xba3   : > { %v1020_v6 = vadd.f32 %v1019_v40, %v1018_v41 }
 0xba5   : > { %v1021_v47 = vrot.slane %v1020_v6, 4 }
 0xba7   : > { %v1022_v63 = vadd.f32 %v1021_v47, %v1020_v6  ;;  %v1076_v6 = vpop.permute.xlu0 %1075  ;;  %v1080_v47 = vpop.permute.xlu1 %1079 }
 0xba8   : > { %2187 = vrcp.f32 %v1076_v6 }
 0xba9   : > { %v1023_v4 = vrot.slane %v1022_v63, 2 }
 0xbab   : > { %v1024_v55 = vadd.f32 %v1023_v4, %v1022_v63 }
 0xbad   : > { %v1025_v46 = vrot.slane %v1024_v55, 1 }
 0xbaf   : > { %v1026_v59 = vadd.f32 %v1025_v46, %v1024_v55 }
 0xbb1   : > { %v1030_v42 = vsub.f32 %v2005_v13, %v1026_v59 }
 0xbb3   : > { %v1032_v39 = vmul.f32 %v2184_v49, %v1030_v42 }
 0xbb5   : > { %v1036_v61 = vrot.slane %v1032_v39, %v2387_v1 }
 0xbb7   : > { %v1037_v62 = vmul.f32 %v2466_v17, %v1036_v61  ;;  %v1038_v0 = vmul.f32 0.0, %v1036_v61  ;;  %v2006_v17 = vsel %vm1060_vm8, 1.0, %v2289_v29 }
 0xbb9   : > { %v1039_v24 = vadd.f32 %v1037_v62, %v1006_v50  ;;  %v1040_v5 = vadd.f32 %v1038_v0, %v1007_v10  ;;  %v2186_v50 = vpop.eup %2185 }
 0xbba   : > { %v2188_v0 = vpop.eup %2187 }
 0xbbb   : > { %v1049_v28 = vmul.f32 %v1043_v57, %v1039_v24  ;;  %v1050_v60 = vmul.f32 %v1047_v27, %v1040_v5  ;;  %v2007_v57 = vsel %vm1093_vm9, 1.0, %v2289_v29 }
 0xbbd   : > { %v1051_v37 = vsel %vm117_vm0, %v1049_v28, 0.0  ;;  %v1052_v15 = vsel %vm117_vm0, %v1050_v60, 0.0 }
 0xbbe   : > { %v1053_v22 = vadd.f32 %v1052_v15, %v1051_v37  ;;  %v1113_v15 = vpop.permute.xlu0 %1112 }
 0xbc0   : > { %v1054_v11 = vrot.slane %v1053_v22, 4 }
 0xbc2   : > { %v1055_v18 = vadd.f32 %v1054_v11, %v1053_v22  ;;  %v1109_v22 = vpop.permute.xlu1 %1108 }
 0xbc3   : > { %2189 = vrcp.f32 %v1109_v22 }
 0xbc4   : > { %v1056_v30 = vrot.slane %v1055_v18, 2 }
 0xbc6   : > { %v1057_v32 = vadd.f32 %v1056_v30, %v1055_v18 }
 0xbc8   : > { %v1058_v43 = vrot.slane %v1057_v32, 1 }
 0xbca   : > { %v1059_v56 = vadd.f32 %v1058_v43, %v1057_v32 }
 0xbcc   : > { %v1063_v10 = vsub.f32 %v2006_v17, %v1059_v56 }
 0xbce   : > { %v1065_v58 = vmul.f32 %v2186_v50, %v1063_v10 }
 0xbd0   : > { %v1069_v16 = vrot.slane %v1065_v58, %v2400_v23 }
 0xbd2   : > { %v1070_v45 = vmul.f32 %v2473_v25, %v1069_v16  ;;  %v1071_v12 = vmul.f32 0.0, %v1069_v16 }
 0xbd4   : > { %v1072_v40 = vadd.f32 %v1070_v45, %v1039_v24  ;;  %v1073_v41 = vadd.f32 %v1071_v12, %v1040_v5  ;;  %v2190_v12 = vpop.eup %2189 }
 0xbd6   : > { %v1082_v63 = vmul.f32 %v1076_v6, %v1072_v40  ;;  %v1083_v4 = vmul.f32 %v1080_v47, %v1073_v41 }
 0xbd8   : > { %v1084_v55 = vsel %vm117_vm0, %v1082_v63, 0.0  ;;  %v1085_v46 = vsel %vm117_vm0, %v1083_v4, 0.0 }
 0xbd9   : > { %v1086_v13 = vadd.f32 %v1085_v46, %v1084_v55 }
 0xbdb   : > { %v1087_v59 = vrot.slane %v1086_v13, 4 }
 0xbdd   : > { %v1088_v42 = vadd.f32 %v1087_v59, %v1086_v13 }
 0xbdf   : > { %v1089_v49 = vrot.slane %v1088_v42, 2 }
 0xbe1   : > { %v1090_v39 = vadd.f32 %v1089_v49, %v1088_v42 }
 0xbe3   : > { %v1091_v25 = vrot.slane %v1090_v39, 1 }
 0xbe5   : > { %v1092_v61 = vadd.f32 %v1091_v25, %v1090_v39 }
 0xbe7   : > { %v1096_v62 = vsub.f32 %v2007_v57, %v1092_v61 }
 0xbe9   : > { %v1098_v24 = vmul.f32 %v2188_v0, %v1096_v62 }
 0xbeb   : > { %v1102_v5 = vrot.slane %v1098_v24, %v2415_v52 }
 0xbed   : > { %v1104_v27 = vmul.f32 0.0, %v1102_v5  ;;  %v1103_v28 = vmul.f32 %v2482_v33, %v1102_v5  ;;  %v2008_v33 = vsel %vm1126_vm10, 1.0, %v2289_v29 }
 0xbef   : > { %v1106_v60 = vadd.f32 %v1104_v27, %v1073_v41  ;;  %v1105_v37 = vadd.f32 %v1103_v28, %v1072_v40  ;;  %v1142_v41 = vpop.permute.xlu1 %1141 }
 0xbf0   : > { %2191 = vrcp.f32 %v1142_v41 }
 0xbf1   : > { %v1116_v11 = vmul.f32 %v1113_v15, %v1106_v60  ;;  %v1115_v18 = vmul.f32 %v1109_v22, %v1105_v37 }
 0xbf3   : > { %v1118_v30 = vsel %vm117_vm0, %v1116_v11, 0.0  ;;  %v1117_v32 = vsel %vm117_vm0, %v1115_v18, 0.0  ;;  %v1146_v46 = vpop.permute.xlu1 %1145  ;;  %v1175_v18 = vpop.permute.xlu0 %1174 }
 0xbf4   : > { %v1119_v43 = vadd.f32 %v1118_v30, %v1117_v32  ;;  %2193 = vrcp.f32 %v1175_v18 }
 0xbf6   : > { %v1120_v17 = vrot.slane %v1119_v43, 4 }
 0xbf7   : > { %v1179_v30 = vpop.permute.xlu1 %1178 }
 0xbf8   : > { %v1121_v56 = vadd.f32 %v1120_v17, %v1119_v43 }
 0xbfa   : > { %v1122_v10 = vrot.slane %v1121_v56, 2 }
 0xbfc   : > { %v1123_v50 = vadd.f32 %v1122_v10, %v1121_v56 }
 0xbfd   : > { %v2192_v27 = vpop.eup %2191 }
 0xbfe   : > { %v1124_v58 = vrot.slane %v1123_v50, 1 }
 0xc00   : > { %v1125_v16 = vadd.f32 %v1124_v58, %v1123_v50 }
 0xc02   : > { %v1129_v45 = vsub.f32 %v2008_v33, %v1125_v16 }
 0xc04   : > { %v1131_v40 = vmul.f32 %v2190_v12, %v1129_v45  ;;  %v2010_v45 = vsel %vm1192_vm12, 1.0, %v2289_v29 }
 0xc06   : > { %v1135_v6 = vrot.slane %v1131_v40, %v2428_v9 }
 0xc08   : > { %v1136_v47 = vmul.f32 %v2492_v14, %v1135_v6  ;;  %v1137_v63 = vmul.f32 0.0, %v1135_v6  ;;  %v2009_v14 = vsel %vm1159_vm11, 1.0, %v2289_v29 }
 0xc0a   : > { %v1138_v4 = vadd.f32 %v1136_v47, %v1105_v37  ;;  %v1139_v55 = vadd.f32 %v1137_v63, %v1106_v60 }
 0xc0c   : > { %v1148_v13 = vmul.f32 %v1142_v41, %v1138_v4  ;;  %v1149_v59 = vmul.f32 %v1146_v46, %v1139_v55  ;;  %v2194_v41 = vpop.eup %2193 }
 0xc0e   : > { %v1150_v42 = vsel %vm117_vm0, %v1148_v13, 0.0  ;;  %v1151_v49 = vsel %vm117_vm0, %v1149_v59, 0.0  ;;  %v1212_v13 = vpop.permute.xlu0 %1211  ;;  %v1208_v59 = vpop.permute.xlu1 %1207 }
 0xc0f   : > { %v1152_v39 = vadd.f32 %v1151_v49, %v1150_v42  ;;  %2195 = vrcp.f32 %v1212_v13 }
 0xc11   : > { %v1153_v25 = vrot.slane %v1152_v39, 4 }
 0xc13   : > { %v1154_v57 = vadd.f32 %v1153_v25, %v1152_v39 }
 0xc15   : > { %v1155_v61 = vrot.slane %v1154_v57, 2 }
 0xc17   : > { %v1156_v62 = vadd.f32 %v1155_v61, %v1154_v57 }
 0xc19   : > { %v1157_v0 = vrot.slane %v1156_v62, 1 }
 0xc1b   : > { %v1158_v24 = vadd.f32 %v1157_v0, %v1156_v62 }
 0xc1d   : > { %v1162_v5 = vsub.f32 %v2009_v14, %v1158_v24 }
 0xc1f   : > { %v1164_v28 = vmul.f32 %v2192_v27, %v1162_v5 }
 0xc21   : > { %v1168_v60 = vrot.slane %v1164_v28, %v2441_v38  ;;  %v2196_v28 = vpop.eup %2195 }
 0xc23   : > { %v1169_v37 = vmul.f32 %v2497_v48, %v1168_v60  ;;  %v1170_v15 = vmul.f32 0.0, %v1168_v60 }
 0xc25   : > { %v1171_v22 = vadd.f32 %v1169_v37, %v1138_v4  ;;  %v1172_v11 = vadd.f32 %v1170_v15, %v1139_v55  ;;  %v1241_v37 = vpop.permute.xlu1 %1240 }
 0xc27   : > { %v1181_v32 = vmul.f32 %v1175_v18, %v1171_v22  ;;  %v1182_v43 = vmul.f32 %v1179_v30, %v1172_v11 }
 0xc29   : > { %v1183_v17 = vsel %vm117_vm0, %v1181_v32, 0.0  ;;  %v1184_v56 = vsel %vm117_vm0, %v1182_v43, 0.0  ;;  %v1245_v32 = vpop.permute.xlu1 %1244 }
 0xc2a   : > { %v1185_v10 = vadd.f32 %v1184_v56, %v1183_v17  ;;  %2197 = vrcp.f32 %v1245_v32 }
 0xc2c   : > { %v1186_v50 = vrot.slane %v1185_v10, 4 }
 0xc2e   : > { %v1187_v58 = vadd.f32 %v1186_v50, %v1185_v10 }
 0xc30   : > { %v1188_v33 = vrot.slane %v1187_v58, 2 }
 0xc32   : > { %v1189_v16 = vadd.f32 %v1188_v33, %v1187_v58 }
 0xc34   : > { %v1190_v48 = vrot.slane %v1189_v16, 1 }
 0xc36   : > { %v1191_v12 = vadd.f32 %v1190_v48, %v1189_v16 }
 0xc38   : > { %v1195_v40 = vsub.f32 %v2010_v45, %v1191_v12 }
 0xc3a   : > { %v1197_v6 = vmul.f32 %v2194_v41, %v1195_v40  ;;  %v2198_v40 = vpop.eup %2197 }
 0xc3c   : > { %v1201_v47 = vrot.slane %v1197_v6, %v2451_v3 }
 0xc3e   : > { %v1203_v63 = vmul.f32 0.0, %v1201_v47  ;;  %v1202_v4 = vmul.f32 %v2505_v2, %v1201_v47  ;;  %v2011_v2 = vsel %vm1225_vm13, 1.0, %v2289_v29 }
 0xc40   : > { %v1205_v55 = vadd.f32 %v1203_v63, %v1172_v11  ;;  %v1204_v46 = vadd.f32 %v1202_v4, %v1171_v22 }
 0xc42   : > { %v1215_v42 = vmul.f32 %v1212_v13, %v1205_v55  ;;  %v1214_v49 = vmul.f32 %v1208_v59, %v1204_v46  ;;  %v1278_v13 = vpop.permute.xlu1 %1277 }
 0xc43   : > { %2199 = vrcp.f32 %v1278_v13 }
 0xc44   : > { %v1217_v39 = vsel %vm117_vm0, %v1215_v42, 0.0  ;;  %v1216_v25 = vsel %vm117_vm0, %v1214_v49, 0.0 }
 0xc45   : > { %v1218_v57 = vadd.f32 %v1217_v39, %v1216_v25 }
 0xc47   : > { %v1219_v61 = vrot.slane %v1218_v57, 4 }
 0xc49   : > { %v1220_v62 = vadd.f32 %v1219_v61, %v1218_v57 }
 0xc4b   : > { %v1221_v0 = vrot.slane %v1220_v62, 2 }
 0xc4d   : > { %v1222_v14 = vadd.f32 %v1221_v0, %v1220_v62 }
 0xc4f   : > { %v1223_v24 = vrot.slane %v1222_v14, 1 }
 0xc51   : > { %v1224_v5 = vadd.f32 %v1223_v24, %v1222_v14 }
 0xc53   : > { %v1228_v27 = vsub.f32 %v2011_v2, %v1224_v5  ;;  %v2200_v2 = vpop.eup %2199 }
 0xc55   : > { %v1230_v60 = vmul.f32 %v2196_v28, %v1228_v27 }
 0xc57   : > { %v1234_v15 = vrot.slane %v1230_v60, %v2366_v36 }
 0xc59   : > { %v1235_v22 = vmul.f32 0.0, %v1234_v15  ;;  %v1236_v11 = vmul.f32 %v2518_v44, %v1234_v15  ;;  %v2012_v44 = vsel %vm1258_vm14, 1.0, %v2289_v29 }
 0xc5b   : > { %v1237_v18 = vadd.f32 %v1235_v22, %v1204_v46  ;;  %v1238_v30 = vadd.f32 %v1236_v11, %v1205_v55  ;;  %v1274_v46 = vpop.permute.xlu0 %1273  ;;  %v1307_v11 = vpop.permute.xlu1 %1306 }
 0xc5d   : > { %v1247_v43 = vmul.f32 %v1241_v37, %v1237_v18  ;;  %v1248_v17 = vmul.f32 %v1245_v32, %v1238_v30 }
 0xc5f   : > { %v1249_v56 = vsel %vm117_vm0, %v1247_v43, 0.0  ;;  %v1250_v10 = vsel %vm117_vm0, %v1248_v17, 0.0  ;;  %v1311_v22 = vpop.permute.xlu0 %1310 }
 0xc60   : > { %v1251_v50 = vadd.f32 %v1250_v10, %v1249_v56  ;;  %2201 = vrcp.f32 %v1311_v22 }
 0xc62   : > { %v1252_v58 = vrot.slane %v1251_v50, 4 }
 0xc64   : > { %v1253_v33 = vadd.f32 %v1252_v58, %v1251_v50  ;;  %v2014_v58 = vsel %vm1324_vm1, 1.0, %v2289_v29 }
 0xc66   : > { %v1254_v16 = vrot.slane %v1253_v33, 2 }
 0xc68   : > { %v1255_v48 = vadd.f32 %v1254_v16, %v1253_v33 }
 0xc6a   : > { %v1256_v36 = vrot.slane %v1255_v48, 1 }
 0xc6c   : > { %v1257_v45 = vadd.f32 %v1256_v36, %v1255_v48 }
 0xc6d   : > { %v2202_v48 = vpop.eup %2201 }
 0xc6e   : > { %v1261_v12 = vsub.f32 %v2012_v44, %v1257_v45  ;;  %v2688_v44 = vld [vmem:[%s2331_s11] sm:$0xff] }
 0xc6f   : > { %v2692_v45 = vmul.f32 %v2688_v44, %v2688_v44 }
 0xc70   : > { %v1263_v41 = vmul.f32 %v2198_v40, %v1261_v12  ;;  %v2695_v12 = vld [vmem:[%s2331_s11 + $0x8] sm:$0xff] }
 0xc71   : > { %v2699_v40 = vmul.f32 %v2695_v12, %v2695_v12  ;;  %1726 = vrot.lane.b32.xlu0 %v2692_v45, %s2305_s12 }
 0xc72   : > { %v1267_v6 = vrot.slane %v1263_v41, %v2376_v51  ;;  %v1340_v41 = vpop.permute.xlu1 %1339 }
 0xc73   : > { %1728 = vrot.lane.b32.xlu1 %v2699_v40, %s2305_s12 }
 0xc74   : > { %v1269_v47 = vmul.f32 %v2529_v31, %v1267_v6  ;;  %v1268_v63 = vmul.f32 0.0, %v1267_v6  ;;  %v2013_v31 = vsel %vm1291_vm15, 1.0, %v2289_v29 }
 0xc76   : > { %v1271_v4 = vadd.f32 %v1269_v47, %v1238_v30  ;;  %v1270_v55 = vadd.f32 %v1268_v63, %v1237_v18  ;;  %v2707_v47 = vld [vmem:[%s2331_s11 + $0x10] sm:$0xff] }
 0xc77   : > { %v2711_v63 = vmul.f32 %v2707_v47, %v2707_v47 }
 0xc78   : > { %v1281_v59 = vmul.f32 %v1278_v13, %v1271_v4  ;;  %v1280_v42 = vmul.f32 %v1274_v46, %v1270_v55 }
 0xc79   : > { %1730 = vrot.lane.b32.xlu1 %v2711_v63, %s2305_s12 }
 0xc7a   : > { %v1283_v49 = vsel %vm117_vm0, %v1281_v59, 0.0  ;;  %v1282_v39 = vsel %vm117_vm0, %v1280_v42, 0.0 }
 0xc7b   : > { %v1284_v25 = vadd.f32 %v1283_v49, %v1282_v39 }
 0xc7d   : > { %v1285_v57 = vrot.slane %v1284_v25, 4 }
 0xc7f   : > { %v1286_v61 = vadd.f32 %v1285_v57, %v1284_v25 }
 0xc81   : > { %v1287_v62 = vrot.slane %v1286_v61, 2 }
 0xc83   : > { %v1288_v0 = vadd.f32 %v1287_v62, %v1286_v61 }
 0xc85   : > { %v1289_v51 = vrot.slane %v1288_v0, 1 }
 0xc87   : > { %v1290_v14 = vadd.f32 %v1289_v51, %v1288_v0  ;;  %v2015_v51 = vsel %vm1357_vm2, 1.0, %v2289_v29 }
 0xc89   : > { %v1294_v24 = vsub.f32 %v2013_v31, %v1290_v14 }
 0xc8b   : > { %v1296_v5 = vmul.f32 %v2200_v2, %v1294_v24 }
 0xc8d   : > { %v1300_v27 = vrot.slane %v1296_v5, %v2387_v1 }
 0xc8f   : > { %v1301_v28 = vmul.f32 0.0, %v1300_v27  ;;  %v1302_v60 = vmul.f32 %v2539_v54, %v1300_v27 }
 0xc91   : > { %v1303_v37 = vadd.f32 %v1301_v28, %v1270_v55  ;;  %v1304_v15 = vadd.f32 %v1302_v60, %v1271_v4 }
 0xc93   : > { %v1314_v18 = vmul.f32 %v1311_v22, %v1304_v15  ;;  %v1313_v30 = vmul.f32 %v1307_v11, %v1303_v37 }
 0xc95   : > { %v1316_v32 = vsel %vm117_vm0, %v1314_v18, 0.0  ;;  %v1315_v43 = vsel %vm117_vm0, %v1313_v30, 0.0 }
 0xc96   : > { %v1317_v17 = vadd.f32 %v1316_v32, %v1315_v43 }
 0xc98   : > { %v1318_v56 = vrot.slane %v1317_v17, 4 }
 0xc9a   : > { %v1319_v10 = vadd.f32 %v1318_v56, %v1317_v17 }
 0xc9c   : > { %v1320_v1 = vrot.slane %v1319_v10, 2 }
 0xc9e   : > { %v1321_v50 = vadd.f32 %v1320_v1, %v1319_v10 }
 0xca0   : > { %v1322_v54 = vrot.slane %v1321_v50, 1 }
 0xca2   : > { %v1323_v33 = vadd.f32 %v1322_v54, %v1321_v50 }
 0xca4   : > { %v1327_v16 = vsub.f32 %v2014_v58, %v1323_v33 }
 0xca6   : > { %v1329_v36 = vmul.f32 %v2202_v48, %v1327_v16 }
 0xca8   : > { %v1333_v6 = vrot.slane %v1329_v36, %v2400_v23  ;;  %v1344_v23 = vpop.permute.xlu1 %1343 }
 0xca9   : > { %2203 = vrcp.f32 %v1344_v23 }
 0xcaa   : > { %v1334_v4 = vmul.f32 0.0, %v1333_v6  ;;  %v1335_v55 = vmul.f32 %v2550_v35, %v1333_v6 }
 0xcac   : > { %v1336_v46 = vadd.f32 %v1334_v4, %v1303_v37  ;;  %v1337_v13 = vadd.f32 %v1335_v55, %v1304_v15  ;;  %v1373_v15 = vpop.permute.xlu0 %1372  ;;  %v1377_v22 = vpop.permute.xlu1 %1376 }
 0xcad   : > { %2205 = vrcp.f32 %v1377_v22 }
 0xcae   : > { %v1346_v59 = vmul.f32 %v1340_v41, %v1336_v46  ;;  %v1347_v42 = vmul.f32 %v1344_v23, %v1337_v13 }
 0xcb0   : > { %v1348_v49 = vsel %vm117_vm0, %v1346_v59, 0.0  ;;  %v1349_v39 = vsel %vm117_vm0, %v1347_v42, 0.0  ;;  %v1410_v4 = vpop.permute.xlu0 %1409  ;;  %v1406_v55 = vpop.permute.xlu1 %1405 }
 0xcb1   : > { %v1350_v25 = vadd.f32 %v1349_v39, %v1348_v49  ;;  %2207 = vrcp.f32 %v1410_v4 }
 0xcb3   : > { %v1351_v57 = vrot.slane %v1350_v25, 4 }
 0xcb5   : > { %v1352_v61 = vadd.f32 %v1351_v57, %v1350_v25 }
 0xcb6   : > { %v2204_v24 = vpop.eup %2203 }
 0xcb7   : > { %v1353_v62 = vrot.slane %v1352_v61, 2 }
 0xcb9   : > { %v1354_v0 = vadd.f32 %v1353_v62, %v1352_v61 }
 0xcba   : > { %v2206_v58 = vpop.eup %2205 }
 0xcbb   : > { %v1355_v35 = vrot.slane %v1354_v0, 1 }
 0xcbd   : > { %v1356_v31 = vadd.f32 %v1355_v35, %v1354_v0 }
 0xcbe   : > { %v2208_v0 = vpop.eup %2207 }
 0xcbf   : > { %v1360_v14 = vsub.f32 %v2015_v51, %v1356_v31  ;;  %v1439_v51 = vpop.permute.xlu1 %1438 }
 0xcc1   : > { %v1362_v2 = vmul.f32 %v2204_v24, %v1360_v14 }
 0xcc3   : > { %v1366_v5 = vrot.slane %v1362_v2, %v2415_v52 }
 0xcc5   : > { %v1368_v27 = vmul.f32 %v2561_v8, %v1366_v5  ;;  %v1367_v28 = vmul.f32 0.0, %v1366_v5  ;;  %v2016_v8 = vsel %vm1390_vm3, 1.0, %v2289_v29 }
 0xcc7   : > { %v1370_v60 = vadd.f32 %v1368_v27, %v1337_v13  ;;  %v1369_v37 = vadd.f32 %v1367_v28, %v1336_v46  ;;  %v1443_v27 = vpop.permute.xlu1 %1442 }
 0xcc8   : > { %2209 = vrcp.f32 %v1443_v27 }
 0xcc9   : > { %v1380_v11 = vmul.f32 %v1377_v22, %v1370_v60  ;;  %v1379_v18 = vmul.f32 %v1373_v15, %v1369_v37 }
 0xccb   : > { %v1382_v30 = vsel %vm117_vm0, %v1380_v11, 0.0  ;;  %v1381_v32 = vsel %vm117_vm0, %v1379_v18, 0.0 }
 0xccc   : > { %v1383_v43 = vadd.f32 %v1382_v30, %v1381_v32 }
 0xcce   : > { %v1384_v17 = vrot.slane %v1383_v43, 4 }
 0xcd0   : > { %v1385_v56 = vadd.f32 %v1384_v17, %v1383_v43 }
 0xcd2   : > { %v1386_v10 = vrot.slane %v1385_v56, 2 }
 0xcd4   : > { %v1387_v1 = vadd.f32 %v1386_v10, %v1385_v56 }
 0xcd5   : > { %v2210_v56 = vpop.eup %2209 }
 0xcd6   : > { %v1388_v52 = vrot.slane %v1387_v1, 1 }
 0xcd8   : > { %v1389_v50 = vadd.f32 %v1388_v52, %v1387_v1 }
 0xcda   : > { %v1393_v54 = vsub.f32 %v2016_v8, %v1389_v50 }
 0xcdc   : > { %v1395_v33 = vmul.f32 %v2206_v58, %v1393_v54 }
 0xcde   : > { %v1399_v16 = vrot.slane %v1395_v33, %v2428_v9 }
 0xce0   : > { %v1400_v48 = vmul.f32 0.0, %v1399_v16  ;;  %v1401_v36 = vmul.f32 %v2571_v34, %v1399_v16  ;;  %v2017_v34 = vsel %vm1423_vm4, 1.0, %v2289_v29 }
 0xce2   : > { %v1402_v41 = vadd.f32 %v1400_v48, %v1369_v37  ;;  %v1403_v6 = vadd.f32 %v1401_v36, %v1370_v60  ;;  %v2772_v48 = vld [vmem:[%s2331_s11 + $0x18] sm:$0xff] }
 0xce3   : > { %v2776_v36 = vmul.f32 %v2772_v48, %v2772_v48 }
 0xce4   : > { %v1413_v46 = vmul.f32 %v1410_v4, %v1403_v6  ;;  %v1412_v13 = vmul.f32 %v1406_v55, %v1402_v41 }
 0xce5   : > { %v1729_v4 = vpop.permute.xlu1 %1728 }
 0xce6   : > { %v1415_v23 = vsel %vm117_vm0, %v1413_v46, 0.0  ;;  %v1414_v59 = vsel %vm117_vm0, %v1412_v13, 0.0  ;;  %v1741_v46 = vsel %vm1577_vm6, %v1729_v4, 0.0 }
 0xce7   : > { %v1416_v42 = vadd.f32 %v1415_v23, %v1414_v59 }
 0xce9   : > { %v1417_v49 = vrot.slane %v1416_v42, 4 }
 0xceb   : > { %v1418_v39 = vadd.f32 %v1417_v49, %v1416_v42  ;;  %v1731_v13 = vpop.permute.xlu1 %1730 }
 0xcec   : > { %v1744_v59 = vsel %vm1577_vm6, %v1731_v13, 0.0 }
 0xced   : > { %v1419_v25 = vrot.slane %v1418_v39, 2 }
 0xcef   : > { %v1420_v57 = vadd.f32 %v1419_v25, %v1418_v39 }
 0xcf1   : > { %v1421_v9 = vrot.slane %v1420_v57, 1 }
 0xcf3   : > { %v1422_v61 = vadd.f32 %v1421_v9, %v1420_v57 }
 0xcf5   : > { %v1426_v62 = vsub.f32 %v2017_v34, %v1422_v61 }
 0xcf7   : > { %v1428_v35 = vmul.f32 %v2208_v0, %v1426_v62 }
 0xcf9   : > { %v1432_v31 = vrot.slane %v1428_v35, %v2441_v38 }
 0xcfb   : > { %v1433_v14 = vmul.f32 0.0, %v1432_v31  ;;  %v1434_v24 = vmul.f32 %v2582_v53, %v1432_v31  ;;  %v2018_v53 = vsel %vm1456_vm5, 1.0, %v2289_v29 }
 0xcfd   : > { %v1435_v2 = vadd.f32 %v1433_v14, %v1402_v41  ;;  %v1436_v5 = vadd.f32 %v1434_v24, %v1403_v6  ;;  %v1727_v41 = vpop.permute.xlu0 %1726  ;;  %v1578_v14 = vsel %vm1577_vm6, %v2692_v45, 0.0 }
 0xcfe   : > { %v1738_v55 = vsel %vm1577_vm6, %v1727_v41, 0.0 }
 0xcff   : > { %v1445_v28 = vmul.f32 %v1439_v51, %v1435_v2  ;;  %v1446_v60 = vmul.f32 %v1443_v27, %v1436_v5 }
 0xd01   : > { %v1447_v37 = vsel %vm117_vm0, %v1445_v28, 0.0  ;;  %v1448_v15 = vsel %vm117_vm0, %v1446_v60, 0.0 }
 0xd02   : > { %v1449_v22 = vadd.f32 %v1448_v15, %v1447_v37 }
 0xd04   : > { %v1450_v11 = vrot.slane %v1449_v22, 4 }
 0xd06   : > { %v1451_v18 = vadd.f32 %v1450_v11, %v1449_v22 }
 0xd08   : > { %v1452_v30 = vrot.slane %v1451_v18, 2 }
 0xd0a   : > { %v1453_v32 = vadd.f32 %v1452_v30, %v1451_v18 }
 0xd0c   : > { %v1454_v38 = vrot.slane %v1453_v32, 1 }
 0xd0e   : > { %v1455_v43 = vadd.f32 %v1454_v38, %v1453_v32 }
 0xd10   : > { %v1459_v17 = vsub.f32 %v2018_v53, %v1455_v43 }
 0xd12   : > { %v1461_v10 = vmul.f32 %v2210_v56, %v1459_v17  ;;  %v1584_v56 = vsel %vm1577_vm6, %v2711_v63, 0.0 }
 0xd14   : > { %v1465_v1 = vrot.slane %v1461_v10, %v2451_v3 }
 0xd16   : > { %v1466_v52 = vmul.f32 0.0, %v1465_v1  ;;  %v1467_v8 = vmul.f32 %v2590_v7, %v1465_v1  ;;  %v1587_v1 = vsel %vm1577_vm6, %v2776_v36, 0.0 }
 0xd18   : > { %v1469_v50 = vadd.f32 %v1467_v8, %v1436_v5  ;;  %v1468_v54 = vadd.f32 %v1466_v52, %v1435_v2 }
 0xd1a   : > { %2051 = vmatprep.subr.msk.mxu1 %vm117_vm0, %v1469_v50 }
 0xd1b   : > { %2052 = vmatpush3.xpose.msk.msra.mxu1 %vm117_vm0, %v1469_v50 }
 0xd1c   : > { %2053 = vmatprep.subr.msk.mxu1 %vm117_vm0, %v1468_v54 }
 0xd1f   : > { %2054 = vmatpush3.xpose.msk.msra.mxu1 %vm117_vm0, %v1468_v54 }
 0xd22   : > { %2056 = vmatmul.mubr.msk.f32.vlgmr.msra.gmra.mxu1 %vm117_vm0, %v2343_v20 }
 0xd23   : > { %2058 = vmatprep.mubr.msk.f32.mxu1 %vm117_vm0, %v2345_v21 }
 0xd26   : > { %2059 = vmatmul.mubr.msk.f32.gmra.mxu1 %vm117_vm0, %v2341_v19 }
 0xde2   : > { %v2750_v26 = vpop.f32.mrf.mxu1 }
 0xde3   : > { %v1631_v29 = vmul.f32 %v2750_v26, %v2750_v26 }
 0xde4   : > { %v2754_v3 = vpop.f32.mrf.mxu1 }
 0xde5   : > { %v1630_v7 = vmul.f32 %v2754_v3, %v2754_v3  ;;  %1640 = vrot.lane.b32.xlu1 %v1631_v29, %s2305_s12  ;;  %v1793_v19 = vsel %vm1577_vm6, %v1631_v29, 0.0 }
 0xde6   : > { %v2762_v21 = vpop.f32.mrf.mxu1 }
 0xde7   : > { %1638 = vrot.lane.b32.xlu0 %v1630_v7, %s2305_s12  ;;  %v1790_v20 = vsel %vm1577_vm6, %v1630_v7, 0.0  ;;  %v1633_v58 = vmul.f32 %v2762_v21, %v2762_v21 }
 0xde8   : > { %v2766_v33 = vpop.f32.mrf.mxu1 }
 0xde9   : > { %v1632_v16 = vmul.f32 %v2766_v33, %v2766_v33  ;;  %v1799_v23 = vsel %vm1577_vm6, %v1633_v58, 0.0 }
 0xdeb   : > { %v1796_v6 = vsel %vm1577_vm6, %v1632_v16, 0.0 }
 0xe06   : > { %1791 = vadd.xlane.f32.xlu0 %v1790_v20 }
 0xe09   : > { %1794 = vadd.xlane.f32.xlu1 %v1793_v19 }
 0xe1a   : > { %1644 = vrot.lane.b32.xlu1 %v1633_v58, %s2305_s12 }
 0xe1c   : > { %1642 = vrot.lane.b32.xlu0 %v1632_v16, %s2305_s12 }
 0xe1e   : > { %1732 = vrot.lane.b32.xlu1 %v2776_v36, %s2305_s12 }
 0xe3b   : > { %1797 = vadd.xlane.f32.xlu0 %v1796_v6 }
 0xe3f   : > { %1739 = vadd.xlane.f32.xlu0 %v1738_v55 }
 0xe42   : > { %1800 = vadd.xlane.f32.xlu1 %v1799_v23 }
 0xe43   : > { %1742 = vadd.xlane.f32.xlu0 %v1741_v46 }
 0xe46   : > { %1745 = vadd.xlane.f32.xlu1 %v1744_v59 }
 0xe57   : > { %v1641_v42 = vpop.permute.xlu1 %1640 }
 0xe58   : > { %v1653_v49 = vsel %vm1577_vm6, %v1641_v42, 0.0 }
 0xe59   : > { %v1639_v39 = vpop.permute.xlu0 %1638  ;;  %1654 = vadd.xlane.f32.xlu0 %v1653_v49 }
 0xe5a   : > { %v1650_v25 = vsel %vm1577_vm6, %v1639_v39, 0.0 }
 0xe5d   : > { %1651 = vadd.xlane.f32.xlu0 %v1650_v25 }
 0xe8f   : > { %v1792_v57 = vpop.xlane.xlu0 %1791 }
 0xe90   : > { %2211 = vrsqrt.f32 %v1792_v57  ;;  %vm1804_vm0 = vcmp.eq.f32.partialorder %v1792_v57, inf  ;;  %v1807_v2 = vand.u32 2147483648, %v1792_v57  ;;  %vm1806_vm7 = vcmp.eq.f32.partialorder %v1792_v57, 0.0 }
 0xe92   : > { %v1795_v9 = vpop.xlane.xlu1 %1794 }
 0xe93   : > { %2213 = vrsqrt.f32 %v1795_v9  ;;  %v1643_v62 = vpop.permute.xlu0 %1642  ;;  %vm1811_vm8 = vcmp.eq.f32.partialorder %v1795_v9, inf  ;;  %v1814_v15 = vand.u32 2147483648, %v1795_v9  ;;  %vm1813_vm9 = vcmp.eq.f32.partialorder %v1795_v9, 0.0 }
 0xe94   : > { %v1656_v51 = vsel %vm1577_vm6, %v1643_v62, 0.0 }
 0xe96   : > { %v1645_v34 = vpop.permute.xlu1 %1644 }
 0xe97   : > { %v1659_v61 = vsel %vm1577_vm6, %v1645_v34, 0.0 }
 0xe98   : > { %1660 = vadd.xlane.f32.xlu0 %v1659_v61 }
 0xe9a   : > { %v1733_v0 = vpop.permute.xlu1 %1732 }
 0xe9b   : > { %v1747_v35 = vsel %vm1577_vm6, %v1733_v0, 0.0 }
 0xe9c   : > { %1657 = vadd.xlane.f32.xlu0 %v1656_v51  ;;  %1748 = vadd.xlane.f32.xlu1 %v1747_v35 }
 0xe9d   : > { %v2212_v31 = vpop.eup %2211 }
 0xe9e   : > { %v1803_v24 = vmul.f32 %v2212_v31, %v1792_v57 }
 0xea0   : > { %v2214_v5 = vpop.eup %2213  ;;  %v1805_v27 = vsel %vm1804_vm0, %v1792_v57, %v1803_v24  ;;  %1579 = vadd.xlane.f32.xlu0 %v1578_v14 }
 0xea1   : > { %v1808_v28 = vsel %vm1806_vm7, %v1807_v2, %v1805_v27  ;;  %v1810_v60 = vmul.f32 %v2214_v5, %v1795_v9  ;;  %v1581_v27 = vsel %vm1577_vm6, %v2699_v40, 0.0 }
 0xea2   : > { %v1830_v37 = vmax.f32 %v1808_v28, 1e-12 }
 0xea3   : > { %v1812_v22 = vsel %vm1811_vm8, %v1795_v9, %v1810_v60 }
 0xea4   : > { %2215 = vrcp.f32 %v1830_v37  ;;  %v1815_v11 = vsel %vm1813_vm9, %v1814_v15, %v1812_v22 }
 0xea5   : > { %v1831_v18 = vmax.f32 %v1815_v11, 1e-12 }
 0xea7   : > { %2217 = vrcp.f32 %v1831_v18 }
 0xeb1   : > { %v2216_v30 = vpop.eup %2215 }
 0xeb2   : > { %v1835_v32 = vmul.f32 %v2216_v30, %v2754_v3 }
 0xeb4   : > { %v2218_v45 = vpop.eup %2217 }
 0xeb5   : > { %v1837_v38 = vmul.f32 %v2218_v45, %v2750_v26 }
 0xeb6   : > { %1846 = vrot.lane.b32.xlu0 %v1835_v32, %s2306_s13 }
 0xeb7   : > { %1848 = vrot.lane.b32.xlu1 %v1837_v38, %s2306_s13 }
 0xec4   : > { %v1798_v53 = vpop.xlane.xlu0 %1797 }
 0xec5   : > { %2219 = vrsqrt.f32 %v1798_v53  ;;  %vm1818_vm10 = vcmp.eq.f32.partialorder %v1798_v53, inf  ;;  %v1821_v54 = vand.u32 2147483648, %v1798_v53  ;;  %vm1820_vm11 = vcmp.eq.f32.partialorder %v1798_v53, 0.0 }
 0xec8   : > { %v1740_v8 = vpop.xlane.xlu0 %1739 }
 0xec9   : > { %vm1752_vm2 = vcmp.eq.f32.partialorder %v1740_v8, inf  ;;  %v1755_v14 = vand.u32 2147483648, %v1740_v8  ;;  %vm1754_vm4 = vcmp.eq.f32.partialorder %v1740_v8, 0.0 }
 0xecb   : > { %v1801_v43 = vpop.xlane.xlu1 %1800 }
 0xecc   : > { %2221 = vrsqrt.f32 %v1801_v43  ;;  %vm1825_vm12 = vcmp.eq.f32.partialorder %v1801_v43, inf  ;;  %v1828_v20 = vand.u32 2147483648, %v1801_v43  ;;  %vm1827_vm13 = vcmp.eq.f32.partialorder %v1801_v43, 0.0  ;;  %v2801_v41 = vpop.xlane.xlu0 %1742 }
 0xecd   : > { %vm1759_vm5 = vcmp.eq.f32.partialorder %v2801_v41, inf  ;;  %v1762_v30 = vand.u32 2147483648, %v2801_v41  ;;  %vm1761_vm0 = vcmp.eq.f32.partialorder %v2801_v41, 0.0 }
 0xecf   : > { %v1746_v32 = vpop.xlane.xlu1 %1745 }
 0xed2   : > { %v2220_v17 = vpop.eup %2219 }
 0xed3   : > { %v1817_v10 = vmul.f32 %v2220_v17, %v1798_v53 }
 0xed5   : > { %1585 = vadd.xlane.f32.xlu0 %v1584_v56  ;;  %v1819_v52 = vsel %vm1818_vm10, %v1798_v53, %v1817_v10 }
 0xed6   : > { %v1822_v7 = vsel %vm1820_vm11, %v1821_v54, %v1819_v52 }
 0xed7   : > { %v1832_v63 = vmax.f32 %v1822_v7, 1e-12 }
 0xed9   : > { %v2222_v50 = vpop.eup %2221  ;;  %1588 = vadd.xlane.f32.xlu0 %v1587_v1 }
 0xeda   : > { %v1824_v29 = vmul.f32 %v2222_v50, %v1801_v43 }
 0xedc   : > { %v1826_v19 = vsel %vm1825_vm12, %v1801_v43, %v1824_v29  ;;  %vm1766_vm12 = vcmp.eq.f32.partialorder %v1746_v32, inf }
 0xedd   : > { %v1829_v58 = vsel %vm1827_vm13, %v1828_v20, %v1826_v19 }
 0xede   : > { %v1833_v16 = vmax.f32 %v1829_v58, 1e-12 }
 0xee0   : > { %2223 = vrcp.f32 %v1833_v16 }
 0xee1   : > { %2225 = vrcp.f32 %v1832_v63 }
 0xee2   : > { %v1655_v36 = vpop.xlane.xlu0 %1654 }
 0xee3   : > { %vm1671_vm1 = vcmp.eq.f32.partialorder %v1655_v36, inf  ;;  %v1674_v51 = vand.u32 2147483648, %v1655_v36  ;;  %vm1673_vm3 = vcmp.eq.f32.partialorder %v1655_v36, 0.0 }
 0xee6   : > { %v1652_v6 = vpop.xlane.xlu0 %1651 }
 0xee7   : > { %2227 = vrsqrt.f32 %v1652_v6  ;;  %vm1664_vm14 = vcmp.eq.f32.partialorder %v1652_v6, inf  ;;  %v1667_v42 = vand.u32 2147483648, %v1652_v6  ;;  %vm1666_vm15 = vcmp.eq.f32.partialorder %v1652_v6, 0.0 }
 0xee8   : > { %2229 = vrsqrt.f32 %v1655_v36 }
 0xeed   : > { %v2224_v4 = vpop.eup %2223 }
 0xeee   : > { %v1841_v55 = vmul.f32 %v2224_v4, %v2762_v21  ;;  %v2226_v46 = vpop.eup %2225 }
 0xeef   : > { %v1839_v13 = vmul.f32 %v2226_v46, %v2766_v33 }
 0xef0   : > { %1852 = vrot.lane.b32.xlu1 %v1841_v55, %s2306_s13 }
 0xef4   : > { %v2228_v23 = vpop.eup %2227  ;;  %1850 = vrot.lane.b32.xlu1 %v1839_v13, %s2306_s13 }
 0xef5   : > { %v1663_v59 = vmul.f32 %v2228_v23, %v1652_v6  ;;  %v2230_v57 = vpop.eup %2229 }
 0xef6   : > { %v1670_v34 = vmul.f32 %v2230_v57, %v1655_v36 }
 0xef7   : > { %v1665_v49 = vsel %vm1664_vm14, %v1652_v6, %v1663_v59  ;;  %vm1768_vm14 = vcmp.eq.f32.partialorder %v1746_v32, 0.0 }
 0xef8   : > { %v1668_v39 = vsel %vm1666_vm15, %v1667_v42, %v1665_v49  ;;  %v1672_v0 = vsel %vm1671_vm1, %v1655_v36, %v1670_v34 }
 0xef9   : > { %v1690_v25 = vmax.f32 %v1668_v39, 1e-12  ;;  %v1675_v31 = vsel %vm1673_vm3, %v1674_v51, %v1672_v0 }
 0xefa   : > { %v1691_v2 = vmax.f32 %v1675_v31, 1e-12 }
 0xefb   : > { %2231 = vrcp.f32 %v1690_v25 }
 0xefc   : > { %2233 = vrsqrt.f32 %v1740_v8 }
 0xefd   : > { %2235 = vrsqrt.f32 %v2801_v41 }
 0xefe   : > { %2237 = vrcp.f32 %v1691_v2 }
 0xf08   : > { %v2232_v9 = vpop.eup %2231 }
 0xf09   : > { %v1695_v61 = vmul.f32 %v2232_v9, %v2754_v3  ;;  %v2234_v62 = vpop.eup %2233  ;;  %v1769_v9 = vand.u32 2147483648, %v1746_v32 }
 0xf0a   : > { %v1751_v35 = vmul.f32 %v2234_v62, %v1740_v8  ;;  %v2236_v60 = vpop.eup %2235 }
 0xf0b   : > { %1706 = vrot.lane.b32.xlu0 %v1695_v61, %s2305_s12  ;;  %v2238_v37 = vpop.eup %2237  ;;  %v1758_v22 = vmul.f32 %v2236_v60, %v2801_v41 }
 0xf0c   : > { %v1753_v24 = vsel %vm1752_vm2, %v1740_v8, %v1751_v35  ;;  %v1697_v11 = vmul.f32 %v2238_v37, %v2750_v26 }
 0xf0d   : > { %v1756_v5 = vsel %vm1754_vm4, %v1755_v14, %v1753_v24  ;;  %v1760_v45 = vsel %vm1759_vm5, %v2801_v41, %v1758_v22 }
 0xf0e   : > { %v1778_v3 = vmax.f32 %v1756_v5, 1e-12  ;;  %v1763_v43 = vsel %vm1761_vm0, %v1762_v30, %v1760_v45 }
 0xf0f   : > { %v1779_v52 = vmax.f32 %v1763_v43, 1e-12 }
 0xf10   : > { %2239 = vrcp.f32 %v1778_v3 }
 0xf18   : > { %1582 = vadd.xlane.f32.xlu1 %v1581_v27 }
 0xf1d   : > { %v2240_v18 = vpop.eup %2239 }
 0xf1e   : > { %v1783_v38 = vmul.f32 %v2688_v44, %v2240_v18 }
 0xf21   : > { %v1661_v28 = vpop.xlane.xlu0 %1660 }
 0xf22   : > { %2241 = vrsqrt.f32 %v1661_v28  ;;  %vm1685_vm7 = vcmp.eq.f32.partialorder %v1661_v28, inf  ;;  %v1688_v8 = vand.u32 2147483648, %v1661_v28  ;;  %vm1687_vm8 = vcmp.eq.f32.partialorder %v1661_v28, 0.0 }
 0xf25   : > { %v1658_v15 = vpop.xlane.xlu0 %1657  ;;  %v1749_v10 = vpop.xlane.xlu1 %1748 }
 0xf26   : > { %2243 = vrsqrt.f32 %v1658_v15  ;;  %vm1678_vm9 = vcmp.eq.f32.partialorder %v1658_v15, inf  ;;  %v1681_v19 = vand.u32 2147483648, %v1658_v15  ;;  %vm1680_vm10 = vcmp.eq.f32.partialorder %v1658_v15, 0.0 }
 0xf27   : > { %2245 = vrsqrt.f32 %v1749_v10  ;;  %vm1773_vm11 = vcmp.eq.f32.partialorder %v1749_v10, inf  ;;  %v1776_v39 = vand.u32 2147483648, %v1749_v10  ;;  %vm1775_vm13 = vcmp.eq.f32.partialorder %v1749_v10, 0.0 }
 0xf28   : > { %2247 = vrcp.f32 %v1779_v52 }
 0xf29   : > { %v2815_v40 = vpop.xlane.xlu0 %1579  ;;  %1708 = vrot.lane.b32.xlu1 %v1697_v11, %s2305_s12  ;;  %v1849_v13 = vpop.permute.xlu1 %1848 }
 0xf2a   : > { %vm1592_vm15 = vcmp.eq.f32.partialorder %v2815_v40, inf  ;;  %vm1594_vm2 = vcmp.eq.f32.partialorder %v2815_v40, 0.0 }
 0xf2d   : > { %v1847_v53 = vpop.permute.xlu0 %1846 }
 0xf2e   : > { %v1858_v17 = vsub.f32 %v1783_v38, %v1847_v53 }
 0xf2f   : > { %v2242_v26 = vpop.eup %2241 }
 0xf30   : > { %v1684_v56 = vmul.f32 %v2242_v26, %v1661_v28  ;;  %v1885_v1 = vmul.f32 %v1858_v17, %v1858_v17 }
 0xf32   : > { %v1686_v50 = vsel %vm1685_vm7, %v1661_v28, %v1684_v56  ;;  %1893 = vrot.lane.b32.xlu0 %v1885_v1, %s2305_s12 }
 0xf33   : > { %v2244_v54 = vpop.eup %2243  ;;  %v1689_v29 = vsel %vm1687_vm8, %v1688_v8, %v1686_v50 }
 0xf34   : > { %v1693_v7 = vmax.f32 %v1689_v29, 1e-12  ;;  %v1677_v20 = vmul.f32 %v2244_v54, %v1658_v15  ;;  %v2246_v41 = vpop.eup %2245 }
 0xf35   : > { %v2248_v36 = vpop.eup %2247  ;;  %v1772_v4 = vmul.f32 %v2246_v41, %v1749_v10 }
 0xf36   : > { %2249 = vrcp.f32 %v1693_v7  ;;  %v1679_v58 = vsel %vm1678_vm9, %v1658_v15, %v1677_v20  ;;  %v1785_v23 = vmul.f32 %v2695_v12, %v2248_v36 }
 0xf37   : > { %2251 = vrsqrt.f32 %v1746_v32  ;;  %v1682_v63 = vsel %vm1680_vm10, %v1681_v19, %v1679_v58  ;;  %v1774_v49 = vsel %vm1773_vm11, %v1749_v10, %v1772_v4 }
 0xf38   : > { %v1692_v16 = vmax.f32 %v1682_v63, 1e-12  ;;  %v1859_v25 = vsub.f32 %v1785_v23, %v1849_v13  ;;  %v1777_v34 = vsel %vm1775_vm13, %v1776_v39, %v1774_v49 }
 0xf39   : > { %v1781_v62 = vmax.f32 %v1777_v34, 1e-12 }
 0xf3a   : > { %2253 = vrcp.f32 %v1692_v16  ;;  %v1886_v61 = vmul.f32 %v1859_v25, %v1859_v25 }
 0xf3b   : > { %2255 = vrcp.f32 %v1781_v62 }
 0xf43   : > { %v2250_v6 = vpop.eup %2249 }
 0xf44   : > { %v2252_v55 = vpop.eup %2251  ;;  %v1701_v46 = vmul.f32 %v2250_v6, %v2762_v21 }
 0xf45   : > { %v1765_v42 = vmul.f32 %v2252_v55, %v1746_v32 }
 0xf46   : > { %1712 = vrot.lane.b32.xlu1 %v1701_v46, %s2305_s12 }
 0xf47   : > { %v2254_v59 = vpop.eup %2253  ;;  %v1767_v21 = vsel %vm1766_vm12, %v1746_v32, %v1765_v42  ;;  %v1595_v32 = vand.u32 2147483648, %v2815_v40 }
 0xf48   : > { %v1699_v57 = vmul.f32 %v2254_v59, %v2766_v33  ;;  %v1770_v0 = vsel %vm1768_vm14, %v1769_v9, %v1767_v21  ;;  %v2256_v51 = vpop.eup %2255 }
 0xf49   : > { %v1780_v35 = vmax.f32 %v1770_v0, 1e-12  ;;  %v1789_v31 = vmul.f32 %v2772_v48, %v2256_v51 }
 0xf4a   : > { %1710 = vrot.lane.b32.xlu1 %v1699_v57, %s2305_s12 }
 0xf4b   : > { %2257 = vrcp.f32 %v1780_v35 }
 0xf4c   : > { %2259 = vrsqrt.f32 %v2815_v40 }
 0xf4e   : > { %1895 = vrot.lane.b32.xlu1 %v1886_v61, %s2305_s12 }
 0xf58   : > { %v2258_v14 = vpop.eup %2257 }
 0xf59   : > { %v1787_v5 = vmul.f32 %v2707_v47, %v2258_v14  ;;  %v2260_v15 = vpop.eup %2259 }
 0xf5a   : > { %v1591_v18 = vmul.f32 %v2260_v15, %v2815_v40 }
 0xf5c   : > { %v1593_v53 = vsel %vm1592_vm15, %v2815_v40, %v1591_v18 }
 0xf5d   : > { %v1596_v56 = vsel %vm1594_vm2, %v1595_v32, %v1593_v53 }
 0xf5e   : > { %v1586_v60 = vpop.xlane.xlu0 %1585  ;;  %v1618_v52 = vmax.f32 %v1596_v56, 1e-12 }
 0xf5f   : > { %2261 = vrsqrt.f32 %v1586_v60  ;;  %vm1606_vm1 = vcmp.eq.f32.partialorder %v1586_v60, inf  ;;  %v1609_v43 = vand.u32 2147483648, %v1586_v60  ;;  %vm1608_vm4 = vcmp.eq.f32.partialorder %v1586_v60, 0.0 }
 0xf62   : > { %v1853_v33 = vpop.permute.xlu1 %1852  ;;  %v1589_v37 = vpop.xlane.xlu0 %1588 }
 0xf63   : > { %v1861_v24 = vsub.f32 %v1789_v31, %v1853_v33  ;;  %2263 = vrsqrt.f32 %v1589_v37  ;;  %vm1613_vm3 = vcmp.eq.f32.partialorder %v1589_v37, inf  ;;  %v1616_v26 = vand.u32 2147483648, %v1589_v37 }
 0xf64   : > { %vm1615_vm5 = vcmp.eq.f32.partialorder %v1589_v37, 0.0 }
 0xf65   : > { %v1888_v2 = vmul.f32 %v1861_v24, %v1861_v24 }
 0xf66   : > { %v1851_v27 = vpop.permute.xlu1 %1850 }
 0xf67   : > { %v1860_v3 = vsub.f32 %v1787_v5, %v1851_v27  ;;  %1899 = vrot.lane.b32.xlu1 %v1888_v2, %s2305_s12 }
 0xf69   : > { %v1887_v28 = vmul.f32 %v1860_v3, %v1860_v3 }
 0xf6b   : > { %1897 = vrot.lane.b32.xlu0 %v1887_v28, %s2305_s12 }
 0xf6c   : > { %v2262_v22 = vpop.eup %2261 }
 0xf6d   : > { %v1605_v45 = vmul.f32 %v2262_v22, %v1586_v60 }
 0xf6f   : > { %v1607_v17 = vsel %vm1606_vm1, %v1586_v60, %v1605_v45 }
 0xf70   : > { %v2264_v11 = vpop.eup %2263  ;;  %v1610_v1 = vsel %vm1608_vm4, %v1609_v43, %v1607_v17 }
 0xf71   : > { %v1612_v38 = vmul.f32 %v2264_v11, %v1589_v37  ;;  %v1620_v50 = vmax.f32 %v1610_v1, 1e-12 }
 0xf73   : > { %v1614_v10 = vsel %vm1613_vm3, %v1589_v37, %v1612_v38 }
 0xf74   : > { %v1617_v8 = vsel %vm1615_vm5, %v1616_v26, %v1614_v10 }
 0xf75   : > { %v1621_v54 = vmax.f32 %v1617_v8, 1e-12 }
 0xf7d   : > { %v1707_v4 = vpop.permute.xlu0 %1706 }
 0xfa1   : > { %v1583_v30 = vpop.xlane.xlu1 %1582 }
 0xfa2   : > { %2265 = vrsqrt.f32 %v1583_v30  ;;  %vm1599_vm0 = vcmp.eq.f32.partialorder %v1583_v30, inf  ;;  %v1602_v7 = vand.u32 2147483648, %v1583_v30  ;;  %vm1601_vm7 = vcmp.eq.f32.partialorder %v1583_v30, 0.0 }
 0xfa3   : > { %2267 = vrcp.f32 %v1618_v52 }
 0xfa4   : > { %2269 = vrcp.f32 %v1620_v50  ;;  %v1894_v31 = vpop.permute.xlu0 %1893 }
 0xfa5   : > { %2271 = vrcp.f32 %v1621_v54  ;;  %v1709_v63 = vpop.permute.xlu1 %1708  ;;  %v1905_v33 = vsel %vm1577_vm6, %v1894_v31, 0.0 }
 0xfaf   : > { %v2266_v29 = vpop.eup %2265 }
 0xfb0   : > { %v1598_v20 = vmul.f32 %v2266_v29, %v1583_v30  ;;  %v2268_v41 = vpop.eup %2267 }
 0xfb1   : > { %v2270_v36 = vpop.eup %2269  ;;  %v1623_v55 = vmul.f32 %v2688_v44, %v2268_v41 }
 0xfb2   : > { %v1600_v40 = vsel %vm1599_vm0, %v1583_v30, %v1598_v20  ;;  %v2272_v6 = vpop.eup %2271  ;;  %v1627_v46 = vmul.f32 %v2707_v47, %v2270_v36 }
 0xfb3   : > { %v1603_v19 = vsel %vm1601_vm7, %v1602_v7, %v1600_v40  ;;  %v1718_v23 = vsub.f32 %v1623_v55, %v1707_v4  ;;  %v1629_v59 = vmul.f32 %v2772_v48, %v2272_v6 }
 0xfb4   : > { %v1619_v58 = vmax.f32 %v1603_v19, 1e-12 }
 0xfb5   : > { %v1862_v25 = vmul.f32 %v1718_v23, %v1718_v23 }
 0xfb6   : > { %2273 = vrcp.f32 %v1619_v58 }
 0xfb7   : > { %v1866_v61 = vsel %vm1577_vm6, %v1862_v25, 0.0 }
 0xfb8   : > { %v1713_v16 = vpop.permute.xlu1 %1712 }
 0xfb9   : > { %v1721_v9 = vsub.f32 %v1629_v59, %v1713_v16 }
 0xfbb   : > { %v1865_v44 = vmul.f32 %v1721_v9, %v1721_v9 }
 0xfbc   : > { %v1711_v13 = vpop.permute.xlu1 %1710 }
 0xfbd   : > { %v1720_v39 = vsub.f32 %v1627_v46, %v1711_v13  ;;  %v1871_v48 = vsel %vm1577_vm6, %v1865_v44, 0.0 }
 0xfbf   : > { %v1864_v21 = vmul.f32 %v1720_v39, %v1720_v39 }
 0xfc1   : > { %v1869_v47 = vsel %vm1577_vm6, %v1864_v21, 0.0 }
 0xfc3   : > { %v2274_v42 = vpop.eup %2273 }
 0xfc4   : > { %v1625_v49 = vmul.f32 %v2695_v12, %v2274_v42  ;;  %v1896_v12 = vpop.permute.xlu1 %1895 }
 0xfc5   : > { %v1906_v14 = vsel %vm1577_vm6, %v1896_v12, 0.0 }
 0xfc6   : > { %v1719_v57 = vsub.f32 %v1625_v49, %v1709_v63  ;;  %v1907_v24 = vadd.f32 %v1906_v14, %v1905_v33 }
 0xfc8   : > { %v1863_v34 = vmul.f32 %v1719_v57, %v1719_v57 }
 0xfca   : > { %v1867_v62 = vsel %vm1577_vm6, %v1863_v34, 0.0 }
 0xfcb   : > { %v1868_v0 = vadd.f32 %v1867_v62, %v1866_v61 }
 0xfcd   : > { %v1870_v35 = vadd.f32 %v1869_v47, %v1868_v0 }
 0xfcf   : > { %v1872_v51 = vadd.f32 %v1871_v48, %v1870_v35 }
 0xfd1   : > { %1873 = vadd.xlane.f32.xlu0 %v1872_v51 }
 0xfd9   : > { %v1900_v2 = vpop.permute.xlu1 %1899 }
 0xfda   : > { %v1910_v28 = vsel %vm1577_vm6, %v1900_v2, 0.0 }
 0xfdd   : > { %v1898_v5 = vpop.permute.xlu0 %1897 }
 0xfde   : > { %v1908_v27 = vsel %vm1577_vm6, %v1898_v5, 0.0  ;;  %vm1927_vm6 = vcmask 0  }
 0xfdf   : > { %v1909_v3 = vadd.f32 %v1908_v27, %v1907_v24 }
 0xfe1   : > { %v1911_v60 = vadd.f32 %v1910_v28, %v1909_v3 }
 0xfe3   : > { %1912 = vadd.xlane.f32.xlu1 %v1911_v60 }
0x105a   : > { %v1874_v37 = vpop.xlane.xlu0 %1873 }
0x105b   : > { %v1875_v15 = vrot.slane %v1874_v37, 4 }
0x105d   : > { %v1876_v22 = vadd.f32 %v1875_v15, %v1874_v37 }
0x105f   : > { %v1877_v11 = vrot.slane %v1876_v22, 2 }
0x1061   : > { %v1878_v18 = vadd.f32 %v1877_v11, %v1876_v22 }
0x1063   : > { %v1879_v30 = vrot.slane %v1878_v18, 1 }
0x1065   : > { %v1880_v45 = vadd.f32 %v1879_v30, %v1878_v18 }
0x1067   : > { %2061 = vpush %v1880_v45 }
0x106c   : > { %v1913_v32 = vpop.xlane.xlu1 %1912 }
0x106d   : > { %v1914_v38 = vrot.slane %v1913_v32, 4 }
0x106f   : > { %v1915_v53 = vadd.f32 %v1914_v38, %v1913_v32 }
0x1071   : > { %v1916_v43 = vrot.slane %v1915_v53, 2 }
0x1073   : > { %v1917_v17 = vadd.f32 %v1916_v43, %v1915_v53 }
0x1075   : > { %v1918_v26 = vrot.slane %v1917_v17, 1 }
0x1077   : > { %v1919_v56 = vadd.f32 %v1918_v26, %v1917_v17 }
0x1079   : > { %2063 = vpush %v1919_v56 }
0x1098   : > { %s2062_s14 = spop %2061 }
0x1099   : > { %s1884_s15 = smul.f32 0.00390625, %s2062_s14 }
0x10aa   : > { %s2064_s16 = spop %2063 }
0x10ab   : > { %s1923_s17 = smul.f32 0.00390625, %s2064_s16 }
0x10ad   : > { %s1924_s18 = sadd.f32 %s1923_s17, %s1884_s15 }
0x10af   : > { %s1925_s22 = smul.f32 0.5, %s1924_s18 }
0x10b1   : > { %v1926_v10 = vstv %s1925_s22 }
0x10b2   : > { %1928 = vst.msk [vmem:[%s112_s21] sm:$0x1] %vm1927_vm6, %v1926_v10 }
0x10b3 PF: > { %s11_s6 = sadd.s32 1, %s2285_s6  }
0x10b4   : > { %p8_p4 = scmp.ge.s32.totalorder %s11_s6, 4  }
0x10b6   :  { %10 = sbr.rel (!%p8_p4) target bundleno = 1 (0x1), region = 54 }

</bundles_post_ra>
